<compile_context>
chip_gen: v6e
topology: v6e:2x2x1
jax: 0.10.0
libtpu: 0.0.40
codegen_flags: <defaults>
</compile_context>

<pallas_src>
import functools

import jax
import jax.numpy as jnp
from jax.experimental import pallas as pl
from jax.experimental.pallas import tpu as pltpu

OUT_NC = 64
KSIZE = 4
STRIDE = 2
PAD = 1
LEAKY_ALPHA = 0.2
BN_EPS = 1e-5


def _round_up(x, m):
    return ((x + m - 1) // m) * m


# ---------------------------------------------------------------------------
# Fused conv-as-matmul kernel: Y = X @ W  (+ BN + LeakyReLU  /  + LeakyReLU)
# grid = (n_tiles [parallel], passes [arbitrary], m_tiles [arbitrary])
# ---------------------------------------------------------------------------
def _conv_matmul_kernel(x_ref, w_ref, g_ref, b_ref, o_ref, *scratch,
                        mode, m_true, two_pass):
    # bf16 x bf16 -> f32 accumulation on the MXU.
    y = jnp.dot(x_ref[...], w_ref[...], preferred_element_type=jnp.float32)
    inv_m = 1.0 / m_true

    def bn_leaky(y, mean, var):
        rstd = jax.lax.rsqrt(jnp.maximum(var, 0.0) + BN_EPS)
        z = (y - mean) * rstd * g_ref[...] + b_ref[...]
        return jnp.where(z >= 0, z, LEAKY_ALPHA * z)

    if mode == "leaky":
        z = jnp.where(y >= 0, y, LEAKY_ALPHA * y)
        o_ref[...] = z.astype(o_ref.dtype)

    elif mode == "bn_leaky" and not two_pass:
        # Whole M fits in one tile: exact batch stats from this block.
        # Padded rows of X are zero -> their y rows are zero, so dividing the
        # column sums by the true row count gives exact statistics.
        mean = jnp.sum(y, axis=0, keepdims=True) * inv_m
        var = jnp.sum(y * y, axis=0, keepdims=True) * inv_m - mean * mean
        o_ref[...] = bn_leaky(y, mean, var).astype(o_ref.dtype)

    elif mode == "bn_leaky":
        sum_ref, ss_ref = scratch
        p = pl.program_id(1)   # pass: 0 = accumulate stats, 1 = normalize
        s = pl.program_id(2)   # M tile

        @pl.when(jnp.logical_and(p == 0, s == 0))
        def _():
            sum_ref[...] = jnp.zeros_like(sum_ref)
            ss_ref[...] = jnp.zeros_like(ss_ref)

        @pl.when(p == 0)
        def _():
            sum_ref[...] = sum_ref[...] + jnp.sum(y, axis=0, keepdims=True)
            ss_ref[...] = ss_ref[...] + jnp.sum(y * y, axis=0, keepdims=True)
            o_ref[...] = y.astype(o_ref.dtype)   # raw write; overwritten in pass 1

        @pl.when(p == 1)
        def _():
            mean = sum_ref[...] * inv_m
            var = ss_ref[...] * inv_m - mean * mean
            o_ref[...] = bn_leaky(y, mean, var).astype(o_ref.dtype)

    else:
        raise ValueError(mode)


def conv_matmul(x, w, gamma, beta, mode, out_dtype=jnp.bfloat16):
    """x: (M, K), w: (K, N), gamma/beta: (N,) or None. Returns (M, N) out_dtype."""
    M, K = x.shape
    K2, N = w.shape
    assert K == K2

    tn = 128
    tm = min(256, _round_up(M, 16))        # 16-row multiples for bf16 tiles
    Mp = _round_up(M, tm)
    Kp = _round_up(K, 128)
    Np = _round_up(N, tn)
    m_tiles = Mp // tm
    n_tiles = Np // tn

    # bf16 operands for the MXU; pad (with jnp.pad, not zeros().at[].set()).
    xp = x.astype(jnp.bfloat16)
    if (Mp, Kp) != (M, K):
        xp = jnp.pad(xp, ((0, Mp - M), (0, Kp - K)))
    wp = w.astype(jnp.bfloat16)
    if (Kp, Np) != (K, N):
        wp = jnp.pad(wp, ((0, Kp - K), (0, Np - N)))

    g = gamma if gamma is not None else jnp.ones((N,), jnp.float32)
    b = beta if beta is not None else jnp.zeros((N,), jnp.float32)
    gp = jnp.pad(g.astype(jnp.float32), (0, Np - N)).reshape(1, Np)
    bp = jnp.pad(b.astype(jnp.float32), (0, Np - N)).reshape(1, Np)

    two_pass = (mode == "bn_leaky") and (m_tiles > 1)
    passes = 2 if two_pass else 1

    kernel = functools.partial(_conv_matmul_kernel, mode=mode,
                               m_true=float(M), two_pass=two_pass)

    scratch_shapes = ()
    if two_pass:
        scratch_shapes = (pltpu.VMEM((1, tn), jnp.float32),
                          pltpu.VMEM((1, tn), jnp.float32))

    out = pl.pallas_call(
        kernel,
        out_shape=jax.ShapeDtypeStruct((Mp, Np), out_dtype),
        grid_spec=pltpu.PrefetchScalarGridSpec(
            num_scalar_prefetch=0,
            grid=(n_tiles, passes, m_tiles),
            in_specs=[
                pl.BlockSpec((tm, Kp), lambda j, p, s: (s, 0)),   # X tile over M
                pl.BlockSpec((Kp, tn), lambda j, p, s: (0, j)),   # W tile over N
                pl.BlockSpec((1, tn), lambda j, p, s: (0, j)),    # gamma
                pl.BlockSpec((1, tn), lambda j, p, s: (0, j)),    # beta
            ],
            out_specs=pl.BlockSpec((tm, tn), lambda j, p, s: (s, j)),
            scratch_shapes=scratch_shapes,
        ),
        compiler_params=pltpu.CompilerParams(
            dimension_semantics=("parallel", "arbitrary", "arbitrary"),
            vmem_limit_bytes=48 * 1024 * 1024,   # fits v7x's 64 MiB VMEM
        ),
    )(xp, wp, gp, bp)

    return out[:M, :N]


# ---------------------------------------------------------------------------
# Final Linear(8192 -> 1) + Sigmoid as a VPU multiply+reduce (no padded MXU).
# ---------------------------------------------------------------------------
def _linear_sigmoid_kernel(x_ref, w_ref, b_ref, o_ref):
    x = x_ref[...].astype(jnp.float32)          # (Mp, Kp)
    w = w_ref[...].astype(jnp.float32)          # (1,  Kp)
    y = jnp.sum(x * w, axis=-1, keepdims=True) + b_ref[0]
    o_ref[...] = jax.nn.sigmoid(y).astype(o_ref.dtype)


def linear_sigmoid(x, w, b):
    """x: (B, K), w: (K, 1), b: (1,) -> (B, 1) f32 = sigmoid(x @ w + b)."""
    M, K = x.shape
    Mp = _round_up(max(M, 16), 16)
    Kp = _round_up(K, 128)
    xp = x.astype(jnp.bfloat16)
    if (Mp, Kp) != (M, K):
        xp = jnp.pad(xp, ((0, Mp - M), (0, Kp - K)))
    wp = jnp.pad(w.astype(jnp.float32).reshape(1, K), ((0, 0), (0, Kp - K)))

    out = pl.pallas_call(
        _linear_sigmoid_kernel,
        out_shape=jax.ShapeDtypeStruct((Mp, 1), jnp.float32),
        in_specs=[
            pl.BlockSpec(memory_space=pltpu.MemorySpace.VMEM),
            pl.BlockSpec(memory_space=pltpu.MemorySpace.VMEM),
            pl.BlockSpec(memory_space=pltpu.MemorySpace.SMEM),
        ],
        out_specs=pl.BlockSpec(memory_space=pltpu.MemorySpace.VMEM),
    )(xp, wp, b.astype(jnp.float32))
    return out[:M]


# ---------------------------------------------------------------------------
# Plain-JAX glue: im2col, layer plumbing, params, forward
# ---------------------------------------------------------------------------
def _im2col_nhwc(x, k=KSIZE, s=STRIDE, p=PAD):
    """x: (B, H, W, C) -> (B, Ho, Wo, k*k*C), patch feature order = (kh, kw, cin)."""
    B, H, W, C = x.shape
    Ho = (H + 2 * p - k) // s + 1
    Wo = (W + 2 * p - k) // s + 1
    xp = jnp.pad(x, ((0, 0), (p, p), (p, p), (0, 0)))
    cols = []
    for kh in range(k):
        for kw in range(k):
            cols.append(xp[:, kh:kh + s * Ho:s, kw:kw + s * Wo:s, :])
    return jnp.concatenate(cols, axis=-1)


def _conv_block(x_nhwc, w_khkwcico, gamma, beta, mode):
    """Conv2d(k=4,s=2,p=1,bias=False) + fused epilogue via the Pallas matmul."""
    B = x_nhwc.shape[0]
    patches = _im2col_nhwc(x_nhwc)                     # (B, Ho, Wo, 16*Cin)
    _, Ho, Wo, K = patches.shape
    kh, kw, cin, cout = w_khkwcico.shape
    w_mat = w_khkwcico.reshape(kh * kw * cin, cout)    # matches (kh,kw,cin) order
    y = conv_matmul(patches.reshape(B * Ho * Wo, K), w_mat, gamma, beta, mode)
    return y.reshape(B, Ho, Wo, cout)


def init_params(key):
    ks = jax.random.split(key, 5)
    params = {
        "w1": 0.02 * jax.random.normal(ks[0], (KSIZE, KSIZE, 3, OUT_NC), jnp.float32),
        "w2": 0.02 * jax.random.normal(ks[1], (KSIZE, KSIZE, OUT_NC, OUT_NC * 2), jnp.float32),
        "w3": 0.02 * jax.random.normal(ks[2], (KSIZE, KSIZE, OUT_NC * 2, OUT_NC * 4), jnp.float32),
        "w4": 0.02 * jax.random.normal(ks[3], (KSIZE, KSIZE, OUT_NC * 4, OUT_NC * 8), jnp.float32),
        # BatchNorm2d default init: weight=1, bias=0
        "g2": jnp.ones((OUT_NC * 2,), jnp.float32), "b2": jnp.zeros((OUT_NC * 2,), jnp.float32),
        "g3": jnp.ones((OUT_NC * 4,), jnp.float32), "b3": jnp.zeros((OUT_NC * 4,), jnp.float32),
        "g4": jnp.ones((OUT_NC * 8,), jnp.float32), "b4": jnp.zeros((OUT_NC * 8,), jnp.float32),
        # Linear(out_nc*64*2 = 8192 -> 1): stored as (in, out)
        "w5": 0.02 * jax.random.normal(ks[4], (OUT_NC * 64 * 2, 1), jnp.float32),
        "b5": jnp.zeros((1,), jnp.float32),
    }
    return params


def discriminator_forward(x_nchw, params):
    """x_nchw: (B, 3, 64, 64) float32 -> (B, 1) float32 in (0, 1)."""
    x = jnp.transpose(x_nchw, (0, 2, 3, 1)).astype(jnp.bfloat16)              # NCHW -> NHWC
    x = _conv_block(x, params["w1"], None, None, "leaky")                      # (B,32,32, 64)
    x = _conv_block(x, params["w2"], params["g2"], params["b2"], "bn_leaky")   # (B,16,16,128)
    x = _conv_block(x, params["w3"], params["g3"], params["b3"], "bn_leaky")   # (B, 8, 8,256)
    x = _conv_block(x, params["w4"], params["g4"], params["b4"], "bn_leaky")   # (B, 4, 4,512)
    # PyTorch flattens NCHW: x.view(B, -1) -> feature order (C, H, W)
    B = x.shape[0]
    flat = jnp.transpose(x, (0, 3, 1, 2)).reshape(B, -1)                       # (B, 8192)
    return linear_sigmoid(flat, params["w5"], params["b5"])                    # (B, 1)


if __name__ == "__main__":
    key = jax.random.PRNGKey(0)
    k_x, k_p = jax.random.split(key)
    # Input: batch=2, 3x64x64 (4 stride-2 convs -> 4x4 spatial, 512*4*4 = 8192 = out_nc*64*2)
    x = jax.random.normal(k_x, (2, 3, 64, 64), jnp.float32)
    params = init_params(k_p)

    fwd = jax.jit(discriminator_forward)
    out = jax.block_until_ready(fwd(x, params))
    assert out.shape == (2, 1)
    assert bool(jnp.all(jnp.isfinite(out)))
    assert bool(jnp.all((out > 0.0) & (out < 1.0)))
    print("KERNEL_OK")
</pallas_src>

<mosaic_0001>
module attributes {stable_mosaic.version = 11 : i64} {
  func.func @_conv_matmul_kernel(%arg0: i32, %arg1: i32, %arg2: i32, %arg3: memref<256x128xbf16, #tpu.memory_space<vmem>>, %arg4: memref<128x128xbf16, #tpu.memory_space<vmem>>, %arg5: memref<1x128xf32, #tpu.memory_space<vmem>>, %arg6: memref<1x128xf32, #tpu.memory_space<vmem>>, %arg7: memref<256x128xbf16, #tpu.memory_space<vmem>>) attributes {dimension_semantics = [#tpu.dimension_semantics<parallel>, #tpu.dimension_semantics<arbitrary>, #tpu.dimension_semantics<arbitrary>], iteration_bounds = array<i64: 1, 1, 8>, scalar_prefetch = 0 : i64, scratch_operands = 0 : i64, tpu.core_type = #tpu.core_type<tc>, window_params = [{transform_indices = @transform_0, window_bounds = array<i64: 256, 128>}, {transform_indices = @transform_1, window_bounds = array<i64: 128, 128>}, {transform_indices = @transform_2, window_bounds = array<i64: 1, 128>}, {transform_indices = @transform_3, window_bounds = array<i64: 1, 128>}, {transform_indices = @transform_4, window_bounds = array<i64: 256, 128>}]} {
    %c0 = arith.constant 0 : index
    %c0_0 = arith.constant 0 : index
    %0 = vector.load %arg3[%c0, %c0_0] : memref<256x128xbf16, #tpu.memory_space<vmem>>, vector<256x128xbf16>
    %c0_1 = arith.constant 0 : index
    %c0_2 = arith.constant 0 : index
    %1 = vector.load %arg4[%c0_1, %c0_2] : memref<128x128xbf16, #tpu.memory_space<vmem>>, vector<128x128xbf16>
    %cst = arith.constant dense<0.000000e+00> : vector<256x128xf32>
    %2 = tpu.matmul %0, %1, %cst {dimension_numbers = #tpu.dot_dimension_numbers<[1], [0], [0], [1], [0, 0, 1, 1], [], []>} : vector<256x128xbf16>, vector<128x128xbf16>, vector<256x128xf32> -> vector<256x128xf32>
    %cst_3 = arith.constant 0.000000e+00 : f32
    %3 = vector.broadcast %cst_3 : f32 to vector<256x128xf32>
    %4 = arith.cmpf oge, %2, %3 : vector<256x128xf32>
    %cst_4 = arith.constant 2.000000e-01 : f32
    %5 = vector.broadcast %cst_4 : f32 to vector<256x128xf32>
    %6 = arith.mulf %5, %2 : vector<256x128xf32>
    %7 = arith.select %4, %2, %6 : vector<256x128xi1>, vector<256x128xf32>
    %8 = arith.truncf %7 : vector<256x128xf32> to vector<256x128xbf16>
    %c0_5 = arith.constant 0 : index
    %c0_6 = arith.constant 0 : index
    %9 = vector.load %arg7[%c0_5, %c0_6] : memref<256x128xbf16, #tpu.memory_space<vmem>>, vector<256x128xbf16>
    tpu.vector_store %arg7[%c0_5, %c0_6], %8 {strides = array<i32>} : memref<256x128xbf16, #tpu.memory_space<vmem>>, vector<256x128xbf16>,
    return
  }
  func.func @transform_0(%arg0: i32, %arg1: i32, %arg2: i32) -> (i32, i32) {
    %c0_i32 = arith.constant 0 : i32
    %c0_i32_0 = arith.constant 0 : i32
    return %arg2, %c0_i32 : i32, i32
  }
  func.func @transform_1(%arg0: i32, %arg1: i32, %arg2: i32) -> (i32, i32) {
    %c0_i32 = arith.constant 0 : i32
    %c0_i32_0 = arith.constant 0 : i32
    return %c0_i32, %arg0 : i32, i32
  }
  func.func @transform_2(%arg0: i32, %arg1: i32, %arg2: i32) -> (i32, i32) {
    %c0_i32 = arith.constant 0 : i32
    %c0_i32_0 = arith.constant 0 : i32
    return %c0_i32, %arg0 : i32, i32
  }
  func.func @transform_3(%arg0: i32, %arg1: i32, %arg2: i32) -> (i32, i32) {
    %c0_i32 = arith.constant 0 : i32
    %c0_i32_0 = arith.constant 0 : i32
    return %c0_i32, %arg0 : i32, i32
  }
  func.func @transform_4(%arg0: i32, %arg1: i32, %arg2: i32) -> (i32, i32) {
    %c0_i32 = arith.constant 0 : i32
    return %arg2, %arg0 : i32, i32
  }
}

module attributes {stable_mosaic.version = 11 : i64} {
  func.func @_conv_matmul_kernel(%arg0: i32, %arg1: i32, %arg2: i32, %arg3: memref<256x1024xbf16, #tpu.memory_space<vmem>>, %arg4: memref<1024x128xbf16, #tpu.memory_space<vmem>>, %arg5: memref<1x128xf32, #tpu.memory_space<vmem>>, %arg6: memref<1x128xf32, #tpu.memory_space<vmem>>, %arg7: memref<256x128xbf16, #tpu.memory_space<vmem>>, %arg8: memref<1x128xf32, #tpu.memory_space<vmem>>, %arg9: memref<1x128xf32, #tpu.memory_space<vmem>>) attributes {dimension_semantics = [#tpu.dimension_semantics<parallel>, #tpu.dimension_semantics<arbitrary>, #tpu.dimension_semantics<arbitrary>], iteration_bounds = array<i64: 1, 2, 2>, scalar_prefetch = 0 : i64, scratch_operands = 2 : i64, tpu.core_type = #tpu.core_type<tc>, window_params = [{transform_indices = @transform_0, window_bounds = array<i64: 256, 1024>}, {transform_indices = @transform_1, window_bounds = array<i64: 1024, 128>}, {transform_indices = @transform_2, window_bounds = array<i64: 1, 128>}, {transform_indices = @transform_3, window_bounds = array<i64: 1, 128>}, {transform_indices = @transform_4, window_bounds = array<i64: 256, 128>}]} {
    %c0 = arith.constant 0 : index
    %c0_0 = arith.constant 0 : index
    %0 = vector.load %arg3[%c0, %c0_0] : memref<256x1024xbf16, #tpu.memory_space<vmem>>, vector<256x1024xbf16>
    %c0_1 = arith.constant 0 : index
    %c0_2 = arith.constant 0 : index
    %1 = vector.load %arg4[%c0_1, %c0_2] : memref<1024x128xbf16, #tpu.memory_space<vmem>>, vector<1024x128xbf16>
    %cst = arith.constant dense<0.000000e+00> : vector<256x128xf32>
    %2 = tpu.matmul %0, %1, %cst {dimension_numbers = #tpu.dot_dimension_numbers<[1], [0], [0], [1], [0, 0, 1, 1], [], []>} : vector<256x1024xbf16>, vector<1024x128xbf16>, vector<256x128xf32> -> vector<256x128xf32>
    %c0_i32 = arith.constant 0 : i32
    %3 = arith.cmpi eq, %arg1, %c0_i32 : i32
    %c0_i32_3 = arith.constant 0 : i32
    %4 = arith.cmpi eq, %arg2, %c0_i32_3 : i32
    %5 = arith.andi %3, %4 : i1
    %6 = arith.extui %5 : i1 to i32
    %c0_i32_4 = arith.constant 0 : i32
    %7 = arith.cmpi ne, %6, %c0_i32_4 : i32
    scf.if %7 {
      %cst_8 = arith.constant 0.000000e+00 : f32
      %14 = vector.broadcast %cst_8 : f32 to vector<1x128xf32>
      %c0_9 = arith.constant 0 : index
      %c0_10 = arith.constant 0 : index
      %15 = vector.load %arg8[%c0_9, %c0_10] : memref<1x128xf32, #tpu.memory_space<vmem>>, vector<1x128xf32>
      tpu.vector_store %arg8[%c0_9, %c0_10], %14 {strides = array<i32>} : memref<1x128xf32, #tpu.memory_space<vmem>>, vector<1x128xf32>,
      %cst_11 = arith.constant 0.000000e+00 : f32
      %16 = vector.broadcast %cst_11 : f32 to vector<1x128xf32>
      %c0_12 = arith.constant 0 : index
      %c0_13 = arith.constant 0 : index
      %17 = vector.load %arg9[%c0_12, %c0_13] : memref<1x128xf32, #tpu.memory_space<vmem>>, vector<1x128xf32>
      tpu.vector_store %arg9[%c0_12, %c0_13], %16 {strides = array<i32>} : memref<1x128xf32, #tpu.memory_space<vmem>>, vector<1x128xf32>,
    } else {
    }
    %c0_i32_5 = arith.constant 0 : i32
    %8 = arith.cmpi eq, %arg1, %c0_i32_5 : i32
    %9 = arith.extui %8 : i1 to i32
    %c0_i32_6 = arith.constant 0 : i32
    %10 = arith.cmpi ne, %9, %c0_i32_6 : i32
    scf.if %10 {
      %c0_8 = arith.constant 0 : index
      %c0_9 = arith.constant 0 : index
      %14 = vector.load %arg8[%c0_8, %c0_9] : memref<1x128xf32, #tpu.memory_space<vmem>>, vector<1x128xf32>
      %cst_10 = arith.constant dense<0.000000e+00> : vector<128xf32>
      %15 = vector.multi_reduction <add>, %2, %cst_10 [0] : vector<256x128xf32> to vector<128xf32>
      %16 = vector.shape_cast %15 : vector<128xf32> to vector<1x128xf32>
      %17 = arith.addf %14, %16 : vector<1x128xf32>
      %c0_11 = arith.constant 0 : index
      %c0_12 = arith.constant 0 : index
      %18 = vector.load %arg8[%c0_11, %c0_12] : memref<1x128xf32, #tpu.memory_space<vmem>>, vector<1x128xf32>
      tpu.vector_store %arg8[%c0_11, %c0_12], %17 {strides = array<i32>} : memref<1x128xf32, #tpu.memory_space<vmem>>, vector<1x128xf32>,
      %c0_13 = arith.constant 0 : index
      %c0_14 = arith.constant 0 : index
      %19 = vector.load %arg9[%c0_13, %c0_14] : memref<1x128xf32, #tpu.memory_space<vmem>>, vector<1x128xf32>
      %20 = arith.mulf %2, %2 : vector<256x128xf32>
      %cst_15 = arith.constant dense<0.000000e+00> : vector<128xf32>
      %21 = vector.multi_reduction <add>, %20, %cst_15 [0] : vector<256x128xf32> to vector<128xf32>
      %22 = vector.shape_cast %21 : vector<128xf32> to vector<1x128xf32>
      %23 = arith.addf %19, %22 : vector<1x128xf32>
      %c0_16 = arith.constant 0 : index
      %c0_17 = arith.constant 0 : index
      %24 = vector.load %arg9[%c0_16, %c0_17] : memref<1x128xf32, #tpu.memory_space<vmem>>, vector<1x128xf32>
      tpu.vector_store %arg9[%c0_16, %c0_17], %23 {strides = array<i32>} : memref<1x128xf32, #tpu.memory_space<vmem>>, vector<1x128xf32>,
      %25 = arith.truncf %2 : vector<256x128xf32> to vector<256x128xbf16>
      %c0_18 = arith.constant 0 : index
      %c0_19 = arith.constant 0 : index
      %26 = vector.load %arg7[%c0_18, %c0_19] : memref<256x128xbf16, #tpu.memory_space<vmem>>, vector<256x128xbf16>
      tpu.vector_store %arg7[%c0_18, %c0_19], %25 {strides = array<i32>} : memref<256x128xbf16, #tpu.memory_space<vmem>>, vector<256x128xbf16>,
    } else {
    }
    %c1_i32 = arith.constant 1 : i32
    %11 = arith.cmpi eq, %arg1, %c1_i32 : i32
    %12 = arith.extui %11 : i1 to i32
    %c0_i32_7 = arith.constant 0 : i32
    %13 = arith.cmpi ne, %12, %c0_i32_7 : i32
    scf.if %13 {
      %c0_8 = arith.constant 0 : index
      %c0_9 = arith.constant 0 : index
      %14 = vector.load %arg8[%c0_8, %c0_9] : memref<1x128xf32, #tpu.memory_space<vmem>>, vector<1x128xf32>
      %cst_10 = arith.constant 0.001953125 : f32
      %15 = vector.broadcast %cst_10 : f32 to vector<1x128xf32>
      %16 = arith.mulf %14, %15 : vector<1x128xf32>
      %c0_11 = arith.constant 0 : index
      %c0_12 = arith.constant 0 : index
      %17 = vector.load %arg9[%c0_11, %c0_12] : memref<1x128xf32, #tpu.memory_space<vmem>>, vector<1x128xf32>
      %cst_13 = arith.constant 0.001953125 : f32
      %18 = vector.broadcast %cst_13 : f32 to vector<1x128xf32>
      %19 = arith.mulf %17, %18 : vector<1x128xf32>
      %20 = arith.mulf %16, %16 : vector<1x128xf32>
      %21 = arith.subf %19, %20 : vector<1x128xf32>
      %cst_14 = arith.constant 0.000000e+00 : f32
      %22 = vector.broadcast %cst_14 : f32 to vector<1x128xf32>
      %23 = arith.maximumf %21, %22 : vector<1x128xf32>
      %cst_15 = arith.constant 9.99999974E-6 : f32
      %24 = vector.broadcast %cst_15 : f32 to vector<1x128xf32>
      %25 = arith.addf %23, %24 : vector<1x128xf32>
      %26 = math.rsqrt %25 : vector<1x128xf32>
      %27 = vector.broadcast %16 : vector<1x128xf32> to vector<256x128xf32>
      %28 = arith.subf %2, %27 : vector<256x128xf32>
      %29 = vector.broadcast %26 : vector<1x128xf32> to vector<256x128xf32>
      %30 = arith.mulf %28, %29 : vector<256x128xf32>
      %c0_16 = arith.constant 0 : index
      %c0_17 = arith.constant 0 : index
      %31 = vector.load %arg5[%c0_16, %c0_17] : memref<1x128xf32, #tpu.memory_space<vmem>>, vector<1x128xf32>
      %32 = vector.broadcast %31 : vector<1x128xf32> to vector<256x128xf32>
      %33 = arith.mulf %30, %32 : vector<256x128xf32>
      %c0_18 = arith.constant 0 : index
      %c0_19 = arith.constant 0 : index
      %34 = vector.load %arg6[%c0_18, %c0_19] : memref<1x128xf32, #tpu.memory_space<vmem>>, vector<1x128xf32>
      %35 = vector.broadcast %34 : vector<1x128xf32> to vector<256x128xf32>
      %36 = arith.addf %33, %35 : vector<256x128xf32>
      %cst_20 = arith.constant 0.000000e+00 : f32
      %37 = vector.broadcast %cst_20 : f32 to vector<256x128xf32>
      %38 = arith.cmpf oge, %36, %37 : vector<256x128xf32>
      %cst_21 = arith.constant 2.000000e-01 : f32
      %39 = vector.broadcast %cst_21 : f32 to vector<256x128xf32>
      %40 = arith.mulf %39, %36 : vector<256x128xf32>
      %41 = arith.select %38, %36, %40 : vector<256x128xi1>, vector<256x128xf32>
      %42 = arith.truncf %41 : vector<256x128xf32> to vector<256x128xbf16>
      %c0_22 = arith.constant 0 : index
      %c0_23 = arith.constant 0 : index
      %43 = vector.load %arg7[%c0_22, %c0_23] : memref<256x128xbf16, #tpu.memory_space<vmem>>, vector<256x128xbf16>
      tpu.vector_store %arg7[%c0_22, %c0_23], %42 {strides = array<i32>} : memref<256x128xbf16, #tpu.memory_space<vmem>>, vector<256x128xbf16>,
    } else {
    }
    return
  }
  func.func @transform_0(%arg0: i32, %arg1: i32, %arg2: i32) -> (i32, i32) {
    %c0_i32 = arith.constant 0 : i32
    %c0_i32_0 = arith.constant 0 : i32
    return %arg2, %c0_i32 : i32, i32
  }
  func.func @transform_1(%arg0: i32, %arg1: i32, %arg2: i32) -> (i32, i32) {
    %c0_i32 = arith.constant 0 : i32
    %c0_i32_0 = arith.constant 0 : i32
    return %c0_i32, %arg0 : i32, i32
  }
  func.func @transform_2(%arg0: i32, %arg1: i32, %arg2: i32) -> (i32, i32) {
    %c0_i32 = arith.constant 0 : i32
    %c0_i32_0 = arith.constant 0 : i32
    return %c0_i32, %arg0 : i32, i32
  }
  func.func @transform_3(%arg0: i32, %arg1: i32, %arg2: i32) -> (i32, i32) {
    %c0_i32 = arith.constant 0 : i32
    %c0_i32_0 = arith.constant 0 : i32
    return %c0_i32, %arg0 : i32, i32
  }
  func.func @transform_4(%arg0: i32, %arg1: i32, %arg2: i32) -> (i32, i32) {
    %c0_i32 = arith.constant 0 : i32
    return %arg2, %arg0 : i32, i32
  }
}

module attributes {stable_mosaic.version = 11 : i64} {
  func.func @_conv_matmul_kernel(%arg0: i32, %arg1: i32, %arg2: i32, %arg3: memref<128x2048xbf16, #tpu.memory_space<vmem>>, %arg4: memref<2048x128xbf16, #tpu.memory_space<vmem>>, %arg5: memref<1x128xf32, #tpu.memory_space<vmem>>, %arg6: memref<1x128xf32, #tpu.memory_space<vmem>>, %arg7: memref<128x128xbf16, #tpu.memory_space<vmem>>) attributes {dimension_semantics = [#tpu.dimension_semantics<parallel>, #tpu.dimension_semantics<arbitrary>, #tpu.dimension_semantics<arbitrary>], iteration_bounds = array<i64: 2, 1, 1>, scalar_prefetch = 0 : i64, scratch_operands = 0 : i64, tpu.core_type = #tpu.core_type<tc>, window_params = [{transform_indices = @transform_0, window_bounds = array<i64: 128, 2048>}, {transform_indices = @transform_1, window_bounds = array<i64: 2048, 128>}, {transform_indices = @transform_2, window_bounds = array<i64: 1, 128>}, {transform_indices = @transform_3, window_bounds = array<i64: 1, 128>}, {transform_indices = @transform_4, window_bounds = array<i64: 128, 128>}]} {
    %c0 = arith.constant 0 : index
    %c0_0 = arith.constant 0 : index
    %0 = vector.load %arg3[%c0, %c0_0] : memref<128x2048xbf16, #tpu.memory_space<vmem>>, vector<128x2048xbf16>
    %c0_1 = arith.constant 0 : index
    %c0_2 = arith.constant 0 : index
    %1 = vector.load %arg4[%c0_1, %c0_2] : memref<2048x128xbf16, #tpu.memory_space<vmem>>, vector<2048x128xbf16>
    %cst = arith.constant dense<0.000000e+00> : vector<128x128xf32>
    %2 = tpu.matmul %0, %1, %cst {dimension_numbers = #tpu.dot_dimension_numbers<[1], [0], [0], [1], [0, 0, 1, 1], [], []>} : vector<128x2048xbf16>, vector<2048x128xbf16>, vector<128x128xf32> -> vector<128x128xf32>
    %cst_3 = arith.constant dense<0.000000e+00> : vector<128xf32>
    %3 = vector.multi_reduction <add>, %2, %cst_3 [0] : vector<128x128xf32> to vector<128xf32>
    %4 = vector.shape_cast %3 : vector<128xf32> to vector<1x128xf32>
    %cst_4 = arith.constant 7.812500e-03 : f32
    %5 = vector.broadcast %cst_4 : f32 to vector<1x128xf32>
    %6 = arith.mulf %4, %5 : vector<1x128xf32>
    %7 = arith.mulf %2, %2 : vector<128x128xf32>
    %cst_5 = arith.constant dense<0.000000e+00> : vector<128xf32>
    %8 = vector.multi_reduction <add>, %7, %cst_5 [0] : vector<128x128xf32> to vector<128xf32>
    %9 = vector.shape_cast %8 : vector<128xf32> to vector<1x128xf32>
    %cst_6 = arith.constant 7.812500e-03 : f32
    %10 = vector.broadcast %cst_6 : f32 to vector<1x128xf32>
    %11 = arith.mulf %9, %10 : vector<1x128xf32>
    %12 = arith.mulf %6, %6 : vector<1x128xf32>
    %13 = arith.subf %11, %12 : vector<1x128xf32>
    %cst_7 = arith.constant 0.000000e+00 : f32
    %14 = vector.broadcast %cst_7 : f32 to vector<1x128xf32>
    %15 = arith.maximumf %13, %14 : vector<1x128xf32>
    %cst_8 = arith.constant 9.99999974E-6 : f32
    %16 = vector.broadcast %cst_8 : f32 to vector<1x128xf32>
    %17 = arith.addf %15, %16 : vector<1x128xf32>
    %18 = math.rsqrt %17 : vector<1x128xf32>
    %19 = vector.broadcast %6 : vector<1x128xf32> to vector<128x128xf32>
    %20 = arith.subf %2, %19 : vector<128x128xf32>
    %21 = vector.broadcast %18 : vector<1x128xf32> to vector<128x128xf32>
    %22 = arith.mulf %20, %21 : vector<128x128xf32>
    %c0_9 = arith.constant 0 : index
    %c0_10 = arith.constant 0 : index
    %23 = vector.load %arg5[%c0_9, %c0_10] : memref<1x128xf32, #tpu.memory_space<vmem>>, vector<1x128xf32>
    %24 = vector.broadcast %23 : vector<1x128xf32> to vector<128x128xf32>
    %25 = arith.mulf %22, %24 : vector<128x128xf32>
    %c0_11 = arith.constant 0 : index
    %c0_12 = arith.constant 0 : index
    %26 = vector.load %arg6[%c0_11, %c0_12] : memref<1x128xf32, #tpu.memory_space<vmem>>, vector<1x128xf32>
    %27 = vector.broadcast %26 : vector<1x128xf32> to vector<128x128xf32>
    %28 = arith.addf %25, %27 : vector<128x128xf32>
    %cst_13 = arith.constant 0.000000e+00 : f32
    %29 = vector.broadcast %cst_13 : f32 to vector<128x128xf32>
    %30 = arith.cmpf oge, %28, %29 : vector<128x128xf32>
    %cst_14 = arith.constant 2.000000e-01 : f32
    %31 = vector.broadcast %cst_14 : f32 to vector<128x128xf32>
    %32 = arith.mulf %31, %28 : vector<128x128xf32>
    %33 = arith.select %30, %28, %32 : vector<128x128xi1>, vector<128x128xf32>
    %34 = arith.truncf %33 : vector<128x128xf32> to vector<128x128xbf16>
    %c0_15 = arith.constant 0 : index
    %c0_16 = arith.constant 0 : index
    %35 = vector.load %arg7[%c0_15, %c0_16] : memref<128x128xbf16, #tpu.memory_space<vmem>>, vector<128x128xbf16>
    tpu.vector_store %arg7[%c0_15, %c0_16], %34 {strides = array<i32>} : memref<128x128xbf16, #tpu.memory_space<vmem>>, vector<128x128xbf16>,
    return
  }
  func.func @transform_0(%arg0: i32, %arg1: i32, %arg2: i32) -> (i32, i32) {
    %c0_i32 = arith.constant 0 : i32
    %c0_i32_0 = arith.constant 0 : i32
    return %arg2, %c0_i32 : i32, i32
  }
  func.func @transform_1(%arg0: i32, %arg1: i32, %arg2: i32) -> (i32, i32) {
    %c0_i32 = arith.constant 0 : i32
    %c0_i32_0 = arith.constant 0 : i32
    return %c0_i32, %arg0 : i32, i32
  }
  func.func @transform_2(%arg0: i32, %arg1: i32, %arg2: i32) -> (i32, i32) {
    %c0_i32 = arith.constant 0 : i32
    %c0_i32_0 = arith.constant 0 : i32
    return %c0_i32, %arg0 : i32, i32
  }
  func.func @transform_3(%arg0: i32, %arg1: i32, %arg2: i32) -> (i32, i32) {
    %c0_i32 = arith.constant 0 : i32
    %c0_i32_0 = arith.constant 0 : i32
    return %c0_i32, %arg0 : i32, i32
  }
  func.func @transform_4(%arg0: i32, %arg1: i32, %arg2: i32) -> (i32, i32) {
    %c0_i32 = arith.constant 0 : i32
    return %arg2, %arg0 : i32, i32
  }
}

module attributes {stable_mosaic.version = 11 : i64} {
  func.func @_conv_matmul_kernel(%arg0: i32, %arg1: i32, %arg2: i32, %arg3: memref<32x4096xbf16, #tpu.memory_space<vmem>>, %arg4: memref<4096x128xbf16, #tpu.memory_space<vmem>>, %arg5: memref<1x128xf32, #tpu.memory_space<vmem>>, %arg6: memref<1x128xf32, #tpu.memory_space<vmem>>, %arg7: memref<32x128xbf16, #tpu.memory_space<vmem>>) attributes {dimension_semantics = [#tpu.dimension_semantics<parallel>, #tpu.dimension_semantics<arbitrary>, #tpu.dimension_semantics<arbitrary>], iteration_bounds = array<i64: 4, 1, 1>, scalar_prefetch = 0 : i64, scratch_operands = 0 : i64, tpu.core_type = #tpu.core_type<tc>, window_params = [{transform_indices = @transform_0, window_bounds = array<i64: 32, 4096>}, {transform_indices = @transform_1, window_bounds = array<i64: 4096, 128>}, {transform_indices = @transform_2, window_bounds = array<i64: 1, 128>}, {transform_indices = @transform_3, window_bounds = array<i64: 1, 128>}, {transform_indices = @transform_4, window_bounds = array<i64: 32, 128>}]} {
    %c0 = arith.constant 0 : index
    %c0_0 = arith.constant 0 : index
    %0 = vector.load %arg3[%c0, %c0_0] : memref<32x4096xbf16, #tpu.memory_space<vmem>>, vector<32x4096xbf16>
    %c0_1 = arith.constant 0 : index
    %c0_2 = arith.constant 0 : index
    %1 = vector.load %arg4[%c0_1, %c0_2] : memref<4096x128xbf16, #tpu.memory_space<vmem>>, vector<4096x128xbf16>
    %cst = arith.constant dense<0.000000e+00> : vector<32x128xf32>
    %2 = tpu.matmul %0, %1, %cst {dimension_numbers = #tpu.dot_dimension_numbers<[1], [0], [0], [1], [0, 0, 1, 1], [], []>} : vector<32x4096xbf16>, vector<4096x128xbf16>, vector<32x128xf32> -> vector<32x128xf32>
    %cst_3 = arith.constant dense<0.000000e+00> : vector<128xf32>
    %3 = vector.multi_reduction <add>, %2, %cst_3 [0] : vector<32x128xf32> to vector<128xf32>
    %4 = vector.shape_cast %3 : vector<128xf32> to vector<1x128xf32>
    %cst_4 = arith.constant 3.125000e-02 : f32
    %5 = vector.broadcast %cst_4 : f32 to vector<1x128xf32>
    %6 = arith.mulf %4, %5 : vector<1x128xf32>
    %7 = arith.mulf %2, %2 : vector<32x128xf32>
    %cst_5 = arith.constant dense<0.000000e+00> : vector<128xf32>
    %8 = vector.multi_reduction <add>, %7, %cst_5 [0] : vector<32x128xf32> to vector<128xf32>
    %9 = vector.shape_cast %8 : vector<128xf32> to vector<1x128xf32>
    %cst_6 = arith.constant 3.125000e-02 : f32
    %10 = vector.broadcast %cst_6 : f32 to vector<1x128xf32>
    %11 = arith.mulf %9, %10 : vector<1x128xf32>
    %12 = arith.mulf %6, %6 : vector<1x128xf32>
    %13 = arith.subf %11, %12 : vector<1x128xf32>
    %cst_7 = arith.constant 0.000000e+00 : f32
    %14 = vector.broadcast %cst_7 : f32 to vector<1x128xf32>
    %15 = arith.maximumf %13, %14 : vector<1x128xf32>
    %cst_8 = arith.constant 9.99999974E-6 : f32
    %16 = vector.broadcast %cst_8 : f32 to vector<1x128xf32>
    %17 = arith.addf %15, %16 : vector<1x128xf32>
    %18 = math.rsqrt %17 : vector<1x128xf32>
    %19 = vector.broadcast %6 : vector<1x128xf32> to vector<32x128xf32>
    %20 = arith.subf %2, %19 : vector<32x128xf32>
    %21 = vector.broadcast %18 : vector<1x128xf32> to vector<32x128xf32>
    %22 = arith.mulf %20, %21 : vector<32x128xf32>
    %c0_9 = arith.constant 0 : index
    %c0_10 = arith.constant 0 : index
    %23 = vector.load %arg5[%c0_9, %c0_10] : memref<1x128xf32, #tpu.memory_space<vmem>>, vector<1x128xf32>
    %24 = vector.broadcast %23 : vector<1x128xf32> to vector<32x128xf32>
    %25 = arith.mulf %22, %24 : vector<32x128xf32>
    %c0_11 = arith.constant 0 : index
    %c0_12 = arith.constant 0 : index
    %26 = vector.load %arg6[%c0_11, %c0_12] : memref<1x128xf32, #tpu.memory_space<vmem>>, vector<1x128xf32>
    %27 = vector.broadcast %26 : vector<1x128xf32> to vector<32x128xf32>
    %28 = arith.addf %25, %27 : vector<32x128xf32>
    %cst_13 = arith.constant 0.000000e+00 : f32
    %29 = vector.broadcast %cst_13 : f32 to vector<32x128xf32>
    %30 = arith.cmpf oge, %28, %29 : vector<32x128xf32>
    %cst_14 = arith.constant 2.000000e-01 : f32
    %31 = vector.broadcast %cst_14 : f32 to vector<32x128xf32>
    %32 = arith.mulf %31, %28 : vector<32x128xf32>
    %33 = arith.select %30, %28, %32 : vector<32x128xi1>, vector<32x128xf32>
    %34 = arith.truncf %33 : vector<32x128xf32> to vector<32x128xbf16>
    %c0_15 = arith.constant 0 : index
    %c0_16 = arith.constant 0 : index
    %35 = vector.load %arg7[%c0_15, %c0_16] : memref<32x128xbf16, #tpu.memory_space<vmem>>, vector<32x128xbf16>
    tpu.vector_store %arg7[%c0_15, %c0_16], %34 {strides = array<i32>} : memref<32x128xbf16, #tpu.memory_space<vmem>>, vector<32x128xbf16>,
    return
  }
  func.func @transform_0(%arg0: i32, %arg1: i32, %arg2: i32) -> (i32, i32) {
    %c0_i32 = arith.constant 0 : i32
    %c0_i32_0 = arith.constant 0 : i32
    return %arg2, %c0_i32 : i32, i32
  }
  func.func @transform_1(%arg0: i32, %arg1: i32, %arg2: i32) -> (i32, i32) {
    %c0_i32 = arith.constant 0 : i32
    %c0_i32_0 = arith.constant 0 : i32
    return %c0_i32, %arg0 : i32, i32
  }
  func.func @transform_2(%arg0: i32, %arg1: i32, %arg2: i32) -> (i32, i32) {
    %c0_i32 = arith.constant 0 : i32
    %c0_i32_0 = arith.constant 0 : i32
    return %c0_i32, %arg0 : i32, i32
  }
  func.func @transform_3(%arg0: i32, %arg1: i32, %arg2: i32) -> (i32, i32) {
    %c0_i32 = arith.constant 0 : i32
    %c0_i32_0 = arith.constant 0 : i32
    return %c0_i32, %arg0 : i32, i32
  }
  func.func @transform_4(%arg0: i32, %arg1: i32, %arg2: i32) -> (i32, i32) {
    %c0_i32 = arith.constant 0 : i32
    return %arg2, %arg0 : i32, i32
  }
}

module attributes {stable_mosaic.version = 11 : i64} {
  func.func @_linear_sigmoid_kernel(%arg0: memref<16x8192xbf16, #tpu.memory_space<vmem>>, %arg1: memref<1x8192xf32, #tpu.memory_space<vmem>>, %arg2: memref<1xf32, #tpu.memory_space<smem>>, %arg3: memref<16x1xf32, #tpu.memory_space<vmem>>) attributes {dimension_semantics = [], scalar_prefetch = 0 : i64, scratch_operands = 0 : i64, tpu.core_type = #tpu.core_type<tc>} {
    %c0 = arith.constant 0 : index
    %c0_0 = arith.constant 0 : index
    %0 = vector.load %arg0[%c0, %c0_0] : memref<16x8192xbf16, #tpu.memory_space<vmem>>, vector<16x8192xbf16>
    %1 = arith.extf %0 : vector<16x8192xbf16> to vector<16x8192xf32>
    %c0_1 = arith.constant 0 : index
    %c0_2 = arith.constant 0 : index
    %2 = vector.load %arg1[%c0_1, %c0_2] : memref<1x8192xf32, #tpu.memory_space<vmem>>, vector<1x8192xf32>
    %3 = vector.broadcast %2 : vector<1x8192xf32> to vector<16x8192xf32>
    %4 = arith.mulf %1, %3 : vector<16x8192xf32>
    %cst = arith.constant dense<0.000000e+00> : vector<16xf32>
    %5 = vector.multi_reduction <add>, %4, %cst [1] : vector<16x8192xf32> to vector<16xf32>
    %6 = vector.shape_cast %5 : vector<16xf32> to vector<16x1xf32>
    %c0_3 = arith.constant 0 : index
    %7 = memref.load %arg2[%c0_3] : memref<1xf32, #tpu.memory_space<smem>>
    %8 = vector.broadcast %7 : f32 to vector<16x1xf32>
    %9 = arith.addf %6, %8 : vector<16x1xf32>
    %10 = arith.negf %9 : vector<16x1xf32>
    %11 = math.exp %10 : vector<16x1xf32>
    %cst_4 = arith.constant 1.000000e+00 : f32
    %12 = vector.broadcast %cst_4 : f32 to vector<16x1xf32>
    %13 = arith.addf %12, %11 : vector<16x1xf32>
    %14 = arith.divf %12, %13 : vector<16x1xf32>
    %c0_5 = arith.constant 0 : index
    %c0_6 = arith.constant 0 : index
    %15 = vector.load %arg3[%c0_5, %c0_6] : memref<16x1xf32, #tpu.memory_space<vmem>>, vector<16x1xf32>
    tpu.vector_store %arg3[%c0_5, %c0_6], %14 {strides = array<i32>} : memref<16x1xf32, #tpu.memory_space<vmem>>, vector<16x1xf32>,
    return
  }
}

</mosaic_0001>

<bundles_post_ra>
// kernel: discriminator_forward.5
= control target key start
LH: loop header
LB: loop body
LE: loop exit
PB: predicated region body
PF: predicated region fallthrough
CT: control target
= control target key end

     0   :  { %s1379_s15 = smov 0   ;;  %s1381_s16 = smov 0   ;;  %s1484_s0 = inlined_call_operand.vmem [shape: bf16[2048,128], index: 0, kind: input, shape index: {}]   ;;  %s1485_s1 = inlined_call_operand.vmem [shape: bf16[128,128], index: 1, kind: input, shape index: {}]   ;;  %s1486_s2 = inlined_call_operand.vmem [shape: f32[1,128], index: 2, kind: input, shape index: {}]   ;;  %s1487_s3 = inlined_call_operand.vmem [shape: f32[1,128], index: 3, kind: input, shape index: {}]   ;;  %s1488_s4 = inlined_call_operand.vmem [shape: bf16[2048,128], index: 4, kind: output, shape index: {}]  }
   0x1   :  { %s1383_s17 = smov 0  }
   0x2 LB: > { %s26_s2 = sadd.s32 1, %s1348_s16  ;;  %p1004_p0 = scmp.ge.s32.totalorder %s1352_s17, 1  ;;  %s1352_s17 = sphi %s1383_s17, %s14_s17   ;;  %s1348_s16 = sphi %s1381_s16, %s1490_s16   ;;  %s1344_s15 = sphi %s1379_s15, %s1489_s15  }
   0x3   : > { %p27_p1 = scmp.ge.s32.totalorder %s26_s2, 8  ;;  %p209_p2 = scmp.lt.s32.totalorder %s1352_s17, 9 }
   0x5   : > { %s1492_s2 = smov (%p27_p1, %s26_s2), 0  ;;  %p210_p3 = pnand %p1004_p0, %p209_p2 }
   0x6   : > { %s1005_s19 = sshll.u32 (!%p210_p3), %s1344_s15, 5 }
   0x7   : > { %213 = sbr.rel (%p210_p3) target bundleno = 275 (0x113), region = 36  ;;  %p249_p4 = scmp.lt.s32.totalorder (!%p210_p3), %s1005_s19, 255 }
   0xc   : > { %v1306_v0 = vld [vmem:[%s1485_s1 + $0x38] sm:$0xff]   ;;  %v1307_v1 = vld [vmem:[%s1485_s1 + $0x30] sm:$0xff]   ;;  %s1494_s19 = smov (!%p249_p4, %s1005_s19), 255  ;;  %v1308_v2 = vld [vmem:[%s1485_s1 + $0x28] sm:$0xff]  }
   0xd   : > { %1218 = vmatprep.subr.bf16.mxu0 %v1306_v0  ;;  %1266 = vmatprep.subr.bf16.mxu1 %v1306_v0  ;;  %s1006_s24 = sshll.u32 %s1494_s19, 2  ;;  %v1309_v3 = vld [vmem:[%s1485_s1 + $0x20] sm:$0xff]   ;;  %v1310_v6 = vld [vmem:[%s1485_s1 + $0x18] sm:$0xff]   ;;  %v1311_v7 = vld [vmem:[%s1485_s1 + $0x10] sm:$0xff]  }
   0xe   : > { %1219 = vmatpush3.bf16.msra.mxu0 %v1306_v0  ;;  %1274 = vmatpush3.bf16.msra.mxu1 %v1306_v0  ;;  %s1414_s27 = scalar_lea.vmem %s1484_s0, %s1006_s24  ;;  %v1312_v8 = vld [vmem:[%s1485_s1 + $0x8] sm:$0xff]   ;;  %v1313_v9 = vld [vmem:[%s1485_s1] sm:$0xff]   ;;  %s1452_s14 = scalar_lea.vmem %s1488_s4, %s1006_s24 }
   0xf   : > { %1220 = vmatprep.subr.bf16.mxu0 %v1307_v1  ;;  %1267 = vmatprep.subr.bf16.mxu1 %v1307_v1  ;;  %v1314_v4 = vld [vmem:[%s1414_s27] sm:$0xff]   ;;  %v1316_v10 = vld [vmem:[%s1414_s27 + $0x8] sm:$0xff]   ;;  %v1318_v12 = vld [vmem:[%s1414_s27 + $0x10] sm:$0xff]  }
  0x10   : > { %v1315_v5 = vld [vmem:[%s1414_s27 + $0x40] sm:$0xff]   ;;  %1234 = vmatprep.mubr.bf16.mxu0 %v1314_v4  ;;  %v1317_v11 = vld [vmem:[%s1414_s27 + $0x48] sm:$0xff]   ;;  %v1319_v13 = vld [vmem:[%s1414_s27 + $0x50] sm:$0xff]  }
  0x11   : > { %1250 = vmatprep.mubr.bf16.mxu1 %v1315_v5  ;;  %v1320_v14 = vld [vmem:[%s1414_s27 + $0x18] sm:$0xff]   ;;  %v1322_v16 = vld [vmem:[%s1414_s27 + $0x20] sm:$0xff]   ;;  %v1324_v18 = vld [vmem:[%s1414_s27 + $0x28] sm:$0xff]  }
  0x12   : > { %1221 = vmatpush3.bf16.msra.mxu0 %v1307_v1  ;;  %1275 = vmatpush3.bf16.msra.mxu1 %v1307_v1  ;;  %v1321_v15 = vld [vmem:[%s1414_s27 + $0x58] sm:$0xff]   ;;  %v1323_v17 = vld [vmem:[%s1414_s27 + $0x60] sm:$0xff]   ;;  %v1325_v19 = vld [vmem:[%s1414_s27 + $0x68] sm:$0xff]  }
  0x13   : > { %1222 = vmatprep.subr.bf16.mxu0 %v1308_v2  ;;  %1268 = vmatprep.subr.bf16.mxu1 %v1308_v2  ;;  %v1326_v20 = vld [vmem:[%s1414_s27 + $0x30] sm:$0xff]   ;;  %v1328_v22 = vld [vmem:[%s1414_s27 + $0x38] sm:$0xff]  }
  0x14   : > { %v1327_v21 = vld [vmem:[%s1414_s27 + $0x70] sm:$0xff]   ;;  %v1329_v23 = vld [vmem:[%s1414_s27 + $0x78] sm:$0xff]  }
  0x16   : > { %1223 = vmatpush3.bf16.msra.mxu0 %v1308_v2  ;;  %1276 = vmatpush3.bf16.msra.mxu1 %v1308_v2 }
  0x17   : > { %1224 = vmatprep.subr.bf16.mxu0 %v1309_v3  ;;  %1269 = vmatprep.subr.bf16.mxu1 %v1309_v3 }
  0x1a   : > { %1225 = vmatpush3.bf16.msra.mxu0 %v1309_v3  ;;  %1277 = vmatpush3.bf16.msra.mxu1 %v1309_v3 }
  0x1b   : > { %1226 = vmatprep.subr.bf16.mxu0 %v1310_v6  ;;  %1270 = vmatprep.subr.bf16.mxu1 %v1310_v6 }
  0x1e   : > { %1227 = vmatpush3.bf16.msra.mxu0 %v1310_v6  ;;  %1278 = vmatpush3.bf16.msra.mxu1 %v1310_v6 }
  0x1f   : > { %1228 = vmatprep.subr.bf16.mxu0 %v1311_v7  ;;  %1271 = vmatprep.subr.bf16.mxu1 %v1311_v7 }
  0x22   : > { %1229 = vmatpush3.bf16.msra.mxu0 %v1311_v7  ;;  %1279 = vmatpush3.bf16.msra.mxu1 %v1311_v7 }
  0x23   : > { %1230 = vmatprep.subr.bf16.mxu0 %v1312_v8  ;;  %1272 = vmatprep.subr.bf16.mxu1 %v1312_v8 }
  0x26   : > { %1231 = vmatpush3.bf16.msra.mxu0 %v1312_v8  ;;  %1280 = vmatpush3.bf16.msra.mxu1 %v1312_v8 }
  0x27   : > { %1232 = vmatprep.subr.bf16.mxu0 %v1313_v9  ;;  %1273 = vmatprep.subr.bf16.mxu1 %v1313_v9 }
  0x2a   : > { %1233 = vmatpush3.bf16.msra.mxu0 %v1313_v9  ;;  %1281 = vmatpush3.bf16.msra.mxu1 %v1313_v9 }
  0x2d   : > { %1235 = vmatmul.mubr.bf16.vlgmr.msra.gmra.mxu0 %v1316_v10  ;;  %1251 = vmatmul.mubr.bf16.vlgmr.msra.gmra.mxu1 %v1317_v11 }
  0x2e   : > { %1238 = vmatprep.mubr.bf16.mxu0 %v1318_v12  ;;  %1254 = vmatprep.mubr.bf16.mxu1 %v1319_v13 }
  0x35   : > { %1239 = vmatmul.mubr.bf16.gmra.mxu0 %v1320_v14  ;;  %1255 = vmatmul.mubr.bf16.gmra.mxu1 %v1321_v15 }
  0x36   : > { %1242 = vmatprep.mubr.bf16.mxu0 %v1322_v16  ;;  %1258 = vmatprep.mubr.bf16.mxu1 %v1323_v17 }
  0x3d   : > { %1243 = vmatmul.mubr.bf16.gmra.mxu0 %v1324_v18  ;;  %1259 = vmatmul.mubr.bf16.gmra.mxu1 %v1325_v19 }
  0x3e   : > { %1246 = vmatprep.mubr.bf16.mxu0 %v1326_v20  ;;  %1262 = vmatprep.mubr.bf16.mxu1 %v1327_v21 }
  0x45   : > { %1247 = vmatmul.mubr.bf16.gmra.mxu0 %v1328_v22  ;;  %1263 = vmatmul.mubr.bf16.gmra.mxu1 %v1329_v23 }
  0xed   : > { %v1236_v24 = vpop.f32.mrf.mxu0  ;;  %v1252_v25 = vpop.f32.mrf.mxu1 }
  0xee   : > { %vm629_vm0 = vcmp.ge.f32.partialorder %v1236_v24, 0.0  ;;  %v661_v26 = vmul.f32 0.2, %v1236_v24  ;;  %v677_v27 = vmul.f32 0.2, %v1252_v25  ;;  %vm645_vm1 = vcmp.ge.f32.partialorder %v1252_v25, 0.0 }
  0xef   : > { %v500_v28 = vpop.f32.mrf.mxu0  ;;  %v564_v29 = vpop.f32.mrf.mxu1 }
  0xf0   : > { %v693_v30 = vsel %vm629_vm0, %v1236_v24, %v661_v26  ;;  %v659_v31 = vmul.f32 0.2, %v500_v28  ;;  %vm627_vm2 = vcmp.ge.f32.partialorder %v500_v28, 0.0  ;;  %v709_v35 = vsel %vm645_vm1, %v1252_v25, %v677_v27 }
  0xf1   : > { %v1237_v32 = vpop.f32.mrf.mxu0  ;;  %v1253_v33 = vpop.f32.mrf.mxu1  ;;  %vm643_vm5 = vcmp.ge.f32.partialorder %v564_v29, 0.0  ;;  %v675_v36 = vmul.f32 0.2, %v564_v29 }
  0xf2   : > { %vm630_vm3 = vcmp.ge.f32.partialorder %v1237_v32, 0.0  ;;  %v662_v34 = vmul.f32 0.2, %v1237_v32  ;;  %vm646_vm4 = vcmp.ge.f32.partialorder %v1253_v33, 0.0  ;;  %v678_v37 = vmul.f32 0.2, %v1253_v33 }
  0xf3   : > { %v503_v38 = vpop.f32.mrf.mxu0  ;;  %v567_v39 = vpop.f32.mrf.mxu1  ;;  %v691_v42 = vsel %vm627_vm2, %v500_v28, %v659_v31  ;;  %v707_v51 = vsel %vm643_vm5, %v564_v29, %v675_v36 }
  0xf4   : > { %v694_v40 = vsel %vm630_vm3, %v1237_v32, %v662_v34  ;;  %vm628_vm6 = vcmp.ge.f32.partialorder %v503_v38, 0.0  ;;  %v660_v41 = vmul.f32 0.2, %v503_v38  ;;  %vm644_vm7 = vcmp.ge.f32.partialorder %v567_v39, 0.0 }
  0xf5   : > { %v1107_v43 = vpack.c.bf16 %v694_v40, %v693_v30  ;;  %v710_v44 = vsel %vm646_vm4, %v1253_v33, %v678_v37  ;;  %v676_v45 = vmul.f32 0.2, %v567_v39  ;;  %v1240_v46 = vpop.f32.mrf.mxu0  ;;  %v1256_v47 = vpop.f32.mrf.mxu1 }
  0xf6   : > { %v1147_v48 = vpack.c.bf16 %v710_v44, %v709_v35  ;;  %v692_v49 = vsel %vm628_vm6, %v503_v38, %v660_v41  ;;  %vm633_vm8 = vcmp.ge.f32.partialorder %v1240_v46, 0.0  ;;  %v665_v50 = vmul.f32 0.2, %v1240_v46 }
  0xf7   : > { %1179 = vst [vmem:[%s1452_s14 + $0x8] sm:$0xff] %v1107_v43   ;;  %v1102_v52 = vpack.c.bf16 %v692_v49, %v691_v42  ;;  %v708_v53 = vsel %vm644_vm7, %v567_v39, %v676_v45  ;;  %v681_v54 = vmul.f32 0.2, %v1256_v47  ;;  %v516_v55 = vpop.f32.mrf.mxu0  ;;  %v580_v56 = vpop.f32.mrf.mxu1  ;;  %vm649_vm9 = vcmp.ge.f32.partialorder %v1256_v47, 0.0 }
  0xf8   : > { %1187 = vst [vmem:[%s1452_s14 + $0x48] sm:$0xff] %v1147_v48   ;;  %v1142_v57 = vpack.c.bf16 %v708_v53, %v707_v51  ;;  %v697_v58 = vsel %vm633_vm8, %v1240_v46, %v665_v50  ;;  %v663_v59 = vmul.f32 0.2, %v516_v55  ;;  %vm631_vm10 = vcmp.ge.f32.partialorder %v516_v55, 0.0 }
  0xf9   : > { %1103 = vst [vmem:[%s1452_s14] sm:$0xff] %v1102_v52   ;;  %v1241_v60 = vpop.f32.mrf.mxu0  ;;  %v1257_v61 = vpop.f32.mrf.mxu1  ;;  %v713_v63 = vsel %vm649_vm9, %v1256_v47, %v681_v54  ;;  %vm647_vm13 = vcmp.ge.f32.partialorder %v580_v56, 0.0  ;;  %v679_v0 = vmul.f32 0.2, %v580_v56 }
  0xfa   : > { %1186 = vst [vmem:[%s1452_s14 + $0x40] sm:$0xff] %v1142_v57   ;;  %vm634_vm11 = vcmp.ge.f32.partialorder %v1241_v60, 0.0  ;;  %v666_v62 = vmul.f32 0.2, %v1241_v60  ;;  %vm650_vm12 = vcmp.ge.f32.partialorder %v1257_v61, 0.0  ;;  %v695_v6 = vsel %vm631_vm10, %v516_v55, %v663_v59 }
  0xfb   : > { %v682_v1 = vmul.f32 0.2, %v1257_v61  ;;  %v519_v2 = vpop.f32.mrf.mxu0  ;;  %v583_v3 = vpop.f32.mrf.mxu1  ;;  %v711_v15 = vsel %vm647_vm13, %v580_v56, %v679_v0 }
  0xfc   : > { %v698_v4 = vsel %vm634_vm11, %v1241_v60, %v666_v62  ;;  %vm632_vm14 = vcmp.ge.f32.partialorder %v519_v2, 0.0  ;;  %v664_v5 = vmul.f32 0.2, %v519_v2  ;;  %vm648_vm15 = vcmp.ge.f32.partialorder %v583_v3, 0.0 }
  0xfd   : > { %v1117_v7 = vpack.c.bf16 %v698_v4, %v697_v58  ;;  %v714_v8 = vsel %vm650_vm12, %v1257_v61, %v682_v1  ;;  %v680_v9 = vmul.f32 0.2, %v583_v3  ;;  %v1244_v10 = vpop.f32.mrf.mxu0  ;;  %v1260_v11 = vpop.f32.mrf.mxu1 }
  0xfe   : > { %v1157_v12 = vpack.c.bf16 %v714_v8, %v713_v63  ;;  %v696_v13 = vsel %vm632_vm14, %v519_v2, %v664_v5  ;;  %vm637_vm0 = vcmp.ge.f32.partialorder %v1244_v10, 0.0  ;;  %v669_v14 = vmul.f32 0.2, %v1244_v10 }
  0xff   : > { %1181 = vst [vmem:[%s1452_s14 + $0x18] sm:$0xff] %v1117_v7   ;;  %v1112_v16 = vpack.c.bf16 %v696_v13, %v695_v6  ;;  %v712_v17 = vsel %vm648_vm15, %v583_v3, %v680_v9  ;;  %v685_v18 = vmul.f32 0.2, %v1260_v11  ;;  %v532_v19 = vpop.f32.mrf.mxu0  ;;  %v596_v20 = vpop.f32.mrf.mxu1  ;;  %vm653_vm1 = vcmp.ge.f32.partialorder %v1260_v11, 0.0 }
 0x100   : > { %1189 = vst [vmem:[%s1452_s14 + $0x58] sm:$0xff] %v1157_v12   ;;  %v1152_v21 = vpack.c.bf16 %v712_v17, %v711_v15  ;;  %v701_v22 = vsel %vm637_vm0, %v1244_v10, %v669_v14  ;;  %v667_v23 = vmul.f32 0.2, %v532_v19  ;;  %vm635_vm2 = vcmp.ge.f32.partialorder %v532_v19, 0.0 }
 0x101   : > { %1180 = vst [vmem:[%s1452_s14 + $0x10] sm:$0xff] %v1112_v16   ;;  %v1245_v24 = vpop.f32.mrf.mxu0  ;;  %v1261_v25 = vpop.f32.mrf.mxu1  ;;  %v717_v27 = vsel %vm653_vm1, %v1260_v11, %v685_v18  ;;  %vm651_vm5 = vcmp.ge.f32.partialorder %v596_v20, 0.0  ;;  %v683_v28 = vmul.f32 0.2, %v596_v20 }
 0x102   : > { %1188 = vst [vmem:[%s1452_s14 + $0x50] sm:$0xff] %v1152_v21   ;;  %vm638_vm3 = vcmp.ge.f32.partialorder %v1245_v24, 0.0  ;;  %v670_v26 = vmul.f32 0.2, %v1245_v24  ;;  %vm654_vm4 = vcmp.ge.f32.partialorder %v1261_v25, 0.0  ;;  %v699_v34 = vsel %vm635_vm2, %v532_v19, %v667_v23 }
 0x103   : > { %v686_v29 = vmul.f32 0.2, %v1261_v25  ;;  %v535_v30 = vpop.f32.mrf.mxu0  ;;  %v599_v31 = vpop.f32.mrf.mxu1  ;;  %v715_v43 = vsel %vm651_vm5, %v596_v20, %v683_v28 }
 0x104   : > { %v702_v32 = vsel %vm638_vm3, %v1245_v24, %v670_v26  ;;  %vm636_vm6 = vcmp.ge.f32.partialorder %v535_v30, 0.0  ;;  %v668_v33 = vmul.f32 0.2, %v535_v30  ;;  %vm652_vm7 = vcmp.ge.f32.partialorder %v599_v31, 0.0 }
 0x105   : > { %v1127_v35 = vpack.c.bf16 %v702_v32, %v701_v22  ;;  %v718_v36 = vsel %vm654_vm4, %v1261_v25, %v686_v29  ;;  %v684_v37 = vmul.f32 0.2, %v599_v31  ;;  %v1248_v38 = vpop.f32.mrf.mxu0  ;;  %v1264_v39 = vpop.f32.mrf.mxu1 }
 0x106   : > { %v1167_v40 = vpack.c.bf16 %v718_v36, %v717_v27  ;;  %v700_v41 = vsel %vm636_vm6, %v535_v30, %v668_v33  ;;  %vm641_vm8 = vcmp.ge.f32.partialorder %v1248_v38, 0.0  ;;  %v673_v42 = vmul.f32 0.2, %v1248_v38 }
 0x107   : > { %1183 = vst [vmem:[%s1452_s14 + $0x28] sm:$0xff] %v1127_v35   ;;  %v1122_v44 = vpack.c.bf16 %v700_v41, %v699_v34  ;;  %v716_v45 = vsel %vm652_vm7, %v599_v31, %v684_v37  ;;  %v548_v46 = vpop.f32.mrf.mxu0  ;;  %v612_v47 = vpop.f32.mrf.mxu1  ;;  %vm657_vm9 = vcmp.ge.f32.partialorder %v1264_v39, 0.0  ;;  %v689_v50 = vmul.f32 0.2, %v1264_v39 }
 0x108   : > { %1191 = vst [vmem:[%s1452_s14 + $0x68] sm:$0xff] %v1167_v40   ;;  %v1162_v48 = vpack.c.bf16 %v716_v45, %v715_v43  ;;  %v705_v49 = vsel %vm641_vm8, %v1248_v38, %v673_v42  ;;  %v671_v53 = vmul.f32 0.2, %v548_v46  ;;  %vm639_vm12 = vcmp.ge.f32.partialorder %v548_v46, 0.0 }
 0x109   : > { %1182 = vst [vmem:[%s1452_s14 + $0x20] sm:$0xff] %v1122_v44   ;;  %v1249_v51 = vpop.f32.mrf.mxu0  ;;  %v1265_v52 = vpop.f32.mrf.mxu1  ;;  %vm655_vm13 = vcmp.ge.f32.partialorder %v612_v47, 0.0  ;;  %v687_v55 = vmul.f32 0.2, %v612_v47  ;;  %v721_v61 = vsel %vm657_vm9, %v1264_v39, %v689_v50 }
 0x10a   : > { %1190 = vst [vmem:[%s1452_s14 + $0x60] sm:$0xff] %v1162_v48   ;;  %vm642_vm10 = vcmp.ge.f32.partialorder %v1249_v51, 0.0  ;;  %v674_v54 = vmul.f32 0.2, %v1249_v51  ;;  %vm658_vm11 = vcmp.ge.f32.partialorder %v1265_v52, 0.0  ;;  %v703_v1 = vsel %vm639_vm12, %v548_v46, %v671_v53 }
 0x10b   : > { %v690_v56 = vmul.f32 0.2, %v1265_v52  ;;  %v551_v57 = vpop.f32.mrf.mxu0  ;;  %v615_v58 = vpop.f32.mrf.mxu1  ;;  %v719_v4 = vsel %vm655_vm13, %v612_v47, %v687_v55 }
 0x10c   : > { %v706_v59 = vsel %vm642_vm10, %v1249_v51, %v674_v54  ;;  %vm640_vm14 = vcmp.ge.f32.partialorder %v551_v57, 0.0  ;;  %v672_v60 = vmul.f32 0.2, %v551_v57  ;;  %vm656_vm15 = vcmp.ge.f32.partialorder %v615_v58, 0.0 }
 0x10d   : > { %v1137_v62 = vpack.c.bf16 %v706_v59, %v705_v49  ;;  %v722_v63 = vsel %vm658_vm11, %v1265_v52, %v690_v56  ;;  %v688_v0 = vmul.f32 0.2, %v615_v58 }
 0x10e   : > { %v1177_v2 = vpack.c.bf16 %v722_v63, %v721_v61  ;;  %v704_v3 = vsel %vm640_vm14, %v551_v57, %v672_v60 }
 0x10f   : > { %1185 = vst [vmem:[%s1452_s14 + $0x38] sm:$0xff] %v1137_v62   ;;  %v1132_v5 = vpack.c.bf16 %v704_v3, %v703_v1  ;;  %v720_v6 = vsel %vm656_vm15, %v615_v58, %v688_v0 }
 0x110   : > { %1193 = vst [vmem:[%s1452_s14 + $0x78] sm:$0xff] %v1177_v2   ;;  %v1172_v7 = vpack.c.bf16 %v720_v6, %v719_v4 }
 0x111   : > { %1184 = vst [vmem:[%s1452_s14 + $0x30] sm:$0xff] %v1132_v5  }
 0x112   : > { %1192 = vst [vmem:[%s1452_s14 + $0x70] sm:$0xff] %v1172_v7  }
 0x113 PF: > { %s14_s17 = sadd.s32 1, %s1352_s17   ;;  %s1489_s15 = smov %s1348_s16 }
 0x114   : > { %p11_p5 = scmp.ge.s32.totalorder %s14_s17, 10   ;;  %s1490_s16 = smov %s1492_s2 }
 0x116   :  { %13 = sbr.rel (!%p11_p5) target bundleno = 2 (0x2), region = 75 }

// kernel: discriminator_forward.6
= control target key start
LH: loop header
LB: loop body
LE: loop exit
PB: predicated region body
PF: predicated region fallthrough
CT: control target
= control target key end

     0   :  { %s4178_s15 = smov 0   ;;  %s4180_s16 = smov 0   ;;  %s5138_s0 = inlined_call_operand.vmem [shape: bf16[512,1024], index: 0, kind: input, shape index: {}]   ;;  %s5139_s1 = inlined_call_operand.vmem [shape: bf16[1024,128], index: 1, kind: input, shape index: {}]   ;;  %s5140_s2 = inlined_call_operand.vmem [shape: f32[1,128], index: 2, kind: input, shape index: {}]   ;;  %s5141_s3 = inlined_call_operand.vmem [shape: f32[1,128], index: 3, kind: input, shape index: {}]   ;;  %s5142_s4 = inlined_call_operand.vmem [shape: bf16[512,128], index: 4, kind: output, shape index: {}]  }
   0x1   :  { %s4182_s17 = smov 0   ;;  %s4184_s18 = smov 0  }
   0x2   :  { %s4186_s19 = smov 0  }
   0x3 LB: > { %s26_s20 = sadd.s32 1, %s4142_s17  ;;  %s29_s21 = sadd.s32 1, %s4146_s18  ;;  %s4150_s19 = sphi %s4186_s19, %s14_s19   ;;  %s4146_s18 = sphi %s4184_s18, %s5158_s18   ;;  %s4142_s17 = sphi %s4182_s17, %s5157_s17   ;;  %s4138_s16 = sphi %s4180_s16, %s5156_s16   ;;  %s4134_s15 = sphi %s4178_s15, %s5155_s15  }
   0x4   : > { %p27_p0 = scmp.ge.s32.totalorder %s26_s20, 2  ;;  %p3034_p1 = scmp.ge.s32.totalorder %s4150_s19, 1 }
   0x5   : > { %p210_p2 = scmp.lt.s32.totalorder %s4150_s19, 5 }
   0x6   : > { %s5160_s20 = smov (%p27_p0, %s26_s20), 0  ;;  %s5162_s21 = smov (!%p27_p0, %s29_s21), %s4146_s18 }
   0x7   : > { %p211_p3 = pnand %p3034_p1, %p210_p2  ;;  %p31_p4 = scmp.ge.s32.totalorder %s5162_s21, 2 }
   0x8   : > { %s3035_s24 = sshll.u32 (!%p211_p3), %s4134_s15, 5  ;;  %p2201_p6 = scmp.eq.s32.totalorder (!%p211_p3), %s4138_s16, 0 }
   0x9   : > { %s5164_s21 = smov (%p31_p4, %s5162_s21), 0  ;;  %214 = sbr.rel (%p211_p3) target bundleno = 686 (0x2ae), region = 36 }
   0xa   : > { %p251_p5 = scmp.lt.s32.totalorder (!%p211_p3), %s3035_s24, 63  ;;  %p2202_p7 = scmp.eq.s32.totalorder (!%p211_p3), %s4134_s15, 0 }
   0xc   : > { %p4613_p8 = pnand (!%p211_p3), %p2202_p7, %p2201_p6 }
   0xe   : > { %v4046_v0 = vld [vmem:[%s5139_s1 + $0x78] sm:$0xff]   ;;  %v4050_v4 = vld [vmem:[%s5139_s1 + $0x70] sm:$0xff]   ;;  %s5166_s24 = smov (!%p251_p5, %s3035_s24), 63  ;;  %v4054_v8 = vld [vmem:[%s5139_s1 + $0x68] sm:$0xff]  }
   0xf   : > { %v4047_v1 = vld [vmem:[%s5139_s1 + $0xf8] sm:$0xff]   ;;  %3557 = vmatprep.subr.bf16.mxu0 %v4046_v0  ;;  %v4051_v5 = vld [vmem:[%s5139_s1 + $0xf0] sm:$0xff]   ;;  %s3039_s11 = sshll.u32 %s5166_s24, 2  ;;  %v4055_v9 = vld [vmem:[%s5139_s1 + $0xe8] sm:$0xff]   ;;  %s3302_s29 = sshll.u32 %s5166_s24, 5 }
  0x10   : > { %v4048_v2 = vld [vmem:[%s5139_s1 + $0x38] sm:$0xff]   ;;  %3669 = vmatprep.subr.bf16.mxu1 %v4047_v1  ;;  %v4052_v6 = vld [vmem:[%s5139_s1 + $0x30] sm:$0xff]   ;;  %s4243_s23 = scalar_lea.vmem %s5142_s4, %s3039_s11  ;;  %v4056_v10 = vld [vmem:[%s5139_s1 + $0x28] sm:$0xff]   ;;  %s4315_s12 = scalar_lea.vmem %s5138_s0, %s3302_s29 }
  0x11   : > { %v4049_v3 = vld [vmem:[%s5139_s1 + $0xb8] sm:$0xff]   ;;  %3558 = vmatpush3.bf16.msra.mxu0 %v4048_v2  ;;  %v4053_v7 = vld [vmem:[%s5139_s1 + $0xb0] sm:$0xff]   ;;  %v4057_v11 = vld [vmem:[%s5139_s1 + $0xa8] sm:$0xff]  }
  0x12   : > { %3670 = vmatpush3.bf16.msra.mxu1 %v4049_v3  ;;  %3559 = vmatprep.subr.bf16.mxu0 %v4050_v4  ;;  %v4058_v12 = vld [vmem:[%s5139_s1 + $0x60] sm:$0xff]   ;;  %v4062_v16 = vld [vmem:[%s5139_s1 + $0x58] sm:$0xff]   ;;  %v4066_v20 = vld [vmem:[%s5139_s1 + $0x50] sm:$0xff]  }
  0x13   : > { %3671 = vmatprep.subr.bf16.mxu1 %v4051_v5  ;;  %v4059_v13 = vld [vmem:[%s5139_s1 + $0xe0] sm:$0xff]   ;;  %v4063_v17 = vld [vmem:[%s5139_s1 + $0xd8] sm:$0xff]   ;;  %v4067_v21 = vld [vmem:[%s5139_s1 + $0xd0] sm:$0xff]  }
  0x14   : > { %v4060_v14 = vld [vmem:[%s5139_s1 + $0x20] sm:$0xff]   ;;  %v4064_v18 = vld [vmem:[%s5139_s1 + $0x18] sm:$0xff]   ;;  %v4068_v22 = vld [vmem:[%s5139_s1 + $0x10] sm:$0xff]  }
  0x15   : > { %3560 = vmatpush3.bf16.msra.mxu0 %v4052_v6  ;;  %v4061_v15 = vld [vmem:[%s5139_s1 + $0xa0] sm:$0xff]   ;;  %v4065_v19 = vld [vmem:[%s5139_s1 + $0x98] sm:$0xff]   ;;  %v4069_v23 = vld [vmem:[%s5139_s1 + $0x90] sm:$0xff]  }
  0x16   : > { %3672 = vmatpush3.bf16.msra.mxu1 %v4053_v7  ;;  %3561 = vmatprep.subr.bf16.mxu0 %v4054_v8  ;;  %v4070_v24 = vld [vmem:[%s5139_s1 + $0x48] sm:$0xff]   ;;  %v4074_v28 = vld [vmem:[%s5139_s1 + $0x40] sm:$0xff]   ;;  %v4078_v40 = vld [vmem:[%s5139_s1 + $0x178] sm:$0xff]  }
  0x17   : > { %3673 = vmatprep.subr.bf16.mxu1 %v4055_v9  ;;  %v4071_v25 = vld [vmem:[%s5139_s1 + $0xc8] sm:$0xff]   ;;  %v4075_v29 = vld [vmem:[%s5139_s1 + $0xc0] sm:$0xff]   ;;  %v4079_v41 = vld [vmem:[%s5139_s1 + $0x138] sm:$0xff]  }
  0x18   : > { %v4072_v26 = vld [vmem:[%s5139_s1 + $0x8] sm:$0xff]   ;;  %v4076_v30 = vld [vmem:[%s5139_s1] sm:$0xff]   ;;  %v4080_v42 = vld [vmem:[%s5139_s1 + $0x1f8] sm:$0xff]  }
  0x19   : > { %3562 = vmatpush3.bf16.msra.mxu0 %v4056_v10  ;;  %v4073_v27 = vld [vmem:[%s5139_s1 + $0x88] sm:$0xff]   ;;  %v4077_v31 = vld [vmem:[%s5139_s1 + $0x80] sm:$0xff]   ;;  %v4081_v43 = vld [vmem:[%s5139_s1 + $0x1b8] sm:$0xff]  }
  0x1a   : > { %3674 = vmatpush3.bf16.msra.mxu1 %v4057_v11  ;;  %3563 = vmatprep.subr.bf16.mxu0 %v4058_v12  ;;  %v277_v32 = vld [vmem:[%s4315_s12] sm:$0xff]  ;;  %v278_v34 = vld [vmem:[%s4315_s12 + $0x8] sm:$0xff]  ;;  %v4082_v55 = vld [vmem:[%s5139_s1 + $0x170] sm:$0xff]  }
  0x1b   : > { %3675 = vmatprep.subr.bf16.mxu1 %v4059_v13  ;;  %v281_v33 = vld [vmem:[%s4315_s12 + $0x20] sm:$0xff]  ;;  %v282_v37 = vld [vmem:[%s4315_s12 + $0x28] sm:$0xff]  ;;  %v4083_v58 = vld [vmem:[%s5139_s1 + $0x130] sm:$0xff]  }
  0x1c   : > { %v3040_v35 = vcombine.low %v277_v32, %v281_v33  ;;  %v3041_v36 = vcombine.high %v277_v32, %v281_v33  ;;  %v3042_v38 = vcombine.low %v278_v34, %v282_v37  ;;  %v3043_v39 = vcombine.high %v278_v34, %v282_v37  ;;  %v285_v44 = vld [vmem:[%s4315_s12 + $0x40] sm:$0xff]  ;;  %v286_v47 = vld [vmem:[%s4315_s12 + $0x48] sm:$0xff]  ;;  %v4084_v60 = vld [vmem:[%s5139_s1 + $0x1f0] sm:$0xff]  }
  0x1d   : > { %3564 = vmatpush3.bf16.msra.mxu0 %v4060_v14  ;;  %v289_v45 = vld [vmem:[%s4315_s12 + $0x60] sm:$0xff]  ;;  %v290_v48 = vld [vmem:[%s4315_s12 + $0x68] sm:$0xff]  ;;  %v4085_v61 = vld [vmem:[%s5139_s1 + $0x1b0] sm:$0xff]  }
  0x1e   : > { %3676 = vmatpush3.bf16.msra.mxu1 %v4061_v15  ;;  %3565 = vmatprep.subr.bf16.mxu0 %v4062_v16  ;;  %v3049_v46 = vcombine.high %v285_v44, %v289_v45  ;;  %v293_v49 = vld [vmem:[%s4315_s12 + $0x80] sm:$0xff]  ;;  %v3051_v50 = vcombine.high %v286_v47, %v290_v48  ;;  %v294_v52 = vld [vmem:[%s4315_s12 + $0x88] sm:$0xff]  ;;  %v3048_v54 = vcombine.low %v285_v44, %v289_v45  ;;  %v4098_v34 = vld [vmem:[%s5139_s1 + $0x150] sm:$0xff]  }
  0x1f   : > { %3677 = vmatprep.subr.bf16.mxu1 %v4063_v17  ;;  %1589 = vmatprep.mubr.bf16.mxu0 %v3041_v36  ;;  %v297_v51 = vld [vmem:[%s4315_s12 + $0xa0] sm:$0xff]  ;;  %v298_v53 = vld [vmem:[%s4315_s12 + $0xa8] sm:$0xff]  ;;  %v3050_v56 = vcombine.low %v286_v47, %v290_v48  ;;  %v4099_v36 = vld [vmem:[%s5139_s1 + $0x110] sm:$0xff]  }
  0x20   : > { %1750 = vmatprep.mubr.bf16.mxu1 %v3043_v39  ;;  %v3057_v57 = vcombine.high %v293_v49, %v297_v51  ;;  %v3059_v59 = vcombine.high %v294_v52, %v298_v53  ;;  %v301_v62 = vld [vmem:[%s4315_s12 + $0xc0] sm:$0xff]  ;;  %v302_v0 = vld [vmem:[%s4315_s12 + $0xc8] sm:$0xff]  ;;  %v3056_v3 = vcombine.low %v293_v49, %v297_v51  ;;  %v3058_v5 = vcombine.low %v294_v52, %v298_v53  ;;  %v4100_v37 = vld [vmem:[%s5139_s1 + $0x1d0] sm:$0xff]  }
  0x21   : > { %3566 = vmatpush3.bf16.msra.mxu0 %v4064_v18  ;;  %v305_v63 = vld [vmem:[%s4315_s12 + $0xe0] sm:$0xff]  ;;  %v306_v1 = vld [vmem:[%s4315_s12 + $0xe8] sm:$0xff]  ;;  %v4101_v39 = vld [vmem:[%s5139_s1 + $0x190] sm:$0xff]  }
  0x22   : > { %3678 = vmatpush3.bf16.msra.mxu1 %v4065_v19  ;;  %3567 = vmatprep.subr.bf16.mxu0 %v4066_v20  ;;  %v4086_v2 = vld [vmem:[%s5139_s1 + $0x168] sm:$0xff]   ;;  %v3065_v6 = vcombine.high %v301_v62, %v305_v63  ;;  %v3067_v8 = vcombine.high %v302_v0, %v306_v1  ;;  %v309_v10 = vld [vmem:[%s4315_s12 + $0x100] sm:$0xff]  ;;  %v3064_v16 = vcombine.low %v301_v62, %v305_v63 }
  0x23   : > { %3679 = vmatprep.subr.bf16.mxu1 %v4067_v21  ;;  %v4087_v4 = vld [vmem:[%s5139_s1 + $0x128] sm:$0xff]   ;;  %v313_v11 = vld [vmem:[%s4315_s12 + $0x120] sm:$0xff]  ;;  %v3066_v18 = vcombine.low %v302_v0, %v306_v1 }
  0x24   : > { %v4088_v7 = vld [vmem:[%s5139_s1 + $0x1e8] sm:$0xff]   ;;  %v4090_v14 = vld [vmem:[%s5139_s1 + $0x160] sm:$0xff]   ;;  %v3073_v19 = vcombine.high %v309_v10, %v313_v11 }
  0x25   : > { %3568 = vmatpush3.bf16.msra.mxu0 %v4068_v22  ;;  %v4089_v9 = vld [vmem:[%s5139_s1 + $0x1a8] sm:$0xff]   ;;  %v4091_v15 = vld [vmem:[%s5139_s1 + $0x120] sm:$0xff]  }
  0x26   : > { %3680 = vmatpush3.bf16.msra.mxu1 %v4069_v23  ;;  %3569 = vmatprep.subr.bf16.mxu0 %v4070_v24  ;;  %v310_v12 = vld [vmem:[%s4315_s12 + $0x108] sm:$0xff]  ;;  %v4092_v17 = vld [vmem:[%s5139_s1 + $0x1e0] sm:$0xff]   ;;  %v4094_v24 = vld [vmem:[%s5139_s1 + $0x158] sm:$0xff]  }
  0x27   : > { %3681 = vmatprep.subr.bf16.mxu1 %v4071_v25  ;;  %v314_v13 = vld [vmem:[%s4315_s12 + $0x128] sm:$0xff]  ;;  %v4093_v20 = vld [vmem:[%s5139_s1 + $0x1a0] sm:$0xff]  }
  0x28   : > { %v3075_v21 = vcombine.high %v310_v12, %v314_v13  ;;  %v317_v22 = vld [vmem:[%s4315_s12 + $0x140] sm:$0xff]  ;;  %v318_v25 = vld [vmem:[%s4315_s12 + $0x148] sm:$0xff] }
  0x29   : > { %3570 = vmatpush3.bf16.msra.mxu0 %v4072_v26  ;;  %v321_v23 = vld [vmem:[%s4315_s12 + $0x160] sm:$0xff]  ;;  %v322_v26 = vld [vmem:[%s4315_s12 + $0x168] sm:$0xff] }
  0x2a   : > { %3682 = vmatpush3.bf16.msra.mxu1 %v4073_v27  ;;  %3571 = vmatprep.subr.bf16.mxu0 %v4074_v28  ;;  %v4095_v27 = vld [vmem:[%s5139_s1 + $0x118] sm:$0xff]   ;;  %v3081_v32 = vcombine.high %v317_v22, %v321_v23  ;;  %v3083_v33 = vcombine.high %v318_v25, %v322_v26  ;;  %v4103_v47 = vld [vmem:[%s5139_s1 + $0x108] sm:$0xff]   ;;  %v337_v51 = vld [vmem:[%s4315_s12 + $0x1e0] sm:$0xff] }
  0x2b   : > { %3683 = vmatprep.subr.bf16.mxu1 %v4075_v29  ;;  %v4096_v28 = vld [vmem:[%s5139_s1 + $0x1d8] sm:$0xff]   ;;  %v4104_v48 = vld [vmem:[%s5139_s1 + $0x1c8] sm:$0xff]   ;;  %v341_v62 = vld [vmem:[%s4315_s12 + $0x200] sm:$0xff] }
  0x2c   : > { %v4097_v29 = vld [vmem:[%s5139_s1 + $0x198] sm:$0xff]   ;;  %v4105_v49 = vld [vmem:[%s5139_s1 + $0x188] sm:$0xff]   ;;  %v345_v63 = vld [vmem:[%s4315_s12 + $0x220] sm:$0xff] }
  0x2d   : > { %3572 = vmatpush3.bf16.msra.mxu0 %v4076_v30  ;;  %v3072_v30 = vcombine.low %v309_v10, %v313_v11  ;;  %v334_v52 = vld [vmem:[%s4315_s12 + $0x1c8] sm:$0xff]  ;;  %v3104_v10 = vcombine.low %v341_v62, %v345_v63 }
  0x2e   : > { %3684 = vmatpush3.bf16.msra.mxu1 %v4077_v31  ;;  %3781 = vmatprep.subr.bf16.mxu0 %v4078_v40  ;;  %v3074_v31 = vcombine.low %v310_v12, %v314_v13  ;;  %v326_v40 = vld [vmem:[%s4315_s12 + $0x188] sm:$0xff] }
  0x2f   : > { %3893 = vmatprep.subr.bf16.mxu1 %v4080_v42  ;;  %v3080_v42 = vcombine.low %v317_v22, %v321_v23  ;;  %v338_v53 = vld [vmem:[%s4315_s12 + $0x1e8] sm:$0xff]  ;;  %v365_v22 = vld [vmem:[%s4315_s12 + $0x2c0] sm:$0xff] }
  0x30   : > { %1590 = vmatmul.mubr.bf16.vlgmr.msra.gmra.mxu0 %v3040_v35  ;;  %v325_v35 = vld [vmem:[%s4315_s12 + $0x180] sm:$0xff]  ;;  %v342_v0 = vld [vmem:[%s4315_s12 + $0x208] sm:$0xff] }
  0x31   : > { %1751 = vmatmul.mubr.bf16.vlgmr.msra.gmra.mxu1 %v3042_v38  ;;  %3782 = vmatpush3.bf16.msra.mxu0 %v4079_v41  ;;  %v329_v38 = vld [vmem:[%s4315_s12 + $0x1a0] sm:$0xff]  ;;  %v330_v41 = vld [vmem:[%s4315_s12 + $0x1a8] sm:$0xff] }
  0x32   : > { %3894 = vmatpush3.bf16.msra.mxu1 %v4081_v43  ;;  %1597 = vmatprep.mubr.bf16.mxu0 %v3049_v46  ;;  %v3082_v43 = vcombine.low %v318_v25, %v322_v26  ;;  %v3089_v44 = vcombine.high %v325_v35, %v329_v38  ;;  %v3091_v45 = vcombine.high %v326_v40, %v330_v41  ;;  %v4102_v46 = vld [vmem:[%s5139_s1 + $0x148] sm:$0xff]   ;;  %v369_v23 = vld [vmem:[%s4315_s12 + $0x2e0] sm:$0xff] }
  0x33   : > { %1758 = vmatprep.mubr.bf16.mxu1 %v3051_v50  ;;  %3783 = vmatprep.subr.bf16.mxu0 %v4082_v55  ;;  %v333_v50 = vld [vmem:[%s4315_s12 + $0x1c0] sm:$0xff]  ;;  %v346_v1 = vld [vmem:[%s4315_s12 + $0x228] sm:$0xff] }
  0x34   : > { %3895 = vmatprep.subr.bf16.mxu1 %v4084_v60  ;;  %v4106_v55 = vld [vmem:[%s5139_s1 + $0x140] sm:$0xff]   ;;  %v3106_v11 = vcombine.low %v342_v0, %v346_v1  ;;  %v370_v25 = vld [vmem:[%s4315_s12 + $0x2e8] sm:$0xff] }
  0x35   : > { %3784 = vmatpush3.bf16.msra.mxu0 %v4083_v58  ;;  %v4107_v58 = vld [vmem:[%s5139_s1 + $0x100] sm:$0xff]  }
  0x36   : > { %3896 = vmatpush3.bf16.msra.mxu1 %v4085_v61  ;;  %3785 = vmatprep.subr.bf16.mxu0 %v4086_v2  ;;  %v4108_v60 = vld [vmem:[%s5139_s1 + $0x1c0] sm:$0xff]   ;;  %v3096_v2 = vcombine.low %v333_v50, %v337_v51 }
  0x37   : > { %3897 = vmatprep.subr.bf16.mxu1 %v4088_v7  ;;  %v4109_v61 = vld [vmem:[%s5139_s1 + $0x180] sm:$0xff]  }
  0x38   : > { %1598 = vmatmul.mubr.bf16.gmra.mxu0 %v3048_v54  ;;  %v3088_v54 = vcombine.low %v325_v35, %v329_v38  ;;  %v353_v7 = vld [vmem:[%s4315_s12 + $0x260] sm:$0xff] }
  0x39   : > { %1759 = vmatmul.mubr.bf16.gmra.mxu1 %v3050_v56  ;;  %1605 = vmatprep.mubr.bf16.mxu0 %v3057_v57  ;;  %v3090_v56 = vcombine.low %v326_v40, %v330_v41  ;;  %v3097_v57 = vcombine.high %v333_v50, %v337_v51  ;;  %v381_v38 = vld [vmem:[%s4315_s12 + $0x340] sm:$0xff]  ;;  %v382_v40 = vld [vmem:[%s4315_s12 + $0x348] sm:$0xff] }
  0x3a   : > { %1766 = vmatprep.mubr.bf16.mxu1 %v3059_v59  ;;  %3786 = vmatpush3.bf16.msra.mxu0 %v4087_v4  ;;  %v3099_v59 = vcombine.high %v334_v52, %v338_v53  ;;  %v3105_v4 = vcombine.high %v341_v62, %v345_v63  ;;  %v386_v41 = vld [vmem:[%s4315_s12 + $0x368] sm:$0xff]  ;;  %v279_v62 = vld [vmem:[%s4315_s12 + $0x10] sm:$0xff] }
  0x3b   : > { %3898 = vmatpush3.bf16.msra.mxu1 %v4089_v9  ;;  %3787 = vmatprep.subr.bf16.mxu0 %v4090_v14  ;;  %v354_v9 = vld [vmem:[%s4315_s12 + $0x268] sm:$0xff]  ;;  %v357_v14 = vld [vmem:[%s4315_s12 + $0x280] sm:$0xff]  ;;  %v3146_v51 = vcombine.low %v382_v40, %v386_v41  ;;  %v283_v63 = vld [vmem:[%s4315_s12 + $0x30] sm:$0xff] }
  0x3c   : > { %3899 = vmatprep.subr.bf16.mxu1 %v4092_v17  ;;  %v362_v17 = vld [vmem:[%s4315_s12 + $0x2a8] sm:$0xff] }
  0x3e   : > { %3788 = vmatpush3.bf16.msra.mxu0 %v4091_v15  ;;  %v361_v15 = vld [vmem:[%s4315_s12 + $0x2a0] sm:$0xff] }
  0x3f   : > { %3900 = vmatpush3.bf16.msra.mxu1 %v4093_v20  ;;  %3789 = vmatprep.subr.bf16.mxu0 %v4094_v24  ;;  %v3121_v20 = vcombine.high %v357_v14, %v361_v15  ;;  %v366_v24 = vld [vmem:[%s4315_s12 + $0x2c8] sm:$0xff]  ;;  %v3120_v26 = vcombine.low %v357_v14, %v361_v15  ;;  %v295_v14 = vld [vmem:[%s4315_s12 + $0x90] sm:$0xff] }
  0x40   : > { %1606 = vmatmul.mubr.bf16.gmra.mxu0 %v3056_v3  ;;  %3901 = vmatprep.subr.bf16.mxu1 %v4096_v28  ;;  %v3098_v3 = vcombine.low %v334_v52, %v338_v53  ;;  %v3129_v28 = vcombine.high %v365_v22, %v369_v23  ;;  %v3130_v35 = vcombine.low %v366_v24, %v370_v25  ;;  %v299_v15 = vld [vmem:[%s4315_s12 + $0xb0] sm:$0xff] }
  0x41   : > { %1767 = vmatmul.mubr.bf16.gmra.mxu1 %v3058_v5  ;;  %1613 = vmatprep.mubr.bf16.mxu0 %v3065_v6  ;;  %v3107_v5 = vcombine.high %v342_v0, %v346_v1  ;;  %v349_v6 = vld [vmem:[%s4315_s12 + $0x240] sm:$0xff]  ;;  %v280_v0 = vld [vmem:[%s4315_s12 + $0x18] sm:$0xff] }
  0x42   : > { %1774 = vmatprep.mubr.bf16.mxu1 %v3067_v8  ;;  %3790 = vmatpush3.bf16.msra.mxu0 %v4095_v27  ;;  %v350_v8 = vld [vmem:[%s4315_s12 + $0x248] sm:$0xff]  ;;  %v3113_v12 = vcombine.high %v349_v6, %v353_v7  ;;  %v284_v1 = vld [vmem:[%s4315_s12 + $0x38] sm:$0xff] }
  0x43   : > { %3902 = vmatpush3.bf16.msra.mxu1 %v4097_v29  ;;  %3791 = vmatprep.subr.bf16.mxu0 %v4098_v34  ;;  %v3115_v13 = vcombine.high %v350_v8, %v354_v9  ;;  %v3131_v29 = vcombine.high %v366_v24, %v370_v25  ;;  %v3128_v34 = vcombine.low %v365_v22, %v369_v23  ;;  %v303_v22 = vld [vmem:[%s4315_s12 + $0xd0] sm:$0xff]  ;;  %v304_v24 = vld [vmem:[%s4315_s12 + $0xd8] sm:$0xff] }
  0x44   : > { %3903 = vmatprep.subr.bf16.mxu1 %v4100_v37  ;;  %v307_v23 = vld [vmem:[%s4315_s12 + $0xf0] sm:$0xff]  ;;  %v308_v25 = vld [vmem:[%s4315_s12 + $0xf8] sm:$0xff] }
  0x46   : > { %3792 = vmatpush3.bf16.msra.mxu0 %v4099_v36 }
  0x47   : > { %3904 = vmatpush3.bf16.msra.mxu1 %v4101_v39  ;;  %3793 = vmatprep.subr.bf16.mxu0 %v4102_v46  ;;  %v385_v39 = vld [vmem:[%s4315_s12 + $0x360] sm:$0xff] }
  0x48   : > { %1614 = vmatmul.mubr.bf16.gmra.mxu0 %v3064_v16  ;;  %3905 = vmatprep.subr.bf16.mxu1 %v4104_v48  ;;  %v358_v16 = vld [vmem:[%s4315_s12 + $0x288] sm:$0xff]  ;;  %v389_v46 = vld [vmem:[%s4315_s12 + $0x380] sm:$0xff]  ;;  %v3144_v50 = vcombine.low %v381_v38, %v385_v39 }
  0x49   : > { %1775 = vmatmul.mubr.bf16.gmra.mxu1 %v3066_v18  ;;  %1621 = vmatprep.mubr.bf16.mxu0 %v3073_v19  ;;  %v3112_v18 = vcombine.low %v349_v6, %v353_v7  ;;  %v3114_v19 = vcombine.low %v350_v8, %v354_v9  ;;  %v3122_v27 = vcombine.low %v358_v16, %v362_v17  ;;  %v390_v48 = vld [vmem:[%s4315_s12 + $0x388] sm:$0xff]  ;;  %v287_v6 = vld [vmem:[%s4315_s12 + $0x50] sm:$0xff]  ;;  %v288_v8 = vld [vmem:[%s4315_s12 + $0x58] sm:$0xff] }
  0x4a   : > { %1782 = vmatprep.mubr.bf16.mxu1 %v3075_v21  ;;  %3794 = vmatpush3.bf16.msra.mxu0 %v4103_v47  ;;  %v3123_v21 = vcombine.high %v358_v16, %v362_v17  ;;  %v393_v47 = vld [vmem:[%s4315_s12 + $0x3a0] sm:$0xff]  ;;  %v291_v7 = vld [vmem:[%s4315_s12 + $0x70] sm:$0xff]  ;;  %v292_v9 = vld [vmem:[%s4315_s12 + $0x78] sm:$0xff] }
  0x4b   : > { %3906 = vmatpush3.bf16.msra.mxu1 %v4105_v49  ;;  %3795 = vmatprep.subr.bf16.mxu0 %v4106_v55  ;;  %v394_v49 = vld [vmem:[%s4315_s12 + $0x3a8] sm:$0xff]  ;;  %v3153_v52 = vcombine.high %v389_v46, %v393_v47  ;;  %v401_v55 = vld [vmem:[%s4315_s12 + $0x3e0] sm:$0xff]  ;;  %v296_v16 = vld [vmem:[%s4315_s12 + $0x98] sm:$0xff] }
  0x4c   : > { %3907 = vmatprep.subr.bf16.mxu1 %v4108_v60  ;;  %v3155_v53 = vcombine.high %v390_v48, %v394_v49  ;;  %v300_v17 = vld [vmem:[%s4315_s12 + $0xb8] sm:$0xff] }
  0x4e   : > { %3796 = vmatpush3.bf16.msra.mxu0 %v4107_v58  ;;  %v3152_v58 = vcombine.low %v389_v46, %v393_v47  ;;  %v327_v46 = vld [vmem:[%s4315_s12 + $0x190] sm:$0xff] }
  0x4f   : > { %3908 = vmatpush3.bf16.msra.mxu1 %v4109_v61  ;;  %v331_v47 = vld [vmem:[%s4315_s12 + $0x1b0] sm:$0xff] }
  0x50   : > { %1622 = vmatmul.mubr.bf16.gmra.mxu0 %v3072_v30  ;;  %v373_v30 = vld [vmem:[%s4315_s12 + $0x300] sm:$0xff] }
  0x51   : > { %1783 = vmatmul.mubr.bf16.gmra.mxu1 %v3074_v31  ;;  %1629 = vmatprep.mubr.bf16.mxu0 %v3081_v32  ;;  %v377_v31 = vld [vmem:[%s4315_s12 + $0x320] sm:$0xff]  ;;  %v374_v32 = vld [vmem:[%s4315_s12 + $0x308] sm:$0xff] }
  0x52   : > { %1790 = vmatprep.mubr.bf16.mxu1 %v3083_v33  ;;  %v378_v33 = vld [vmem:[%s4315_s12 + $0x328] sm:$0xff]  ;;  %v3137_v36 = vcombine.high %v373_v30, %v377_v31 }
  0x53   : > { %v3139_v37 = vcombine.high %v374_v32, %v378_v33 }
  0x58   : > { %1630 = vmatmul.mubr.bf16.gmra.mxu0 %v3080_v42  ;;  %v3136_v42 = vcombine.low %v373_v30, %v377_v31  ;;  %v311_v30 = vld [vmem:[%s4315_s12 + $0x110] sm:$0xff] }
  0x59   : > { %1791 = vmatmul.mubr.bf16.gmra.mxu1 %v3082_v43  ;;  %1637 = vmatprep.mubr.bf16.mxu0 %v3089_v44  ;;  %v3138_v43 = vcombine.low %v374_v32, %v378_v33  ;;  %v3145_v44 = vcombine.high %v381_v38, %v385_v39  ;;  %v315_v31 = vld [vmem:[%s4315_s12 + $0x130] sm:$0xff]  ;;  %v312_v32 = vld [vmem:[%s4315_s12 + $0x118] sm:$0xff] }
  0x5a   : > { %1798 = vmatprep.mubr.bf16.mxu1 %v3091_v45  ;;  %v3147_v45 = vcombine.high %v382_v40, %v386_v41  ;;  %v316_v33 = vld [vmem:[%s4315_s12 + $0x138] sm:$0xff]  ;;  %v319_v38 = vld [vmem:[%s4315_s12 + $0x150] sm:$0xff] }
  0x5b   : > { %v323_v39 = vld [vmem:[%s4315_s12 + $0x170] sm:$0xff]  ;;  %v320_v40 = vld [vmem:[%s4315_s12 + $0x158] sm:$0xff] }
  0x5c   : > { %v324_v41 = vld [vmem:[%s4315_s12 + $0x178] sm:$0xff] }
  0x60   : > { %1638 = vmatmul.mubr.bf16.gmra.mxu0 %v3088_v54  ;;  %v397_v54 = vld [vmem:[%s4315_s12 + $0x3c0] sm:$0xff] }
  0x61   : > { %1799 = vmatmul.mubr.bf16.gmra.mxu1 %v3090_v56  ;;  %1645 = vmatprep.mubr.bf16.mxu0 %v3097_v57  ;;  %v398_v56 = vld [vmem:[%s4315_s12 + $0x3c8] sm:$0xff]  ;;  %v3161_v60 = vcombine.high %v397_v54, %v401_v55 }
  0x62   : > { %1806 = vmatprep.mubr.bf16.mxu1 %v3099_v59  ;;  %v402_v57 = vld [vmem:[%s4315_s12 + $0x3e8] sm:$0xff]  ;;  %v3154_v59 = vcombine.low %v390_v48, %v394_v49  ;;  %v328_v48 = vld [vmem:[%s4315_s12 + $0x198] sm:$0xff] }
  0x63   : > { %v3163_v61 = vcombine.high %v398_v56, %v402_v57  ;;  %v332_v49 = vld [vmem:[%s4315_s12 + $0x1b8] sm:$0xff] }
  0x68   : > { %1646 = vmatmul.mubr.bf16.gmra.mxu0 %v3096_v2  ;;  %v3160_v2 = vcombine.low %v397_v54, %v401_v55  ;;  %v335_v54 = vld [vmem:[%s4315_s12 + $0x1d0] sm:$0xff] }
  0x69   : > { %1807 = vmatmul.mubr.bf16.gmra.mxu1 %v3098_v3  ;;  %1653 = vmatprep.mubr.bf16.mxu0 %v3105_v4  ;;  %v3162_v3 = vcombine.low %v398_v56, %v402_v57  ;;  %v3045_v4 = vcombine.high %v279_v62, %v283_v63  ;;  %v339_v55 = vld [vmem:[%s4315_s12 + $0x1f0] sm:$0xff]  ;;  %v336_v56 = vld [vmem:[%s4315_s12 + $0x1d8] sm:$0xff] }
  0x6a   : > { %1814 = vmatprep.mubr.bf16.mxu1 %v3107_v5  ;;  %v3047_v5 = vcombine.high %v280_v0, %v284_v1  ;;  %v340_v57 = vld [vmem:[%s4315_s12 + $0x1f8] sm:$0xff] }
  0x70   : > { %1654 = vmatmul.mubr.bf16.gmra.mxu0 %v3104_v10  ;;  %v3044_v10 = vcombine.low %v279_v62, %v283_v63  ;;  %v343_v62 = vld [vmem:[%s4315_s12 + $0x210] sm:$0xff] }
  0x71   : > { %1815 = vmatmul.mubr.bf16.gmra.mxu1 %v3106_v11  ;;  %1661 = vmatprep.mubr.bf16.mxu0 %v3113_v12  ;;  %v3046_v11 = vcombine.low %v280_v0, %v284_v1  ;;  %v3053_v12 = vcombine.high %v287_v6, %v291_v7  ;;  %v347_v63 = vld [vmem:[%s4315_s12 + $0x230] sm:$0xff]  ;;  %v344_v0 = vld [vmem:[%s4315_s12 + $0x218] sm:$0xff] }
  0x72   : > { %1822 = vmatprep.mubr.bf16.mxu1 %v3115_v13  ;;  %v3055_v13 = vcombine.high %v288_v8, %v292_v9  ;;  %v348_v1 = vld [vmem:[%s4315_s12 + $0x238] sm:$0xff] }
  0x78   : > { %1662 = vmatmul.mubr.bf16.gmra.mxu0 %v3112_v18  ;;  %v3052_v18 = vcombine.low %v287_v6, %v291_v7  ;;  %v351_v6 = vld [vmem:[%s4315_s12 + $0x250] sm:$0xff] }
  0x79   : > { %1823 = vmatmul.mubr.bf16.gmra.mxu1 %v3114_v19  ;;  %1669 = vmatprep.mubr.bf16.mxu0 %v3121_v20  ;;  %v3054_v19 = vcombine.low %v288_v8, %v292_v9  ;;  %v3061_v20 = vcombine.high %v295_v14, %v299_v15  ;;  %v355_v7 = vld [vmem:[%s4315_s12 + $0x270] sm:$0xff]  ;;  %v352_v8 = vld [vmem:[%s4315_s12 + $0x258] sm:$0xff] }
  0x7a   : > { %1830 = vmatprep.mubr.bf16.mxu1 %v3123_v21  ;;  %v3063_v21 = vcombine.high %v296_v16, %v300_v17  ;;  %v356_v9 = vld [vmem:[%s4315_s12 + $0x278] sm:$0xff] }
  0x80   : > { %1670 = vmatmul.mubr.bf16.gmra.mxu0 %v3120_v26  ;;  %v3060_v26 = vcombine.low %v295_v14, %v299_v15 }
  0x81   : > { %1831 = vmatmul.mubr.bf16.gmra.mxu1 %v3122_v27  ;;  %1677 = vmatprep.mubr.bf16.mxu0 %v3129_v28  ;;  %v3062_v27 = vcombine.low %v296_v16, %v300_v17  ;;  %v3069_v28 = vcombine.high %v303_v22, %v307_v23  ;;  %v359_v17 = vld [vmem:[%s4315_s12 + $0x290] sm:$0xff] }
  0x82   : > { %1838 = vmatprep.mubr.bf16.mxu1 %v3131_v29  ;;  %v3071_v29 = vcombine.high %v304_v24, %v308_v25 }
  0x88   : > { %1678 = vmatmul.mubr.bf16.gmra.mxu0 %v3128_v34  ;;  %v3068_v34 = vcombine.low %v303_v22, %v307_v23  ;;  %v364_v22 = vld [vmem:[%s4315_s12 + $0x2b8] sm:$0xff] }
  0x89   : > { %1839 = vmatmul.mubr.bf16.gmra.mxu1 %v3130_v35  ;;  %1685 = vmatprep.mubr.bf16.mxu0 %v3137_v36  ;;  %v3070_v35 = vcombine.low %v304_v24, %v308_v25  ;;  %v3077_v36 = vcombine.high %v311_v30, %v315_v31  ;;  %v3116_v25 = vcombine.low %v351_v6, %v355_v7 }
  0x8a   : > { %1846 = vmatprep.mubr.bf16.mxu1 %v3139_v37  ;;  %v3079_v37 = vcombine.high %v312_v32, %v316_v33 }
  0x90   : > { %1686 = vmatmul.mubr.bf16.gmra.mxu0 %v3136_v42  ;;  %v3076_v42 = vcombine.low %v311_v30, %v315_v31 }
  0x91   : > { %1847 = vmatmul.mubr.bf16.gmra.mxu1 %v3138_v43  ;;  %1693 = vmatprep.mubr.bf16.mxu0 %v3145_v44  ;;  %v3078_v43 = vcombine.low %v312_v32, %v316_v33  ;;  %v3085_v44 = vcombine.high %v319_v38, %v323_v39 }
  0x92   : > { %1854 = vmatprep.mubr.bf16.mxu1 %v3147_v45  ;;  %v3087_v45 = vcombine.high %v320_v40, %v324_v41 }
  0x98   : > { %1694 = vmatmul.mubr.bf16.gmra.mxu0 %v3144_v50  ;;  %v3084_v50 = vcombine.low %v319_v38, %v323_v39  ;;  %v367_v39 = vld [vmem:[%s4315_s12 + $0x2d0] sm:$0xff] }
  0x99   : > { %1855 = vmatmul.mubr.bf16.gmra.mxu1 %v3146_v51  ;;  %1701 = vmatprep.mubr.bf16.mxu0 %v3153_v52  ;;  %v3086_v51 = vcombine.low %v320_v40, %v324_v41  ;;  %v3093_v52 = vcombine.high %v327_v46, %v331_v47  ;;  %v371_v40 = vld [vmem:[%s4315_s12 + $0x2f0] sm:$0xff] }
  0x9a   : > { %1862 = vmatprep.mubr.bf16.mxu1 %v3155_v53  ;;  %v3095_v53 = vcombine.high %v328_v48, %v332_v49 }
  0xa0   : > { %1702 = vmatmul.mubr.bf16.gmra.mxu0 %v3152_v58  ;;  %v3092_v58 = vcombine.low %v327_v46, %v331_v47 }
  0xa1   : > { %1863 = vmatmul.mubr.bf16.gmra.mxu1 %v3154_v59  ;;  %1709 = vmatprep.mubr.bf16.mxu0 %v3161_v60  ;;  %v3094_v59 = vcombine.low %v328_v48, %v332_v49  ;;  %v3101_v60 = vcombine.high %v335_v54, %v339_v55 }
  0xa2   : > { %1870 = vmatprep.mubr.bf16.mxu1 %v3163_v61  ;;  %v3103_v61 = vcombine.high %v336_v56, %v340_v57 }
  0xa8   : > { %1710 = vmatmul.mubr.bf16.gmra.mxu0 %v3160_v2  ;;  %v3100_v2 = vcombine.low %v335_v54, %v339_v55 }
  0xa9   : > { %1871 = vmatmul.mubr.bf16.gmra.mxu1 %v3162_v3  ;;  %1911 = vmatprep.mubr.bf16.mxu0 %v3045_v4  ;;  %v3102_v3 = vcombine.low %v336_v56, %v340_v57  ;;  %v3109_v4 = vcombine.high %v343_v62, %v347_v63 }
  0xaa   : > { %2072 = vmatprep.mubr.bf16.mxu1 %v3047_v5  ;;  %v3111_v5 = vcombine.high %v344_v0, %v348_v1 }
  0xb0   : > { %1912 = vmatmul.mubr.bf16.vlgmr.msra.gmra.mxu0 %v3044_v10  ;;  %v3108_v10 = vcombine.low %v343_v62, %v347_v63  ;;  %v379_v62 = vld [vmem:[%s4315_s12 + $0x330] sm:$0xff] }
  0xb1   : > { %2073 = vmatmul.mubr.bf16.vlgmr.msra.gmra.mxu1 %v3046_v11  ;;  %1919 = vmatprep.mubr.bf16.mxu0 %v3053_v12  ;;  %v3110_v11 = vcombine.low %v344_v0, %v348_v1  ;;  %v3117_v12 = vcombine.high %v351_v6, %v355_v7  ;;  %v376_v1 = vld [vmem:[%s4315_s12 + $0x318] sm:$0xff] }
  0xb2   : > { %2080 = vmatprep.mubr.bf16.mxu1 %v3055_v13  ;;  %v3119_v13 = vcombine.high %v352_v8, %v356_v9 }
  0xb8   : > { %1920 = vmatmul.mubr.bf16.gmra.mxu0 %v3052_v18  ;;  %v363_v18 = vld [vmem:[%s4315_s12 + $0x2b0] sm:$0xff] }
  0xb9   : > { %2081 = vmatmul.mubr.bf16.gmra.mxu1 %v3054_v19  ;;  %1927 = vmatprep.mubr.bf16.mxu0 %v3061_v20  ;;  %v3124_v47 = vcombine.low %v359_v17, %v363_v18 }
  0xba   : > { %2088 = vmatprep.mubr.bf16.mxu1 %v3063_v21  ;;  %v360_v21 = vld [vmem:[%s4315_s12 + $0x298] sm:$0xff] }
  0xbb   : > { %v3127_v31 = vcombine.high %v360_v21, %v364_v22  ;;  %v3126_v49 = vcombine.low %v360_v21, %v364_v22 }
  0xc0   : > { %1928 = vmatmul.mubr.bf16.gmra.mxu0 %v3060_v26 }
  0xc1   : > { %2089 = vmatmul.mubr.bf16.gmra.mxu1 %v3062_v27  ;;  %1935 = vmatprep.mubr.bf16.mxu0 %v3069_v28  ;;  %v3118_v27 = vcombine.low %v352_v8, %v356_v9  ;;  %v3125_v28 = vcombine.high %v359_v17, %v363_v18 }
  0xc2   : > { %2096 = vmatprep.mubr.bf16.mxu1 %v3071_v29 }
  0xc8   : > { %1936 = vmatmul.mubr.bf16.gmra.mxu0 %v3068_v34 }
  0xc9   : > { %2097 = vmatmul.mubr.bf16.gmra.mxu1 %v3070_v35  ;;  %1943 = vmatprep.mubr.bf16.mxu0 %v3077_v36 }
  0xca   : > { %2104 = vmatprep.mubr.bf16.mxu1 %v3079_v37 }
  0xd0   : > { %1944 = vmatmul.mubr.bf16.gmra.mxu0 %v3076_v42 }
  0xd1   : > { %2105 = vmatmul.mubr.bf16.gmra.mxu1 %v3078_v43  ;;  %1951 = vmatprep.mubr.bf16.mxu0 %v3085_v44  ;;  %v368_v43 = vld [vmem:[%s4315_s12 + $0x2d8] sm:$0xff] }
  0xd2   : > { %2112 = vmatprep.mubr.bf16.mxu1 %v3087_v45  ;;  %v372_v44 = vld [vmem:[%s4315_s12 + $0x2f8] sm:$0xff] }
  0xd3   : > { %v3134_v7 = vcombine.low %v368_v43, %v372_v44 }
  0xd8   : > { %1952 = vmatmul.mubr.bf16.gmra.mxu0 %v3084_v50  ;;  %v3133_v50 = vcombine.high %v367_v39, %v371_v40 }
  0xd9   : > { %2113 = vmatmul.mubr.bf16.gmra.mxu1 %v3086_v51  ;;  %1959 = vmatprep.mubr.bf16.mxu0 %v3093_v52 }
  0xda   : > { %2120 = vmatprep.mubr.bf16.mxu1 %v3095_v53  ;;  %v3135_v53 = vcombine.high %v368_v43, %v372_v44  ;;  %v391_v43 = vld [vmem:[%s4315_s12 + $0x390] sm:$0xff] }
  0xdb   : > { %v395_v44 = vld [vmem:[%s4315_s12 + $0x3b0] sm:$0xff] }
  0xe0   : > { %1960 = vmatmul.mubr.bf16.gmra.mxu0 %v3092_v58 }
  0xe1   : > { %2121 = vmatmul.mubr.bf16.gmra.mxu1 %v3094_v59  ;;  %1967 = vmatprep.mubr.bf16.mxu0 %v3101_v60 }
  0xe2   : > { %2128 = vmatprep.mubr.bf16.mxu1 %v3103_v61  ;;  %v375_v61 = vld [vmem:[%s4315_s12 + $0x310] sm:$0xff] }
  0xe3   : > { %v3141_v8 = vcombine.high %v375_v61, %v379_v62 }
  0xe8   : > { %1968 = vmatmul.mubr.bf16.gmra.mxu0 %v3100_v2  ;;  %v380_v2 = vld [vmem:[%s4315_s12 + $0x338] sm:$0xff] }
  0xe9   : > { %2129 = vmatmul.mubr.bf16.gmra.mxu1 %v3102_v3  ;;  %1975 = vmatprep.mubr.bf16.mxu0 %v3109_v4 }
  0xea   : > { %2136 = vmatprep.mubr.bf16.mxu1 %v3111_v5  ;;  %v3132_v5 = vcombine.low %v367_v39, %v371_v40 }
  0xf0   : > { %v3573_v14 = vpop.f32.mrf.mxu0  ;;  %1976 = vmatmul.mubr.bf16.gmra.mxu0 %v3108_v10 }
  0xf1   : > { %v3685_v15 = vpop.f32.mrf.mxu1  ;;  %2137 = vmatmul.mubr.bf16.gmra.mxu1 %v3110_v11  ;;  %1983 = vmatprep.mubr.bf16.mxu0 %v3117_v12  ;;  %v3143_v11 = vcombine.high %v376_v1, %v380_v2 }
  0xf2   : > { %v3574_v16 = vpop.f32.mrf.mxu0  ;;  %2144 = vmatprep.mubr.bf16.mxu1 %v3119_v13 }
  0xf3   : > { %v3575_v19 = vadd.f32 %v3574_v16, %v3573_v14  ;;  %v3686_v20 = vpop.f32.mrf.mxu1 }
  0xf4   : > { %v3687_v23 = vadd.f32 %v3686_v20, %v3685_v15  ;;  %v3576_v24 = vpop.f32.mrf.mxu0  ;;  %v387_v20 = vld [vmem:[%s4315_s12 + $0x370] sm:$0xff] }
  0xf5   : > { %v3688_v26 = vpop.f32.mrf.mxu1 }
  0xf6   : > { %v4527_v29 = vadd.f32 %v3687_v23, %v3575_v19  ;;  %v3577_v30 = vpop.f32.mrf.mxu0  ;;  %v383_v19 = vld [vmem:[%s4315_s12 + $0x350] sm:$0xff]  ;;  %v384_v23 = vld [vmem:[%s4315_s12 + $0x358] sm:$0xff] }
  0xf7   : > { %v3578_v32 = vadd.f32 %v3577_v30, %v3576_v24  ;;  %v3689_v33 = vpop.f32.mrf.mxu1  ;;  %v388_v24 = vld [vmem:[%s4315_s12 + $0x378] sm:$0xff]  ;;  %v3142_v30 = vcombine.low %v376_v1, %v380_v2 }
  0xf8   : > { %v3690_v34 = vadd.f32 %v3689_v33, %v3688_v26  ;;  %v3579_v35 = vpop.f32.mrf.mxu0  ;;  %1984 = vmatmul.mubr.bf16.gmra.mxu0 %v3116_v25 }
  0xf9   : > { %v3691_v36 = vpop.f32.mrf.mxu1  ;;  %2145 = vmatmul.mubr.bf16.gmra.mxu1 %v3118_v27  ;;  %1991 = vmatprep.mubr.bf16.mxu0 %v3125_v28  ;;  %v3140_v27 = vcombine.low %v375_v61, %v379_v62 }
  0xfa   : > { %v4529_v37 = vadd.f32 %v3690_v34, %v3578_v32  ;;  %v3580_v38 = vpop.f32.mrf.mxu0  ;;  %2152 = vmatprep.mubr.bf16.mxu1 %v3127_v31  ;;  %v3149_v31 = vcombine.high %v383_v19, %v387_v20  ;;  %v3151_v34 = vcombine.high %v384_v23, %v388_v24 }
  0xfb   : > { %v3581_v41 = vadd.f32 %v3580_v38, %v3579_v35  ;;  %v3692_v42 = vpop.f32.mrf.mxu1 }
  0xfc   : > { %v3693_v45 = vadd.f32 %v3692_v42, %v3691_v36  ;;  %v3582_v46 = vpop.f32.mrf.mxu0 }
  0xfd   : > { %v3694_v48 = vpop.f32.mrf.mxu1 }
  0xfe   : > { %v4535_v51 = vadd.f32 %v3693_v45, %v3581_v41  ;;  %v3583_v52 = vpop.f32.mrf.mxu0 }
  0xff   : > { %v3584_v54 = vadd.f32 %v3583_v52, %v3582_v46  ;;  %v3695_v55 = vpop.f32.mrf.mxu1  ;;  %v3148_v52 = vcombine.low %v383_v19, %v387_v20 }
 0x100   : > { %v3696_v56 = vadd.f32 %v3695_v55, %v3694_v48  ;;  %v3585_v57 = vpop.f32.mrf.mxu0  ;;  %1992 = vmatmul.mubr.bf16.gmra.mxu0 %v3124_v47  ;;  %v392_v47 = vld [vmem:[%s4315_s12 + $0x398] sm:$0xff]  ;;  %v3157_v55 = vcombine.high %v391_v43, %v395_v44 }
 0x101   : > { %v3697_v58 = vpop.f32.mrf.mxu1  ;;  %2153 = vmatmul.mubr.bf16.gmra.mxu1 %v3126_v49  ;;  %1999 = vmatprep.mubr.bf16.mxu0 %v3133_v50  ;;  %v396_v48 = vld [vmem:[%s4315_s12 + $0x3b8] sm:$0xff] }
 0x102   : > { %v4537_v59 = vadd.f32 %v3696_v56, %v3584_v54  ;;  %v3586_v60 = vpop.f32.mrf.mxu0  ;;  %2160 = vmatprep.mubr.bf16.mxu1 %v3135_v53  ;;  %v3150_v54 = vcombine.low %v384_v23, %v388_v24 }
 0x103   : > { %v3587_v63 = vadd.f32 %v3586_v60, %v3585_v57  ;;  %v3698_v0 = vpop.f32.mrf.mxu1 }
 0x104   : > { %v3699_v3 = vadd.f32 %v3698_v0, %v3697_v58  ;;  %v3588_v4 = vpop.f32.mrf.mxu0  ;;  %v3159_v58 = vcombine.high %v392_v47, %v396_v48 }
 0x105   : > { %v3700_v6 = vpop.f32.mrf.mxu1 }
 0x106   : > { %v4543_v9 = vadd.f32 %v3699_v3, %v3587_v63  ;;  %v3589_v10 = vpop.f32.mrf.mxu0  ;;  %v399_v3 = vld [vmem:[%s4315_s12 + $0x3d0] sm:$0xff] }
 0x107   : > { %v3590_v12 = vadd.f32 %v3589_v10, %v3588_v4  ;;  %v3701_v13 = vpop.f32.mrf.mxu1  ;;  %v403_v4 = vld [vmem:[%s4315_s12 + $0x3f0] sm:$0xff] }
 0x108   : > { %v3702_v14 = vadd.f32 %v3701_v13, %v3700_v6  ;;  %v3591_v15 = vpop.f32.mrf.mxu0  ;;  %2000 = vmatmul.mubr.bf16.gmra.mxu0 %v3132_v5 }
 0x109   : > { %v3703_v16 = vpop.f32.mrf.mxu1  ;;  %2161 = vmatmul.mubr.bf16.gmra.mxu1 %v3134_v7  ;;  %2007 = vmatprep.mubr.bf16.mxu0 %v3141_v8  ;;  %v400_v7 = vld [vmem:[%s4315_s12 + $0x3d8] sm:$0xff] }
 0x10a   : > { %v4545_v17 = vadd.f32 %v3702_v14, %v3590_v12  ;;  %v3592_v18 = vpop.f32.mrf.mxu0  ;;  %2168 = vmatprep.mubr.bf16.mxu1 %v3143_v11  ;;  %v404_v8 = vld [vmem:[%s4315_s12 + $0x3f8] sm:$0xff]  ;;  %v3156_v12 = vcombine.low %v391_v43, %v395_v44  ;;  %v3158_v14 = vcombine.low %v392_v47, %v396_v48 }
 0x10b   : > { %v3593_v21 = vadd.f32 %v3592_v18, %v3591_v15  ;;  %v3704_v22 = vpop.f32.mrf.mxu1  ;;  %v3165_v15 = vcombine.high %v399_v3, %v403_v4  ;;  %v3167_v19 = vcombine.high %v400_v7, %v404_v8 }
 0x10c   : > { %v3705_v25 = vadd.f32 %v3704_v22, %v3703_v16  ;;  %v3594_v26 = vpop.f32.mrf.mxu0 }
 0x10d   : > { %v3706_v28 = vpop.f32.mrf.mxu1 }
 0x10e   : > { %v4551_v32 = vadd.f32 %v3705_v25, %v3593_v21  ;;  %v3595_v33 = vpop.f32.mrf.mxu0 }
 0x10f   : > { %v3596_v35 = vadd.f32 %v3595_v33, %v3594_v26  ;;  %v3707_v36 = vpop.f32.mrf.mxu1  ;;  %v3164_v33 = vcombine.low %v399_v3, %v403_v4 }
 0x110   : > { %v3708_v38 = vadd.f32 %v3707_v36, %v3706_v28  ;;  %v3597_v39 = vpop.f32.mrf.mxu0  ;;  %2008 = vmatmul.mubr.bf16.gmra.mxu0 %v3140_v27 }
 0x111   : > { %v3709_v40 = vpop.f32.mrf.mxu1  ;;  %2169 = vmatmul.mubr.bf16.gmra.mxu1 %v3142_v30  ;;  %2015 = vmatprep.mubr.bf16.mxu0 %v3149_v31 }
 0x112   : > { %v4553_v41 = vadd.f32 %v3708_v38, %v3596_v35  ;;  %v3598_v42 = vpop.f32.mrf.mxu0  ;;  %2176 = vmatprep.mubr.bf16.mxu1 %v3151_v34  ;;  %v3166_v35 = vcombine.low %v400_v7, %v404_v8 }
 0x113   : > { %v3599_v45 = vadd.f32 %v3598_v42, %v3597_v39  ;;  %v3710_v46 = vpop.f32.mrf.mxu1 }
 0x114   : > { %v3711_v49 = vadd.f32 %v3710_v46, %v3709_v40  ;;  %v3600_v50 = vpop.f32.mrf.mxu0 }
 0x115   : > { %v3712_v53 = vpop.f32.mrf.mxu1 }
 0x116   : > { %v4559_v56 = vadd.f32 %v3711_v49, %v3599_v45  ;;  %v3601_v57 = vpop.f32.mrf.mxu0 }
 0x117   : > { %v3602_v60 = vadd.f32 %v3601_v57, %v3600_v50  ;;  %v3713_v61 = vpop.f32.mrf.mxu1 }
 0x118   : > { %v3714_v62 = vadd.f32 %v3713_v61, %v3712_v53  ;;  %v3603_v63 = vpop.f32.mrf.mxu0  ;;  %2016 = vmatmul.mubr.bf16.gmra.mxu0 %v3148_v52 }
 0x119   : > { %v3715_v0 = vpop.f32.mrf.mxu1  ;;  %2177 = vmatmul.mubr.bf16.gmra.mxu1 %v3150_v54  ;;  %2023 = vmatprep.mubr.bf16.mxu0 %v3157_v55 }
 0x11a   : > { %v4561_v1 = vadd.f32 %v3714_v62, %v3602_v60  ;;  %v3604_v2 = vpop.f32.mrf.mxu0  ;;  %2184 = vmatprep.mubr.bf16.mxu1 %v3159_v58 }
 0x11b   : > { %v3605_v5 = vadd.f32 %v3604_v2, %v3603_v63  ;;  %v3716_v6 = vpop.f32.mrf.mxu1 }
 0x11c   : > { %v3717_v10 = vadd.f32 %v3716_v6, %v3715_v0  ;;  %v3606_v11 = vpop.f32.mrf.mxu0 }
 0x11d   : > { %v3718_v13 = vpop.f32.mrf.mxu1 }
 0x11e   : > { %v4567_v16 = vadd.f32 %v3717_v10, %v3605_v5  ;;  %v3607_v18 = vpop.f32.mrf.mxu0 }
 0x11f   : > { %v3608_v20 = vadd.f32 %v3607_v18, %v3606_v11  ;;  %v3719_v21 = vpop.f32.mrf.mxu1 }
 0x120   : > { %v3720_v22 = vadd.f32 %v3719_v21, %v3718_v13  ;;  %v3609_v23 = vpop.f32.mrf.mxu0  ;;  %2024 = vmatmul.mubr.bf16.gmra.mxu0 %v3156_v12 }
 0x121   : > { %v3721_v24 = vpop.f32.mrf.mxu1  ;;  %2185 = vmatmul.mubr.bf16.gmra.mxu1 %v3158_v14  ;;  %2031 = vmatprep.mubr.bf16.mxu0 %v3165_v15 }
 0x122   : > { %v4569_v25 = vadd.f32 %v3720_v22, %v3608_v20  ;;  %v3610_v26 = vpop.f32.mrf.mxu0  ;;  %2192 = vmatprep.mubr.bf16.mxu1 %v3167_v19 }
 0x123   : > { %v3611_v27 = vadd.f32 %v3610_v26, %v3609_v23  ;;  %v3722_v28 = vpop.f32.mrf.mxu1 }
 0x124   : > { %v3723_v30 = vadd.f32 %v3722_v28, %v3721_v24  ;;  %v3612_v31 = vpop.f32.mrf.mxu0 }
 0x125   : > { %v3724_v34 = vpop.f32.mrf.mxu1 }
 0x126   : > { %v4571_v36 = vadd.f32 %v3723_v30, %v3611_v27  ;;  %v3613_v38 = vpop.f32.mrf.mxu0 }
 0x127   : > { %v3614_v39 = vadd.f32 %v3613_v38, %v3612_v31  ;;  %v3725_v40 = vpop.f32.mrf.mxu1 }
 0x128   : > { %v3726_v42 = vadd.f32 %v3725_v40, %v3724_v34  ;;  %v3615_v43 = vpop.f32.mrf.mxu0  ;;  %2032 = vmatmul.mubr.bf16.gmra.mxu0 %v3164_v33 }
 0x129   : > { %v3727_v44 = vpop.f32.mrf.mxu1  ;;  %2193 = vmatmul.mubr.bf16.gmra.mxu1 %v3166_v35 }
 0x12a   : > { %v4573_v45 = vadd.f32 %v3726_v42, %v3614_v39  ;;  %v3616_v46 = vpop.f32.mrf.mxu0 }
 0x12b   : > { %v3617_v47 = vadd.f32 %v3616_v46, %v3615_v43  ;;  %v3728_v48 = vpop.f32.mrf.mxu1 }
 0x12c   : > { %v3729_v49 = vadd.f32 %v3728_v48, %v3727_v44  ;;  %v3618_v50 = vpop.f32.mrf.mxu0 }
 0x12d   : > { %v3730_v52 = vpop.f32.mrf.mxu1 }
 0x12e   : > { %v4575_v53 = vadd.f32 %v3729_v49, %v3617_v47  ;;  %v3619_v54 = vpop.f32.mrf.mxu0 }
 0x12f   : > { %v3620_v55 = vadd.f32 %v3619_v54, %v3618_v50  ;;  %v3731_v57 = vpop.f32.mrf.mxu1 }
 0x130   : > { %v3732_v58 = vadd.f32 %v3731_v57, %v3730_v52  ;;  %v3621_v60 = vpop.f32.mrf.mxu0 }
 0x131   : > { %v3733_v61 = vpop.f32.mrf.mxu1 }
 0x132   : > { %v4577_v62 = vadd.f32 %v3732_v58, %v3620_v55  ;;  %v3622_v63 = vpop.f32.mrf.mxu0 }
 0x133   : > { %v3623_v0 = vadd.f32 %v3622_v63, %v3621_v60  ;;  %v3734_v2 = vpop.f32.mrf.mxu1 }
 0x134   : > { %v3735_v3 = vadd.f32 %v3734_v2, %v3733_v61  ;;  %v3624_v4 = vpop.f32.mrf.mxu0 }
 0x135   : > { %v3736_v5 = vpop.f32.mrf.mxu1 }
 0x136   : > { %v4579_v6 = vadd.f32 %v3735_v3, %v3623_v0  ;;  %v3625_v7 = vpop.f32.mrf.mxu0 }
 0x137   : > { %v3626_v8 = vadd.f32 %v3625_v7, %v3624_v4  ;;  %v3737_v10 = vpop.f32.mrf.mxu1 }
 0x138   : > { %v3738_v11 = vadd.f32 %v3737_v10, %v3736_v5  ;;  %v3627_v12 = vpop.f32.mrf.mxu0 }
 0x139   : > { %v3739_v13 = vpop.f32.mrf.mxu1 }
 0x13a   : > { %v4581_v14 = vadd.f32 %v3738_v11, %v3626_v8  ;;  %v3628_v15 = vpop.f32.mrf.mxu0 }
 0x13b   : > { %v3629_v18 = vadd.f32 %v3628_v15, %v3627_v12  ;;  %v3740_v19 = vpop.f32.mrf.mxu1 }
 0x13c   : > { %v3741_v20 = vadd.f32 %v3740_v19, %v3739_v13  ;;  %v3630_v21 = vpop.f32.mrf.mxu0 }
 0x13d   : > { %v3742_v22 = vpop.f32.mrf.mxu1 }
 0x13e   : > { %v4583_v23 = vadd.f32 %v3741_v20, %v3629_v18  ;;  %v3631_v24 = vpop.f32.mrf.mxu0 }
 0x13f   : > { %v3632_v26 = vadd.f32 %v3631_v24, %v3630_v21  ;;  %v3743_v27 = vpop.f32.mrf.mxu1 }
 0x140   : > { %v3744_v28 = vadd.f32 %v3743_v27, %v3742_v22  ;;  %v3633_v30 = vpop.f32.mrf.mxu0 }
 0x141   : > { %v3745_v31 = vpop.f32.mrf.mxu1 }
 0x142   : > { %v4585_v33 = vadd.f32 %v3744_v28, %v3632_v26  ;;  %v3634_v34 = vpop.f32.mrf.mxu0 }
 0x143   : > { %v3635_v35 = vadd.f32 %v3634_v34, %v3633_v30  ;;  %v3746_v38 = vpop.f32.mrf.mxu1 }
 0x144   : > { %v3747_v39 = vadd.f32 %v3746_v38, %v3745_v31  ;;  %v3636_v40 = vpop.f32.mrf.mxu0 }
 0x145   : > { %v3748_v42 = vpop.f32.mrf.mxu1 }
 0x146   : > { %v4587_v43 = vadd.f32 %v3747_v39, %v3635_v35  ;;  %v3637_v44 = vpop.f32.mrf.mxu0 }
 0x147   : > { %v3638_v46 = vadd.f32 %v3637_v44, %v3636_v40  ;;  %v3749_v47 = vpop.f32.mrf.mxu1 }
 0x148   : > { %v3750_v48 = vadd.f32 %v3749_v47, %v3748_v42  ;;  %v3639_v49 = vpop.f32.mrf.mxu0 }
 0x149   : > { %v3751_v50 = vpop.f32.mrf.mxu1 }
 0x14a   : > { %v4589_v52 = vadd.f32 %v3750_v48, %v3638_v46  ;;  %v3640_v54 = vpop.f32.mrf.mxu0 }
 0x14b   : > { %v3641_v55 = vadd.f32 %v3640_v54, %v3639_v49  ;;  %v3752_v57 = vpop.f32.mrf.mxu1 }
 0x14c   : > { %v3753_v58 = vadd.f32 %v3752_v57, %v3751_v50  ;;  %v3642_v60 = vpop.f32.mrf.mxu0 }
 0x14d   : > { %v3754_v61 = vpop.f32.mrf.mxu1 }
 0x14e   : > { %v4591_v63 = vadd.f32 %v3753_v58, %v3641_v55  ;;  %v3643_v0 = vpop.f32.mrf.mxu0 }
 0x14f   : > { %v3644_v2 = vadd.f32 %v3643_v0, %v3642_v60  ;;  %v3755_v3 = vpop.f32.mrf.mxu1 }
 0x150   : > { %v3756_v4 = vadd.f32 %v3755_v3, %v3754_v61  ;;  %v3645_v5 = vpop.f32.mrf.mxu0 }
 0x151   : > { %v3757_v7 = vpop.f32.mrf.mxu1 }
 0x152   : > { %v4593_v8 = vadd.f32 %v3756_v4, %v3644_v2  ;;  %v3646_v10 = vpop.f32.mrf.mxu0 }
 0x153   : > { %v3647_v11 = vadd.f32 %v3646_v10, %v3645_v5  ;;  %v3758_v12 = vpop.f32.mrf.mxu1 }
 0x154   : > { %v3759_v13 = vadd.f32 %v3758_v12, %v3757_v7  ;;  %v3648_v15 = vpop.f32.mrf.mxu0 }
 0x155   : > { %v3760_v18 = vpop.f32.mrf.mxu1 }
 0x156   : > { %v4595_v19 = vadd.f32 %v3759_v13, %v3647_v11  ;;  %v3649_v20 = vpop.f32.mrf.mxu0 }
 0x157   : > { %v3650_v21 = vadd.f32 %v3649_v20, %v3648_v15  ;;  %v3761_v22 = vpop.f32.mrf.mxu1 }
 0x158   : > { %v3762_v24 = vadd.f32 %v3761_v22, %v3760_v18  ;;  %v3651_v26 = vpop.f32.mrf.mxu0 }
 0x159   : > { %v3763_v27 = vpop.f32.mrf.mxu1 }
 0x15a   : > { %v4597_v28 = vadd.f32 %v3762_v24, %v3650_v21  ;;  %v3652_v30 = vpop.f32.mrf.mxu0 }
 0x15b   : > { %v3653_v31 = vadd.f32 %v3652_v30, %v3651_v26  ;;  %v3764_v34 = vpop.f32.mrf.mxu1 }
 0x15c   : > { %v3765_v35 = vadd.f32 %v3764_v34, %v3763_v27  ;;  %v3654_v38 = vpop.f32.mrf.mxu0 }
 0x15d   : > { %v3766_v39 = vpop.f32.mrf.mxu1 }
 0x15e   : > { %v4599_v40 = vadd.f32 %v3765_v35, %v3653_v31  ;;  %v3655_v42 = vpop.f32.mrf.mxu0 }
 0x15f   : > { %v3656_v44 = vadd.f32 %v3655_v42, %v3654_v38  ;;  %v3767_v46 = vpop.f32.mrf.mxu1 }
 0x160   : > { %v3768_v47 = vadd.f32 %v3767_v46, %v3766_v39  ;;  %v3657_v48 = vpop.f32.mrf.mxu0 }
 0x161   : > { %v3769_v49 = vpop.f32.mrf.mxu1 }
 0x162   : > { %v4601_v50 = vadd.f32 %v3768_v47, %v3656_v44  ;;  %v3658_v54 = vpop.f32.mrf.mxu0 }
 0x163   : > { %v3659_v55 = vadd.f32 %v3658_v54, %v3657_v48  ;;  %v3770_v57 = vpop.f32.mrf.mxu1 }
 0x164   : > { %v3771_v58 = vadd.f32 %v3770_v57, %v3769_v49  ;;  %v3660_v60 = vpop.f32.mrf.mxu0 }
 0x165   : > { %v3772_v61 = vpop.f32.mrf.mxu1 }
 0x166   : > { %v4603_v0 = vadd.f32 %v3771_v58, %v3659_v55  ;;  %v3661_v2 = vpop.f32.mrf.mxu0 }
 0x167   : > { %v3662_v3 = vadd.f32 %v3661_v2, %v3660_v60  ;;  %v3773_v4 = vpop.f32.mrf.mxu1 }
 0x168   : > { %v3774_v5 = vadd.f32 %v3773_v4, %v3772_v61  ;;  %v3663_v7 = vpop.f32.mrf.mxu0 }
 0x169   : > { %v3775_v10 = vpop.f32.mrf.mxu1 }
 0x16a   : > { %v4605_v11 = vadd.f32 %v3774_v5, %v3662_v3  ;;  %v3664_v12 = vpop.f32.mrf.mxu0 }
 0x16b   : > { %v3665_v13 = vadd.f32 %v3664_v12, %v3663_v7  ;;  %v3776_v15 = vpop.f32.mrf.mxu1 }
 0x16c   : > { %v3777_v18 = vadd.f32 %v3776_v15, %v3775_v10  ;;  %v3666_v20 = vpop.f32.mrf.mxu0 }
 0x16d   : > { %v3778_v21 = vpop.f32.mrf.mxu1 }
 0x16e   : > { %v4607_v22 = vadd.f32 %v3777_v18, %v3665_v13  ;;  %v3667_v24 = vpop.f32.mrf.mxu0 }
 0x16f   : > { %v3668_v26 = vadd.f32 %v3667_v24, %v3666_v20  ;;  %v3779_v27 = vpop.f32.mrf.mxu1 }
 0x170   : > { %v3780_v30 = vadd.f32 %v3779_v27, %v3778_v21  ;;  %v3797_v31 = vpop.f32.mrf.mxu0 }
 0x171   : > { %v3909_v34 = vpop.f32.mrf.mxu1 }
 0x172   : > { %v4609_v35 = vadd.f32 %v3780_v30, %v3668_v26  ;;  %v3798_v38 = vpop.f32.mrf.mxu0 }
 0x173   : > { %v3799_v39 = vadd.f32 %v3798_v38, %v3797_v31  ;;  %v3910_v42 = vpop.f32.mrf.mxu1 }
 0x174   : > { %v3911_v44 = vadd.f32 %v3910_v42, %v3909_v34  ;;  %v3800_v46 = vpop.f32.mrf.mxu0 }
 0x175   : > { %v1914_v47 = vadd.f32 %v3799_v39, %v4527_v29  ;;  %v3912_v48 = vpop.f32.mrf.mxu1 }
 0x176   : > { %v3801_v49 = vpop.f32.mrf.mxu0 }
 0x177   : > { %v4618_v54 = vadd.f32 %v3911_v44, %v1914_v47  ;;  %v3802_v55 = vadd.f32 %v3801_v49, %v3800_v46  ;;  %v3913_v57 = vpop.f32.mrf.mxu1 }
 0x178   : > { %v3914_v58 = vadd.f32 %v3913_v57, %v3912_v48  ;;  %v3803_v60 = vpop.f32.mrf.mxu0 }
 0x179   : > { %v1917_v61 = vadd.f32 %v3802_v55, %v4529_v37  ;;  %v3915_v2 = vpop.f32.mrf.mxu1 }
 0x17a   : > { %v3804_v3 = vpop.f32.mrf.mxu0 }
 0x17b   : > { %v4621_v4 = vadd.f32 %v3914_v58, %v1917_v61  ;;  %v3805_v5 = vadd.f32 %v3804_v3, %v3803_v60  ;;  %v3916_v7 = vpop.f32.mrf.mxu1 }
 0x17c   : > { %v3917_v10 = vadd.f32 %v3916_v7, %v3915_v2  ;;  %v3806_v12 = vpop.f32.mrf.mxu0 }
 0x17d   : > { %v1922_v29 = vadd.f32 %v3805_v5, %v4535_v51  ;;  %v3918_v13 = vpop.f32.mrf.mxu1 }
 0x17e   : > { %v3807_v15 = vpop.f32.mrf.mxu0 }
 0x17f   : > { %v4624_v18 = vadd.f32 %v3917_v10, %v1922_v29  ;;  %v3808_v20 = vadd.f32 %v3807_v15, %v3806_v12  ;;  %v3919_v21 = vpop.f32.mrf.mxu1 }
 0x180   : > { %v3920_v24 = vadd.f32 %v3919_v21, %v3918_v13  ;;  %v3809_v26 = vpop.f32.mrf.mxu0 }
 0x181   : > { %v1925_v37 = vadd.f32 %v3808_v20, %v4537_v59  ;;  %v3921_v27 = vpop.f32.mrf.mxu1 }
 0x182   : > { %v3810_v30 = vpop.f32.mrf.mxu0 }
 0x183   : > { %v4627_v31 = vadd.f32 %v3920_v24, %v1925_v37  ;;  %v3811_v34 = vadd.f32 %v3810_v30, %v3809_v26  ;;  %v3922_v38 = vpop.f32.mrf.mxu1 }
 0x184   : > { %v3923_v39 = vadd.f32 %v3922_v38, %v3921_v27  ;;  %v3812_v42 = vpop.f32.mrf.mxu0 }
 0x185   : > { %v1930_v51 = vadd.f32 %v3811_v34, %v4543_v9  ;;  %v3924_v44 = vpop.f32.mrf.mxu1 }
 0x186   : > { %v3813_v46 = vpop.f32.mrf.mxu0 }
 0x187   : > { %v4630_v47 = vadd.f32 %v3923_v39, %v1930_v51  ;;  %v3814_v48 = vadd.f32 %v3813_v46, %v3812_v42  ;;  %v3925_v49 = vpop.f32.mrf.mxu1 }
 0x188   : > { %v3926_v55 = vadd.f32 %v3925_v49, %v3924_v44  ;;  %v3815_v57 = vpop.f32.mrf.mxu0 }
 0x189   : > { %v1933_v59 = vadd.f32 %v3814_v48, %v4545_v17  ;;  %v3927_v58 = vpop.f32.mrf.mxu1 }
 0x18a   : > { %v3816_v60 = vpop.f32.mrf.mxu0 }
 0x18b   : > { %v4633_v61 = vadd.f32 %v3926_v55, %v1933_v59  ;;  %v3817_v2 = vadd.f32 %v3816_v60, %v3815_v57  ;;  %v3928_v3 = vpop.f32.mrf.mxu1 }
 0x18c   : > { %v3929_v5 = vadd.f32 %v3928_v3, %v3927_v58  ;;  %v3818_v7 = vpop.f32.mrf.mxu0 }
 0x18d   : > { %v1938_v9 = vadd.f32 %v3817_v2, %v4551_v32  ;;  %v3930_v10 = vpop.f32.mrf.mxu1 }
 0x18e   : > { %v3819_v12 = vpop.f32.mrf.mxu0 }
 0x18f   : > { %v4636_v29 = vadd.f32 %v3929_v5, %v1938_v9  ;;  %v3820_v13 = vadd.f32 %v3819_v12, %v3818_v7  ;;  %v3931_v15 = vpop.f32.mrf.mxu1 }
 0x190   : > { %v3932_v20 = vadd.f32 %v3931_v15, %v3930_v10  ;;  %v3821_v21 = vpop.f32.mrf.mxu0 }
 0x191   : > { %v1941_v17 = vadd.f32 %v3820_v13, %v4553_v41  ;;  %v3933_v24 = vpop.f32.mrf.mxu1 }
 0x192   : > { %v3822_v26 = vpop.f32.mrf.mxu0 }
 0x193   : > { %v4639_v37 = vadd.f32 %v3932_v20, %v1941_v17  ;;  %v3823_v27 = vadd.f32 %v3822_v26, %v3821_v21  ;;  %v3934_v30 = vpop.f32.mrf.mxu1 }
 0x194   : > { %v3935_v34 = vadd.f32 %v3934_v30, %v3933_v24  ;;  %v3824_v38 = vpop.f32.mrf.mxu0 }
 0x195   : > { %v1946_v32 = vadd.f32 %v3823_v27, %v4559_v56  ;;  %v3936_v39 = vpop.f32.mrf.mxu1 }
 0x196   : > { %v3825_v42 = vpop.f32.mrf.mxu0 }
 0x197   : > { %v4642_v51 = vadd.f32 %v3935_v34, %v1946_v32  ;;  %v3826_v44 = vadd.f32 %v3825_v42, %v3824_v38  ;;  %v3937_v46 = vpop.f32.mrf.mxu1 }
 0x198   : > { %v3938_v48 = vadd.f32 %v3937_v46, %v3936_v39  ;;  %v3827_v49 = vpop.f32.mrf.mxu0 }
 0x199   : > { %v1949_v41 = vadd.f32 %v3826_v44, %v4561_v1  ;;  %v3939_v55 = vpop.f32.mrf.mxu1 }
 0x19a   : > { %v3828_v57 = vpop.f32.mrf.mxu0 }
 0x19b   : > { %v4645_v59 = vadd.f32 %v3938_v48, %v1949_v41  ;;  %v3829_v58 = vadd.f32 %v3828_v57, %v3827_v49  ;;  %v3940_v60 = vpop.f32.mrf.mxu1 }
 0x19c   : > { %v3941_v2 = vadd.f32 %v3940_v60, %v3939_v55  ;;  %v3830_v3 = vpop.f32.mrf.mxu0 }
 0x19d   : > { %v1954_v56 = vadd.f32 %v3829_v58, %v4567_v16  ;;  %v3942_v5 = vpop.f32.mrf.mxu1 }
 0x19e   : > { %v3831_v7 = vpop.f32.mrf.mxu0 }
 0x19f   : > { %v4648_v9 = vadd.f32 %v3941_v2, %v1954_v56  ;;  %v3832_v10 = vadd.f32 %v3831_v7, %v3830_v3  ;;  %v3943_v12 = vpop.f32.mrf.mxu1 }
 0x1a0   : > { %v3944_v13 = vadd.f32 %v3943_v12, %v3942_v5  ;;  %v3833_v15 = vpop.f32.mrf.mxu0 }
 0x1a1   : > { %v1957_v1 = vadd.f32 %v3832_v10, %v4569_v25  ;;  %v3945_v20 = vpop.f32.mrf.mxu1 }
 0x1a2   : > { %v3834_v21 = vpop.f32.mrf.mxu0 }
 0x1a3   : > { %v4651_v17 = vadd.f32 %v3944_v13, %v1957_v1  ;;  %v3835_v24 = vadd.f32 %v3834_v21, %v3833_v15  ;;  %v3946_v26 = vpop.f32.mrf.mxu1 }
 0x1a4   : > { %v3947_v27 = vadd.f32 %v3946_v26, %v3945_v20  ;;  %v3836_v30 = vpop.f32.mrf.mxu0 }
 0x1a5   : > { %v1962_v16 = vadd.f32 %v3835_v24, %v4571_v36  ;;  %v3948_v34 = vpop.f32.mrf.mxu1 }
 0x1a6   : > { %v3837_v38 = vpop.f32.mrf.mxu0 }
 0x1a7   : > { %v4654_v32 = vadd.f32 %v3947_v27, %v1962_v16  ;;  %v3838_v39 = vadd.f32 %v3837_v38, %v3836_v30  ;;  %v3949_v42 = vpop.f32.mrf.mxu1 }
 0x1a8   : > { %v3950_v44 = vadd.f32 %v3949_v42, %v3948_v34  ;;  %v3839_v46 = vpop.f32.mrf.mxu0 }
 0x1a9   : > { %v1965_v25 = vadd.f32 %v3838_v39, %v4573_v45  ;;  %v3951_v48 = vpop.f32.mrf.mxu1 }
 0x1aa   : > { %v3840_v49 = vpop.f32.mrf.mxu0 }
 0x1ab   : > { %v4657_v41 = vadd.f32 %v3950_v44, %v1965_v25  ;;  %v3841_v55 = vadd.f32 %v3840_v49, %v3839_v46  ;;  %v3952_v57 = vpop.f32.mrf.mxu1 }
 0x1ac   : > { %v3953_v58 = vadd.f32 %v3952_v57, %v3951_v48  ;;  %v3842_v60 = vpop.f32.mrf.mxu0 }
 0x1ad   : > { %v1970_v36 = vadd.f32 %v3841_v55, %v4575_v53  ;;  %v3954_v2 = vpop.f32.mrf.mxu1 }
 0x1ae   : > { %v3843_v3 = vpop.f32.mrf.mxu0 }
 0x1af   : > { %v4660_v56 = vadd.f32 %v3953_v58, %v1970_v36  ;;  %v3844_v5 = vadd.f32 %v3843_v3, %v3842_v60  ;;  %v3955_v7 = vpop.f32.mrf.mxu1 }
 0x1b0   : > { %v3956_v10 = vadd.f32 %v3955_v7, %v3954_v2  ;;  %v3845_v12 = vpop.f32.mrf.mxu0 }
 0x1b1   : > { %v1973_v45 = vadd.f32 %v3844_v5, %v4577_v62  ;;  %v3957_v13 = vpop.f32.mrf.mxu1 }
 0x1b2   : > { %v3846_v15 = vpop.f32.mrf.mxu0 }
 0x1b3   : > { %v4663_v1 = vadd.f32 %v3956_v10, %v1973_v45  ;;  %v3847_v20 = vadd.f32 %v3846_v15, %v3845_v12  ;;  %v3958_v21 = vpop.f32.mrf.mxu1 }
 0x1b4   : > { %v3848_v24 = vpop.f32.mrf.mxu0  ;;  %v3959_v53 = vadd.f32 %v3958_v21, %v3957_v13 }
 0x1b5   : > { %v1978_v26 = vadd.f32 %v3847_v20, %v4579_v6  ;;  %v3960_v27 = vpop.f32.mrf.mxu1 }
 0x1b6   : > { %v3849_v30 = vpop.f32.mrf.mxu0 }
 0x1b7   : > { %v4666_v16 = vadd.f32 %v3959_v53, %v1978_v26  ;;  %v3850_v34 = vadd.f32 %v3849_v30, %v3848_v24  ;;  %v3961_v38 = vpop.f32.mrf.mxu1 }
 0x1b8   : > { %v3851_v39 = vpop.f32.mrf.mxu0  ;;  %v3962_v62 = vadd.f32 %v3961_v38, %v3960_v27 }
 0x1b9   : > { %v1981_v42 = vadd.f32 %v3850_v34, %v4581_v14  ;;  %v3963_v44 = vpop.f32.mrf.mxu1 }
 0x1ba   : > { %v3852_v46 = vpop.f32.mrf.mxu0 }
 0x1bb   : > { %v4669_v25 = vadd.f32 %v3962_v62, %v1981_v42  ;;  %v3853_v48 = vadd.f32 %v3852_v46, %v3851_v39  ;;  %v3964_v49 = vpop.f32.mrf.mxu1 }
 0x1bc   : > { %v3854_v55 = vpop.f32.mrf.mxu0  ;;  %v3965_v57 = vadd.f32 %v3964_v49, %v3963_v44 }
 0x1bd   : > { %v1986_v6 = vadd.f32 %v3853_v48, %v4583_v23  ;;  %v3966_v58 = vpop.f32.mrf.mxu1 }
 0x1be   : > { %v3855_v60 = vpop.f32.mrf.mxu0 }
 0x1bf   : > { %v4672_v36 = vadd.f32 %v3965_v57, %v1986_v6  ;;  %v3856_v2 = vadd.f32 %v3855_v60, %v3854_v55  ;;  %v3967_v3 = vpop.f32.mrf.mxu1 }
 0x1c0   : > { %v3857_v5 = vpop.f32.mrf.mxu0  ;;  %v3968_v7 = vadd.f32 %v3967_v3, %v3966_v58 }
 0x1c1   : > { %v1989_v14 = vadd.f32 %v3856_v2, %v4585_v33  ;;  %v3969_v10 = vpop.f32.mrf.mxu1 }
 0x1c2   : > { %v3858_v12 = vpop.f32.mrf.mxu0 }
 0x1c3   : > { %v4675_v45 = vadd.f32 %v3968_v7, %v1989_v14  ;;  %v3859_v13 = vadd.f32 %v3858_v12, %v3857_v5  ;;  %v3970_v15 = vpop.f32.mrf.mxu1 }
 0x1c4   : > { %v3860_v20 = vpop.f32.mrf.mxu0  ;;  %v3971_v21 = vadd.f32 %v3970_v15, %v3969_v10 }
 0x1c5   : > { %v1994_v23 = vadd.f32 %v3859_v13, %v4587_v43  ;;  %v3972_v24 = vpop.f32.mrf.mxu1 }
 0x1c6   : > { %v3861_v26 = vpop.f32.mrf.mxu0 }
 0x1c7   : > { %v4678_v53 = vadd.f32 %v3971_v21, %v1994_v23  ;;  %v3862_v27 = vadd.f32 %v3861_v26, %v3860_v20  ;;  %v3973_v30 = vpop.f32.mrf.mxu1 }
 0x1c8   : > { %v3863_v34 = vpop.f32.mrf.mxu0  ;;  %v3974_v38 = vadd.f32 %v3973_v30, %v3972_v24 }
 0x1c9   : > { %v1997_v33 = vadd.f32 %v3862_v27, %v4589_v52  ;;  %v3975_v39 = vpop.f32.mrf.mxu1 }
 0x1ca   : > { %v3864_v42 = vpop.f32.mrf.mxu0 }
 0x1cb   : > { %v4681_v62 = vadd.f32 %v3974_v38, %v1997_v33  ;;  %v3865_v44 = vadd.f32 %v3864_v42, %v3863_v34  ;;  %v3976_v46 = vpop.f32.mrf.mxu1 }
 0x1cc   : > { %v3866_v48 = vpop.f32.mrf.mxu0  ;;  %v3977_v49 = vadd.f32 %v3976_v46, %v3975_v39 }
 0x1cd   : > { %v2002_v43 = vadd.f32 %v3865_v44, %v4591_v63  ;;  %v3978_v55 = vpop.f32.mrf.mxu1 }
 0x1ce   : > { %v3867_v6 = vpop.f32.mrf.mxu0 }
 0x1cf   : > { %v4684_v57 = vadd.f32 %v3977_v49, %v2002_v43  ;;  %v3868_v58 = vadd.f32 %v3867_v6, %v3866_v48  ;;  %v3979_v60 = vpop.f32.mrf.mxu1 }
 0x1d0   : > { %v3869_v2 = vpop.f32.mrf.mxu0  ;;  %v3980_v3 = vadd.f32 %v3979_v60, %v3978_v55 }
 0x1d1   : > { %v2005_v52 = vadd.f32 %v3868_v58, %v4593_v8  ;;  %v3981_v5 = vpop.f32.mrf.mxu1 }
 0x1d2   : > { %v3870_v14 = vpop.f32.mrf.mxu0 }
 0x1d3   : > { %v4687_v7 = vadd.f32 %v3980_v3, %v2005_v52  ;;  %v3871_v10 = vadd.f32 %v3870_v14, %v3869_v2  ;;  %v3982_v12 = vpop.f32.mrf.mxu1 }
 0x1d4   : > { %v3872_v13 = vpop.f32.mrf.mxu0  ;;  %v3983_v15 = vadd.f32 %v3982_v12, %v3981_v5 }
 0x1d5   : > { %v2010_v63 = vadd.f32 %v3871_v10, %v4595_v19  ;;  %v3984_v20 = vpop.f32.mrf.mxu1 }
 0x1d6   : > { %v3873_v23 = vpop.f32.mrf.mxu0 }
 0x1d7   : > { %v4690_v21 = vadd.f32 %v3983_v15, %v2010_v63  ;;  %v3874_v24 = vadd.f32 %v3873_v23, %v3872_v13  ;;  %v3985_v26 = vpop.f32.mrf.mxu1 }
 0x1d8   : > { %v3875_v27 = vpop.f32.mrf.mxu0  ;;  %v3986_v30 = vadd.f32 %v3985_v26, %v3984_v20 }
 0x1d9   : > { %v2013_v8 = vadd.f32 %v3874_v24, %v4597_v28  ;;  %v3987_v34 = vpop.f32.mrf.mxu1 }
 0x1da   : > { %v3876_v33 = vpop.f32.mrf.mxu0 }
 0x1db   : > { %v4693_v38 = vadd.f32 %v3986_v30, %v2013_v8  ;;  %v3877_v39 = vadd.f32 %v3876_v33, %v3875_v27  ;;  %v3988_v42 = vpop.f32.mrf.mxu1 }
 0x1dc   : > { %v3878_v44 = vpop.f32.mrf.mxu0  ;;  %v3989_v46 = vadd.f32 %v3988_v42, %v3987_v34 }
 0x1dd   : > { %v2018_v19 = vadd.f32 %v3877_v39, %v4599_v40  ;;  %v3990_v48 = vpop.f32.mrf.mxu1 }
 0x1de   : > { %v3879_v43 = vpop.f32.mrf.mxu0 }
 0x1df   : > { %v4696_v49 = vadd.f32 %v3989_v46, %v2018_v19  ;;  %v3880_v55 = vadd.f32 %v3879_v43, %v3878_v44  ;;  %v3991_v6 = vpop.f32.mrf.mxu1 }
 0x1e0   : > { %v3881_v58 = vpop.f32.mrf.mxu0  ;;  %v3992_v60 = vadd.f32 %v3991_v6, %v3990_v48 }
 0x1e1   : > { %v2021_v28 = vadd.f32 %v3880_v55, %v4601_v50  ;;  %v3993_v2 = vpop.f32.mrf.mxu1 }
 0x1e2   : > { %v3882_v52 = vpop.f32.mrf.mxu0 }
 0x1e3   : > { %v4699_v3 = vadd.f32 %v3992_v60, %v2021_v28  ;;  %v3883_v5 = vadd.f32 %v3882_v52, %v3881_v58  ;;  %v3994_v14 = vpop.f32.mrf.mxu1 }
 0x1e4   : > { %v3884_v10 = vpop.f32.mrf.mxu0  ;;  %v3995_v12 = vadd.f32 %v3994_v14, %v3993_v2 }
 0x1e5   : > { %v2026_v40 = vadd.f32 %v3883_v5, %v4603_v0  ;;  %v3996_v13 = vpop.f32.mrf.mxu1 }
 0x1e6   : > { %v3885_v63 = vpop.f32.mrf.mxu0 }
 0x1e7   : > { %v4702_v15 = vadd.f32 %v3995_v12, %v2026_v40  ;;  %v3886_v20 = vadd.f32 %v3885_v63, %v3884_v10  ;;  %v3997_v23 = vpop.f32.mrf.mxu1 }
 0x1e8   : > { %v3887_v24 = vpop.f32.mrf.mxu0  ;;  %v3998_v26 = vadd.f32 %v3997_v23, %v3996_v13 }
 0x1e9   : > { %v2029_v50 = vadd.f32 %v3886_v20, %v4605_v11  ;;  %v3999_v27 = vpop.f32.mrf.mxu1 }
 0x1ea   : > { %v3888_v8 = vpop.f32.mrf.mxu0 }
 0x1eb   : > { %v4705_v30 = vadd.f32 %v3998_v26, %v2029_v50  ;;  %v3889_v34 = vadd.f32 %v3888_v8, %v3887_v24  ;;  %v4000_v33 = vpop.f32.mrf.mxu1 }
 0x1ec   : > { %v3890_v39 = vpop.f32.mrf.mxu0  ;;  %v4001_v42 = vadd.f32 %v4000_v33, %v3999_v27 }
 0x1ed   : > { %v2034_v0 = vadd.f32 %v3889_v34, %v4607_v22  ;;  %v4002_v44 = vpop.f32.mrf.mxu1 }
 0x1ee   : > { %v3891_v19 = vpop.f32.mrf.mxu0 }
 0x1ef   : > { %v4708_v46 = vadd.f32 %v4001_v42, %v2034_v0  ;;  %v3892_v48 = vadd.f32 %v3891_v19, %v3890_v39  ;;  %v4003_v43 = vpop.f32.mrf.mxu1  ;;  %2206 = sbr.rel (%p4613_p8) target bundleno = 502 (0x1f6), region = 40 }
 0x1f0   : > { %v4004_v11 = vadd.f32 %v4003_v43, %v4002_v44 }
 0x1f1   : > { %v2037_v55 = vadd.f32 %v3892_v48, %v4609_v35 }
 0x1f3   : > { %v4711_v6 = vadd.f32 %v4004_v11, %v2037_v55 }
 0x1f4   : > { %v4152_v58 = vmov 0.0  }
 0x1f5   : > { %2207 = vst [vmem:[#allocation2] sm:$0x1] %v4152_v58  ;;  %2208 = vst [vmem:[#allocation3] sm:$0x1] %v4152_v58 }
 0x1f6 PF: > { %p3232_p9 = scmp.ne.s32.totalorder %s4138_s16, 0 }
 0x1f8   : > { %2211 = sbr.rel (%p3232_p9) target bundleno = 589 (0x24d), region = 44 }
 0x1fd   : > { %v2213_v22 = vadd.f32 %v4621_v4, %v4618_v54  ;;  %v2253_v60 = vmul.f32 %v4618_v54, %v4618_v54  ;;  %v2254_v2 = vmul.f32 %v4621_v4, %v4621_v4  ;;  %v2255_v5 = vmul.f32 %v4624_v18, %v4624_v18 }
 0x1fe   : > { %v2256_v10 = vmul.f32 %v4627_v31, %v4627_v31  ;;  %v2257_v40 = vmul.f32 %v4630_v47, %v4630_v47  ;;  %v2258_v12 = vmul.f32 %v4633_v61, %v4633_v61  ;;  %v3370_v63 = vpack.c.bf16 %v4621_v4, %v4618_v54 }
 0x1ff   : > { %v2214_v28 = vadd.f32 %v2213_v22, %v4624_v18  ;;  %v2285_v13 = vadd.f32 %v2254_v2, %v2253_v60  ;;  %v3375_v20 = vpack.c.bf16 %v4627_v31, %v4624_v18  ;;  %v3380_v24 = vpack.c.bf16 %v4633_v61, %v4630_v47 }
 0x200   : > { %v3385_v50 = vpack.c.bf16 %v4639_v37, %v4636_v29  ;;  %v3390_v26 = vpack.c.bf16 %v4645_v59, %v4642_v51  ;;  %3371 = vst [vmem:[%s4243_s23] sm:$0xff] %v3370_v63   ;;  %v3395_v8 = vpack.c.bf16 %v4651_v17, %v4648_v9  ;;  %v3400_v34 = vpack.c.bf16 %v4657_v41, %v4654_v32 }
 0x201   : > { %v2215_v35 = vadd.f32 %v2214_v28, %v4627_v31  ;;  %v2286_v27 = vadd.f32 %v2285_v13, %v2255_v5  ;;  %3527 = vst [vmem:[%s4243_s23 + $0x8] sm:$0xff] %v3375_v20   ;;  %v3405_v33 = vpack.c.bf16 %v4663_v1, %v4660_v56  ;;  %3528 = vst [vmem:[%s4243_s23 + $0x10] sm:$0xff] %v3380_v24  }
 0x202   : > { %3529 = vst [vmem:[%s4243_s23 + $0x18] sm:$0xff] %v3385_v50   ;;  %3530 = vst [vmem:[%s4243_s23 + $0x20] sm:$0xff] %v3390_v26   ;;  %v3410_v0 = vpack.c.bf16 %v4669_v25, %v4666_v16  ;;  %v3415_v42 = vpack.c.bf16 %v4675_v45, %v4672_v36  ;;  %v3420_v44 = vpack.c.bf16 %v4681_v62, %v4678_v53 }
 0x203   : > { %v2216_v52 = vadd.f32 %v2215_v35, %v4630_v47  ;;  %v2287_v19 = vadd.f32 %v2286_v27, %v2256_v10  ;;  %3531 = vst [vmem:[%s4243_s23 + $0x28] sm:$0xff] %v3395_v8   ;;  %3532 = vst [vmem:[%s4243_s23 + $0x30] sm:$0xff] %v3400_v34   ;;  %v3425_v48 = vpack.c.bf16 %v4687_v7, %v4684_v57 }
 0x204   : > { %3533 = vst [vmem:[%s4243_s23 + $0x38] sm:$0xff] %v3405_v33   ;;  %v3430_v43 = vpack.c.bf16 %v4693_v38, %v4690_v21  ;;  %v3435_v55 = vpack.c.bf16 %v4699_v3, %v4696_v49  ;;  %3534 = vst [vmem:[%s4243_s23 + $0x40] sm:$0xff] %v3410_v0   ;;  %v3440_v58 = vpack.c.bf16 %v4705_v30, %v4702_v15 }
 0x205   : > { %v2217_v14 = vadd.f32 %v2216_v52, %v4633_v61  ;;  %3535 = vst [vmem:[%s4243_s23 + $0x48] sm:$0xff] %v3415_v42   ;;  %3536 = vst [vmem:[%s4243_s23 + $0x50] sm:$0xff] %v3420_v44   ;;  %v3445_v22 = vpack.c.bf16 %v4711_v6, %v4708_v46  ;;  %v2259_v28 = vmul.f32 %v4636_v29, %v4636_v29 }
 0x206   : > { %v2288_v35 = vadd.f32 %v2287_v19, %v2257_v40  ;;  %3537 = vst [vmem:[%s4243_s23 + $0x58] sm:$0xff] %v3425_v48   ;;  %3538 = vst [vmem:[%s4243_s23 + $0x60] sm:$0xff] %v3430_v43   ;;  %v2260_v2 = vmul.f32 %v4639_v37, %v4639_v37  ;;  %v2262_v40 = vmul.f32 %v4645_v59, %v4645_v59 }
 0x207   : > { %v2218_v23 = vadd.f32 %v2217_v14, %v4636_v29  ;;  %3539 = vst [vmem:[%s4243_s23 + $0x68] sm:$0xff] %v3435_v55   ;;  %3540 = vst [vmem:[%s4243_s23 + $0x70] sm:$0xff] %v3440_v58   ;;  %v2261_v14 = vmul.f32 %v4642_v51, %v4642_v51  ;;  %v2264_v50 = vmul.f32 %v4651_v17, %v4651_v17 }
 0x208   : > { %3541 = vst [vmem:[%s4243_s23 + $0x78] sm:$0xff] %v3445_v22   ;;  %v2289_v52 = vadd.f32 %v2288_v35, %v2258_v12  ;;  %v2265_v8 = vmul.f32 %v4654_v32, %v4654_v32  ;;  %v2267_v44 = vmul.f32 %v4660_v56, %v4660_v56  ;;  %v2268_v43 = vmul.f32 %v4663_v1, %v4663_v1 }
 0x209   : > { %v2219_v39 = vadd.f32 %v2218_v23, %v4639_v37  ;;  %v2263_v23 = vmul.f32 %v4648_v9, %v4648_v9  ;;  %v2269_v58 = vmul.f32 %v4666_v16, %v4666_v16  ;;  %v2270_v35 = vmul.f32 %v4669_v25, %v4669_v25 }
 0x20a   : > { %v2290_v10 = vadd.f32 %v2289_v52, %v2259_v28  ;;  %v2271_v52 = vmul.f32 %v4672_v36, %v4672_v36 }
 0x20b   : > { %v2220_v11 = vadd.f32 %v2219_v39, %v4642_v51  ;;  %v2266_v39 = vmul.f32 %v4657_v41, %v4657_v41 }
 0x20c   : > { %v2291_v63 = vadd.f32 %v2290_v10, %v2260_v2  ;;  %v2272_v10 = vmul.f32 %v4675_v45, %v4675_v45 }
 0x20d   : > { %v2221_v60 = vadd.f32 %v2220_v11, %v4645_v59 }
 0x20e   : > { %v2292_v24 = vadd.f32 %v2291_v63, %v2261_v14  ;;  %v2273_v63 = vmul.f32 %v4678_v53, %v4678_v53 }
 0x20f   : > { %v2222_v5 = vadd.f32 %v2221_v60, %v4648_v9 }
 0x210   : > { %v2293_v26 = vadd.f32 %v2292_v24, %v2262_v40  ;;  %v2274_v24 = vmul.f32 %v4681_v62, %v4681_v62 }
 0x211   : > { %v2223_v13 = vadd.f32 %v2222_v5, %v4651_v17 }
 0x212   : > { %v2294_v34 = vadd.f32 %v2293_v26, %v2263_v23  ;;  %v2275_v26 = vmul.f32 %v4684_v57, %v4684_v57 }
 0x213   : > { %v2224_v20 = vadd.f32 %v2223_v13, %v4654_v32 }
 0x214   : > { %v2295_v0 = vadd.f32 %v2294_v34, %v2264_v50  ;;  %v2276_v34 = vmul.f32 %v4687_v7, %v4687_v7 }
 0x215   : > { %v2225_v12 = vadd.f32 %v2224_v20, %v4657_v41 }
 0x216   : > { %v2296_v19 = vadd.f32 %v2295_v0, %v2265_v8  ;;  %v2277_v0 = vmul.f32 %v4690_v21, %v4690_v21 }
 0x217   : > { %v2226_v27 = vadd.f32 %v2225_v12, %v4660_v56 }
 0x218   : > { %v2297_v55 = vadd.f32 %v2296_v19, %v2266_v39  ;;  %v2278_v19 = vmul.f32 %v4693_v38, %v4693_v38 }
 0x219   : > { %v2227_v33 = vadd.f32 %v2226_v27, %v4663_v1 }
 0x21a   : > { %v2298_v22 = vadd.f32 %v2297_v55, %v2267_v44  ;;  %v2279_v55 = vmul.f32 %v4696_v49, %v4696_v49 }
 0x21b   : > { %v2228_v42 = vadd.f32 %v2227_v33, %v4666_v16 }
 0x21c   : > { %v2299_v60 = vadd.f32 %v2298_v22, %v2268_v43  ;;  %v2280_v22 = vmul.f32 %v4699_v3, %v4699_v3 }
 0x21d   : > { %v2229_v48 = vadd.f32 %v2228_v42, %v4669_v25 }
 0x21e   : > { %v2300_v5 = vadd.f32 %v2299_v60, %v2269_v58  ;;  %v2281_v60 = vmul.f32 %v4702_v15, %v4702_v15 }
 0x21f   : > { %v2230_v11 = vadd.f32 %v2229_v48, %v4672_v36 }
 0x220   : > { %v2301_v13 = vadd.f32 %v2300_v5, %v2270_v35  ;;  %v2282_v5 = vmul.f32 %v4705_v30, %v4705_v30 }
 0x221   : > { %v2231_v28 = vadd.f32 %v2230_v11, %v4675_v45 }
 0x222   : > { %v2302_v20 = vadd.f32 %v2301_v13, %v2271_v52  ;;  %v2283_v13 = vmul.f32 %v4708_v46, %v4708_v46 }
 0x223   : > { %v2232_v2 = vadd.f32 %v2231_v28, %v4678_v53 }
 0x224   : > { %v2303_v12 = vadd.f32 %v2302_v20, %v2272_v10  ;;  %v2284_v20 = vmul.f32 %v4711_v6, %v4711_v6 }
 0x225   : > { %v2233_v14 = vadd.f32 %v2232_v2, %v4681_v62 }
 0x226   : > { %v2304_v27 = vadd.f32 %v2303_v12, %v2273_v63 }
 0x227   : > { %v2234_v40 = vadd.f32 %v2233_v14, %v4684_v57 }
 0x228   : > { %v2305_v33 = vadd.f32 %v2304_v27, %v2274_v24 }
 0x229   : > { %v2235_v23 = vadd.f32 %v2234_v40, %v4687_v7 }
 0x22a   : > { %v2306_v42 = vadd.f32 %v2305_v33, %v2275_v26 }
 0x22b   : > { %v2236_v50 = vadd.f32 %v2235_v23, %v4690_v21 }
 0x22c   : > { %v2307_v48 = vadd.f32 %v2306_v42, %v2276_v34 }
 0x22d   : > { %v2237_v8 = vadd.f32 %v2236_v50, %v4693_v38 }
 0x22e   : > { %v2308_v11 = vadd.f32 %v2307_v48, %v2277_v0  ;;  %v2252_v48 = vld [vmem:[#allocation3] sm:$0x1] }
 0x22f   : > { %v2238_v39 = vadd.f32 %v2237_v8, %v4696_v49  ;;  %v2212_v8 = vld [vmem:[#allocation2] sm:$0x1] }
 0x230   : > { %v2309_v28 = vadd.f32 %v2308_v11, %v2278_v19 }
 0x231   : > { %v2239_v44 = vadd.f32 %v2238_v39, %v4699_v3 }
 0x232   : > { %v2310_v2 = vadd.f32 %v2309_v28, %v2279_v55 }
 0x233   : > { %v2240_v43 = vadd.f32 %v2239_v44, %v4702_v15 }
 0x234   : > { %v2311_v14 = vadd.f32 %v2310_v2, %v2280_v22 }
 0x235   : > { %v2241_v58 = vadd.f32 %v2240_v43, %v4705_v30 }
 0x236   : > { %v2312_v40 = vadd.f32 %v2311_v14, %v2281_v60 }
 0x237   : > { %v2242_v35 = vadd.f32 %v2241_v58, %v4708_v46 }
 0x238   : > { %v2313_v23 = vadd.f32 %v2312_v40, %v2282_v5 }
 0x239   : > { %v2243_v52 = vadd.f32 %v2242_v35, %v4711_v6 }
 0x23a   : > { %v2314_v12 = vadd.f32 %v2313_v23, %v2283_v13 }
 0x23b   : > { %v2244_v10 = vrot.slane %v2243_v52, 4 }
 0x23c   : > { %v2315_v26 = vadd.f32 %v2314_v12, %v2284_v20 }
 0x23d   : > { %v2245_v63 = vadd.f32 %v2244_v10, %v2243_v52 }
 0x23e   : > { %v2316_v34 = vrot.slane %v2315_v26, 4 }
 0x23f   : > { %v2246_v24 = vrot.slane %v2245_v63, 2 }
 0x240   : > { %v2317_v39 = vadd.f32 %v2316_v34, %v2315_v26 }
 0x241   : > { %v2247_v50 = vadd.f32 %v2246_v24, %v2245_v63 }
 0x242   : > { %v2318_v42 = vrot.slane %v2317_v39, 2 }
 0x243   : > { %v2248_v27 = vrot.slane %v2247_v50, 1 }
 0x244   : > { %v2319_v44 = vadd.f32 %v2318_v42, %v2317_v39 }
 0x245   : > { %v2249_v33 = vadd.f32 %v2248_v27, %v2247_v50 }
 0x246   : > { %v2320_v19 = vrot.slane %v2319_v44, 1 }
 0x247   : > { %v2250_v0 = vadd.f32 %v2249_v33, %v2212_v8 }
 0x248   : > { %v2321_v43 = vadd.f32 %v2320_v19, %v2319_v44 }
 0x249   : > { %2251 = vst [vmem:[#allocation2] sm:$0x1] %v2250_v0 }
 0x24a   : > { %v2322_v55 = vadd.f32 %v2321_v43, %v2252_v48 }
 0x24c   : > { %2323 = vst [vmem:[#allocation3] sm:$0x1] %v2322_v55 }
 0x24d PF: > { %p3265_p10 = scmp.ne.s32.totalorder %s4138_s16, 1 }
 0x24f   : > { %2487 = sbr.rel (%p3265_p10) target bundleno = 686 (0x2ae), region = 48 }
 0x254   : > { %v2488_v11 = vld [vmem:[#allocation2] sm:$0x1]  ;;  %v2490_v58 = vld [vmem:[#allocation3] sm:$0x1]  ;;  %v2498_v35 = vlaneseq }
 0x255   : > { %v2489_v22 = vmul.f32 0.001953125, %v2488_v11  ;;  %v2491_v28 = vmul.f32 0.001953125, %v2490_v58 }
 0x256   : > { %v2499_v52 = vshrl.u32 %v2498_v35, 7 }
 0x257   : > { %v2492_v60 = vmul.f32 %v2489_v22, %v2489_v22 }
 0x258   : > { %v2500_v10 = vsub.s32 0, %v2499_v52 }
 0x259   : > { %v2493_v2 = vsub.f32 %v2491_v28, %v2492_v60 }
 0x25a   : > { %v4861_v13 = vrot.slane %v2489_v22, %v2500_v10  ;;  %v4924_v22 = vld [vmem:[%s5140_s2] ss:$0 sm:$0xff] }
 0x25b   : > { %v2494_v5 = vmax.f32 %v2493_v2, 0.0 }
 0x25c   : > { %v2503_v40 = vsub.f32 %v4618_v54, %v4861_v13  ;;  %v2504_v63 = vsub.f32 %v4621_v4, %v4861_v13  ;;  %v2505_v20 = vsub.f32 %v4624_v18, %v4861_v13  ;;  %v2506_v23 = vsub.f32 %v4627_v31, %v4861_v13 }
 0x25d   : > { %v2495_v14 = vadd.f32 1e-05, %v2494_v5  ;;  %v2507_v24 = vsub.f32 %v4630_v47, %v4861_v13  ;;  %v2508_v12 = vsub.f32 %v4633_v61, %v4861_v13  ;;  %v2509_v50 = vsub.f32 %v4636_v29, %v4861_v13 }
 0x25e   : > { %v2510_v54 = vsub.f32 %v4639_v37, %v4861_v13  ;;  %v2511_v4 = vsub.f32 %v4642_v51, %v4861_v13  ;;  %v2512_v18 = vsub.f32 %v4645_v59, %v4861_v13  ;;  %v2513_v31 = vsub.f32 %v4648_v9, %v4861_v13 }
 0x25f   : > { %4110 = vrsqrt.f32 %v2495_v14  ;;  %v2514_v47 = vsub.f32 %v4651_v17, %v4861_v13  ;;  %v2515_v61 = vsub.f32 %v4654_v32, %v4861_v13  ;;  %v2516_v29 = vsub.f32 %v4657_v41, %v4861_v13 }
 0x260   : > { %v2517_v37 = vsub.f32 %v4660_v56, %v4861_v13  ;;  %v2518_v26 = vsub.f32 %v4663_v1, %v4861_v13  ;;  %v2519_v27 = vsub.f32 %v4666_v16, %v4861_v13  ;;  %v2520_v8 = vsub.f32 %v4669_v25, %v4861_v13 }
 0x261   : > { %v2521_v34 = vsub.f32 %v4672_v36, %v4861_v13  ;;  %v2522_v33 = vsub.f32 %v4675_v45, %v4861_v13  ;;  %v2523_v39 = vsub.f32 %v4678_v53, %v4861_v13 }
 0x26c   : > { %v4111_v0 = vpop.eup %4110 }
 0x26d   : > { %v4913_v43 = vrot.slane %v4111_v0, %v2500_v10  ;;  %v4941_v0 = vld [vmem:[%s5141_s3] ss:$0 sm:$0xff] }
 0x26f   : > { %v2541_v52 = vmul.f32 %v4913_v43, %v2503_v40  ;;  %v2542_v5 = vmul.f32 %v4913_v43, %v2504_v63  ;;  %v2543_v14 = vmul.f32 %v4913_v43, %v2505_v20  ;;  %v2544_v10 = vmul.f32 %v4913_v43, %v2506_v23 }
 0x270   : > { %v2545_v35 = vmul.f32 %v4913_v43, %v2507_v24  ;;  %v2546_v60 = vmul.f32 %v4913_v43, %v2508_v12  ;;  %v2547_v28 = vmul.f32 %v4913_v43, %v2509_v50  ;;  %v2548_v2 = vmul.f32 %v4913_v43, %v2510_v54 }
 0x271   : > { %v2580_v40 = vmul.f32 %v4924_v22, %v2541_v52  ;;  %v2581_v63 = vmul.f32 %v4924_v22, %v2542_v5  ;;  %v2582_v20 = vmul.f32 %v4924_v22, %v2543_v14  ;;  %v2583_v23 = vmul.f32 %v4924_v22, %v2544_v10 }
 0x272   : > { %v2584_v58 = vmul.f32 %v4924_v22, %v2545_v35  ;;  %v2585_v11 = vmul.f32 %v4924_v22, %v2546_v60  ;;  %v2586_v24 = vmul.f32 %v4924_v22, %v2547_v28  ;;  %v2587_v12 = vmul.f32 %v4924_v22, %v2548_v2 }
 0x273   : > { %v2619_v50 = vadd.f32 %v4941_v0, %v2580_v40  ;;  %v2620_v54 = vadd.f32 %v4941_v0, %v2581_v63  ;;  %v2621_v52 = vadd.f32 %v4941_v0, %v2582_v20  ;;  %v2622_v5 = vadd.f32 %v4941_v0, %v2583_v23 }
 0x274   : > { %v2623_v14 = vadd.f32 %v4941_v0, %v2584_v58  ;;  %v2624_v10 = vadd.f32 %v4941_v0, %v2585_v11  ;;  %v2625_v35 = vadd.f32 %v4941_v0, %v2586_v24  ;;  %v2626_v60 = vadd.f32 %v4941_v0, %v2587_v12 }
 0x275   : > { %vm2651_vm0 = vcmp.ge.f32.partialorder %v2619_v50, 0.0  ;;  %vm2652_vm1 = vcmp.ge.f32.partialorder %v2620_v54, 0.0  ;;  %v2683_v28 = vmul.f32 0.2, %v2619_v50  ;;  %v2684_v2 = vmul.f32 0.2, %v2620_v54 }
 0x276   : > { %vm2653_vm2 = vcmp.ge.f32.partialorder %v2621_v52, 0.0  ;;  %vm2654_vm3 = vcmp.ge.f32.partialorder %v2622_v5, 0.0  ;;  %v2685_v40 = vmul.f32 0.2, %v2621_v52  ;;  %v2686_v63 = vmul.f32 0.2, %v2622_v5 }
 0x277   : > { %v2715_v20 = vsel %vm2651_vm0, %v2619_v50, %v2683_v28  ;;  %v2716_v55 = vsel %vm2652_vm1, %v2620_v54, %v2684_v2  ;;  %vm2655_vm4 = vcmp.ge.f32.partialorder %v2623_v14, 0.0  ;;  %vm2656_vm5 = vcmp.ge.f32.partialorder %v2624_v10, 0.0 }
 0x278   : > { %v3450_v58 = vpack.c.bf16 %v2716_v55, %v2715_v20  ;;  %v2717_v11 = vsel %vm2653_vm2, %v2621_v52, %v2685_v40  ;;  %v2718_v23 = vsel %vm2654_vm3, %v2622_v5, %v2686_v63  ;;  %v2687_v24 = vmul.f32 0.2, %v2623_v14 }
 0x279   : > { %v3455_v48 = vpack.c.bf16 %v2718_v23, %v2717_v11  ;;  %v2688_v12 = vmul.f32 0.2, %v2624_v10  ;;  %vm2657_vm6 = vcmp.ge.f32.partialorder %v2625_v35, 0.0  ;;  %vm2658_vm7 = vcmp.ge.f32.partialorder %v2626_v60, 0.0 }
 0x27a   : > { %3451 = vst [vmem:[%s4243_s23] sm:$0xff] %v3450_v58   ;;  %v2719_v19 = vsel %vm2655_vm4, %v2623_v14, %v2687_v24  ;;  %v2689_v44 = vmul.f32 0.2, %v2625_v35  ;;  %v2690_v42 = vmul.f32 0.2, %v2626_v60  ;;  %v2549_v50 = vmul.f32 %v4913_v43, %v2511_v4 }
 0x27b   : > { %3542 = vst [vmem:[%s4243_s23 + $0x8] sm:$0xff] %v3455_v48   ;;  %v2720_v54 = vsel %vm2656_vm5, %v2624_v10, %v2688_v12  ;;  %v2550_v55 = vmul.f32 %v4913_v43, %v2512_v18  ;;  %v2551_v52 = vmul.f32 %v4913_v43, %v2513_v31  ;;  %v2552_v51 = vmul.f32 %v4913_v43, %v2514_v47 }
 0x27c   : > { %v3460_v5 = vpack.c.bf16 %v2720_v54, %v2719_v19  ;;  %v2721_v4 = vsel %vm2657_vm6, %v2625_v35, %v2689_v44  ;;  %v2722_v48 = vsel %vm2658_vm7, %v2626_v60, %v2690_v42  ;;  %v2588_v14 = vmul.f32 %v4924_v22, %v2549_v50 }
 0x27d   : > { %v3465_v10 = vpack.c.bf16 %v2722_v48, %v2721_v4  ;;  %v2589_v59 = vmul.f32 %v4924_v22, %v2550_v55  ;;  %v2590_v18 = vmul.f32 %v4924_v22, %v2551_v52  ;;  %v2591_v9 = vmul.f32 %v4924_v22, %v2552_v51 }
 0x27e   : > { %3543 = vst [vmem:[%s4243_s23 + $0x10] sm:$0xff] %v3460_v5   ;;  %v2627_v31 = vadd.f32 %v4941_v0, %v2588_v14  ;;  %v2553_v17 = vmul.f32 %v4913_v43, %v2515_v61  ;;  %v2554_v47 = vmul.f32 %v4913_v43, %v2516_v29  ;;  %v2555_v42 = vmul.f32 %v4913_v43, %v2517_v37 }
 0x27f   : > { %3544 = vst [vmem:[%s4243_s23 + $0x18] sm:$0xff] %v3465_v10   ;;  %v2628_v44 = vadd.f32 %v4941_v0, %v2589_v59  ;;  %v2629_v19 = vadd.f32 %v4941_v0, %v2590_v18  ;;  %v2630_v35 = vadd.f32 %v4941_v0, %v2591_v9  ;;  %v2556_v32 = vmul.f32 %v4913_v43, %v2518_v26 }
 0x280   : > { %vm2659_vm8 = vcmp.ge.f32.partialorder %v2627_v31, 0.0  ;;  %v2691_v41 = vmul.f32 0.2, %v2627_v31  ;;  %v2592_v61 = vmul.f32 %v4924_v22, %v2553_v17  ;;  %v2593_v56 = vmul.f32 %v4924_v22, %v2554_v47 }
 0x281   : > { %vm2660_vm9 = vcmp.ge.f32.partialorder %v2628_v44, 0.0  ;;  %v2692_v29 = vmul.f32 0.2, %v2628_v44  ;;  %vm2661_vm10 = vcmp.ge.f32.partialorder %v2629_v19, 0.0  ;;  %vm2662_vm11 = vcmp.ge.f32.partialorder %v2630_v35, 0.0 }
 0x282   : > { %v2723_v37 = vsel %vm2659_vm8, %v2627_v31, %v2691_v41  ;;  %v2693_v60 = vmul.f32 0.2, %v2629_v19  ;;  %v2694_v28 = vmul.f32 0.2, %v2630_v35  ;;  %v2631_v2 = vadd.f32 %v4941_v0, %v2592_v61 }
 0x283   : > { %v2724_v40 = vsel %vm2660_vm9, %v2628_v44, %v2692_v29  ;;  %v2632_v1 = vadd.f32 %v4941_v0, %v2593_v56  ;;  %v2594_v26 = vmul.f32 %v4924_v22, %v2555_v42  ;;  %v2595_v63 = vmul.f32 %v4924_v22, %v2556_v32 }
 0x284   : > { %v3470_v20 = vpack.c.bf16 %v2724_v40, %v2723_v37  ;;  %v2725_v58 = vsel %vm2661_vm10, %v2629_v19, %v2693_v60  ;;  %v2726_v11 = vsel %vm2662_vm11, %v2630_v35, %v2694_v28  ;;  %vm2663_vm12 = vcmp.ge.f32.partialorder %v2631_v2, 0.0 }
 0x285   : > { %v3475_v23 = vpack.c.bf16 %v2726_v11, %v2725_v58  ;;  %vm2664_vm13 = vcmp.ge.f32.partialorder %v2632_v1, 0.0  ;;  %v2695_v24 = vmul.f32 0.2, %v2631_v2  ;;  %v2696_v12 = vmul.f32 0.2, %v2632_v1 }
 0x286   : > { %3545 = vst [vmem:[%s4243_s23 + $0x20] sm:$0xff] %v3470_v20   ;;  %v2633_v50 = vadd.f32 %v4941_v0, %v2594_v26  ;;  %v2634_v54 = vadd.f32 %v4941_v0, %v2595_v63  ;;  %v2557_v55 = vmul.f32 %v4913_v43, %v2519_v27  ;;  %v2558_v52 = vmul.f32 %v4913_v43, %v2520_v8 }
 0x287   : > { %3546 = vst [vmem:[%s4243_s23 + $0x28] sm:$0xff] %v3475_v23   ;;  %v2727_v51 = vsel %vm2663_vm12, %v2631_v2, %v2695_v24  ;;  %v2728_v5 = vsel %vm2664_vm13, %v2632_v1, %v2696_v12  ;;  %v2559_v4 = vmul.f32 %v4913_v43, %v2521_v34  ;;  %v2560_v16 = vmul.f32 %v4913_v43, %v2522_v33 }
 0x288   : > { %v3480_v48 = vpack.c.bf16 %v2728_v5, %v2727_v51  ;;  %vm2665_vm14 = vcmp.ge.f32.partialorder %v2633_v50, 0.0  ;;  %vm2666_vm15 = vcmp.ge.f32.partialorder %v2634_v54, 0.0  ;;  %v2697_v27 = vmul.f32 0.2, %v2633_v50 }
 0x289   : > { %v2698_v25 = vmul.f32 0.2, %v2634_v54  ;;  %v2596_v8 = vmul.f32 %v4924_v22, %v2557_v55  ;;  %v2597_v14 = vmul.f32 %v4924_v22, %v2558_v52  ;;  %v2598_v10 = vmul.f32 %v4924_v22, %v2559_v4 }
 0x28a   : > { %3547 = vst [vmem:[%s4243_s23 + $0x30] sm:$0xff] %v3480_v48   ;;  %v2729_v36 = vsel %vm2665_vm14, %v2633_v50, %v2697_v27  ;;  %v2599_v34 = vmul.f32 %v4924_v22, %v2560_v16  ;;  %v2561_v45 = vmul.f32 %v4913_v43, %v2523_v39  ;;  %v5144_v33 = vsub.f32 %v4681_v62, %v4861_v13 }
 0x28b   : > { %v2730_v18 = vsel %vm2666_vm15, %v2634_v54, %v2698_v25  ;;  %v2635_v9 = vadd.f32 %v4941_v0, %v2596_v8  ;;  %v2636_v31 = vadd.f32 %v4941_v0, %v2597_v14  ;;  %v2637_v17 = vadd.f32 %v4941_v0, %v2598_v10 }
 0x28c   : > { %v2562_v59 = vmul.f32 %v4913_v43, %v5144_v33  ;;  %v3485_v47 = vpack.c.bf16 %v2730_v18, %v2729_v36  ;;  %v2638_v42 = vadd.f32 %v4941_v0, %v2599_v34  ;;  %v2600_v44 = vmul.f32 %v4924_v22, %v2561_v45 }
 0x28d   : > { %vm2667_vm0 = vcmp.ge.f32.partialorder %v2635_v9, 0.0  ;;  %vm2668_vm1 = vcmp.ge.f32.partialorder %v2636_v31, 0.0  ;;  %v2699_v39 = vmul.f32 0.2, %v2635_v9  ;;  %v2700_v62 = vmul.f32 0.2, %v2636_v31 }
 0x28e   : > { %v2601_v53 = vmul.f32 %v4924_v22, %v2562_v59  ;;  %3548 = vst [vmem:[%s4243_s23 + $0x38] sm:$0xff] %v3485_v47   ;;  %vm2669_vm2 = vcmp.ge.f32.partialorder %v2637_v17, 0.0  ;;  %vm2670_vm3 = vcmp.ge.f32.partialorder %v2638_v42, 0.0  ;;  %v2701_v19 = vmul.f32 0.2, %v2637_v17 }
 0x28f   : > { %v2702_v35 = vmul.f32 0.2, %v2638_v42  ;;  %v2731_v32 = vsel %vm2667_vm0, %v2635_v9, %v2699_v39  ;;  %v2732_v41 = vsel %vm2668_vm1, %v2636_v31, %v2700_v62  ;;  %v2639_v61 = vadd.f32 %v4941_v0, %v2600_v44 }
 0x290   : > { %v2640_v56 = vadd.f32 %v4941_v0, %v2601_v53  ;;  %v3490_v29 = vpack.c.bf16 %v2732_v41, %v2731_v32  ;;  %v2733_v37 = vsel %vm2669_vm2, %v2637_v17, %v2701_v19  ;;  %v5145_v28 = vsub.f32 %v4684_v57, %v4861_v13 }
 0x291   : > { %v2734_v60 = vsel %vm2670_vm3, %v2638_v42, %v2702_v35  ;;  %vm2671_vm4 = vcmp.ge.f32.partialorder %v2639_v61, 0.0  ;;  %v2703_v1 = vmul.f32 0.2, %v2639_v61  ;;  %v5146_v63 = vsub.f32 %v4687_v7, %v4861_v13 }
 0x292   : > { %v2563_v2 = vmul.f32 %v4913_v43, %v5145_v28  ;;  %v3495_v40 = vpack.c.bf16 %v2734_v60, %v2733_v37  ;;  %vm2672_vm5 = vcmp.ge.f32.partialorder %v2640_v56, 0.0  ;;  %3549 = vst [vmem:[%s4243_s23 + $0x40] sm:$0xff] %v3490_v29   ;;  %v2704_v26 = vmul.f32 0.2, %v2640_v56 }
 0x293   : > { %v2564_v20 = vmul.f32 %v4913_v43, %v5146_v63  ;;  %v5147_v11 = vsub.f32 %v4690_v21, %v4861_v13  ;;  %v2735_v23 = vsel %vm2671_vm4, %v2639_v61, %v2703_v1  ;;  %v5148_v24 = vsub.f32 %v4693_v38, %v4861_v13 }
 0x294   : > { %v2602_v58 = vmul.f32 %v4924_v22, %v2563_v2  ;;  %3550 = vst [vmem:[%s4243_s23 + $0x48] sm:$0xff] %v3495_v40   ;;  %v5149_v7 = vsub.f32 %v4696_v49, %v4861_v13  ;;  %v5150_v54 = vsub.f32 %v4699_v3, %v4861_v13  ;;  %v2736_v55 = vsel %vm2672_vm5, %v2640_v56, %v2704_v26 }
 0x295   : > { %v2565_v57 = vmul.f32 %v4913_v43, %v5147_v11  ;;  %v2566_v12 = vmul.f32 %v4913_v43, %v5148_v24  ;;  %v2603_v52 = vmul.f32 %v4924_v22, %v2564_v20  ;;  %v3500_v5 = vpack.c.bf16 %v2736_v55, %v2735_v23 }
 0x296   : > { %v2567_v50 = vmul.f32 %v4913_v43, %v5149_v7  ;;  %v2568_v21 = vmul.f32 %v4913_v43, %v5150_v54  ;;  %v2641_v51 = vadd.f32 %v4941_v0, %v2602_v58  ;;  %v5151_v10 = vsub.f32 %v4702_v15, %v4861_v13 }
 0x297   : > { %v2604_v38 = vmul.f32 %v4924_v22, %v2565_v57  ;;  %v2605_v4 = vmul.f32 %v4924_v22, %v2566_v12  ;;  %v2642_v48 = vadd.f32 %v4941_v0, %v2603_v52  ;;  %3551 = vst [vmem:[%s4243_s23 + $0x50] sm:$0xff] %v3500_v5   ;;  %v5152_v42 = vsub.f32 %v4705_v30, %v4861_v13 }
 0x298   : > { %v2606_v16 = vmul.f32 %v4924_v22, %v2567_v50  ;;  %v2607_v49 = vmul.f32 %v4924_v22, %v2568_v21  ;;  %vm2673_vm6 = vcmp.ge.f32.partialorder %v2641_v51, 0.0  ;;  %v2705_v3 = vmul.f32 0.2, %v2641_v51 }
 0x299   : > { %v2643_v27 = vadd.f32 %v4941_v0, %v2604_v38  ;;  %v2644_v25 = vadd.f32 %v4941_v0, %v2605_v4  ;;  %v2569_v36 = vmul.f32 %v4913_v43, %v5151_v10  ;;  %vm2674_vm7 = vcmp.ge.f32.partialorder %v2642_v48, 0.0 }
 0x29a   : > { %v2645_v8 = vadd.f32 %v4941_v0, %v2606_v16  ;;  %v2646_v14 = vadd.f32 %v4941_v0, %v2607_v49  ;;  %v2706_v34 = vmul.f32 0.2, %v2642_v48  ;;  %v2737_v45 = vsel %vm2673_vm6, %v2641_v51, %v2705_v3 }
 0x29b   : > { %vm2675_vm8 = vcmp.ge.f32.partialorder %v2643_v27, 0.0  ;;  %vm2676_vm9 = vcmp.ge.f32.partialorder %v2644_v25, 0.0  ;;  %v2707_v33 = vmul.f32 0.2, %v2643_v27  ;;  %v2708_v59 = vmul.f32 0.2, %v2644_v25 }
 0x29c   : > { %vm2677_vm10 = vcmp.ge.f32.partialorder %v2645_v8, 0.0  ;;  %v2738_v18 = vsel %vm2674_vm7, %v2642_v48, %v2706_v34  ;;  %vm2678_vm11 = vcmp.ge.f32.partialorder %v2646_v14, 0.0  ;;  %v2709_v9 = vmul.f32 0.2, %v2645_v8 }
 0x29d   : > { %v2710_v31 = vmul.f32 0.2, %v2646_v14  ;;  %v3505_v17 = vpack.c.bf16 %v2738_v18, %v2737_v45  ;;  %v2739_v47 = vsel %vm2675_vm8, %v2643_v27, %v2707_v33  ;;  %v2740_v15 = vsel %vm2676_vm9, %v2644_v25, %v2708_v59 }
 0x29e   : > { %v2570_v44 = vmul.f32 %v4913_v43, %v5152_v42  ;;  %v3510_v53 = vpack.c.bf16 %v2740_v15, %v2739_v47  ;;  %v2741_v39 = vsel %vm2677_vm10, %v2645_v8, %v2709_v9  ;;  %v2608_v19 = vmul.f32 %v4924_v22, %v2569_v36 }
 0x29f   : > { %v2742_v62 = vsel %vm2678_vm11, %v2646_v14, %v2710_v31  ;;  %3552 = vst [vmem:[%s4243_s23 + $0x58] sm:$0xff] %v3505_v17   ;;  %v5153_v41 = vsub.f32 %v4708_v46, %v4861_v13  ;;  %v5154_v56 = vsub.f32 %v4711_v6, %v4861_v13 }
 0x2a0   : > { %v3515_v35 = vpack.c.bf16 %v2742_v62, %v2741_v39  ;;  %v2609_v32 = vmul.f32 %v4924_v22, %v2570_v44  ;;  %3553 = vst [vmem:[%s4243_s23 + $0x60] sm:$0xff] %v3510_v53   ;;  %v2647_v29 = vadd.f32 %v4941_v0, %v2608_v19 }
 0x2a1   : > { %v2571_v61 = vmul.f32 %v4913_v43, %v5153_v41  ;;  %v2572_v30 = vmul.f32 %v4913_v43, %v5154_v56 }
 0x2a2   : > { %3554 = vst [vmem:[%s4243_s23 + $0x68] sm:$0xff] %v3515_v35   ;;  %v2648_v37 = vadd.f32 %v4941_v0, %v2609_v32  ;;  %vm2679_vm12 = vcmp.ge.f32.partialorder %v2647_v29, 0.0  ;;  %v2711_v46 = vmul.f32 0.2, %v2647_v29 }
 0x2a3   : > { %v2610_v60 = vmul.f32 %v4924_v22, %v2571_v61  ;;  %v2611_v28 = vmul.f32 %v4924_v22, %v2572_v30 }
 0x2a4   : > { %vm2680_vm13 = vcmp.ge.f32.partialorder %v2648_v37, 0.0  ;;  %v2712_v2 = vmul.f32 0.2, %v2648_v37  ;;  %v2743_v43 = vsel %vm2679_vm12, %v2647_v29, %v2711_v46 }
 0x2a5   : > { %v2649_v6 = vadd.f32 %v4941_v0, %v2610_v60  ;;  %v2650_v13 = vadd.f32 %v4941_v0, %v2611_v28 }
 0x2a6   : > { %v2744_v40 = vsel %vm2680_vm13, %v2648_v37, %v2712_v2 }
 0x2a7   : > { %vm2681_vm14 = vcmp.ge.f32.partialorder %v2649_v6, 0.0  ;;  %vm2682_vm15 = vcmp.ge.f32.partialorder %v2650_v13, 0.0  ;;  %v2713_v1 = vmul.f32 0.2, %v2649_v6  ;;  %v3520_v26 = vpack.c.bf16 %v2744_v40, %v2743_v43 }
 0x2a8   : > { %v2714_v63 = vmul.f32 0.2, %v2650_v13 }
 0x2a9   : > { %v2745_v20 = vsel %vm2681_vm14, %v2649_v6, %v2713_v1  ;;  %3555 = vst [vmem:[%s4243_s23 + $0x70] sm:$0xff] %v3520_v26  }
 0x2aa   : > { %v2746_v58 = vsel %vm2682_vm15, %v2650_v13, %v2714_v63 }
 0x2ab   : > { %v3525_v22 = vpack.c.bf16 %v2746_v58, %v2745_v20 }
 0x2ad   : > { %3556 = vst [vmem:[%s4243_s23 + $0x78] sm:$0xff] %v3525_v22  }
 0x2ae PF: > { %s14_s19 = sadd.s32 1, %s4150_s19   ;;  %s5155_s15 = smov %s4142_s17 }
 0x2af   : > { %p11_p11 = scmp.ge.s32.totalorder %s14_s19, 6   ;;  %s5156_s16 = smov %s4146_s18 }
 0x2b0   : > { %s5157_s17 = smov %s5160_s20  ;;  %s5158_s18 = smov %s5164_s21 }
 0x2b1   :  { %13 = sbr.rel (!%p11_p11) target bundleno = 3 (0x3), region = 87 }

// kernel: discriminator_forward.7
= control target key start
LH: loop header
LB: loop body
LE: loop exit
PB: predicated region body
PF: predicated region fallthrough
CT: control target
= control target key end

     0   :  { %s5481_s15 = smov 0   ;;  %s5483_s16 = smov 0   ;;  %s6903_s0 = inlined_call_operand.vmem [shape: bf16[128,2048], index: 0, kind: input, shape index: {}]   ;;  %s6904_s1 = inlined_call_operand.vmem [shape: bf16[2048,256], index: 1, kind: input, shape index: {}]   ;;  %s6905_s2 = inlined_call_operand.vmem [shape: f32[1,256], index: 2, kind: input, shape index: {}]   ;;  %s6906_s3 = inlined_call_operand.vmem [shape: f32[1,256], index: 3, kind: input, shape index: {}]   ;;  %s6907_s4 = inlined_call_operand.vmem [shape: bf16[128,256], index: 4, kind: output, shape index: {}]  }
   0x1   :  { %s5485_s17 = smov 0   ;;  %s5487_s18 = smov 0  }
   0x2   :  { %s5489_s19 = smov 0  }
   0x3 LB: > { %s33_s20 = sadd.s32 1, %s5450_s18  ;;  %s4383_s21 = sadd.s32 4294967295, %s5454_s19   ;;  %s5454_s19 = sphi %s5489_s19, %s14_s19   ;;  %s5450_s18 = sphi %s5487_s18, %s6912_s18   ;;  %s5446_s17 = sphi %s5485_s17, %s6911_s17   ;;  %s5442_s16 = sphi %s5483_s16, %s6910_s16   ;;  %s5438_s15 = sphi %s5481_s15, %s6909_s15  }
   0x4   : > { %p35_p0 = scmp.ge.s32.totalorder %s33_s20, 2  ;;  %p73_p1 = scmp.ne.s32.totalorder %s5442_s16, %s5438_s15 }
   0x5   : > { %p74_p2 = scmp.eq.s32.totalorder %s5454_s19, 0  ;;  %p157_p4 = scmp.eq.s32.totalorder %s4383_s21, 1 }
   0x6   : > { %s6914_s20 = smov (%p35_p0, %s33_s20), 0  ;;  %s66_s23 = sadd.s32 1, %s5442_s16 }
   0x7   : > { %p75_p3 = por %p74_p2, %p73_p1  ;;  %s63_s22 = ssub.s32 %s5450_s18, %s6914_s20 }
   0x8   : > { %p64_p5 = scmp.eq.s32.totalorder %s63_s22, 0  ;;  %p5516_p6 = por %p157_p4, %p73_p1 }
   0x9   : > { %p4387_p7 = scmp.ge.s32.totalorder %s5454_s19, 2 }
   0xa   : > { %s5521_s25 = scalar_select %p64_p5, %s5442_s16, %s66_s23  }
   0xb   : > { %189 = sbr.rel (%p4387_p7) target bundleno = 190 (0xbe), region = 20 }
  0x10   : > { %192 = sbr.rel (!%p75_p3) target bundleno = 190 (0xbe), region = 24  ;;  %s194_s26 = sand.u32 (%p75_p3), 1, %s5442_s16  }
  0x11   : > { %s4389_s27 = sshll.u32 (%p75_p3), %s5450_s18, 2  ;;  %s4388_s28 = sshll.u32 (%p75_p3), %s194_s26, 10 }
  0x12   : > { %s5529_s5 = scalar_lea.vmem (%p75_p3), %s6904_s1, %s4389_s27  ;;  %s5533_s6 = scalar_lea.vmem (%p75_p3), [#allocation2], %s4388_s28 }
  0x13   : > { %v215_v0 = vld [vmem:[%s5529_s5] sm:$0xf] (%p75_p3)  ;;  %v217_v1 = vld [vmem:[%s5529_s5 + $0x8] sm:$0xf] (%p75_p3)  ;;  %v219_v2 = vld [vmem:[%s5529_s5 + $0x10] sm:$0xf] (%p75_p3) }
  0x14   : > { %216 = vst [vmem:[%s5533_s6] sm:$0xf] (%p75_p3), %v215_v0  ;;  %218 = vst [vmem:[%s5533_s6 + $0x4] sm:$0xf] (%p75_p3), %v217_v1  ;;  %v221_v3 = vld [vmem:[%s5529_s5 + $0x18] sm:$0xf] (%p75_p3) }
  0x15   : > { %v223_v4 = vld [vmem:[%s5529_s5 + $0x20] sm:$0xf]  ;;  %220 = vst [vmem:[%s5533_s6 + $0x8] sm:$0xf] %v219_v2  ;;  %222 = vst [vmem:[%s5533_s6 + $0xc] sm:$0xf] %v221_v3 }
  0x16   : > { %224 = vst [vmem:[%s5533_s6 + $0x10] sm:$0xf] %v223_v4  ;;  %v225_v5 = vld [vmem:[%s5529_s5 + $0x28] sm:$0xf]  ;;  %v227_v6 = vld [vmem:[%s5529_s5 + $0x30] sm:$0xf] }
  0x17   : > { %v229_v7 = vld [vmem:[%s5529_s5 + $0x38] sm:$0xf]  ;;  %226 = vst [vmem:[%s5533_s6 + $0x14] sm:$0xf] %v225_v5  ;;  %228 = vst [vmem:[%s5533_s6 + $0x18] sm:$0xf] %v227_v6 }
  0x18   : > { %230 = vst [vmem:[%s5533_s6 + $0x1c] sm:$0xf] %v229_v7  ;;  %v231_v8 = vld [vmem:[%s5529_s5 + $0x40] sm:$0xf]  ;;  %v233_v9 = vld [vmem:[%s5529_s5 + $0x48] sm:$0xf] }
  0x19   : > { %v235_v10 = vld [vmem:[%s5529_s5 + $0x50] sm:$0xf]  ;;  %232 = vst [vmem:[%s5533_s6 + $0x20] sm:$0xf] %v231_v8  ;;  %234 = vst [vmem:[%s5533_s6 + $0x24] sm:$0xf] %v233_v9 }
  0x1a   : > { %236 = vst [vmem:[%s5533_s6 + $0x28] sm:$0xf] %v235_v10  ;;  %v237_v11 = vld [vmem:[%s5529_s5 + $0x58] sm:$0xf]  ;;  %v239_v12 = vld [vmem:[%s5529_s5 + $0x60] sm:$0xf] }
  0x1b   : > { %v241_v13 = vld [vmem:[%s5529_s5 + $0x68] sm:$0xf]  ;;  %238 = vst [vmem:[%s5533_s6 + $0x2c] sm:$0xf] %v237_v11  ;;  %240 = vst [vmem:[%s5533_s6 + $0x30] sm:$0xf] %v239_v12 }
  0x1c   : > { %242 = vst [vmem:[%s5533_s6 + $0x34] sm:$0xf] %v241_v13  ;;  %v243_v14 = vld [vmem:[%s5529_s5 + $0x70] sm:$0xf]  ;;  %v245_v15 = vld [vmem:[%s5529_s5 + $0x78] sm:$0xf] }
  0x1d   : > { %v247_v16 = vld [vmem:[%s5529_s5 + $0x80] sm:$0xf]  ;;  %244 = vst [vmem:[%s5533_s6 + $0x38] sm:$0xf] %v243_v14  ;;  %246 = vst [vmem:[%s5533_s6 + $0x3c] sm:$0xf] %v245_v15 }
  0x1e   : > { %248 = vst [vmem:[%s5533_s6 + $0x40] sm:$0xf] %v247_v16  ;;  %v249_v17 = vld [vmem:[%s5529_s5 + $0x88] sm:$0xf]  ;;  %v251_v18 = vld [vmem:[%s5529_s5 + $0x90] sm:$0xf] }
  0x1f   : > { %v253_v19 = vld [vmem:[%s5529_s5 + $0x98] sm:$0xf]  ;;  %250 = vst [vmem:[%s5533_s6 + $0x44] sm:$0xf] %v249_v17  ;;  %252 = vst [vmem:[%s5533_s6 + $0x48] sm:$0xf] %v251_v18 }
  0x20   : > { %254 = vst [vmem:[%s5533_s6 + $0x4c] sm:$0xf] %v253_v19  ;;  %v255_v20 = vld [vmem:[%s5529_s5 + $0xa0] sm:$0xf]  ;;  %v257_v21 = vld [vmem:[%s5529_s5 + $0xa8] sm:$0xf] }
  0x21   : > { %v259_v22 = vld [vmem:[%s5529_s5 + $0xb0] sm:$0xf]  ;;  %256 = vst [vmem:[%s5533_s6 + $0x50] sm:$0xf] %v255_v20  ;;  %258 = vst [vmem:[%s5533_s6 + $0x54] sm:$0xf] %v257_v21 }
  0x22   : > { %260 = vst [vmem:[%s5533_s6 + $0x58] sm:$0xf] %v259_v22  ;;  %v261_v23 = vld [vmem:[%s5529_s5 + $0xb8] sm:$0xf]  ;;  %v263_v24 = vld [vmem:[%s5529_s5 + $0xc0] sm:$0xf] }
  0x23   : > { %v265_v25 = vld [vmem:[%s5529_s5 + $0xc8] sm:$0xf]  ;;  %262 = vst [vmem:[%s5533_s6 + $0x5c] sm:$0xf] %v261_v23  ;;  %264 = vst [vmem:[%s5533_s6 + $0x60] sm:$0xf] %v263_v24 }
  0x24   : > { %266 = vst [vmem:[%s5533_s6 + $0x64] sm:$0xf] %v265_v25  ;;  %v267_v26 = vld [vmem:[%s5529_s5 + $0xd0] sm:$0xf]  ;;  %v269_v27 = vld [vmem:[%s5529_s5 + $0xd8] sm:$0xf] }
  0x25   : > { %v271_v28 = vld [vmem:[%s5529_s5 + $0xe0] sm:$0xf]  ;;  %268 = vst [vmem:[%s5533_s6 + $0x68] sm:$0xf] %v267_v26  ;;  %270 = vst [vmem:[%s5533_s6 + $0x6c] sm:$0xf] %v269_v27 }
  0x26   : > { %272 = vst [vmem:[%s5533_s6 + $0x70] sm:$0xf] %v271_v28  ;;  %v273_v29 = vld [vmem:[%s5529_s5 + $0xe8] sm:$0xf]  ;;  %v275_v30 = vld [vmem:[%s5529_s5 + $0xf0] sm:$0xf] }
  0x27   : > { %v277_v31 = vld [vmem:[%s5529_s5 + $0xf8] sm:$0xf]  ;;  %274 = vst [vmem:[%s5533_s6 + $0x74] sm:$0xf] %v273_v29  ;;  %276 = vst [vmem:[%s5533_s6 + $0x78] sm:$0xf] %v275_v30 }
  0x28   : > { %278 = vst [vmem:[%s5533_s6 + $0x7c] sm:$0xf] %v277_v31  ;;  %v279_v32 = vld [vmem:[%s5529_s5 + $0x100] sm:$0xf]  ;;  %v281_v33 = vld [vmem:[%s5529_s5 + $0x108] sm:$0xf] }
  0x29   : > { %v283_v34 = vld [vmem:[%s5529_s5 + $0x110] sm:$0xf]  ;;  %280 = vst [vmem:[%s5533_s6 + $0x80] sm:$0xf] %v279_v32  ;;  %282 = vst [vmem:[%s5533_s6 + $0x84] sm:$0xf] %v281_v33 }
  0x2a   : > { %284 = vst [vmem:[%s5533_s6 + $0x88] sm:$0xf] %v283_v34  ;;  %v285_v35 = vld [vmem:[%s5529_s5 + $0x118] sm:$0xf]  ;;  %v287_v36 = vld [vmem:[%s5529_s5 + $0x120] sm:$0xf] }
  0x2b   : > { %v289_v37 = vld [vmem:[%s5529_s5 + $0x128] sm:$0xf]  ;;  %286 = vst [vmem:[%s5533_s6 + $0x8c] sm:$0xf] %v285_v35  ;;  %288 = vst [vmem:[%s5533_s6 + $0x90] sm:$0xf] %v287_v36 }
  0x2c   : > { %290 = vst [vmem:[%s5533_s6 + $0x94] sm:$0xf] %v289_v37  ;;  %v291_v38 = vld [vmem:[%s5529_s5 + $0x130] sm:$0xf]  ;;  %v293_v39 = vld [vmem:[%s5529_s5 + $0x138] sm:$0xf] }
  0x2d   : > { %v295_v40 = vld [vmem:[%s5529_s5 + $0x140] sm:$0xf]  ;;  %292 = vst [vmem:[%s5533_s6 + $0x98] sm:$0xf] %v291_v38  ;;  %294 = vst [vmem:[%s5533_s6 + $0x9c] sm:$0xf] %v293_v39 }
  0x2e   : > { %296 = vst [vmem:[%s5533_s6 + $0xa0] sm:$0xf] %v295_v40  ;;  %v297_v41 = vld [vmem:[%s5529_s5 + $0x148] sm:$0xf]  ;;  %v299_v42 = vld [vmem:[%s5529_s5 + $0x150] sm:$0xf] }
  0x2f   : > { %v301_v43 = vld [vmem:[%s5529_s5 + $0x158] sm:$0xf]  ;;  %298 = vst [vmem:[%s5533_s6 + $0xa4] sm:$0xf] %v297_v41  ;;  %300 = vst [vmem:[%s5533_s6 + $0xa8] sm:$0xf] %v299_v42 }
  0x30   : > { %302 = vst [vmem:[%s5533_s6 + $0xac] sm:$0xf] %v301_v43  ;;  %v303_v44 = vld [vmem:[%s5529_s5 + $0x160] sm:$0xf]  ;;  %v305_v45 = vld [vmem:[%s5529_s5 + $0x168] sm:$0xf] }
  0x31   : > { %v307_v46 = vld [vmem:[%s5529_s5 + $0x170] sm:$0xf]  ;;  %304 = vst [vmem:[%s5533_s6 + $0xb0] sm:$0xf] %v303_v44  ;;  %306 = vst [vmem:[%s5533_s6 + $0xb4] sm:$0xf] %v305_v45 }
  0x32   : > { %308 = vst [vmem:[%s5533_s6 + $0xb8] sm:$0xf] %v307_v46  ;;  %v309_v47 = vld [vmem:[%s5529_s5 + $0x178] sm:$0xf]  ;;  %v311_v48 = vld [vmem:[%s5529_s5 + $0x180] sm:$0xf] }
  0x33   : > { %v313_v49 = vld [vmem:[%s5529_s5 + $0x188] sm:$0xf]  ;;  %310 = vst [vmem:[%s5533_s6 + $0xbc] sm:$0xf] %v309_v47  ;;  %312 = vst [vmem:[%s5533_s6 + $0xc0] sm:$0xf] %v311_v48 }
  0x34   : > { %314 = vst [vmem:[%s5533_s6 + $0xc4] sm:$0xf] %v313_v49  ;;  %v315_v50 = vld [vmem:[%s5529_s5 + $0x190] sm:$0xf]  ;;  %v317_v51 = vld [vmem:[%s5529_s5 + $0x198] sm:$0xf] }
  0x35   : > { %v319_v52 = vld [vmem:[%s5529_s5 + $0x1a0] sm:$0xf]  ;;  %316 = vst [vmem:[%s5533_s6 + $0xc8] sm:$0xf] %v315_v50  ;;  %318 = vst [vmem:[%s5533_s6 + $0xcc] sm:$0xf] %v317_v51 }
  0x36   : > { %320 = vst [vmem:[%s5533_s6 + $0xd0] sm:$0xf] %v319_v52  ;;  %v321_v53 = vld [vmem:[%s5529_s5 + $0x1a8] sm:$0xf]  ;;  %v323_v54 = vld [vmem:[%s5529_s5 + $0x1b0] sm:$0xf] }
  0x37   : > { %v325_v55 = vld [vmem:[%s5529_s5 + $0x1b8] sm:$0xf]  ;;  %322 = vst [vmem:[%s5533_s6 + $0xd4] sm:$0xf] %v321_v53  ;;  %324 = vst [vmem:[%s5533_s6 + $0xd8] sm:$0xf] %v323_v54 }
  0x38   : > { %326 = vst [vmem:[%s5533_s6 + $0xdc] sm:$0xf] %v325_v55  ;;  %v327_v56 = vld [vmem:[%s5529_s5 + $0x1c0] sm:$0xf]  ;;  %v329_v57 = vld [vmem:[%s5529_s5 + $0x1c8] sm:$0xf] }
  0x39   : > { %v331_v58 = vld [vmem:[%s5529_s5 + $0x1d0] sm:$0xf]  ;;  %328 = vst [vmem:[%s5533_s6 + $0xe0] sm:$0xf] %v327_v56  ;;  %330 = vst [vmem:[%s5533_s6 + $0xe4] sm:$0xf] %v329_v57 }
  0x3a   : > { %332 = vst [vmem:[%s5533_s6 + $0xe8] sm:$0xf] %v331_v58  ;;  %v333_v59 = vld [vmem:[%s5529_s5 + $0x1d8] sm:$0xf]  ;;  %v335_v60 = vld [vmem:[%s5529_s5 + $0x1e0] sm:$0xf] }
  0x3b   : > { %v337_v61 = vld [vmem:[%s5529_s5 + $0x1e8] sm:$0xf]  ;;  %334 = vst [vmem:[%s5533_s6 + $0xec] sm:$0xf] %v333_v59  ;;  %336 = vst [vmem:[%s5533_s6 + $0xf0] sm:$0xf] %v335_v60 }
  0x3c   : > { %338 = vst [vmem:[%s5533_s6 + $0xf4] sm:$0xf] %v337_v61  ;;  %v339_v62 = vld [vmem:[%s5529_s5 + $0x1f0] sm:$0xf]  ;;  %v341_v63 = vld [vmem:[%s5529_s5 + $0x1f8] sm:$0xf] }
  0x3d   : > { %v343_v0 = vld [vmem:[%s5529_s5 + $0x200] sm:$0xf]  ;;  %340 = vst [vmem:[%s5533_s6 + $0xf8] sm:$0xf] %v339_v62  ;;  %342 = vst [vmem:[%s5533_s6 + $0xfc] sm:$0xf] %v341_v63 }
  0x3e   : > { %344 = vst [vmem:[%s5533_s6 + $0x100] sm:$0xf] %v343_v0  ;;  %v345_v1 = vld [vmem:[%s5529_s5 + $0x208] sm:$0xf]  ;;  %v347_v2 = vld [vmem:[%s5529_s5 + $0x210] sm:$0xf] }
  0x3f   : > { %v349_v3 = vld [vmem:[%s5529_s5 + $0x218] sm:$0xf]  ;;  %346 = vst [vmem:[%s5533_s6 + $0x104] sm:$0xf] %v345_v1  ;;  %348 = vst [vmem:[%s5533_s6 + $0x108] sm:$0xf] %v347_v2 }
  0x40   : > { %350 = vst [vmem:[%s5533_s6 + $0x10c] sm:$0xf] %v349_v3  ;;  %v351_v4 = vld [vmem:[%s5529_s5 + $0x220] sm:$0xf]  ;;  %v353_v5 = vld [vmem:[%s5529_s5 + $0x228] sm:$0xf] }
  0x41   : > { %v355_v6 = vld [vmem:[%s5529_s5 + $0x230] sm:$0xf]  ;;  %352 = vst [vmem:[%s5533_s6 + $0x110] sm:$0xf] %v351_v4  ;;  %354 = vst [vmem:[%s5533_s6 + $0x114] sm:$0xf] %v353_v5 }
  0x42   : > { %356 = vst [vmem:[%s5533_s6 + $0x118] sm:$0xf] %v355_v6  ;;  %v357_v7 = vld [vmem:[%s5529_s5 + $0x238] sm:$0xf]  ;;  %v359_v8 = vld [vmem:[%s5529_s5 + $0x240] sm:$0xf] }
  0x43   : > { %v361_v9 = vld [vmem:[%s5529_s5 + $0x248] sm:$0xf]  ;;  %358 = vst [vmem:[%s5533_s6 + $0x11c] sm:$0xf] %v357_v7  ;;  %360 = vst [vmem:[%s5533_s6 + $0x120] sm:$0xf] %v359_v8 }
  0x44   : > { %362 = vst [vmem:[%s5533_s6 + $0x124] sm:$0xf] %v361_v9  ;;  %v363_v10 = vld [vmem:[%s5529_s5 + $0x250] sm:$0xf]  ;;  %v365_v11 = vld [vmem:[%s5529_s5 + $0x258] sm:$0xf] }
  0x45   : > { %v367_v12 = vld [vmem:[%s5529_s5 + $0x260] sm:$0xf]  ;;  %364 = vst [vmem:[%s5533_s6 + $0x128] sm:$0xf] %v363_v10  ;;  %366 = vst [vmem:[%s5533_s6 + $0x12c] sm:$0xf] %v365_v11 }
  0x46   : > { %368 = vst [vmem:[%s5533_s6 + $0x130] sm:$0xf] %v367_v12  ;;  %v369_v13 = vld [vmem:[%s5529_s5 + $0x268] sm:$0xf]  ;;  %v371_v14 = vld [vmem:[%s5529_s5 + $0x270] sm:$0xf] }
  0x47   : > { %v373_v15 = vld [vmem:[%s5529_s5 + $0x278] sm:$0xf]  ;;  %370 = vst [vmem:[%s5533_s6 + $0x134] sm:$0xf] %v369_v13  ;;  %372 = vst [vmem:[%s5533_s6 + $0x138] sm:$0xf] %v371_v14 }
  0x48   : > { %374 = vst [vmem:[%s5533_s6 + $0x13c] sm:$0xf] %v373_v15  ;;  %v375_v16 = vld [vmem:[%s5529_s5 + $0x280] sm:$0xf]  ;;  %v377_v17 = vld [vmem:[%s5529_s5 + $0x288] sm:$0xf] }
  0x49   : > { %v379_v18 = vld [vmem:[%s5529_s5 + $0x290] sm:$0xf]  ;;  %376 = vst [vmem:[%s5533_s6 + $0x140] sm:$0xf] %v375_v16  ;;  %378 = vst [vmem:[%s5533_s6 + $0x144] sm:$0xf] %v377_v17 }
  0x4a   : > { %380 = vst [vmem:[%s5533_s6 + $0x148] sm:$0xf] %v379_v18  ;;  %v381_v19 = vld [vmem:[%s5529_s5 + $0x298] sm:$0xf]  ;;  %v383_v20 = vld [vmem:[%s5529_s5 + $0x2a0] sm:$0xf] }
  0x4b   : > { %v385_v21 = vld [vmem:[%s5529_s5 + $0x2a8] sm:$0xf]  ;;  %382 = vst [vmem:[%s5533_s6 + $0x14c] sm:$0xf] %v381_v19  ;;  %384 = vst [vmem:[%s5533_s6 + $0x150] sm:$0xf] %v383_v20 }
  0x4c   : > { %386 = vst [vmem:[%s5533_s6 + $0x154] sm:$0xf] %v385_v21  ;;  %v387_v22 = vld [vmem:[%s5529_s5 + $0x2b0] sm:$0xf]  ;;  %v389_v23 = vld [vmem:[%s5529_s5 + $0x2b8] sm:$0xf] }
  0x4d   : > { %v391_v24 = vld [vmem:[%s5529_s5 + $0x2c0] sm:$0xf]  ;;  %388 = vst [vmem:[%s5533_s6 + $0x158] sm:$0xf] %v387_v22  ;;  %390 = vst [vmem:[%s5533_s6 + $0x15c] sm:$0xf] %v389_v23 }
  0x4e   : > { %392 = vst [vmem:[%s5533_s6 + $0x160] sm:$0xf] %v391_v24  ;;  %v393_v25 = vld [vmem:[%s5529_s5 + $0x2c8] sm:$0xf]  ;;  %v395_v26 = vld [vmem:[%s5529_s5 + $0x2d0] sm:$0xf] }
  0x4f   : > { %v397_v27 = vld [vmem:[%s5529_s5 + $0x2d8] sm:$0xf]  ;;  %394 = vst [vmem:[%s5533_s6 + $0x164] sm:$0xf] %v393_v25  ;;  %396 = vst [vmem:[%s5533_s6 + $0x168] sm:$0xf] %v395_v26 }
  0x50   : > { %398 = vst [vmem:[%s5533_s6 + $0x16c] sm:$0xf] %v397_v27  ;;  %v399_v28 = vld [vmem:[%s5529_s5 + $0x2e0] sm:$0xf]  ;;  %v401_v29 = vld [vmem:[%s5529_s5 + $0x2e8] sm:$0xf] }
  0x51   : > { %v403_v30 = vld [vmem:[%s5529_s5 + $0x2f0] sm:$0xf]  ;;  %400 = vst [vmem:[%s5533_s6 + $0x170] sm:$0xf] %v399_v28  ;;  %402 = vst [vmem:[%s5533_s6 + $0x174] sm:$0xf] %v401_v29 }
  0x52   : > { %404 = vst [vmem:[%s5533_s6 + $0x178] sm:$0xf] %v403_v30  ;;  %v405_v31 = vld [vmem:[%s5529_s5 + $0x2f8] sm:$0xf]  ;;  %v407_v32 = vld [vmem:[%s5529_s5 + $0x300] sm:$0xf] }
  0x53   : > { %v409_v33 = vld [vmem:[%s5529_s5 + $0x308] sm:$0xf]  ;;  %406 = vst [vmem:[%s5533_s6 + $0x17c] sm:$0xf] %v405_v31  ;;  %408 = vst [vmem:[%s5533_s6 + $0x180] sm:$0xf] %v407_v32 }
  0x54   : > { %410 = vst [vmem:[%s5533_s6 + $0x184] sm:$0xf] %v409_v33  ;;  %v411_v34 = vld [vmem:[%s5529_s5 + $0x310] sm:$0xf]  ;;  %v413_v35 = vld [vmem:[%s5529_s5 + $0x318] sm:$0xf] }
  0x55   : > { %v415_v36 = vld [vmem:[%s5529_s5 + $0x320] sm:$0xf]  ;;  %412 = vst [vmem:[%s5533_s6 + $0x188] sm:$0xf] %v411_v34  ;;  %414 = vst [vmem:[%s5533_s6 + $0x18c] sm:$0xf] %v413_v35 }
  0x56   : > { %416 = vst [vmem:[%s5533_s6 + $0x190] sm:$0xf] %v415_v36  ;;  %v417_v37 = vld [vmem:[%s5529_s5 + $0x328] sm:$0xf]  ;;  %v419_v38 = vld [vmem:[%s5529_s5 + $0x330] sm:$0xf] }
  0x57   : > { %v421_v39 = vld [vmem:[%s5529_s5 + $0x338] sm:$0xf]  ;;  %418 = vst [vmem:[%s5533_s6 + $0x194] sm:$0xf] %v417_v37  ;;  %420 = vst [vmem:[%s5533_s6 + $0x198] sm:$0xf] %v419_v38 }
  0x58   : > { %422 = vst [vmem:[%s5533_s6 + $0x19c] sm:$0xf] %v421_v39  ;;  %v423_v40 = vld [vmem:[%s5529_s5 + $0x340] sm:$0xf]  ;;  %v425_v41 = vld [vmem:[%s5529_s5 + $0x348] sm:$0xf] }
  0x59   : > { %v427_v42 = vld [vmem:[%s5529_s5 + $0x350] sm:$0xf]  ;;  %424 = vst [vmem:[%s5533_s6 + $0x1a0] sm:$0xf] %v423_v40  ;;  %426 = vst [vmem:[%s5533_s6 + $0x1a4] sm:$0xf] %v425_v41 }
  0x5a   : > { %428 = vst [vmem:[%s5533_s6 + $0x1a8] sm:$0xf] %v427_v42  ;;  %v429_v43 = vld [vmem:[%s5529_s5 + $0x358] sm:$0xf]  ;;  %v431_v44 = vld [vmem:[%s5529_s5 + $0x360] sm:$0xf] }
  0x5b   : > { %v433_v45 = vld [vmem:[%s5529_s5 + $0x368] sm:$0xf]  ;;  %430 = vst [vmem:[%s5533_s6 + $0x1ac] sm:$0xf] %v429_v43  ;;  %432 = vst [vmem:[%s5533_s6 + $0x1b0] sm:$0xf] %v431_v44 }
  0x5c   : > { %434 = vst [vmem:[%s5533_s6 + $0x1b4] sm:$0xf] %v433_v45  ;;  %v435_v46 = vld [vmem:[%s5529_s5 + $0x370] sm:$0xf]  ;;  %v437_v47 = vld [vmem:[%s5529_s5 + $0x378] sm:$0xf] }
  0x5d   : > { %v439_v48 = vld [vmem:[%s5529_s5 + $0x380] sm:$0xf]  ;;  %436 = vst [vmem:[%s5533_s6 + $0x1b8] sm:$0xf] %v435_v46  ;;  %438 = vst [vmem:[%s5533_s6 + $0x1bc] sm:$0xf] %v437_v47 }
  0x5e   : > { %440 = vst [vmem:[%s5533_s6 + $0x1c0] sm:$0xf] %v439_v48  ;;  %v441_v49 = vld [vmem:[%s5529_s5 + $0x388] sm:$0xf]  ;;  %v443_v50 = vld [vmem:[%s5529_s5 + $0x390] sm:$0xf] }
  0x5f   : > { %v445_v51 = vld [vmem:[%s5529_s5 + $0x398] sm:$0xf]  ;;  %442 = vst [vmem:[%s5533_s6 + $0x1c4] sm:$0xf] %v441_v49  ;;  %444 = vst [vmem:[%s5533_s6 + $0x1c8] sm:$0xf] %v443_v50 }
  0x60   : > { %446 = vst [vmem:[%s5533_s6 + $0x1cc] sm:$0xf] %v445_v51  ;;  %v447_v52 = vld [vmem:[%s5529_s5 + $0x3a0] sm:$0xf]  ;;  %v449_v53 = vld [vmem:[%s5529_s5 + $0x3a8] sm:$0xf] }
  0x61   : > { %v451_v54 = vld [vmem:[%s5529_s5 + $0x3b0] sm:$0xf]  ;;  %448 = vst [vmem:[%s5533_s6 + $0x1d0] sm:$0xf] %v447_v52  ;;  %450 = vst [vmem:[%s5533_s6 + $0x1d4] sm:$0xf] %v449_v53 }
  0x62   : > { %452 = vst [vmem:[%s5533_s6 + $0x1d8] sm:$0xf] %v451_v54  ;;  %v453_v55 = vld [vmem:[%s5529_s5 + $0x3b8] sm:$0xf]  ;;  %v455_v56 = vld [vmem:[%s5529_s5 + $0x3c0] sm:$0xf] }
  0x63   : > { %v457_v57 = vld [vmem:[%s5529_s5 + $0x3c8] sm:$0xf]  ;;  %454 = vst [vmem:[%s5533_s6 + $0x1dc] sm:$0xf] %v453_v55  ;;  %456 = vst [vmem:[%s5533_s6 + $0x1e0] sm:$0xf] %v455_v56 }
  0x64   : > { %458 = vst [vmem:[%s5533_s6 + $0x1e4] sm:$0xf] %v457_v57  ;;  %v459_v58 = vld [vmem:[%s5529_s5 + $0x3d0] sm:$0xf]  ;;  %v461_v59 = vld [vmem:[%s5529_s5 + $0x3d8] sm:$0xf] }
  0x65   : > { %v463_v60 = vld [vmem:[%s5529_s5 + $0x3e0] sm:$0xf]  ;;  %460 = vst [vmem:[%s5533_s6 + $0x1e8] sm:$0xf] %v459_v58  ;;  %462 = vst [vmem:[%s5533_s6 + $0x1ec] sm:$0xf] %v461_v59 }
  0x66   : > { %464 = vst [vmem:[%s5533_s6 + $0x1f0] sm:$0xf] %v463_v60  ;;  %v465_v61 = vld [vmem:[%s5529_s5 + $0x3e8] sm:$0xf]  ;;  %v467_v62 = vld [vmem:[%s5529_s5 + $0x3f0] sm:$0xf] }
  0x67   : > { %v469_v63 = vld [vmem:[%s5529_s5 + $0x3f8] sm:$0xf]  ;;  %466 = vst [vmem:[%s5533_s6 + $0x1f4] sm:$0xf] %v465_v61  ;;  %468 = vst [vmem:[%s5533_s6 + $0x1f8] sm:$0xf] %v467_v62 }
  0x68   : > { %470 = vst [vmem:[%s5533_s6 + $0x1fc] sm:$0xf] %v469_v63  ;;  %v471_v0 = vld [vmem:[%s5529_s5 + $0x400] sm:$0xf]  ;;  %v473_v1 = vld [vmem:[%s5529_s5 + $0x408] sm:$0xf] }
  0x69   : > { %v475_v2 = vld [vmem:[%s5529_s5 + $0x410] sm:$0xf]  ;;  %472 = vst [vmem:[%s5533_s6 + $0x200] sm:$0xf] %v471_v0  ;;  %474 = vst [vmem:[%s5533_s6 + $0x204] sm:$0xf] %v473_v1 }
  0x6a   : > { %476 = vst [vmem:[%s5533_s6 + $0x208] sm:$0xf] %v475_v2  ;;  %v477_v3 = vld [vmem:[%s5529_s5 + $0x418] sm:$0xf]  ;;  %v479_v4 = vld [vmem:[%s5529_s5 + $0x420] sm:$0xf] }
  0x6b   : > { %v481_v5 = vld [vmem:[%s5529_s5 + $0x428] sm:$0xf]  ;;  %478 = vst [vmem:[%s5533_s6 + $0x20c] sm:$0xf] %v477_v3  ;;  %480 = vst [vmem:[%s5533_s6 + $0x210] sm:$0xf] %v479_v4 }
  0x6c   : > { %482 = vst [vmem:[%s5533_s6 + $0x214] sm:$0xf] %v481_v5  ;;  %v483_v6 = vld [vmem:[%s5529_s5 + $0x430] sm:$0xf]  ;;  %v485_v7 = vld [vmem:[%s5529_s5 + $0x438] sm:$0xf] }
  0x6d   : > { %v487_v8 = vld [vmem:[%s5529_s5 + $0x440] sm:$0xf]  ;;  %484 = vst [vmem:[%s5533_s6 + $0x218] sm:$0xf] %v483_v6  ;;  %486 = vst [vmem:[%s5533_s6 + $0x21c] sm:$0xf] %v485_v7 }
  0x6e   : > { %488 = vst [vmem:[%s5533_s6 + $0x220] sm:$0xf] %v487_v8  ;;  %v489_v9 = vld [vmem:[%s5529_s5 + $0x448] sm:$0xf]  ;;  %v491_v10 = vld [vmem:[%s5529_s5 + $0x450] sm:$0xf] }
  0x6f   : > { %v493_v11 = vld [vmem:[%s5529_s5 + $0x458] sm:$0xf]  ;;  %490 = vst [vmem:[%s5533_s6 + $0x224] sm:$0xf] %v489_v9  ;;  %492 = vst [vmem:[%s5533_s6 + $0x228] sm:$0xf] %v491_v10 }
  0x70   : > { %494 = vst [vmem:[%s5533_s6 + $0x22c] sm:$0xf] %v493_v11  ;;  %v495_v12 = vld [vmem:[%s5529_s5 + $0x460] sm:$0xf]  ;;  %v497_v13 = vld [vmem:[%s5529_s5 + $0x468] sm:$0xf] }
  0x71   : > { %v499_v14 = vld [vmem:[%s5529_s5 + $0x470] sm:$0xf]  ;;  %496 = vst [vmem:[%s5533_s6 + $0x230] sm:$0xf] %v495_v12  ;;  %498 = vst [vmem:[%s5533_s6 + $0x234] sm:$0xf] %v497_v13 }
  0x72   : > { %500 = vst [vmem:[%s5533_s6 + $0x238] sm:$0xf] %v499_v14  ;;  %v501_v15 = vld [vmem:[%s5529_s5 + $0x478] sm:$0xf]  ;;  %v503_v16 = vld [vmem:[%s5529_s5 + $0x480] sm:$0xf] }
  0x73   : > { %v505_v17 = vld [vmem:[%s5529_s5 + $0x488] sm:$0xf]  ;;  %502 = vst [vmem:[%s5533_s6 + $0x23c] sm:$0xf] %v501_v15  ;;  %504 = vst [vmem:[%s5533_s6 + $0x240] sm:$0xf] %v503_v16 }
  0x74   : > { %506 = vst [vmem:[%s5533_s6 + $0x244] sm:$0xf] %v505_v17  ;;  %v507_v18 = vld [vmem:[%s5529_s5 + $0x490] sm:$0xf]  ;;  %v509_v19 = vld [vmem:[%s5529_s5 + $0x498] sm:$0xf] }
  0x75   : > { %v511_v20 = vld [vmem:[%s5529_s5 + $0x4a0] sm:$0xf]  ;;  %508 = vst [vmem:[%s5533_s6 + $0x248] sm:$0xf] %v507_v18  ;;  %510 = vst [vmem:[%s5533_s6 + $0x24c] sm:$0xf] %v509_v19 }
  0x76   : > { %512 = vst [vmem:[%s5533_s6 + $0x250] sm:$0xf] %v511_v20  ;;  %v513_v21 = vld [vmem:[%s5529_s5 + $0x4a8] sm:$0xf]  ;;  %v515_v22 = vld [vmem:[%s5529_s5 + $0x4b0] sm:$0xf] }
  0x77   : > { %v517_v23 = vld [vmem:[%s5529_s5 + $0x4b8] sm:$0xf]  ;;  %514 = vst [vmem:[%s5533_s6 + $0x254] sm:$0xf] %v513_v21  ;;  %516 = vst [vmem:[%s5533_s6 + $0x258] sm:$0xf] %v515_v22 }
  0x78   : > { %518 = vst [vmem:[%s5533_s6 + $0x25c] sm:$0xf] %v517_v23  ;;  %v519_v24 = vld [vmem:[%s5529_s5 + $0x4c0] sm:$0xf]  ;;  %v521_v25 = vld [vmem:[%s5529_s5 + $0x4c8] sm:$0xf] }
  0x79   : > { %v523_v26 = vld [vmem:[%s5529_s5 + $0x4d0] sm:$0xf]  ;;  %520 = vst [vmem:[%s5533_s6 + $0x260] sm:$0xf] %v519_v24  ;;  %522 = vst [vmem:[%s5533_s6 + $0x264] sm:$0xf] %v521_v25 }
  0x7a   : > { %524 = vst [vmem:[%s5533_s6 + $0x268] sm:$0xf] %v523_v26  ;;  %v525_v27 = vld [vmem:[%s5529_s5 + $0x4d8] sm:$0xf]  ;;  %v527_v28 = vld [vmem:[%s5529_s5 + $0x4e0] sm:$0xf] }
  0x7b   : > { %v529_v29 = vld [vmem:[%s5529_s5 + $0x4e8] sm:$0xf]  ;;  %526 = vst [vmem:[%s5533_s6 + $0x26c] sm:$0xf] %v525_v27  ;;  %528 = vst [vmem:[%s5533_s6 + $0x270] sm:$0xf] %v527_v28 }
  0x7c   : > { %530 = vst [vmem:[%s5533_s6 + $0x274] sm:$0xf] %v529_v29  ;;  %v531_v30 = vld [vmem:[%s5529_s5 + $0x4f0] sm:$0xf]  ;;  %v533_v31 = vld [vmem:[%s5529_s5 + $0x4f8] sm:$0xf] }
  0x7d   : > { %v535_v32 = vld [vmem:[%s5529_s5 + $0x500] sm:$0xf]  ;;  %532 = vst [vmem:[%s5533_s6 + $0x278] sm:$0xf] %v531_v30  ;;  %534 = vst [vmem:[%s5533_s6 + $0x27c] sm:$0xf] %v533_v31 }
  0x7e   : > { %536 = vst [vmem:[%s5533_s6 + $0x280] sm:$0xf] %v535_v32  ;;  %v537_v33 = vld [vmem:[%s5529_s5 + $0x508] sm:$0xf]  ;;  %v539_v34 = vld [vmem:[%s5529_s5 + $0x510] sm:$0xf] }
  0x7f   : > { %v541_v35 = vld [vmem:[%s5529_s5 + $0x518] sm:$0xf]  ;;  %538 = vst [vmem:[%s5533_s6 + $0x284] sm:$0xf] %v537_v33  ;;  %540 = vst [vmem:[%s5533_s6 + $0x288] sm:$0xf] %v539_v34 }
  0x80   : > { %542 = vst [vmem:[%s5533_s6 + $0x28c] sm:$0xf] %v541_v35  ;;  %v543_v36 = vld [vmem:[%s5529_s5 + $0x520] sm:$0xf]  ;;  %v545_v37 = vld [vmem:[%s5529_s5 + $0x528] sm:$0xf] }
  0x81   : > { %v547_v38 = vld [vmem:[%s5529_s5 + $0x530] sm:$0xf]  ;;  %544 = vst [vmem:[%s5533_s6 + $0x290] sm:$0xf] %v543_v36  ;;  %546 = vst [vmem:[%s5533_s6 + $0x294] sm:$0xf] %v545_v37 }
  0x82   : > { %548 = vst [vmem:[%s5533_s6 + $0x298] sm:$0xf] %v547_v38  ;;  %v549_v39 = vld [vmem:[%s5529_s5 + $0x538] sm:$0xf]  ;;  %v551_v40 = vld [vmem:[%s5529_s5 + $0x540] sm:$0xf] }
  0x83   : > { %v553_v41 = vld [vmem:[%s5529_s5 + $0x548] sm:$0xf]  ;;  %550 = vst [vmem:[%s5533_s6 + $0x29c] sm:$0xf] %v549_v39  ;;  %552 = vst [vmem:[%s5533_s6 + $0x2a0] sm:$0xf] %v551_v40 }
  0x84   : > { %554 = vst [vmem:[%s5533_s6 + $0x2a4] sm:$0xf] %v553_v41  ;;  %v555_v42 = vld [vmem:[%s5529_s5 + $0x550] sm:$0xf]  ;;  %v557_v43 = vld [vmem:[%s5529_s5 + $0x558] sm:$0xf] }
  0x85   : > { %v559_v44 = vld [vmem:[%s5529_s5 + $0x560] sm:$0xf]  ;;  %556 = vst [vmem:[%s5533_s6 + $0x2a8] sm:$0xf] %v555_v42  ;;  %558 = vst [vmem:[%s5533_s6 + $0x2ac] sm:$0xf] %v557_v43 }
  0x86   : > { %560 = vst [vmem:[%s5533_s6 + $0x2b0] sm:$0xf] %v559_v44  ;;  %v561_v45 = vld [vmem:[%s5529_s5 + $0x568] sm:$0xf]  ;;  %v563_v46 = vld [vmem:[%s5529_s5 + $0x570] sm:$0xf] }
  0x87   : > { %v565_v47 = vld [vmem:[%s5529_s5 + $0x578] sm:$0xf]  ;;  %562 = vst [vmem:[%s5533_s6 + $0x2b4] sm:$0xf] %v561_v45  ;;  %564 = vst [vmem:[%s5533_s6 + $0x2b8] sm:$0xf] %v563_v46 }
  0x88   : > { %566 = vst [vmem:[%s5533_s6 + $0x2bc] sm:$0xf] %v565_v47  ;;  %v567_v48 = vld [vmem:[%s5529_s5 + $0x580] sm:$0xf]  ;;  %v569_v49 = vld [vmem:[%s5529_s5 + $0x588] sm:$0xf] }
  0x89   : > { %v571_v50 = vld [vmem:[%s5529_s5 + $0x590] sm:$0xf]  ;;  %568 = vst [vmem:[%s5533_s6 + $0x2c0] sm:$0xf] %v567_v48  ;;  %570 = vst [vmem:[%s5533_s6 + $0x2c4] sm:$0xf] %v569_v49 }
  0x8a   : > { %572 = vst [vmem:[%s5533_s6 + $0x2c8] sm:$0xf] %v571_v50  ;;  %v573_v51 = vld [vmem:[%s5529_s5 + $0x598] sm:$0xf]  ;;  %v575_v52 = vld [vmem:[%s5529_s5 + $0x5a0] sm:$0xf] }
  0x8b   : > { %v577_v53 = vld [vmem:[%s5529_s5 + $0x5a8] sm:$0xf]  ;;  %574 = vst [vmem:[%s5533_s6 + $0x2cc] sm:$0xf] %v573_v51  ;;  %576 = vst [vmem:[%s5533_s6 + $0x2d0] sm:$0xf] %v575_v52 }
  0x8c   : > { %578 = vst [vmem:[%s5533_s6 + $0x2d4] sm:$0xf] %v577_v53  ;;  %v579_v54 = vld [vmem:[%s5529_s5 + $0x5b0] sm:$0xf]  ;;  %v581_v55 = vld [vmem:[%s5529_s5 + $0x5b8] sm:$0xf] }
  0x8d   : > { %v583_v56 = vld [vmem:[%s5529_s5 + $0x5c0] sm:$0xf]  ;;  %580 = vst [vmem:[%s5533_s6 + $0x2d8] sm:$0xf] %v579_v54  ;;  %582 = vst [vmem:[%s5533_s6 + $0x2dc] sm:$0xf] %v581_v55 }
  0x8e   : > { %584 = vst [vmem:[%s5533_s6 + $0x2e0] sm:$0xf] %v583_v56  ;;  %v585_v57 = vld [vmem:[%s5529_s5 + $0x5c8] sm:$0xf]  ;;  %v587_v58 = vld [vmem:[%s5529_s5 + $0x5d0] sm:$0xf] }
  0x8f   : > { %v589_v59 = vld [vmem:[%s5529_s5 + $0x5d8] sm:$0xf]  ;;  %586 = vst [vmem:[%s5533_s6 + $0x2e4] sm:$0xf] %v585_v57  ;;  %588 = vst [vmem:[%s5533_s6 + $0x2e8] sm:$0xf] %v587_v58 }
  0x90   : > { %590 = vst [vmem:[%s5533_s6 + $0x2ec] sm:$0xf] %v589_v59  ;;  %v591_v60 = vld [vmem:[%s5529_s5 + $0x5e0] sm:$0xf]  ;;  %v593_v61 = vld [vmem:[%s5529_s5 + $0x5e8] sm:$0xf] }
  0x91   : > { %v595_v62 = vld [vmem:[%s5529_s5 + $0x5f0] sm:$0xf]  ;;  %592 = vst [vmem:[%s5533_s6 + $0x2f0] sm:$0xf] %v591_v60  ;;  %594 = vst [vmem:[%s5533_s6 + $0x2f4] sm:$0xf] %v593_v61 }
  0x92   : > { %596 = vst [vmem:[%s5533_s6 + $0x2f8] sm:$0xf] %v595_v62  ;;  %v597_v63 = vld [vmem:[%s5529_s5 + $0x5f8] sm:$0xf]  ;;  %v599_v0 = vld [vmem:[%s5529_s5 + $0x600] sm:$0xf] }
  0x93   : > { %v601_v1 = vld [vmem:[%s5529_s5 + $0x608] sm:$0xf]  ;;  %598 = vst [vmem:[%s5533_s6 + $0x2fc] sm:$0xf] %v597_v63  ;;  %600 = vst [vmem:[%s5533_s6 + $0x300] sm:$0xf] %v599_v0 }
  0x94   : > { %602 = vst [vmem:[%s5533_s6 + $0x304] sm:$0xf] %v601_v1  ;;  %v603_v2 = vld [vmem:[%s5529_s5 + $0x610] sm:$0xf]  ;;  %v605_v3 = vld [vmem:[%s5529_s5 + $0x618] sm:$0xf] }
  0x95   : > { %v607_v4 = vld [vmem:[%s5529_s5 + $0x620] sm:$0xf]  ;;  %604 = vst [vmem:[%s5533_s6 + $0x308] sm:$0xf] %v603_v2  ;;  %606 = vst [vmem:[%s5533_s6 + $0x30c] sm:$0xf] %v605_v3 }
  0x96   : > { %608 = vst [vmem:[%s5533_s6 + $0x310] sm:$0xf] %v607_v4  ;;  %v609_v5 = vld [vmem:[%s5529_s5 + $0x628] sm:$0xf]  ;;  %v611_v6 = vld [vmem:[%s5529_s5 + $0x630] sm:$0xf] }
  0x97   : > { %v613_v7 = vld [vmem:[%s5529_s5 + $0x638] sm:$0xf]  ;;  %610 = vst [vmem:[%s5533_s6 + $0x314] sm:$0xf] %v609_v5  ;;  %612 = vst [vmem:[%s5533_s6 + $0x318] sm:$0xf] %v611_v6 }
  0x98   : > { %614 = vst [vmem:[%s5533_s6 + $0x31c] sm:$0xf] %v613_v7  ;;  %v615_v8 = vld [vmem:[%s5529_s5 + $0x640] sm:$0xf]  ;;  %v617_v9 = vld [vmem:[%s5529_s5 + $0x648] sm:$0xf] }
  0x99   : > { %v619_v10 = vld [vmem:[%s5529_s5 + $0x650] sm:$0xf]  ;;  %616 = vst [vmem:[%s5533_s6 + $0x320] sm:$0xf] %v615_v8  ;;  %618 = vst [vmem:[%s5533_s6 + $0x324] sm:$0xf] %v617_v9 }
  0x9a   : > { %620 = vst [vmem:[%s5533_s6 + $0x328] sm:$0xf] %v619_v10  ;;  %v621_v11 = vld [vmem:[%s5529_s5 + $0x658] sm:$0xf]  ;;  %v623_v12 = vld [vmem:[%s5529_s5 + $0x660] sm:$0xf] }
  0x9b   : > { %v625_v13 = vld [vmem:[%s5529_s5 + $0x668] sm:$0xf]  ;;  %622 = vst [vmem:[%s5533_s6 + $0x32c] sm:$0xf] %v621_v11  ;;  %624 = vst [vmem:[%s5533_s6 + $0x330] sm:$0xf] %v623_v12 }
  0x9c   : > { %626 = vst [vmem:[%s5533_s6 + $0x334] sm:$0xf] %v625_v13  ;;  %v627_v14 = vld [vmem:[%s5529_s5 + $0x670] sm:$0xf]  ;;  %v629_v15 = vld [vmem:[%s5529_s5 + $0x678] sm:$0xf] }
  0x9d   : > { %v631_v16 = vld [vmem:[%s5529_s5 + $0x680] sm:$0xf]  ;;  %628 = vst [vmem:[%s5533_s6 + $0x338] sm:$0xf] %v627_v14  ;;  %630 = vst [vmem:[%s5533_s6 + $0x33c] sm:$0xf] %v629_v15 }
  0x9e   : > { %632 = vst [vmem:[%s5533_s6 + $0x340] sm:$0xf] %v631_v16  ;;  %v633_v17 = vld [vmem:[%s5529_s5 + $0x688] sm:$0xf]  ;;  %v635_v18 = vld [vmem:[%s5529_s5 + $0x690] sm:$0xf] }
  0x9f   : > { %v637_v19 = vld [vmem:[%s5529_s5 + $0x698] sm:$0xf]  ;;  %634 = vst [vmem:[%s5533_s6 + $0x344] sm:$0xf] %v633_v17  ;;  %636 = vst [vmem:[%s5533_s6 + $0x348] sm:$0xf] %v635_v18 }
  0xa0   : > { %638 = vst [vmem:[%s5533_s6 + $0x34c] sm:$0xf] %v637_v19  ;;  %v639_v20 = vld [vmem:[%s5529_s5 + $0x6a0] sm:$0xf]  ;;  %v641_v21 = vld [vmem:[%s5529_s5 + $0x6a8] sm:$0xf] }
  0xa1   : > { %v643_v22 = vld [vmem:[%s5529_s5 + $0x6b0] sm:$0xf]  ;;  %640 = vst [vmem:[%s5533_s6 + $0x350] sm:$0xf] %v639_v20  ;;  %642 = vst [vmem:[%s5533_s6 + $0x354] sm:$0xf] %v641_v21 }
  0xa2   : > { %644 = vst [vmem:[%s5533_s6 + $0x358] sm:$0xf] %v643_v22  ;;  %v645_v23 = vld [vmem:[%s5529_s5 + $0x6b8] sm:$0xf]  ;;  %v647_v24 = vld [vmem:[%s5529_s5 + $0x6c0] sm:$0xf] }
  0xa3   : > { %v649_v25 = vld [vmem:[%s5529_s5 + $0x6c8] sm:$0xf]  ;;  %646 = vst [vmem:[%s5533_s6 + $0x35c] sm:$0xf] %v645_v23  ;;  %648 = vst [vmem:[%s5533_s6 + $0x360] sm:$0xf] %v647_v24 }
  0xa4   : > { %650 = vst [vmem:[%s5533_s6 + $0x364] sm:$0xf] %v649_v25  ;;  %v651_v26 = vld [vmem:[%s5529_s5 + $0x6d0] sm:$0xf]  ;;  %v653_v27 = vld [vmem:[%s5529_s5 + $0x6d8] sm:$0xf] }
  0xa5   : > { %v655_v28 = vld [vmem:[%s5529_s5 + $0x6e0] sm:$0xf]  ;;  %652 = vst [vmem:[%s5533_s6 + $0x368] sm:$0xf] %v651_v26  ;;  %654 = vst [vmem:[%s5533_s6 + $0x36c] sm:$0xf] %v653_v27 }
  0xa6   : > { %656 = vst [vmem:[%s5533_s6 + $0x370] sm:$0xf] %v655_v28  ;;  %v657_v29 = vld [vmem:[%s5529_s5 + $0x6e8] sm:$0xf]  ;;  %v659_v30 = vld [vmem:[%s5529_s5 + $0x6f0] sm:$0xf] }
  0xa7   : > { %v661_v31 = vld [vmem:[%s5529_s5 + $0x6f8] sm:$0xf]  ;;  %658 = vst [vmem:[%s5533_s6 + $0x374] sm:$0xf] %v657_v29  ;;  %660 = vst [vmem:[%s5533_s6 + $0x378] sm:$0xf] %v659_v30 }
  0xa8   : > { %662 = vst [vmem:[%s5533_s6 + $0x37c] sm:$0xf] %v661_v31  ;;  %v663_v32 = vld [vmem:[%s5529_s5 + $0x700] sm:$0xf]  ;;  %v665_v33 = vld [vmem:[%s5529_s5 + $0x708] sm:$0xf] }
  0xa9   : > { %v667_v34 = vld [vmem:[%s5529_s5 + $0x710] sm:$0xf]  ;;  %664 = vst [vmem:[%s5533_s6 + $0x380] sm:$0xf] %v663_v32  ;;  %666 = vst [vmem:[%s5533_s6 + $0x384] sm:$0xf] %v665_v33 }
  0xaa   : > { %668 = vst [vmem:[%s5533_s6 + $0x388] sm:$0xf] %v667_v34  ;;  %v669_v35 = vld [vmem:[%s5529_s5 + $0x718] sm:$0xf]  ;;  %v671_v36 = vld [vmem:[%s5529_s5 + $0x720] sm:$0xf] }
  0xab   : > { %v673_v37 = vld [vmem:[%s5529_s5 + $0x728] sm:$0xf]  ;;  %670 = vst [vmem:[%s5533_s6 + $0x38c] sm:$0xf] %v669_v35  ;;  %672 = vst [vmem:[%s5533_s6 + $0x390] sm:$0xf] %v671_v36 }
  0xac   : > { %674 = vst [vmem:[%s5533_s6 + $0x394] sm:$0xf] %v673_v37  ;;  %v675_v38 = vld [vmem:[%s5529_s5 + $0x730] sm:$0xf]  ;;  %v677_v39 = vld [vmem:[%s5529_s5 + $0x738] sm:$0xf] }
  0xad   : > { %v679_v40 = vld [vmem:[%s5529_s5 + $0x740] sm:$0xf]  ;;  %676 = vst [vmem:[%s5533_s6 + $0x398] sm:$0xf] %v675_v38  ;;  %678 = vst [vmem:[%s5533_s6 + $0x39c] sm:$0xf] %v677_v39 }
  0xae   : > { %680 = vst [vmem:[%s5533_s6 + $0x3a0] sm:$0xf] %v679_v40  ;;  %v681_v41 = vld [vmem:[%s5529_s5 + $0x748] sm:$0xf]  ;;  %v683_v42 = vld [vmem:[%s5529_s5 + $0x750] sm:$0xf] }
  0xaf   : > { %v685_v43 = vld [vmem:[%s5529_s5 + $0x758] sm:$0xf]  ;;  %682 = vst [vmem:[%s5533_s6 + $0x3a4] sm:$0xf] %v681_v41  ;;  %684 = vst [vmem:[%s5533_s6 + $0x3a8] sm:$0xf] %v683_v42 }
  0xb0   : > { %686 = vst [vmem:[%s5533_s6 + $0x3ac] sm:$0xf] %v685_v43  ;;  %v687_v44 = vld [vmem:[%s5529_s5 + $0x760] sm:$0xf]  ;;  %v689_v45 = vld [vmem:[%s5529_s5 + $0x768] sm:$0xf] }
  0xb1   : > { %v691_v46 = vld [vmem:[%s5529_s5 + $0x770] sm:$0xf]  ;;  %688 = vst [vmem:[%s5533_s6 + $0x3b0] sm:$0xf] %v687_v44  ;;  %690 = vst [vmem:[%s5533_s6 + $0x3b4] sm:$0xf] %v689_v45 }
  0xb2   : > { %692 = vst [vmem:[%s5533_s6 + $0x3b8] sm:$0xf] %v691_v46  ;;  %v693_v47 = vld [vmem:[%s5529_s5 + $0x778] sm:$0xf]  ;;  %v695_v48 = vld [vmem:[%s5529_s5 + $0x780] sm:$0xf] }
  0xb3   : > { %v697_v49 = vld [vmem:[%s5529_s5 + $0x788] sm:$0xf]  ;;  %694 = vst [vmem:[%s5533_s6 + $0x3bc] sm:$0xf] %v693_v47  ;;  %696 = vst [vmem:[%s5533_s6 + $0x3c0] sm:$0xf] %v695_v48 }
  0xb4   : > { %698 = vst [vmem:[%s5533_s6 + $0x3c4] sm:$0xf] %v697_v49  ;;  %v699_v50 = vld [vmem:[%s5529_s5 + $0x790] sm:$0xf]  ;;  %v701_v51 = vld [vmem:[%s5529_s5 + $0x798] sm:$0xf] }
  0xb5   : > { %v703_v52 = vld [vmem:[%s5529_s5 + $0x7a0] sm:$0xf]  ;;  %700 = vst [vmem:[%s5533_s6 + $0x3c8] sm:$0xf] %v699_v50  ;;  %702 = vst [vmem:[%s5533_s6 + $0x3cc] sm:$0xf] %v701_v51 }
  0xb6   : > { %704 = vst [vmem:[%s5533_s6 + $0x3d0] sm:$0xf] %v703_v52  ;;  %v705_v53 = vld [vmem:[%s5529_s5 + $0x7a8] sm:$0xf]  ;;  %v707_v54 = vld [vmem:[%s5529_s5 + $0x7b0] sm:$0xf] }
  0xb7   : > { %v709_v55 = vld [vmem:[%s5529_s5 + $0x7b8] sm:$0xf]  ;;  %706 = vst [vmem:[%s5533_s6 + $0x3d4] sm:$0xf] %v705_v53  ;;  %708 = vst [vmem:[%s5533_s6 + $0x3d8] sm:$0xf] %v707_v54 }
  0xb8   : > { %710 = vst [vmem:[%s5533_s6 + $0x3dc] sm:$0xf] %v709_v55  ;;  %v711_v56 = vld [vmem:[%s5529_s5 + $0x7c0] sm:$0xf]  ;;  %v713_v57 = vld [vmem:[%s5529_s5 + $0x7c8] sm:$0xf] }
  0xb9   : > { %v715_v58 = vld [vmem:[%s5529_s5 + $0x7d0] sm:$0xf]  ;;  %712 = vst [vmem:[%s5533_s6 + $0x3e0] sm:$0xf] %v711_v56  ;;  %714 = vst [vmem:[%s5533_s6 + $0x3e4] sm:$0xf] %v713_v57 }
  0xba   : > { %716 = vst [vmem:[%s5533_s6 + $0x3e8] sm:$0xf] %v715_v58  ;;  %v717_v59 = vld [vmem:[%s5529_s5 + $0x7d8] sm:$0xf]  ;;  %v719_v60 = vld [vmem:[%s5529_s5 + $0x7e0] sm:$0xf] }
  0xbb   : > { %v721_v61 = vld [vmem:[%s5529_s5 + $0x7e8] sm:$0xf]  ;;  %718 = vst [vmem:[%s5533_s6 + $0x3ec] sm:$0xf] %v717_v59  ;;  %720 = vst [vmem:[%s5533_s6 + $0x3f0] sm:$0xf] %v719_v60 }
  0xbc   : > { %722 = vst [vmem:[%s5533_s6 + $0x3f4] sm:$0xf] %v721_v61  ;;  %v723_v62 = vld [vmem:[%s5529_s5 + $0x7f0] sm:$0xf]  ;;  %v725_v63 = vld [vmem:[%s5529_s5 + $0x7f8] sm:$0xf] }
  0xbd   : > { %724 = vst [vmem:[%s5533_s6 + $0x3f8] sm:$0xf] %v723_v62  ;;  %726 = vst [vmem:[%s5533_s6 + $0x3fc] sm:$0xf] %v725_v63 }
  0xbe PF: > { %p4390_p8 = scmp.ge.s32.totalorder %s5454_s19, 1  ;;  %p1273_p9 = scmp.lt.s32.totalorder %s5454_s19, 3 }
  0xc0   : > { %p1274_p10 = pnand %p4390_p8, %p1273_p9 }
  0xc1   : > { %s1280_s7 = sand.u32 (!%p1274_p10), 1, %s5438_s15   ;;  %p1323_p11 = scmp.lt.s32.totalorder (!%p1274_p10), %s5446_s17, 1 }
  0xc2   : > { %1277 = sbr.rel (%p1274_p10) target bundleno = 768 (0x300), region = 73  ;;  %s4391_s14 = sshll.u32 (!%p1274_p10), %s1280_s7, 10 }
  0xc3   : > { %s6074_s23 = scalar_lea.vmem (!%p1274_p10), [#allocation2], %s4391_s14  ;;  %s6837_s11 = sshll.u32 (!%p1274_p10), %s1280_s7, 6 }
  0xc4   : > { %s6856_s15 = scalar_lea.vmem (!%p1274_p10), [#allocation3], %s6837_s11 }
  0xc7   : > { %v6051_v0 = vld [vmem:[%s6903_s0] sm:$0xff]  ;;  %v6061_v2 = vld [vmem:[%s6903_s0 + $0x8] sm:$0xff]  ;;  %v5286_v6 = vld [vmem:[%s6074_s23 + $0x78] sm:$0xff]   ;;  %s6825_s29 = scalar_select %p1323_p11, %s5446_s17, 1 }
  0xc8   : > { %v6056_v1 = vld [vmem:[%s6903_s0 + $0x40] sm:$0xff]  ;;  %v6070_v4 = vld [vmem:[%s6903_s0 + $0x48] sm:$0xff]  ;;  %v5287_v7 = vld [vmem:[%s6074_s23 + $0xf8] sm:$0xff]   ;;  %4734 = vmatprep.subr.bf16.mxu0 %v5286_v6  ;;  %s4668_s7 = sshll.u32 (%p5516_p6), %s5446_s17, 2 }
  0xc9   : > { %v4394_v3 = vcombine.high %v6051_v0, %v6056_v1  ;;  %v4396_v5 = vcombine.high %v6061_v2, %v6070_v4  ;;  %v5288_v8 = vld [vmem:[%s6074_s23 + $0x38] sm:$0xff]   ;;  %4798 = vmatprep.subr.bf16.mxu1 %v5287_v7  ;;  %v5290_v10 = vld [vmem:[%s6074_s23 + $0x70] sm:$0xff]   ;;  %v5294_v14 = vld [vmem:[%s6074_s23 + $0x68] sm:$0xff]   ;;  %v4393_v42 = vcombine.low %v6051_v0, %v6056_v1  ;;  %v4395_v43 = vcombine.low %v6061_v2, %v6070_v4  ;;  %s1325_s6 = scalar_lea.vmem %s6905_s2, %s6825_s29  ;;  %s1328_s10 = scalar_lea.vmem %s6906_s3, %s6825_s29 }
  0xca   : > { %v5289_v9 = vld [vmem:[%s6074_s23 + $0xb8] sm:$0xff]   ;;  %4735 = vmatpush3.bf16.msra.mxu0 %v5288_v8  ;;  %v5291_v11 = vld [vmem:[%s6074_s23 + $0xf0] sm:$0xff]   ;;  %v5295_v15 = vld [vmem:[%s6074_s23 + $0xe8] sm:$0xff]   ;;  %s4181_s13 = scalar_lea.vmem (%p5516_p6), %s6907_s4, %s4668_s7 }
  0xcb   : > { %3155 = vmatprep.mubr.bf16.mxu0 %v4394_v3  ;;  %3252 = vmatprep.mubr.bf16.mxu1 %v4396_v5  ;;  %v5292_v12 = vld [vmem:[%s6074_s23 + $0x30] sm:$0xff]   ;;  %v5296_v16 = vld [vmem:[%s6074_s23 + $0x28] sm:$0xff]   ;;  %v5298_v18 = vld [vmem:[%s6074_s23 + $0x60] sm:$0xff]  }
  0xcc   : > { %4799 = vmatpush3.bf16.msra.mxu1 %v5289_v9  ;;  %4736 = vmatprep.subr.bf16.mxu0 %v5290_v10  ;;  %v5293_v13 = vld [vmem:[%s6074_s23 + $0xb0] sm:$0xff]   ;;  %v5297_v17 = vld [vmem:[%s6074_s23 + $0xa8] sm:$0xff]   ;;  %v5299_v19 = vld [vmem:[%s6074_s23 + $0xe0] sm:$0xff]  }
  0xcd   : > { %4800 = vmatprep.subr.bf16.mxu1 %v5291_v11  ;;  %v5300_v20 = vld [vmem:[%s6074_s23 + $0x20] sm:$0xff]   ;;  %v5302_v22 = vld [vmem:[%s6074_s23 + $0x58] sm:$0xff]   ;;  %v5306_v26 = vld [vmem:[%s6074_s23 + $0x50] sm:$0xff]  }
  0xce   : > { %4737 = vmatpush3.bf16.msra.mxu0 %v5292_v12  ;;  %v5301_v21 = vld [vmem:[%s6074_s23 + $0xa0] sm:$0xff]   ;;  %v5303_v23 = vld [vmem:[%s6074_s23 + $0xd8] sm:$0xff]   ;;  %v5307_v27 = vld [vmem:[%s6074_s23 + $0xd0] sm:$0xff]  }
  0xcf   : > { %4738 = vmatprep.subr.bf16.mxu0 %v5294_v14  ;;  %v5304_v24 = vld [vmem:[%s6074_s23 + $0x18] sm:$0xff]   ;;  %v5308_v28 = vld [vmem:[%s6074_s23 + $0x10] sm:$0xff]   ;;  %v5310_v30 = vld [vmem:[%s6074_s23 + $0x48] sm:$0xff]  }
  0xd0   : > { %4801 = vmatpush3.bf16.msra.mxu1 %v5293_v13  ;;  %v5305_v25 = vld [vmem:[%s6074_s23 + $0x98] sm:$0xff]   ;;  %v5309_v29 = vld [vmem:[%s6074_s23 + $0x90] sm:$0xff]   ;;  %v5311_v31 = vld [vmem:[%s6074_s23 + $0xc8] sm:$0xff]  }
  0xd1   : > { %4802 = vmatprep.subr.bf16.mxu1 %v5295_v15  ;;  %v5312_v32 = vld [vmem:[%s6074_s23 + $0x8] sm:$0xff]   ;;  %v5314_v34 = vld [vmem:[%s6074_s23 + $0x40] sm:$0xff]   ;;  %v5318_v44 = vld [vmem:[%s6074_s23 + $0x178] sm:$0xff]  }
  0xd2   : > { %4739 = vmatpush3.bf16.msra.mxu0 %v5296_v16  ;;  %v5313_v33 = vld [vmem:[%s6074_s23 + $0x88] sm:$0xff]   ;;  %v1347_v35 = vld [vmem:[%s6903_s0 + $0x80] sm:$0xff]  ;;  %v5319_v45 = vld [vmem:[%s6074_s23 + $0x138] sm:$0xff]  }
  0xd3   : > { %4740 = vmatprep.subr.bf16.mxu0 %v5298_v18  ;;  %v1355_v36 = vld [vmem:[%s6903_s0 + $0xc0] sm:$0xff]  ;;  %v1348_v38 = vld [vmem:[%s6903_s0 + $0x88] sm:$0xff]  ;;  %v5320_v47 = vld [vmem:[%s6074_s23 + $0x1f8] sm:$0xff]  }
  0xd4   : > { %4803 = vmatpush3.bf16.msra.mxu1 %v5297_v17  ;;  %v5315_v37 = vld [vmem:[%s6074_s23 + $0xc0] sm:$0xff]   ;;  %v1356_v39 = vld [vmem:[%s6903_s0 + $0xc8] sm:$0xff]  ;;  %v4410_v46 = vcombine.high %v1347_v35, %v1355_v36  ;;  %v5321_v49 = vld [vmem:[%s6074_s23 + $0x1b8] sm:$0xff]   ;;  %v4409_v54 = vcombine.low %v1347_v35, %v1355_v36 }
  0xd5   : > { %4804 = vmatprep.subr.bf16.mxu1 %v5299_v19  ;;  %v5316_v40 = vld [vmem:[%s6074_s23] sm:$0xff]   ;;  %v4412_v48 = vcombine.high %v1348_v38, %v1356_v39  ;;  %v5322_v50 = vld [vmem:[%s6074_s23 + $0x170] sm:$0xff]   ;;  %v4411_v56 = vcombine.low %v1348_v38, %v1356_v39  ;;  %v1364_v58 = vld [vmem:[%s6903_s0 + $0x108] sm:$0xff] }
  0xd6   : > { %4741 = vmatpush3.bf16.msra.mxu0 %v5300_v20  ;;  %v5317_v41 = vld [vmem:[%s6074_s23 + $0x80] sm:$0xff]   ;;  %v5323_v52 = vld [vmem:[%s6074_s23 + $0x130] sm:$0xff]   ;;  %v1372_v59 = vld [vmem:[%s6903_s0 + $0x148] sm:$0xff] }
  0xd7   : > { %4742 = vmatprep.subr.bf16.mxu0 %v5302_v22  ;;  %v1363_v51 = vld [vmem:[%s6903_s0 + $0x100] sm:$0xff]  ;;  %v5324_v53 = vld [vmem:[%s6074_s23 + $0x1f0] sm:$0xff]   ;;  %v4428_v61 = vcombine.high %v1364_v58, %v1372_v59  ;;  %v5326_v62 = vld [vmem:[%s6074_s23 + $0x168] sm:$0xff]   ;;  %v4427_v8 = vcombine.low %v1364_v58, %v1372_v59 }
  0xd8   : > { %4805 = vmatpush3.bf16.msra.mxu1 %v5301_v21  ;;  %v5325_v55 = vld [vmem:[%s6074_s23 + $0x1b0] sm:$0xff]   ;;  %v1371_v57 = vld [vmem:[%s6903_s0 + $0x140] sm:$0xff]  ;;  %v5327_v63 = vld [vmem:[%s6074_s23 + $0x128] sm:$0xff]  }
  0xd9   : > { %4806 = vmatprep.subr.bf16.mxu1 %v5303_v23  ;;  %v4426_v60 = vcombine.high %v1363_v51, %v1371_v57  ;;  %v5328_v0 = vld [vmem:[%s6074_s23 + $0x1e8] sm:$0xff]   ;;  %v1379_v2 = vld [vmem:[%s6903_s0 + $0x180] sm:$0xff]  ;;  %v4425_v6 = vcombine.low %v1363_v51, %v1371_v57  ;;  %v5334_v18 = vld [vmem:[%s6074_s23 + $0x158] sm:$0xff]  }
  0xda   : > { %4743 = vmatpush3.bf16.msra.mxu0 %v5304_v24  ;;  %v5329_v1 = vld [vmem:[%s6074_s23 + $0x1a8] sm:$0xff]   ;;  %v1387_v3 = vld [vmem:[%s6903_s0 + $0x1c0] sm:$0xff]  ;;  %v5335_v19 = vld [vmem:[%s6074_s23 + $0x118] sm:$0xff]  }
  0xdb   : > { %4744 = vmatprep.subr.bf16.mxu0 %v5306_v26  ;;  %v1380_v4 = vld [vmem:[%s6903_s0 + $0x188] sm:$0xff]  ;;  %v5330_v7 = vld [vmem:[%s6074_s23 + $0x160] sm:$0xff]   ;;  %v4442_v9 = vcombine.high %v1379_v2, %v1387_v3  ;;  %v5336_v20 = vld [vmem:[%s6074_s23 + $0x1d8] sm:$0xff]   ;;  %v4441_v21 = vcombine.low %v1379_v2, %v1387_v3 }
  0xdc   : > { %4807 = vmatpush3.bf16.msra.mxu1 %v5305_v25  ;;  %v1388_v5 = vld [vmem:[%s6903_s0 + $0x1c8] sm:$0xff]  ;;  %v5331_v10 = vld [vmem:[%s6074_s23 + $0x120] sm:$0xff]   ;;  %v5337_v22 = vld [vmem:[%s6074_s23 + $0x198] sm:$0xff]  }
  0xdd   : > { %4808 = vmatprep.subr.bf16.mxu1 %v5307_v27  ;;  %v4444_v11 = vcombine.high %v1380_v4, %v1388_v5  ;;  %v5332_v12 = vld [vmem:[%s6074_s23 + $0x1e0] sm:$0xff]   ;;  %v1396_v16 = vld [vmem:[%s6903_s0 + $0x208] sm:$0xff]  ;;  %v4443_v23 = vcombine.low %v1380_v4, %v1388_v5  ;;  %v5338_v26 = vld [vmem:[%s6074_s23 + $0x150] sm:$0xff]  }
  0xde   : > { %4745 = vmatpush3.bf16.msra.mxu0 %v5308_v28  ;;  %v5333_v13 = vld [vmem:[%s6074_s23 + $0x1a0] sm:$0xff]   ;;  %v1404_v17 = vld [vmem:[%s6903_s0 + $0x248] sm:$0xff]  ;;  %v5339_v27 = vld [vmem:[%s6074_s23 + $0x110] sm:$0xff]  }
  0xdf   : > { %4746 = vmatprep.subr.bf16.mxu0 %v5310_v30  ;;  %v1395_v14 = vld [vmem:[%s6903_s0 + $0x200] sm:$0xff]  ;;  %v4460_v25 = vcombine.high %v1396_v16, %v1404_v17  ;;  %v5340_v28 = vld [vmem:[%s6074_s23 + $0x1d0] sm:$0xff]   ;;  %v5342_v35 = vld [vmem:[%s6074_s23 + $0x148] sm:$0xff]   ;;  %v4459_v36 = vcombine.low %v1396_v16, %v1404_v17 }
  0xe0   : > { %4809 = vmatpush3.bf16.msra.mxu1 %v5309_v29  ;;  %v1403_v15 = vld [vmem:[%s6903_s0 + $0x240] sm:$0xff]  ;;  %v5341_v29 = vld [vmem:[%s6074_s23 + $0x190] sm:$0xff]   ;;  %v5343_v38 = vld [vmem:[%s6074_s23 + $0x108] sm:$0xff]  }
  0xe1   : > { %4810 = vmatprep.subr.bf16.mxu1 %v5311_v31  ;;  %v4458_v24 = vcombine.high %v1395_v14, %v1403_v15  ;;  %v1411_v30 = vld [vmem:[%s6903_s0 + $0x280] sm:$0xff]  ;;  %v1444_v58 = vld [vmem:[%s6903_s0 + $0x388] sm:$0xff]  ;;  %v1334_v2 = vld [vmem:[%s6903_s0 + $0x18] sm:$0xff] }
  0xe2   : > { %4747 = vmatpush3.bf16.msra.mxu0 %v5312_v32  ;;  %v1419_v31 = vld [vmem:[%s6903_s0 + $0x2c0] sm:$0xff]  ;;  %v1412_v32 = vld [vmem:[%s6903_s0 + $0x288] sm:$0xff]  ;;  %v1342_v3 = vld [vmem:[%s6903_s0 + $0x58] sm:$0xff] }
  0xe3   : > { %4748 = vmatprep.subr.bf16.mxu0 %v5314_v34  ;;  %v4457_v34 = vcombine.low %v1395_v14, %v1403_v15  ;;  %v1451_v57 = vld [vmem:[%s6903_s0 + $0x3c0] sm:$0xff]  ;;  %v1452_v59 = vld [vmem:[%s6903_s0 + $0x3c8] sm:$0xff]  ;;  %v5351_v14 = vld [vmem:[%s6074_s23 + $0x238] sm:$0xff]  }
  0xe4   : > { %4811 = vmatpush3.bf16.msra.mxu1 %v5313_v33  ;;  %v1420_v33 = vld [vmem:[%s6903_s0 + $0x2c8] sm:$0xff]  ;;  %v4507_v5 = vcombine.low %v1444_v58, %v1452_v59  ;;  %v5353_v15 = vld [vmem:[%s6074_s23 + $0x2b8] sm:$0xff]  }
  0xe5   : > { %4812 = vmatprep.subr.bf16.mxu1 %v5315_v37  ;;  %v4474_v37 = vcombine.high %v1411_v30, %v1419_v31  ;;  %v4476_v39 = vcombine.high %v1412_v32, %v1420_v33  ;;  %v4475_v51 = vcombine.low %v1412_v32, %v1420_v33  ;;  %v5361_v33 = vld [vmem:[%s6074_s23 + $0x2a8] sm:$0xff]  }
  0xe6   : > { %4749 = vmatpush3.bf16.msra.mxu0 %v5316_v40  ;;  %v5344_v40 = vld [vmem:[%s6074_s23 + $0x1c8] sm:$0xff]  }
  0xe7   : > { %4862 = vmatprep.subr.bf16.mxu0 %v5318_v44  ;;  %v1428_v44 = vld [vmem:[%s6903_s0 + $0x308] sm:$0xff] }
  0xe8   : > { %4813 = vmatpush3.bf16.msra.mxu1 %v5317_v41  ;;  %v5345_v41 = vld [vmem:[%s6074_s23 + $0x188] sm:$0xff]  }
  0xe9   : > { %3156 = vmatmul.mubr.bf16.vlgmr.msra.gmra.mxu0 %v4393_v42  ;;  %4926 = vmatprep.subr.bf16.mxu1 %v5320_v47  ;;  %v1427_v42 = vld [vmem:[%s6903_s0 + $0x300] sm:$0xff] }
  0xea   : > { %4863 = vmatpush3.bf16.msra.mxu0 %v5319_v45  ;;  %3163 = vmatprep.mubr.bf16.mxu0 %v4410_v46  ;;  %v1436_v45 = vld [vmem:[%s6903_s0 + $0x348] sm:$0xff]  ;;  %v5346_v46 = vld [vmem:[%s6074_s23 + $0x140] sm:$0xff]  }
  0xeb   : > { %3253 = vmatmul.mubr.bf16.vlgmr.msra.gmra.mxu1 %v4395_v43  ;;  %4864 = vmatprep.subr.bf16.mxu0 %v5322_v50  ;;  %v1435_v43 = vld [vmem:[%s6903_s0 + $0x340] sm:$0xff] }
  0xec   : > { %4927 = vmatpush3.bf16.msra.mxu1 %v5321_v49  ;;  %3260 = vmatprep.mubr.bf16.mxu1 %v4412_v48  ;;  %v5347_v47 = vld [vmem:[%s6074_s23 + $0x100] sm:$0xff]   ;;  %v4473_v49 = vcombine.low %v1411_v30, %v1419_v31  ;;  %v5359_v31 = vld [vmem:[%s6074_s23 + $0x228] sm:$0xff]  }
  0xed   : > { %4928 = vmatprep.subr.bf16.mxu1 %v5324_v53  ;;  %v5348_v48 = vld [vmem:[%s6074_s23 + $0x1c0] sm:$0xff]   ;;  %v4492_v53 = vcombine.high %v1428_v44, %v1436_v45 }
  0xee   : > { %4865 = vmatpush3.bf16.msra.mxu0 %v5323_v52  ;;  %v5349_v50 = vld [vmem:[%s6074_s23 + $0x180] sm:$0xff]   ;;  %v4490_v52 = vcombine.high %v1427_v42, %v1435_v43 }
  0xef   : > { %4866 = vmatprep.subr.bf16.mxu0 %v5326_v62 }
  0xf0   : > { %4929 = vmatpush3.bf16.msra.mxu1 %v5325_v55  ;;  %v5352_v55 = vld [vmem:[%s6074_s23 + $0x2f8] sm:$0xff]  }
  0xf1   : > { %3164 = vmatmul.mubr.bf16.gmra.mxu0 %v4409_v54  ;;  %4930 = vmatprep.subr.bf16.mxu1 %v5328_v0  ;;  %v5350_v54 = vld [vmem:[%s6074_s23 + $0x278] sm:$0xff]   ;;  %v1333_v0 = vld [vmem:[%s6903_s0 + $0x10] sm:$0xff] }
  0xf2   : > { %3171 = vmatprep.mubr.bf16.mxu0 %v4426_v60  ;;  %4867 = vmatpush3.bf16.msra.mxu0 %v5327_v63  ;;  %v4489_v60 = vcombine.low %v1427_v42, %v1435_v43  ;;  %v4508_v63 = vcombine.high %v1444_v58, %v1452_v59  ;;  %v5366_v42 = vld [vmem:[%s6074_s23 + $0x258] sm:$0xff]   ;;  %v5374_v58 = vld [vmem:[%s6074_s23 + $0x248] sm:$0xff]  }
  0xf3   : > { %3261 = vmatmul.mubr.bf16.gmra.mxu1 %v4411_v56  ;;  %4868 = vmatprep.subr.bf16.mxu0 %v5330_v7  ;;  %v1443_v56 = vld [vmem:[%s6903_s0 + $0x380] sm:$0xff]  ;;  %v4400_v7 = vcombine.high %v1334_v2, %v1342_v3 }
  0xf4   : > { %3268 = vmatprep.mubr.bf16.mxu1 %v4428_v61  ;;  %4931 = vmatpush3.bf16.msra.mxu1 %v5329_v1  ;;  %v4491_v61 = vcombine.low %v1428_v44, %v1436_v45  ;;  %v4506_v62 = vcombine.high %v1443_v56, %v1451_v57  ;;  %v1341_v1 = vld [vmem:[%s6903_s0 + $0x50] sm:$0xff]  ;;  %v4505_v4 = vcombine.low %v1443_v56, %v1451_v57  ;;  %v5368_v44 = vld [vmem:[%s6074_s23 + $0x2d8] sm:$0xff]  }
  0xf5   : > { %4932 = vmatprep.subr.bf16.mxu1 %v5332_v12  ;;  %v1358_v12 = vld [vmem:[%s6903_s0 + $0xd8] sm:$0xff]  ;;  %v5371_v56 = vld [vmem:[%s6074_s23 + $0x210] sm:$0xff]  }
  0xf6   : > { %4869 = vmatpush3.bf16.msra.mxu0 %v5331_v10  ;;  %v1350_v10 = vld [vmem:[%s6903_s0 + $0x98] sm:$0xff]  ;;  %v5373_v57 = vld [vmem:[%s6074_s23 + $0x290] sm:$0xff]  }
  0xf7   : > { %4870 = vmatprep.subr.bf16.mxu0 %v5334_v18  ;;  %v4416_v17 = vcombine.high %v1350_v10, %v1358_v12  ;;  %v5354_v18 = vld [vmem:[%s6074_s23 + $0x270] sm:$0xff]  }
  0xf8   : > { %4933 = vmatpush3.bf16.msra.mxu1 %v5333_v13  ;;  %v4399_v13 = vcombine.low %v1334_v2, %v1342_v3  ;;  %v5378_v2 = vld [vmem:[%s6074_s23 + $0x240] sm:$0xff]   ;;  %v1413_v3 = vld [vmem:[%s6903_s0 + $0x290] sm:$0xff] }
  0xf9   : > { %3172 = vmatmul.mubr.bf16.gmra.mxu0 %v4425_v6  ;;  %4934 = vmatprep.subr.bf16.mxu1 %v5336_v20  ;;  %v4398_v6 = vcombine.high %v1333_v0, %v1341_v1  ;;  %v5356_v20 = vld [vmem:[%s6074_s23 + $0x2f0] sm:$0xff]  }
  0xfa   : > { %3179 = vmatprep.mubr.bf16.mxu0 %v4442_v9  ;;  %4871 = vmatpush3.bf16.msra.mxu0 %v5335_v19  ;;  %v1357_v9 = vld [vmem:[%s6903_s0 + $0xd0] sm:$0xff] }
  0xfb   : > { %3269 = vmatmul.mubr.bf16.gmra.mxu1 %v4427_v8  ;;  %4872 = vmatprep.subr.bf16.mxu0 %v5338_v26  ;;  %v1349_v8 = vld [vmem:[%s6903_s0 + $0x90] sm:$0xff]  ;;  %v5358_v26 = vld [vmem:[%s6074_s23 + $0x268] sm:$0xff]  }
  0xfc   : > { %3276 = vmatprep.mubr.bf16.mxu1 %v4444_v11  ;;  %4935 = vmatpush3.bf16.msra.mxu1 %v5337_v22  ;;  %v4397_v11 = vcombine.low %v1333_v0, %v1341_v1  ;;  %v4414_v16 = vcombine.high %v1349_v8, %v1357_v9  ;;  %v5355_v19 = vld [vmem:[%s6074_s23 + $0x230] sm:$0xff]   ;;  %v5377_v1 = vld [vmem:[%s6074_s23 + $0x288] sm:$0xff]  }
  0xfd   : > { %4936 = vmatprep.subr.bf16.mxu1 %v5340_v28  ;;  %v1365_v22 = vld [vmem:[%s6903_s0 + $0x110] sm:$0xff]  ;;  %v4413_v28 = vcombine.low %v1349_v8, %v1357_v9  ;;  %v5379_v8 = vld [vmem:[%s6074_s23 + $0x200] sm:$0xff]  }
  0xfe   : > { %4873 = vmatpush3.bf16.msra.mxu0 %v5339_v27  ;;  %v5360_v27 = vld [vmem:[%s6074_s23 + $0x2e8] sm:$0xff]   ;;  %v5381_v9 = vld [vmem:[%s6074_s23 + $0x280] sm:$0xff]  }
  0xff   : > { %4874 = vmatprep.subr.bf16.mxu0 %v5342_v35  ;;  %v1381_v35 = vld [vmem:[%s6903_s0 + $0x190] sm:$0xff] }
 0x100   : > { %4937 = vmatpush3.bf16.msra.mxu1 %v5341_v29  ;;  %v4415_v29 = vcombine.low %v1350_v10, %v1358_v12  ;;  %v5382_v10 = vld [vmem:[%s6074_s23 + $0x378] sm:$0xff]  }
 0x101   : > { %3180 = vmatmul.mubr.bf16.gmra.mxu0 %v4441_v21  ;;  %4938 = vmatprep.subr.bf16.mxu1 %v5344_v40  ;;  %v5357_v21 = vld [vmem:[%s6074_s23 + $0x2b0] sm:$0xff]   ;;  %v5363_v40 = vld [vmem:[%s6074_s23 + $0x220] sm:$0xff]   ;;  %v5384_v12 = vld [vmem:[%s6074_s23 + $0x3f8] sm:$0xff]  }
 0x102   : > { %3187 = vmatprep.mubr.bf16.mxu0 %v4458_v24  ;;  %4875 = vmatpush3.bf16.msra.mxu0 %v5343_v38  ;;  %v1366_v24 = vld [vmem:[%s6903_s0 + $0x118] sm:$0xff] }
 0x103   : > { %3277 = vmatmul.mubr.bf16.gmra.mxu1 %v4443_v23  ;;  %4876 = vmatprep.subr.bf16.mxu0 %v5346_v46  ;;  %v1373_v23 = vld [vmem:[%s6903_s0 + $0x150] sm:$0xff]  ;;  %v1382_v38 = vld [vmem:[%s6903_s0 + $0x198] sm:$0xff] }
 0x104   : > { %3284 = vmatprep.mubr.bf16.mxu1 %v4460_v25  ;;  %4939 = vmatpush3.bf16.msra.mxu1 %v5345_v41  ;;  %v1374_v25 = vld [vmem:[%s6903_s0 + $0x158] sm:$0xff]  ;;  %v4430_v30 = vcombine.high %v1365_v22, %v1373_v23  ;;  %v5365_v41 = vld [vmem:[%s6074_s23 + $0x2a0] sm:$0xff]   ;;  %v4429_v43 = vcombine.low %v1365_v22, %v1373_v23 }
 0x105   : > { %4940 = vmatprep.subr.bf16.mxu1 %v5348_v48  ;;  %v4432_v32 = vcombine.high %v1366_v24, %v1374_v25  ;;  %v4431_v45 = vcombine.low %v1366_v24, %v1374_v25  ;;  %v5367_v48 = vld [vmem:[%s6074_s23 + $0x218] sm:$0xff]   ;;  %v1445_v24 = vld [vmem:[%s6903_s0 + $0x390] sm:$0xff] }
 0x106   : > { %4877 = vmatpush3.bf16.msra.mxu0 %v5347_v47  ;;  %v1453_v25 = vld [vmem:[%s6903_s0 + $0x3d0] sm:$0xff] }
 0x107   : > { %4990 = vmatprep.subr.bf16.mxu0 %v5350_v54  ;;  %v1398_v54 = vld [vmem:[%s6903_s0 + $0x218] sm:$0xff] }
 0x108   : > { %4941 = vmatpush3.bf16.msra.mxu1 %v5349_v50  ;;  %v5370_v50 = vld [vmem:[%s6074_s23 + $0x250] sm:$0xff]  }
 0x109   : > { %3188 = vmatmul.mubr.bf16.gmra.mxu0 %v4457_v34  ;;  %5054 = vmatprep.subr.bf16.mxu1 %v5352_v55  ;;  %v5362_v34 = vld [vmem:[%s6074_s23 + $0x260] sm:$0xff]   ;;  %v1406_v55 = vld [vmem:[%s6903_s0 + $0x258] sm:$0xff] }
 0x10a   : > { %3195 = vmatprep.mubr.bf16.mxu0 %v4474_v37  ;;  %v5364_v37 = vld [vmem:[%s6074_s23 + $0x2e0] sm:$0xff]   ;;  %v4464_v0 = vcombine.high %v1398_v54, %v1406_v55 }
 0x10b   : > { %3285 = vmatmul.mubr.bf16.gmra.mxu1 %v4459_v36  ;;  %v1389_v36 = vld [vmem:[%s6903_s0 + $0x1d0] sm:$0xff] }
 0x10c   : > { %3292 = vmatprep.mubr.bf16.mxu1 %v4476_v39  ;;  %v1390_v39 = vld [vmem:[%s6903_s0 + $0x1d8] sm:$0xff]  ;;  %v4446_v46 = vcombine.high %v1381_v35, %v1389_v36  ;;  %v4445_v59 = vcombine.low %v1381_v35, %v1389_v36  ;;  %v1344_v35 = vld [vmem:[%s6903_s0 + $0x68] sm:$0xff]  ;;  %v4509_v36 = vcombine.low %v1445_v24, %v1453_v25 }
 0x10d   : > { %v4448_v47 = vcombine.high %v1382_v38, %v1390_v39 }
 0x111   : > { %3196 = vmatmul.mubr.bf16.gmra.mxu0 %v4473_v49  ;;  %v5369_v49 = vld [vmem:[%s6074_s23 + $0x298] sm:$0xff]  }
 0x112   : > { %3203 = vmatprep.mubr.bf16.mxu0 %v4490_v52  ;;  %v1405_v52 = vld [vmem:[%s6903_s0 + $0x250] sm:$0xff] }
 0x113   : > { %3293 = vmatmul.mubr.bf16.gmra.mxu1 %v4475_v51  ;;  %v1397_v51 = vld [vmem:[%s6903_s0 + $0x210] sm:$0xff] }
 0x114   : > { %3300 = vmatprep.mubr.bf16.mxu1 %v4492_v53  ;;  %v5372_v53 = vld [vmem:[%s6074_s23 + $0x2d0] sm:$0xff]  }
 0x119   : > { %3204 = vmatmul.mubr.bf16.gmra.mxu0 %v4489_v60  ;;  %v5376_v60 = vld [vmem:[%s6074_s23 + $0x2c8] sm:$0xff]  }
 0x11a   : > { %3211 = vmatprep.mubr.bf16.mxu0 %v4506_v62  ;;  %v4462_v62 = vcombine.high %v1397_v51, %v1405_v52 }
 0x11b   : > { %3301 = vmatmul.mubr.bf16.gmra.mxu1 %v4491_v61  ;;  %v4447_v61 = vcombine.low %v1382_v38, %v1390_v39 }
 0x11c   : > { %3308 = vmatprep.mubr.bf16.mxu1 %v4508_v63  ;;  %v5375_v63 = vld [vmem:[%s6074_s23 + $0x208] sm:$0xff]  }
 0x121   : > { %3212 = vmatmul.mubr.bf16.gmra.mxu0 %v4505_v4  ;;  %v1421_v4 = vld [vmem:[%s6903_s0 + $0x2d0] sm:$0xff] }
 0x122   : > { %3349 = vmatprep.mubr.bf16.mxu0 %v4398_v6  ;;  %v1414_v6 = vld [vmem:[%s6903_s0 + $0x298] sm:$0xff] }
 0x123   : > { %3309 = vmatmul.mubr.bf16.gmra.mxu1 %v4507_v5  ;;  %v5380_v5 = vld [vmem:[%s6074_s23 + $0x2c0] sm:$0xff]  }
 0x124   : > { %3446 = vmatprep.mubr.bf16.mxu1 %v4400_v7  ;;  %v1422_v7 = vld [vmem:[%s6903_s0 + $0x2d8] sm:$0xff] }
 0x129   : > { %3350 = vmatmul.mubr.bf16.vlgmr.msra.gmra.mxu0 %v4397_v11  ;;  %v4461_v11 = vcombine.low %v1397_v51, %v1405_v52  ;;  %v5388_v51 = vld [vmem:[%s6074_s23 + $0x3f0] sm:$0xff]  }
 0x12a   : > { %4991 = vmatpush3.bf16.msra.mxu0 %v5351_v14  ;;  %3357 = vmatprep.mubr.bf16.mxu0 %v4414_v16  ;;  %v4478_v14 = vcombine.high %v1413_v3, %v1421_v4  ;;  %v1429_v16 = vld [vmem:[%s6903_s0 + $0x310] sm:$0xff] }
 0x12b   : > { %3447 = vmatmul.mubr.bf16.vlgmr.msra.gmra.mxu1 %v4399_v13  ;;  %4992 = vmatprep.subr.bf16.mxu0 %v5354_v18  ;;  %v4463_v13 = vcombine.low %v1398_v54, %v1406_v55  ;;  %v1430_v18 = vld [vmem:[%s6903_s0 + $0x318] sm:$0xff]  ;;  %v5387_v52 = vld [vmem:[%s6074_s23 + $0x330] sm:$0xff]   ;;  %v1367_v54 = vld [vmem:[%s6903_s0 + $0x120] sm:$0xff] }
 0x12c   : > { %5055 = vmatpush3.bf16.msra.mxu1 %v5353_v15  ;;  %3454 = vmatprep.mubr.bf16.mxu1 %v4416_v17  ;;  %v4480_v15 = vcombine.high %v1414_v6, %v1422_v7  ;;  %v1437_v17 = vld [vmem:[%s6903_s0 + $0x350] sm:$0xff]  ;;  %v1375_v55 = vld [vmem:[%s6903_s0 + $0x160] sm:$0xff] }
 0x12d   : > { %5056 = vmatprep.subr.bf16.mxu1 %v5356_v20  ;;  %v4477_v20 = vcombine.low %v1413_v3, %v1421_v4  ;;  %v4494_v22 = vcombine.high %v1429_v16, %v1437_v17  ;;  %v5396_v3 = vld [vmem:[%s6074_s23 + $0x3e0] sm:$0xff]  }
 0x12e   : > { %4993 = vmatpush3.bf16.msra.mxu0 %v5355_v19  ;;  %v1438_v19 = vld [vmem:[%s6903_s0 + $0x358] sm:$0xff]  ;;  %v1383_v4 = vld [vmem:[%s6903_s0 + $0x1a0] sm:$0xff] }
 0x12f   : > { %4994 = vmatprep.subr.bf16.mxu0 %v5358_v26  ;;  %v4496_v23 = vcombine.high %v1430_v18, %v1438_v19  ;;  %v1446_v26 = vld [vmem:[%s6903_s0 + $0x398] sm:$0xff] }
 0x130   : > { %5057 = vmatpush3.bf16.msra.mxu1 %v5357_v21  ;;  %v4479_v21 = vcombine.low %v1414_v6, %v1422_v7  ;;  %v1384_v6 = vld [vmem:[%s6903_s0 + $0x1a8] sm:$0xff]  ;;  %v5395_v7 = vld [vmem:[%s6074_s23 + $0x320] sm:$0xff]  }
 0x131   : > { %5058 = vmatprep.subr.bf16.mxu1 %v5360_v27  ;;  %3358 = vmatmul.mubr.bf16.gmra.mxu0 %v4413_v28  ;;  %v1454_v27 = vld [vmem:[%s6903_s0 + $0x3d8] sm:$0xff]  ;;  %v4493_v28 = vcombine.low %v1429_v16, %v1437_v17 }
 0x132   : > { %3365 = vmatprep.mubr.bf16.mxu0 %v4430_v30  ;;  %4995 = vmatpush3.bf16.msra.mxu0 %v5359_v31  ;;  %v4510_v30 = vcombine.high %v1445_v24, %v1453_v25  ;;  %v4512_v31 = vcombine.high %v1446_v26, %v1454_v27  ;;  %v5399_v16 = vld [vmem:[%s6074_s23 + $0x318] sm:$0xff]   ;;  %v1408_v24 = vld [vmem:[%s6903_s0 + $0x268] sm:$0xff]  ;;  %v5405_v25 = vld [vmem:[%s6074_s23 + $0x390] sm:$0xff]  }
 0x133   : > { %3455 = vmatmul.mubr.bf16.gmra.mxu1 %v4415_v29  ;;  %4996 = vmatprep.subr.bf16.mxu0 %v5362_v34  ;;  %v4495_v29 = vcombine.low %v1430_v18, %v1438_v19  ;;  %v1336_v34 = vld [vmem:[%s6903_s0 + $0x28] sm:$0xff]  ;;  %v5401_v17 = vld [vmem:[%s6074_s23 + $0x398] sm:$0xff]   ;;  %v5402_v18 = vld [vmem:[%s6074_s23 + $0x350] sm:$0xff]  }
 0x134   : > { %3462 = vmatprep.mubr.bf16.mxu1 %v4432_v32  ;;  %5059 = vmatpush3.bf16.msra.mxu1 %v5361_v33  ;;  %v1335_v32 = vld [vmem:[%s6903_s0 + $0x20] sm:$0xff]  ;;  %v4404_v39 = vcombine.high %v1336_v34, %v1344_v35  ;;  %v5404_v19 = vld [vmem:[%s6074_s23 + $0x3d0] sm:$0xff]  }
 0x135   : > { %5060 = vmatprep.subr.bf16.mxu1 %v5364_v37  ;;  %v1343_v33 = vld [vmem:[%s6903_s0 + $0x60] sm:$0xff]  ;;  %v4511_v37 = vcombine.low %v1446_v26, %v1454_v27  ;;  %v5406_v26 = vld [vmem:[%s6074_s23 + $0x348] sm:$0xff]  }
 0x136   : > { %4997 = vmatpush3.bf16.msra.mxu0 %v5363_v40  ;;  %v4402_v38 = vcombine.high %v1335_v32, %v1343_v33  ;;  %v1351_v40 = vld [vmem:[%s6903_s0 + $0xa0] sm:$0xff] }
 0x137   : > { %4998 = vmatprep.subr.bf16.mxu0 %v5366_v42  ;;  %v4401_v42 = vcombine.low %v1335_v32, %v1343_v33  ;;  %v5407_v32 = vld [vmem:[%s6074_s23 + $0x308] sm:$0xff]  }
 0x138   : > { %5061 = vmatpush3.bf16.msra.mxu1 %v5365_v41  ;;  %v1359_v41 = vld [vmem:[%s6903_s0 + $0xe0] sm:$0xff]  ;;  %v5409_v33 = vld [vmem:[%s6074_s23 + $0x388] sm:$0xff]  }
 0x139   : > { %3366 = vmatmul.mubr.bf16.gmra.mxu0 %v4429_v43  ;;  %5062 = vmatprep.subr.bf16.mxu1 %v5368_v44  ;;  %v1352_v43 = vld [vmem:[%s6903_s0 + $0xa8] sm:$0xff] }
 0x13a   : > { %3373 = vmatprep.mubr.bf16.mxu0 %v4446_v46  ;;  %4999 = vmatpush3.bf16.msra.mxu0 %v5367_v48  ;;  %v1360_v44 = vld [vmem:[%s6903_s0 + $0xe8] sm:$0xff]  ;;  %v5383_v46 = vld [vmem:[%s6074_s23 + $0x338] sm:$0xff]   ;;  %v4418_v48 = vcombine.high %v1351_v40, %v1359_v41 }
 0x13b   : > { %3463 = vmatmul.mubr.bf16.gmra.mxu1 %v4431_v45  ;;  %5000 = vmatprep.subr.bf16.mxu0 %v5370_v50  ;;  %v4403_v45 = vcombine.low %v1336_v34, %v1344_v35  ;;  %v5386_v50 = vld [vmem:[%s6074_s23 + $0x370] sm:$0xff]   ;;  %v5410_v34 = vld [vmem:[%s6074_s23 + $0x340] sm:$0xff]  }
 0x13c   : > { %3470 = vmatprep.mubr.bf16.mxu1 %v4448_v47  ;;  %5063 = vmatpush3.bf16.msra.mxu1 %v5369_v49  ;;  %v5385_v47 = vld [vmem:[%s6074_s23 + $0x3b8] sm:$0xff]   ;;  %v4420_v49 = vcombine.high %v1352_v43, %v1360_v44  ;;  %v5412_v35 = vld [vmem:[%s6074_s23 + $0x3c0] sm:$0xff]  }
 0x13d   : > { %5064 = vmatprep.subr.bf16.mxu1 %v5372_v53  ;;  %v5389_v53 = vld [vmem:[%s6074_s23 + $0x3b0] sm:$0xff]  }
 0x13e   : > { %5001 = vmatpush3.bf16.msra.mxu0 %v5371_v56  ;;  %v5390_v56 = vld [vmem:[%s6074_s23 + $0x368] sm:$0xff]  }
 0x13f   : > { %5002 = vmatprep.subr.bf16.mxu0 %v5374_v58  ;;  %v1376_v58 = vld [vmem:[%s6903_s0 + $0x168] sm:$0xff] }
 0x140   : > { %5065 = vmatpush3.bf16.msra.mxu1 %v5373_v57  ;;  %v1368_v57 = vld [vmem:[%s6903_s0 + $0x128] sm:$0xff] }
 0x141   : > { %3374 = vmatmul.mubr.bf16.gmra.mxu0 %v4445_v59  ;;  %5066 = vmatprep.subr.bf16.mxu1 %v5376_v60  ;;  %v5392_v59 = vld [vmem:[%s6074_s23 + $0x3e8] sm:$0xff]   ;;  %v4417_v60 = vcombine.low %v1351_v40, %v1359_v41  ;;  %v5413_v41 = vld [vmem:[%s6074_s23 + $0x380] sm:$0xff]  }
 0x142   : > { %3381 = vmatprep.mubr.bf16.mxu0 %v4462_v62  ;;  %5003 = vmatpush3.bf16.msra.mxu0 %v5375_v63  ;;  %v4434_v62 = vcombine.high %v1367_v54, %v1375_v55  ;;  %v4436_v63 = vcombine.high %v1368_v57, %v1376_v58  ;;  %v1424_v40 = vld [vmem:[%s6903_s0 + $0x2e8] sm:$0xff] }
 0x143   : > { %3471 = vmatmul.mubr.bf16.gmra.mxu1 %v4447_v61  ;;  %5004 = vmatprep.subr.bf16.mxu0 %v5378_v2  ;;  %v4419_v61 = vcombine.low %v1352_v43, %v1360_v44  ;;  %v5394_v2 = vld [vmem:[%s6074_s23 + $0x360] sm:$0xff]  }
 0x144   : > { %3478 = vmatprep.mubr.bf16.mxu1 %v4464_v0  ;;  %5067 = vmatpush3.bf16.msra.mxu1 %v5377_v1  ;;  %v5391_v0 = vld [vmem:[%s6074_s23 + $0x328] sm:$0xff]  }
 0x145   : > { %5068 = vmatprep.subr.bf16.mxu1 %v5380_v5  ;;  %v5393_v1 = vld [vmem:[%s6074_s23 + $0x3a8] sm:$0xff]   ;;  %v1391_v5 = vld [vmem:[%s6903_s0 + $0x1e0] sm:$0xff] }
 0x146   : > { %5005 = vmatpush3.bf16.msra.mxu0 %v5379_v8  ;;  %v1392_v8 = vld [vmem:[%s6903_s0 + $0x1e8] sm:$0xff]  ;;  %v4449_v27 = vcombine.low %v1383_v4, %v1391_v5 }
 0x147   : > { %5118 = vmatprep.subr.bf16.mxu0 %v5382_v10  ;;  %v5398_v10 = vld [vmem:[%s6074_s23 + $0x358] sm:$0xff]  }
 0x148   : > { %5069 = vmatpush3.bf16.msra.mxu1 %v5381_v9  ;;  %v5397_v9 = vld [vmem:[%s6074_s23 + $0x3a0] sm:$0xff]  }
 0x149   : > { %3382 = vmatmul.mubr.bf16.gmra.mxu0 %v4461_v11  ;;  %5182 = vmatprep.subr.bf16.mxu1 %v5384_v12  ;;  %v4433_v11 = vcombine.low %v1367_v54, %v1375_v55  ;;  %v5400_v12 = vld [vmem:[%s6074_s23 + $0x3d8] sm:$0xff]   ;;  %v1447_v54 = vld [vmem:[%s6903_s0 + $0x3a0] sm:$0xff] }
 0x14a   : > { %3389 = vmatprep.mubr.bf16.mxu0 %v4478_v14  ;;  %v4450_v14 = vcombine.high %v1383_v4, %v1391_v5  ;;  %v1455_v55 = vld [vmem:[%s6903_s0 + $0x3e0] sm:$0xff] }
 0x14b   : > { %3479 = vmatmul.mubr.bf16.gmra.mxu1 %v4463_v13  ;;  %v4435_v13 = vcombine.low %v1368_v57, %v1376_v58  ;;  %v1456_v57 = vld [vmem:[%s6903_s0 + $0x3e8] sm:$0xff] }
 0x14c   : > { %3486 = vmatprep.mubr.bf16.mxu1 %v4480_v15  ;;  %v4452_v15 = vcombine.high %v1384_v6, %v1392_v8 }
 0x151   : > { %3390 = vmatmul.mubr.bf16.gmra.mxu0 %v4477_v20  ;;  %v1399_v20 = vld [vmem:[%s6903_s0 + $0x220] sm:$0xff] }
 0x152   : > { %3397 = vmatprep.mubr.bf16.mxu0 %v4494_v22  ;;  %v1400_v22 = vld [vmem:[%s6903_s0 + $0x228] sm:$0xff] }
 0x153   : > { %3487 = vmatmul.mubr.bf16.gmra.mxu1 %v4479_v21  ;;  %v1407_v21 = vld [vmem:[%s6903_s0 + $0x260] sm:$0xff]  ;;  %v4467_v43 = vcombine.low %v1400_v22, %v1408_v24 }
 0x154   : > { %3494 = vmatprep.mubr.bf16.mxu1 %v4496_v23  ;;  %v5403_v23 = vld [vmem:[%s6074_s23 + $0x310] sm:$0xff]  }
 0x159   : > { %3398 = vmatmul.mubr.bf16.gmra.mxu0 %v4493_v28  ;;  %v5408_v28 = vld [vmem:[%s6074_s23 + $0x3c8] sm:$0xff]  }
 0x15a   : > { %3405 = vmatprep.mubr.bf16.mxu0 %v4510_v30  ;;  %v4466_v30 = vcombine.high %v1399_v20, %v1407_v21 }
 0x15b   : > { %3495 = vmatmul.mubr.bf16.gmra.mxu1 %v4495_v29  ;;  %v4451_v29 = vcombine.low %v1384_v6, %v1392_v8  ;;  %v1353_v6 = vld [vmem:[%s6903_s0 + $0xb0] sm:$0xff]  ;;  %v1354_v8 = vld [vmem:[%s6903_s0 + $0xb8] sm:$0xff] }
 0x15c   : > { %3502 = vmatprep.mubr.bf16.mxu1 %v4512_v31  ;;  %v4468_v31 = vcombine.high %v1400_v22, %v1408_v24  ;;  %v1378_v22 = vld [vmem:[%s6903_s0 + $0x178] sm:$0xff] }
 0x161   : > { %3406 = vmatmul.mubr.bf16.gmra.mxu0 %v4509_v36  ;;  %v1415_v36 = vld [vmem:[%s6903_s0 + $0x2a0] sm:$0xff] }
 0x162   : > { %3543 = vmatprep.mubr.bf16.mxu0 %v4402_v38  ;;  %v5411_v38 = vld [vmem:[%s6074_s23 + $0x300] sm:$0xff]  }
 0x163   : > { %3503 = vmatmul.mubr.bf16.gmra.mxu1 %v4511_v37  ;;  %v1423_v37 = vld [vmem:[%s6903_s0 + $0x2e0] sm:$0xff] }
 0x164   : > { %3640 = vmatprep.mubr.bf16.mxu1 %v4404_v39  ;;  %v1416_v39 = vld [vmem:[%s6903_s0 + $0x2a8] sm:$0xff]  ;;  %v4482_v44 = vcombine.high %v1415_v36, %v1423_v37 }
 0x169   : > { %3544 = vmatmul.mubr.bf16.vlgmr.msra.gmra.mxu0 %v4401_v42  ;;  %v4465_v42 = vcombine.low %v1399_v20, %v1407_v21  ;;  %v1370_v21 = vld [vmem:[%s6903_s0 + $0x138] sm:$0xff] }
 0x16a   : > { %5119 = vmatpush3.bf16.msra.mxu0 %v5383_v46  ;;  %3551 = vmatprep.mubr.bf16.mxu0 %v4418_v48  ;;  %v1431_v46 = vld [vmem:[%s6903_s0 + $0x320] sm:$0xff]  ;;  %v1432_v48 = vld [vmem:[%s6903_s0 + $0x328] sm:$0xff] }
 0x16b   : > { %3641 = vmatmul.mubr.bf16.vlgmr.msra.gmra.mxu1 %v4403_v45  ;;  %5120 = vmatprep.subr.bf16.mxu0 %v5386_v50  ;;  %v4484_v45 = vcombine.high %v1416_v39, %v1424_v40  ;;  %v4481_v50 = vcombine.low %v1415_v36, %v1423_v37 }
 0x16c   : > { %5183 = vmatpush3.bf16.msra.mxu1 %v5385_v47  ;;  %3648 = vmatprep.mubr.bf16.mxu1 %v4420_v49  ;;  %v1439_v47 = vld [vmem:[%s6903_s0 + $0x360] sm:$0xff]  ;;  %v1440_v49 = vld [vmem:[%s6903_s0 + $0x368] sm:$0xff] }
 0x16d   : > { %5184 = vmatprep.subr.bf16.mxu1 %v5388_v51  ;;  %v4483_v51 = vcombine.low %v1416_v39, %v1424_v40  ;;  %v4497_v58 = vcombine.low %v1431_v46, %v1439_v47  ;;  %v1385_v39 = vld [vmem:[%s6903_s0 + $0x1b0] sm:$0xff] }
 0x16e   : > { %5121 = vmatpush3.bf16.msra.mxu0 %v5387_v52  ;;  %v4498_v52 = vcombine.high %v1431_v46, %v1439_v47  ;;  %v1393_v40 = vld [vmem:[%s6903_s0 + $0x1f0] sm:$0xff] }
 0x16f   : > { %5122 = vmatprep.subr.bf16.mxu0 %v5390_v56  ;;  %v1448_v56 = vld [vmem:[%s6903_s0 + $0x3a8] sm:$0xff] }
 0x170   : > { %5185 = vmatpush3.bf16.msra.mxu1 %v5389_v53  ;;  %v4500_v53 = vcombine.high %v1432_v48, %v1440_v49 }
 0x171   : > { %5186 = vmatprep.subr.bf16.mxu1 %v5392_v59  ;;  %3552 = vmatmul.mubr.bf16.gmra.mxu0 %v4417_v60  ;;  %v4499_v59 = vcombine.low %v1432_v48, %v1440_v49  ;;  %v4514_v60 = vcombine.high %v1447_v54, %v1455_v55  ;;  %v4439_v49 = vcombine.low %v1370_v21, %v1378_v22 }
 0x172   : > { %3559 = vmatprep.mubr.bf16.mxu0 %v4434_v62  ;;  %5123 = vmatpush3.bf16.msra.mxu0 %v5391_v0  ;;  %v1337_v62 = vld [vmem:[%s6903_s0 + $0x30] sm:$0xff]  ;;  %v1338_v0 = vld [vmem:[%s6903_s0 + $0x38] sm:$0xff] }
 0x173   : > { %3649 = vmatmul.mubr.bf16.gmra.mxu1 %v4419_v61  ;;  %5124 = vmatprep.subr.bf16.mxu0 %v5394_v2  ;;  %v4516_v61 = vcombine.high %v1448_v56, %v1456_v57  ;;  %v4513_v2 = vcombine.low %v1447_v54, %v1455_v55 }
 0x174   : > { %3656 = vmatprep.mubr.bf16.mxu1 %v4436_v63  ;;  %5187 = vmatpush3.bf16.msra.mxu1 %v5393_v1  ;;  %v1345_v63 = vld [vmem:[%s6903_s0 + $0x70] sm:$0xff]  ;;  %v1346_v1 = vld [vmem:[%s6903_s0 + $0x78] sm:$0xff] }
 0x175   : > { %5188 = vmatprep.subr.bf16.mxu1 %v5396_v3  ;;  %v4515_v3 = vcombine.low %v1448_v56, %v1456_v57  ;;  %v4406_v4 = vcombine.high %v1337_v62, %v1345_v63  ;;  %v4408_v5 = vcombine.high %v1338_v0, %v1346_v1 }
 0x176   : > { %5125 = vmatpush3.bf16.msra.mxu0 %v5395_v7  ;;  %v1361_v7 = vld [vmem:[%s6903_s0 + $0xf0] sm:$0xff] }
 0x177   : > { %5126 = vmatprep.subr.bf16.mxu0 %v5398_v10  ;;  %v4405_v10 = vcombine.low %v1337_v62, %v1345_v63  ;;  %v1409_v62 = vld [vmem:[%s6903_s0 + $0x270] sm:$0xff] }
 0x178   : > { %5189 = vmatpush3.bf16.msra.mxu1 %v5397_v9  ;;  %v1362_v9 = vld [vmem:[%s6903_s0 + $0xf8] sm:$0xff] }
 0x179   : > { %3560 = vmatmul.mubr.bf16.gmra.mxu0 %v4433_v11  ;;  %5190 = vmatprep.subr.bf16.mxu1 %v5400_v12  ;;  %v4407_v11 = vcombine.low %v1338_v0, %v1346_v1  ;;  %v4422_v12 = vcombine.high %v1353_v6, %v1361_v7  ;;  %v1402_v1 = vld [vmem:[%s6903_s0 + $0x238] sm:$0xff] }
 0x17a   : > { %3567 = vmatprep.mubr.bf16.mxu0 %v4450_v14  ;;  %5127 = vmatpush3.bf16.msra.mxu0 %v5399_v16 }
 0x17b   : > { %3657 = vmatmul.mubr.bf16.gmra.mxu1 %v4435_v13  ;;  %5128 = vmatprep.subr.bf16.mxu0 %v5402_v18  ;;  %v4424_v13 = vcombine.high %v1354_v8, %v1362_v9  ;;  %v1377_v18 = vld [vmem:[%s6903_s0 + $0x170] sm:$0xff] }
 0x17c   : > { %3664 = vmatprep.mubr.bf16.mxu1 %v4452_v15  ;;  %5191 = vmatpush3.bf16.msra.mxu1 %v5401_v17  ;;  %v1369_v17 = vld [vmem:[%s6903_s0 + $0x130] sm:$0xff] }
 0x17d   : > { %5192 = vmatprep.subr.bf16.mxu1 %v5404_v19  ;;  %v4437_v47 = vcombine.low %v1369_v17, %v1377_v18 }
 0x17e   : > { %5129 = vmatpush3.bf16.msra.mxu0 %v5403_v23 }
 0x17f   : > { %5130 = vmatprep.subr.bf16.mxu0 %v5406_v26 }
 0x180   : > { %5193 = vmatpush3.bf16.msra.mxu1 %v5405_v25  ;;  %v4421_v25 = vcombine.low %v1353_v6, %v1361_v7 }
 0x181   : > { %3568 = vmatmul.mubr.bf16.gmra.mxu0 %v4449_v27  ;;  %5194 = vmatprep.subr.bf16.mxu1 %v5408_v28  ;;  %v4423_v27 = vcombine.low %v1354_v8, %v1362_v9  ;;  %v4438_v28 = vcombine.high %v1369_v17, %v1377_v18 }
 0x182   : > { %3575 = vmatprep.mubr.bf16.mxu0 %v4466_v30  ;;  %5131 = vmatpush3.bf16.msra.mxu0 %v5407_v32 }
 0x183   : > { %3665 = vmatmul.mubr.bf16.gmra.mxu1 %v4451_v29  ;;  %5132 = vmatprep.subr.bf16.mxu0 %v5410_v34 }
 0x184   : > { %3672 = vmatprep.mubr.bf16.mxu1 %v4468_v31  ;;  %5195 = vmatpush3.bf16.msra.mxu1 %v5409_v33  ;;  %v4440_v31 = vcombine.high %v1370_v21, %v1378_v22 }
 0x185   : > { %5196 = vmatprep.subr.bf16.mxu1 %v5412_v35 }
 0x186   : > { %5133 = vmatpush3.bf16.msra.mxu0 %v5411_v38 }
 0x188   : > { %5197 = vmatpush3.bf16.msra.mxu1 %v5413_v41 }
 0x189   : > { %3576 = vmatmul.mubr.bf16.gmra.mxu0 %v4465_v42 }
 0x18a   : > { %3583 = vmatprep.mubr.bf16.mxu0 %v4482_v44  ;;  %v1394_v44 = vld [vmem:[%s6903_s0 + $0x1f8] sm:$0xff] }
 0x18b   : > { %3673 = vmatmul.mubr.bf16.gmra.mxu1 %v4467_v43  ;;  %v1386_v43 = vld [vmem:[%s6903_s0 + $0x1b8] sm:$0xff] }
 0x18c   : > { %3680 = vmatprep.mubr.bf16.mxu1 %v4484_v45  ;;  %v4455_v7 = vcombine.low %v1386_v43, %v1394_v44 }
 0x191   : > { %3584 = vmatmul.mubr.bf16.gmra.mxu0 %v4481_v50  ;;  %v4454_v50 = vcombine.high %v1385_v39, %v1393_v40 }
 0x192   : > { %3591 = vmatprep.mubr.bf16.mxu0 %v4498_v52 }
 0x193   : > { %3681 = vmatmul.mubr.bf16.gmra.mxu1 %v4483_v51 }
 0x194   : > { %3688 = vmatprep.mubr.bf16.mxu1 %v4500_v53  ;;  %v4456_v53 = vcombine.high %v1386_v43, %v1394_v44  ;;  %v1433_v43 = vld [vmem:[%s6903_s0 + $0x330] sm:$0xff] }
 0x195   : > { %v1441_v44 = vld [vmem:[%s6903_s0 + $0x370] sm:$0xff] }
 0x199   : > { %3592 = vmatmul.mubr.bf16.gmra.mxu0 %v4497_v58 }
 0x19a   : > { %3599 = vmatprep.mubr.bf16.mxu0 %v4514_v60 }
 0x19b   : > { %3689 = vmatmul.mubr.bf16.gmra.mxu1 %v4499_v59 }
 0x19c   : > { %3696 = vmatprep.mubr.bf16.mxu1 %v4516_v61  ;;  %v1401_v61 = vld [vmem:[%s6903_s0 + $0x230] sm:$0xff] }
 0x19d   : > { %v4470_v8 = vcombine.high %v1401_v61, %v1409_v62 }
 0x1a1   : > { %3600 = vmatmul.mubr.bf16.gmra.mxu0 %v4513_v2  ;;  %v1410_v2 = vld [vmem:[%s6903_s0 + $0x278] sm:$0xff] }
 0x1a2   : > { %3737 = vmatprep.mubr.bf16.mxu0 %v4406_v4 }
 0x1a3   : > { %3697 = vmatmul.mubr.bf16.gmra.mxu1 %v4515_v3 }
 0x1a4   : > { %3834 = vmatprep.mubr.bf16.mxu1 %v4408_v5  ;;  %v4453_v5 = vcombine.low %v1385_v39, %v1393_v40 }
 0x1a9   : > { %v4750_v14 = vpop.f32.mrf.mxu0  ;;  %3738 = vmatmul.mubr.bf16.vlgmr.msra.gmra.mxu0 %v4405_v10 }
 0x1aa   : > { %3745 = vmatprep.mubr.bf16.mxu0 %v4422_v12 }
 0x1ab   : > { %v4814_v15 = vpop.f32.mrf.mxu1  ;;  %3835 = vmatmul.mubr.bf16.vlgmr.msra.gmra.mxu1 %v4407_v11  ;;  %v4751_v16 = vpop.f32.mrf.mxu0  ;;  %v4472_v11 = vcombine.high %v1402_v1, %v1410_v2 }
 0x1ac   : > { %3842 = vmatprep.mubr.bf16.mxu1 %v4424_v13  ;;  %v4752_v19 = vadd.f32 %v4751_v16, %v4750_v14 }
 0x1ad   : > { %v4815_v20 = vpop.f32.mrf.mxu1  ;;  %v4753_v24 = vpop.f32.mrf.mxu0 }
 0x1ae   : > { %v4816_v23 = vadd.f32 %v4815_v20, %v4814_v15  ;;  %v1425_v20 = vld [vmem:[%s6903_s0 + $0x2f0] sm:$0xff] }
 0x1af   : > { %v4817_v26 = vpop.f32.mrf.mxu1  ;;  %v4754_v30 = vpop.f32.mrf.mxu0 }
 0x1b0   : > { %v6520_v29 = vadd.f32 %v4816_v23, %v4752_v19  ;;  %v4755_v32 = vadd.f32 %v4754_v30, %v4753_v24  ;;  %v1417_v19 = vld [vmem:[%s6903_s0 + $0x2b0] sm:$0xff]  ;;  %v1418_v23 = vld [vmem:[%s6903_s0 + $0x2b8] sm:$0xff]  ;;  %v4471_v30 = vcombine.low %v1402_v1, %v1410_v2 }
 0x1b1   : > { %v4818_v33 = vpop.f32.mrf.mxu1  ;;  %v4756_v35 = vpop.f32.mrf.mxu0  ;;  %3746 = vmatmul.mubr.bf16.gmra.mxu0 %v4421_v25  ;;  %v1426_v24 = vld [vmem:[%s6903_s0 + $0x2f8] sm:$0xff] }
 0x1b2   : > { %v4819_v34 = vadd.f32 %v4818_v33, %v4817_v26  ;;  %3753 = vmatprep.mubr.bf16.mxu0 %v4438_v28 }
 0x1b3   : > { %v4820_v36 = vpop.f32.mrf.mxu1  ;;  %3843 = vmatmul.mubr.bf16.gmra.mxu1 %v4423_v27  ;;  %v4757_v38 = vpop.f32.mrf.mxu0  ;;  %v4469_v27 = vcombine.low %v1401_v61, %v1409_v62 }
 0x1b4   : > { %v6522_v37 = vadd.f32 %v4819_v34, %v4755_v32  ;;  %3850 = vmatprep.mubr.bf16.mxu1 %v4440_v31  ;;  %v4758_v41 = vadd.f32 %v4757_v38, %v4756_v35  ;;  %v4486_v31 = vcombine.high %v1417_v19, %v1425_v20  ;;  %v4488_v34 = vcombine.high %v1418_v23, %v1426_v24 }
 0x1b5   : > { %v4821_v42 = vpop.f32.mrf.mxu1  ;;  %v4759_v46 = vpop.f32.mrf.mxu0 }
 0x1b6   : > { %v4822_v45 = vadd.f32 %v4821_v42, %v4820_v36 }
 0x1b7   : > { %v4823_v48 = vpop.f32.mrf.mxu1  ;;  %v4760_v52 = vpop.f32.mrf.mxu0 }
 0x1b8   : > { %v6536_v51 = vadd.f32 %v4822_v45, %v4758_v41  ;;  %v4761_v54 = vadd.f32 %v4760_v52, %v4759_v46  ;;  %v4485_v52 = vcombine.low %v1417_v19, %v1425_v20 }
 0x1b9   : > { %v4824_v55 = vpop.f32.mrf.mxu1  ;;  %v4762_v57 = vpop.f32.mrf.mxu0  ;;  %3754 = vmatmul.mubr.bf16.gmra.mxu0 %v4437_v47  ;;  %v1434_v47 = vld [vmem:[%s6903_s0 + $0x338] sm:$0xff] }
 0x1ba   : > { %v4825_v56 = vadd.f32 %v4824_v55, %v4823_v48  ;;  %3761 = vmatprep.mubr.bf16.mxu0 %v4454_v50  ;;  %v1442_v48 = vld [vmem:[%s6903_s0 + $0x378] sm:$0xff]  ;;  %v4502_v55 = vcombine.high %v1433_v43, %v1441_v44 }
 0x1bb   : > { %v4826_v58 = vpop.f32.mrf.mxu1  ;;  %3851 = vmatmul.mubr.bf16.gmra.mxu1 %v4439_v49  ;;  %v4763_v60 = vpop.f32.mrf.mxu0 }
 0x1bc   : > { %v6538_v59 = vadd.f32 %v4825_v56, %v4761_v54  ;;  %3858 = vmatprep.mubr.bf16.mxu1 %v4456_v53  ;;  %v4764_v63 = vadd.f32 %v4763_v60, %v4762_v57  ;;  %v4487_v54 = vcombine.low %v1418_v23, %v1426_v24 }
 0x1bd   : > { %v4827_v0 = vpop.f32.mrf.mxu1  ;;  %v4765_v4 = vpop.f32.mrf.mxu0 }
 0x1be   : > { %v4828_v3 = vadd.f32 %v4827_v0, %v4826_v58  ;;  %v4504_v58 = vcombine.high %v1434_v47, %v1442_v48 }
 0x1bf   : > { %v4829_v6 = vpop.f32.mrf.mxu1  ;;  %v4766_v10 = vpop.f32.mrf.mxu0 }
 0x1c0   : > { %v6552_v9 = vadd.f32 %v4828_v3, %v4764_v63  ;;  %v4767_v12 = vadd.f32 %v4766_v10, %v4765_v4  ;;  %v1449_v3 = vld [vmem:[%s6903_s0 + $0x3b0] sm:$0xff] }
 0x1c1   : > { %v4830_v13 = vpop.f32.mrf.mxu1  ;;  %v4768_v15 = vpop.f32.mrf.mxu0  ;;  %3762 = vmatmul.mubr.bf16.gmra.mxu0 %v4453_v5  ;;  %v1457_v4 = vld [vmem:[%s6903_s0 + $0x3f0] sm:$0xff] }
 0x1c2   : > { %v4831_v14 = vadd.f32 %v4830_v13, %v4829_v6  ;;  %3769 = vmatprep.mubr.bf16.mxu0 %v4470_v8  ;;  %v1458_v8 = vld [vmem:[%s6903_s0 + $0x3f8] sm:$0xff] }
 0x1c3   : > { %v4832_v16 = vpop.f32.mrf.mxu1  ;;  %3859 = vmatmul.mubr.bf16.gmra.mxu1 %v4455_v7  ;;  %v4769_v18 = vpop.f32.mrf.mxu0  ;;  %v1450_v7 = vld [vmem:[%s6903_s0 + $0x3b8] sm:$0xff] }
 0x1c4   : > { %v6554_v17 = vadd.f32 %v4831_v14, %v4767_v12  ;;  %3866 = vmatprep.mubr.bf16.mxu1 %v4472_v11  ;;  %v4770_v21 = vadd.f32 %v4769_v18, %v4768_v15  ;;  %v4501_v12 = vcombine.low %v1433_v43, %v1441_v44  ;;  %v4503_v14 = vcombine.low %v1434_v47, %v1442_v48 }
 0x1c5   : > { %v4833_v22 = vpop.f32.mrf.mxu1  ;;  %v4771_v26 = vpop.f32.mrf.mxu0  ;;  %v4518_v15 = vcombine.high %v1449_v3, %v1457_v4  ;;  %v4520_v19 = vcombine.high %v1450_v7, %v1458_v8 }
 0x1c6   : > { %v4834_v25 = vadd.f32 %v4833_v22, %v4832_v16 }
 0x1c7   : > { %v4835_v28 = vpop.f32.mrf.mxu1  ;;  %v4772_v33 = vpop.f32.mrf.mxu0 }
 0x1c8   : > { %v6568_v32 = vadd.f32 %v4834_v25, %v4770_v21  ;;  %v4773_v35 = vadd.f32 %v4772_v33, %v4771_v26  ;;  %v4517_v33 = vcombine.low %v1449_v3, %v1457_v4 }
 0x1c9   : > { %v4836_v36 = vpop.f32.mrf.mxu1  ;;  %v4774_v39 = vpop.f32.mrf.mxu0  ;;  %3770 = vmatmul.mubr.bf16.gmra.mxu0 %v4469_v27 }
 0x1ca   : > { %v4837_v38 = vadd.f32 %v4836_v36, %v4835_v28  ;;  %3777 = vmatprep.mubr.bf16.mxu0 %v4486_v31 }
 0x1cb   : > { %v4838_v40 = vpop.f32.mrf.mxu1  ;;  %3867 = vmatmul.mubr.bf16.gmra.mxu1 %v4471_v30  ;;  %v4775_v42 = vpop.f32.mrf.mxu0 }
 0x1cc   : > { %v6570_v41 = vadd.f32 %v4837_v38, %v4773_v35  ;;  %3874 = vmatprep.mubr.bf16.mxu1 %v4488_v34  ;;  %v4776_v45 = vadd.f32 %v4775_v42, %v4774_v39  ;;  %v4519_v35 = vcombine.low %v1450_v7, %v1458_v8 }
 0x1cd   : > { %v4839_v46 = vpop.f32.mrf.mxu1  ;;  %v4777_v50 = vpop.f32.mrf.mxu0 }
 0x1ce   : > { %v4840_v49 = vadd.f32 %v4839_v46, %v4838_v40 }
 0x1cf   : > { %v4841_v53 = vpop.f32.mrf.mxu1  ;;  %v4778_v57 = vpop.f32.mrf.mxu0 }
 0x1d0   : > { %v6584_v56 = vadd.f32 %v4840_v49, %v4776_v45  ;;  %v4779_v60 = vadd.f32 %v4778_v57, %v4777_v50 }
 0x1d1   : > { %v4842_v61 = vpop.f32.mrf.mxu1  ;;  %v4780_v63 = vpop.f32.mrf.mxu0  ;;  %3778 = vmatmul.mubr.bf16.gmra.mxu0 %v4485_v52 }
 0x1d2   : > { %v4843_v62 = vadd.f32 %v4842_v61, %v4841_v53  ;;  %3785 = vmatprep.mubr.bf16.mxu0 %v4502_v55 }
 0x1d3   : > { %v4844_v0 = vpop.f32.mrf.mxu1  ;;  %3875 = vmatmul.mubr.bf16.gmra.mxu1 %v4487_v54  ;;  %v4781_v2 = vpop.f32.mrf.mxu0 }
 0x1d4   : > { %v6586_v1 = vadd.f32 %v4843_v62, %v4779_v60  ;;  %3882 = vmatprep.mubr.bf16.mxu1 %v4504_v58  ;;  %v4782_v5 = vadd.f32 %v4781_v2, %v4780_v63 }
 0x1d5   : > { %v4845_v6 = vpop.f32.mrf.mxu1  ;;  %v4783_v11 = vpop.f32.mrf.mxu0 }
 0x1d6   : > { %v4846_v10 = vadd.f32 %v4845_v6, %v4844_v0 }
 0x1d7   : > { %v4847_v13 = vpop.f32.mrf.mxu1  ;;  %v4784_v18 = vpop.f32.mrf.mxu0 }
 0x1d8   : > { %v6600_v16 = vadd.f32 %v4846_v10, %v4782_v5  ;;  %v4785_v20 = vadd.f32 %v4784_v18, %v4783_v11 }
 0x1d9   : > { %v4848_v21 = vpop.f32.mrf.mxu1  ;;  %v4786_v23 = vpop.f32.mrf.mxu0  ;;  %3786 = vmatmul.mubr.bf16.gmra.mxu0 %v4501_v12 }
 0x1da   : > { %v4849_v22 = vadd.f32 %v4848_v21, %v4847_v13  ;;  %3793 = vmatprep.mubr.bf16.mxu0 %v4518_v15 }
 0x1db   : > { %v4850_v24 = vpop.f32.mrf.mxu1  ;;  %3883 = vmatmul.mubr.bf16.gmra.mxu1 %v4503_v14  ;;  %v4787_v26 = vpop.f32.mrf.mxu0 }
 0x1dc   : > { %v6602_v25 = vadd.f32 %v4849_v22, %v4785_v20  ;;  %3890 = vmatprep.mubr.bf16.mxu1 %v4520_v19  ;;  %v4788_v27 = vadd.f32 %v4787_v26, %v4786_v23 }
 0x1dd   : > { %v4851_v28 = vpop.f32.mrf.mxu1  ;;  %v4789_v31 = vpop.f32.mrf.mxu0 }
 0x1de   : > { %v4852_v30 = vadd.f32 %v4851_v28, %v4850_v24 }
 0x1df   : > { %v4853_v34 = vpop.f32.mrf.mxu1  ;;  %v4790_v38 = vpop.f32.mrf.mxu0 }
 0x1e0   : > { %v6604_v36 = vadd.f32 %v4852_v30, %v4788_v27  ;;  %v4791_v39 = vadd.f32 %v4790_v38, %v4789_v31 }
 0x1e1   : > { %v4854_v40 = vpop.f32.mrf.mxu1  ;;  %v4792_v43 = vpop.f32.mrf.mxu0  ;;  %3794 = vmatmul.mubr.bf16.gmra.mxu0 %v4517_v33 }
 0x1e2   : > { %v4855_v42 = vadd.f32 %v4854_v40, %v4853_v34 }
 0x1e3   : > { %v4856_v44 = vpop.f32.mrf.mxu1  ;;  %3891 = vmatmul.mubr.bf16.gmra.mxu1 %v4519_v35  ;;  %v4793_v46 = vpop.f32.mrf.mxu0 }
 0x1e4   : > { %v6606_v45 = vadd.f32 %v4855_v42, %v4791_v39  ;;  %v4794_v47 = vadd.f32 %v4793_v46, %v4792_v43 }
 0x1e5   : > { %v4857_v48 = vpop.f32.mrf.mxu1  ;;  %v4795_v50 = vpop.f32.mrf.mxu0 }
 0x1e6   : > { %v4858_v49 = vadd.f32 %v4857_v48, %v4856_v44 }
 0x1e7   : > { %v4859_v52 = vpop.f32.mrf.mxu1  ;;  %v4796_v54 = vpop.f32.mrf.mxu0 }
 0x1e8   : > { %v6608_v53 = vadd.f32 %v4858_v49, %v4794_v47  ;;  %v4797_v55 = vadd.f32 %v4796_v54, %v4795_v50 }
 0x1e9   : > { %v4860_v57 = vpop.f32.mrf.mxu1  ;;  %v4878_v60 = vpop.f32.mrf.mxu0 }
 0x1ea   : > { %v4861_v58 = vadd.f32 %v4860_v57, %v4859_v52 }
 0x1eb   : > { %v4942_v61 = vpop.f32.mrf.mxu1  ;;  %v4879_v63 = vpop.f32.mrf.mxu0 }
 0x1ec   : > { %v6610_v62 = vadd.f32 %v4861_v58, %v4797_v55  ;;  %v4880_v0 = vadd.f32 %v4879_v63, %v4878_v60 }
 0x1ed   : > { %v4943_v2 = vpop.f32.mrf.mxu1  ;;  %v4881_v4 = vpop.f32.mrf.mxu0 }
 0x1ee   : > { %v4944_v3 = vadd.f32 %v4943_v2, %v4942_v61  ;;  %v3352_v5 = vadd.f32 %v4880_v0, %v6520_v29 }
 0x1ef   : > { %v4945_v6 = vpop.f32.mrf.mxu1  ;;  %v4882_v7 = vpop.f32.mrf.mxu0 }
 0x1f0   : > { %v6613_v8 = vadd.f32 %v4944_v3, %v3352_v5  ;;  %v4883_v10 = vadd.f32 %v4882_v7, %v4881_v4 }
 0x1f1   : > { %v4946_v11 = vpop.f32.mrf.mxu1  ;;  %v4884_v13 = vpop.f32.mrf.mxu0 }
 0x1f2   : > { %v4947_v12 = vadd.f32 %v4946_v11, %v4945_v6  ;;  %v3355_v14 = vadd.f32 %v4883_v10, %v6522_v37 }
 0x1f3   : > { %v4948_v15 = vpop.f32.mrf.mxu1  ;;  %v4885_v18 = vpop.f32.mrf.mxu0 }
 0x1f4   : > { %v6616_v19 = vadd.f32 %v4947_v12, %v3355_v14  ;;  %v4886_v20 = vadd.f32 %v4885_v18, %v4884_v13 }
 0x1f5   : > { %v4949_v21 = vpop.f32.mrf.mxu1  ;;  %v4887_v23 = vpop.f32.mrf.mxu0 }
 0x1f6   : > { %v4950_v22 = vadd.f32 %v4949_v21, %v4948_v15  ;;  %v3360_v29 = vadd.f32 %v4886_v20, %v6536_v51 }
 0x1f7   : > { %v4951_v24 = vpop.f32.mrf.mxu1  ;;  %v4888_v26 = vpop.f32.mrf.mxu0 }
 0x1f8   : > { %v6619_v27 = vadd.f32 %v4950_v22, %v3360_v29  ;;  %v4889_v28 = vadd.f32 %v4888_v26, %v4887_v23 }
 0x1f9   : > { %v4952_v30 = vpop.f32.mrf.mxu1  ;;  %v4890_v33 = vpop.f32.mrf.mxu0 }
 0x1fa   : > { %v4953_v31 = vadd.f32 %v4952_v30, %v4951_v24  ;;  %v3363_v37 = vadd.f32 %v4889_v28, %v6538_v59 }
 0x1fb   : > { %v4954_v34 = vpop.f32.mrf.mxu1  ;;  %v4891_v35 = vpop.f32.mrf.mxu0 }
 0x1fc   : > { %v6622_v38 = vadd.f32 %v4953_v31, %v3363_v37  ;;  %v4892_v39 = vadd.f32 %v4891_v35, %v4890_v33 }
 0x1fd   : > { %v4955_v40 = vpop.f32.mrf.mxu1  ;;  %v4893_v43 = vpop.f32.mrf.mxu0 }
 0x1fe   : > { %v4956_v42 = vadd.f32 %v4955_v40, %v4954_v34  ;;  %v3368_v51 = vadd.f32 %v4892_v39, %v6552_v9 }
 0x1ff   : > { %v4957_v44 = vpop.f32.mrf.mxu1  ;;  %v4894_v46 = vpop.f32.mrf.mxu0 }
 0x200   : > { %v6625_v47 = vadd.f32 %v4956_v42, %v3368_v51  ;;  %v4895_v48 = vadd.f32 %v4894_v46, %v4893_v43 }
 0x201   : > { %v4958_v49 = vpop.f32.mrf.mxu1  ;;  %v4896_v52 = vpop.f32.mrf.mxu0 }
 0x202   : > { %v4959_v50 = vadd.f32 %v4958_v49, %v4957_v44  ;;  %v3371_v59 = vadd.f32 %v4895_v48, %v6554_v17 }
 0x203   : > { %v4960_v54 = vpop.f32.mrf.mxu1  ;;  %v4897_v55 = vpop.f32.mrf.mxu0 }
 0x204   : > { %v6628_v57 = vadd.f32 %v4959_v50, %v3371_v59  ;;  %v4898_v58 = vadd.f32 %v4897_v55, %v4896_v52 }
 0x205   : > { %v4961_v60 = vpop.f32.mrf.mxu1  ;;  %v4899_v63 = vpop.f32.mrf.mxu0 }
 0x206   : > { %v4962_v61 = vadd.f32 %v4961_v60, %v4960_v54  ;;  %v3376_v9 = vadd.f32 %v4898_v58, %v6568_v32 }
 0x207   : > { %v4963_v0 = vpop.f32.mrf.mxu1  ;;  %v4900_v2 = vpop.f32.mrf.mxu0 }
 0x208   : > { %v6631_v3 = vadd.f32 %v4962_v61, %v3376_v9  ;;  %v4901_v4 = vadd.f32 %v4900_v2, %v4899_v63 }
 0x209   : > { %v4964_v5 = vpop.f32.mrf.mxu1  ;;  %v4902_v7 = vpop.f32.mrf.mxu0 }
 0x20a   : > { %v4965_v6 = vadd.f32 %v4964_v5, %v4963_v0  ;;  %v3379_v17 = vadd.f32 %v4901_v4, %v6570_v41 }
 0x20b   : > { %v4966_v10 = vpop.f32.mrf.mxu1  ;;  %v4903_v11 = vpop.f32.mrf.mxu0 }
 0x20c   : > { %v6634_v12 = vadd.f32 %v4965_v6, %v3379_v17  ;;  %v4904_v13 = vadd.f32 %v4903_v11, %v4902_v7 }
 0x20d   : > { %v4967_v14 = vpop.f32.mrf.mxu1  ;;  %v4905_v18 = vpop.f32.mrf.mxu0 }
 0x20e   : > { %v4968_v15 = vadd.f32 %v4967_v14, %v4966_v10  ;;  %v3384_v32 = vadd.f32 %v4904_v13, %v6584_v56 }
 0x20f   : > { %v4969_v20 = vpop.f32.mrf.mxu1  ;;  %v4906_v21 = vpop.f32.mrf.mxu0 }
 0x210   : > { %v6637_v22 = vadd.f32 %v4968_v15, %v3384_v32  ;;  %v4907_v23 = vadd.f32 %v4906_v21, %v4905_v18 }
 0x211   : > { %v4970_v29 = vpop.f32.mrf.mxu1  ;;  %v4908_v26 = vpop.f32.mrf.mxu0 }
 0x212   : > { %v4971_v24 = vadd.f32 %v4970_v29, %v4969_v20  ;;  %v3387_v41 = vadd.f32 %v4907_v23, %v6586_v1 }
 0x213   : > { %v4972_v28 = vpop.f32.mrf.mxu1  ;;  %v4909_v30 = vpop.f32.mrf.mxu0 }
 0x214   : > { %v6640_v31 = vadd.f32 %v4971_v24, %v3387_v41  ;;  %v4910_v33 = vadd.f32 %v4909_v30, %v4908_v26 }
 0x215   : > { %v4973_v37 = vpop.f32.mrf.mxu1  ;;  %v4911_v35 = vpop.f32.mrf.mxu0 }
 0x216   : > { %v4974_v34 = vadd.f32 %v4973_v37, %v4972_v28  ;;  %v3392_v56 = vadd.f32 %v4910_v33, %v6600_v16 }
 0x217   : > { %v4975_v39 = vpop.f32.mrf.mxu1  ;;  %v4912_v40 = vpop.f32.mrf.mxu0 }
 0x218   : > { %v6643_v42 = vadd.f32 %v4974_v34, %v3392_v56  ;;  %v4913_v43 = vadd.f32 %v4912_v40, %v4911_v35 }
 0x219   : > { %v4976_v51 = vpop.f32.mrf.mxu1  ;;  %v4914_v46 = vpop.f32.mrf.mxu0 }
 0x21a   : > { %v4977_v44 = vadd.f32 %v4976_v51, %v4975_v39  ;;  %v3395_v1 = vadd.f32 %v4913_v43, %v6602_v25 }
 0x21b   : > { %v4978_v48 = vpop.f32.mrf.mxu1  ;;  %v4915_v49 = vpop.f32.mrf.mxu0 }
 0x21c   : > { %v6646_v50 = vadd.f32 %v4977_v44, %v3395_v1  ;;  %v4916_v52 = vadd.f32 %v4915_v49, %v4914_v46 }
 0x21d   : > { %v4979_v59 = vpop.f32.mrf.mxu1  ;;  %v4917_v55 = vpop.f32.mrf.mxu0 }
 0x21e   : > { %v4980_v54 = vadd.f32 %v4979_v59, %v4978_v48  ;;  %v3400_v16 = vadd.f32 %v4916_v52, %v6604_v36 }
 0x21f   : > { %v4981_v58 = vpop.f32.mrf.mxu1  ;;  %v4918_v60 = vpop.f32.mrf.mxu0 }
 0x220   : > { %v6649_v61 = vadd.f32 %v4980_v54, %v3400_v16  ;;  %v4919_v63 = vadd.f32 %v4918_v60, %v4917_v55 }
 0x221   : > { %v4982_v9 = vpop.f32.mrf.mxu1  ;;  %v4920_v2 = vpop.f32.mrf.mxu0 }
 0x222   : > { %v4983_v0 = vadd.f32 %v4982_v9, %v4981_v58  ;;  %v3403_v25 = vadd.f32 %v4919_v63, %v6606_v45 }
 0x223   : > { %v4984_v4 = vpop.f32.mrf.mxu1  ;;  %v4921_v5 = vpop.f32.mrf.mxu0 }
 0x224   : > { %v6652_v6 = vadd.f32 %v4983_v0, %v3403_v25  ;;  %v4922_v7 = vadd.f32 %v4921_v5, %v4920_v2 }
 0x225   : > { %v4985_v17 = vpop.f32.mrf.mxu1  ;;  %v4923_v11 = vpop.f32.mrf.mxu0 }
 0x226   : > { %v4986_v10 = vadd.f32 %v4985_v17, %v4984_v4  ;;  %v3408_v36 = vadd.f32 %v4922_v7, %v6608_v53 }
 0x227   : > { %v4987_v13 = vpop.f32.mrf.mxu1  ;;  %v4924_v14 = vpop.f32.mrf.mxu0 }
 0x228   : > { %v6655_v15 = vadd.f32 %v4986_v10, %v3408_v36  ;;  %v4925_v18 = vadd.f32 %v4924_v14, %v4923_v11 }
 0x229   : > { %v4988_v32 = vpop.f32.mrf.mxu1  ;;  %v5006_v21 = vpop.f32.mrf.mxu0 }
 0x22a   : > { %v4989_v20 = vadd.f32 %v4988_v32, %v4987_v13  ;;  %v3411_v45 = vadd.f32 %v4925_v18, %v6610_v62 }
 0x22b   : > { %v5070_v23 = vpop.f32.mrf.mxu1  ;;  %v5007_v29 = vpop.f32.mrf.mxu0 }
 0x22c   : > { %v6658_v24 = vadd.f32 %v4989_v20, %v3411_v45  ;;  %v5008_v26 = vadd.f32 %v5007_v29, %v5006_v21 }
 0x22d   : > { %v5071_v41 = vpop.f32.mrf.mxu1  ;;  %v5009_v30 = vpop.f32.mrf.mxu0 }
 0x22e   : > { %v5072_v28 = vadd.f32 %v5071_v41, %v5070_v23  ;;  %v3546_v53 = vadd.f32 %v5008_v26, %v6613_v8 }
 0x22f   : > { %v5073_v33 = vpop.f32.mrf.mxu1  ;;  %v5010_v37 = vpop.f32.mrf.mxu0 }
 0x230   : > { %v6661_v34 = vadd.f32 %v5072_v28, %v3546_v53  ;;  %v5011_v35 = vadd.f32 %v5010_v37, %v5009_v30 }
 0x231   : > { %v5074_v56 = vpop.f32.mrf.mxu1  ;;  %v5012_v40 = vpop.f32.mrf.mxu0 }
 0x232   : > { %v5075_v39 = vadd.f32 %v5074_v56, %v5073_v33  ;;  %v3549_v62 = vadd.f32 %v5011_v35, %v6616_v19 }
 0x233   : > { %v5076_v43 = vpop.f32.mrf.mxu1  ;;  %v5013_v51 = vpop.f32.mrf.mxu0 }
 0x234   : > { %v6664_v44 = vadd.f32 %v5075_v39, %v3549_v62  ;;  %v5014_v46 = vadd.f32 %v5013_v51, %v5012_v40 }
 0x235   : > { %v5077_v1 = vpop.f32.mrf.mxu1  ;;  %v5015_v49 = vpop.f32.mrf.mxu0 }
 0x236   : > { %v5078_v48 = vadd.f32 %v5077_v1, %v5076_v43  ;;  %v3554_v8 = vadd.f32 %v5014_v46, %v6619_v27 }
 0x237   : > { %v5079_v52 = vpop.f32.mrf.mxu1  ;;  %v5016_v59 = vpop.f32.mrf.mxu0 }
 0x238   : > { %v6667_v54 = vadd.f32 %v5078_v48, %v3554_v8  ;;  %v5017_v55 = vadd.f32 %v5016_v59, %v5015_v49 }
 0x239   : > { %v5080_v16 = vpop.f32.mrf.mxu1  ;;  %v5018_v60 = vpop.f32.mrf.mxu0 }
 0x23a   : > { %v5081_v58 = vadd.f32 %v5080_v16, %v5079_v52  ;;  %v3557_v19 = vadd.f32 %v5017_v55, %v6622_v38 }
 0x23b   : > { %v5082_v63 = vpop.f32.mrf.mxu1  ;;  %v5019_v9 = vpop.f32.mrf.mxu0 }
 0x23c   : > { %v6670_v0 = vadd.f32 %v5081_v58, %v3557_v19  ;;  %v5020_v2 = vadd.f32 %v5019_v9, %v5018_v60 }
 0x23d   : > { %v5083_v25 = vpop.f32.mrf.mxu1  ;;  %v5021_v5 = vpop.f32.mrf.mxu0 }
 0x23e   : > { %v5084_v4 = vadd.f32 %v5083_v25, %v5082_v63  ;;  %v3562_v27 = vadd.f32 %v5020_v2, %v6625_v47 }
 0x23f   : > { %v5085_v7 = vpop.f32.mrf.mxu1  ;;  %v5022_v17 = vpop.f32.mrf.mxu0 }
 0x240   : > { %v6673_v10 = vadd.f32 %v5084_v4, %v3562_v27  ;;  %v5023_v11 = vadd.f32 %v5022_v17, %v5021_v5 }
 0x241   : > { %v5086_v36 = vpop.f32.mrf.mxu1  ;;  %v5024_v14 = vpop.f32.mrf.mxu0 }
 0x242   : > { %v5087_v13 = vadd.f32 %v5086_v36, %v5085_v7  ;;  %v3565_v38 = vadd.f32 %v5023_v11, %v6628_v57 }
 0x243   : > { %v5088_v18 = vpop.f32.mrf.mxu1  ;;  %v5025_v32 = vpop.f32.mrf.mxu0 }
 0x244   : > { %v6676_v20 = vadd.f32 %v5087_v13, %v3565_v38  ;;  %v5026_v21 = vadd.f32 %v5025_v32, %v5024_v14 }
 0x245   : > { %v5089_v45 = vpop.f32.mrf.mxu1  ;;  %v5027_v29 = vpop.f32.mrf.mxu0 }
 0x246   : > { %v5090_v23 = vadd.f32 %v5089_v45, %v5088_v18  ;;  %v3570_v47 = vadd.f32 %v5026_v21, %v6631_v3 }
 0x247   : > { %v5091_v26 = vpop.f32.mrf.mxu1  ;;  %v5028_v41 = vpop.f32.mrf.mxu0 }
 0x248   : > { %v6679_v28 = vadd.f32 %v5090_v23, %v3570_v47  ;;  %v5029_v30 = vadd.f32 %v5028_v41, %v5027_v29 }
 0x249   : > { %v5092_v53 = vpop.f32.mrf.mxu1  ;;  %v5030_v37 = vpop.f32.mrf.mxu0 }
 0x24a   : > { %v5093_v33 = vadd.f32 %v5092_v53, %v5091_v26  ;;  %v3573_v57 = vadd.f32 %v5029_v30, %v6634_v12 }
 0x24b   : > { %v5094_v35 = vpop.f32.mrf.mxu1  ;;  %v5031_v56 = vpop.f32.mrf.mxu0 }
 0x24c   : > { %v6682_v39 = vadd.f32 %v5093_v33, %v3573_v57  ;;  %v5032_v40 = vadd.f32 %v5031_v56, %v5030_v37 }
 0x24d   : > { %v5095_v62 = vpop.f32.mrf.mxu1  ;;  %v5033_v51 = vpop.f32.mrf.mxu0 }
 0x24e   : > { %v5096_v43 = vadd.f32 %v5095_v62, %v5094_v35  ;;  %v3578_v3 = vadd.f32 %v5032_v40, %v6637_v22 }
 0x24f   : > { %v5097_v46 = vpop.f32.mrf.mxu1  ;;  %v5034_v1 = vpop.f32.mrf.mxu0 }
 0x250   : > { %v6685_v48 = vadd.f32 %v5096_v43, %v3578_v3  ;;  %v5035_v49 = vadd.f32 %v5034_v1, %v5033_v51 }
 0x251   : > { %v5098_v8 = vpop.f32.mrf.mxu1  ;;  %v5036_v59 = vpop.f32.mrf.mxu0 }
 0x252   : > { %v5099_v52 = vadd.f32 %v5098_v8, %v5097_v46  ;;  %v3581_v12 = vadd.f32 %v5035_v49, %v6640_v31 }
 0x253   : > { %v5100_v55 = vpop.f32.mrf.mxu1  ;;  %v5037_v16 = vpop.f32.mrf.mxu0 }
 0x254   : > { %v6688_v58 = vadd.f32 %v5099_v52, %v3581_v12  ;;  %v5038_v60 = vadd.f32 %v5037_v16, %v5036_v59 }
 0x255   : > { %v5101_v19 = vpop.f32.mrf.mxu1  ;;  %v5039_v9 = vpop.f32.mrf.mxu0 }
 0x256   : > { %v5102_v63 = vadd.f32 %v5101_v19, %v5100_v55  ;;  %v3586_v22 = vadd.f32 %v5038_v60, %v6643_v42 }
 0x257   : > { %v5103_v2 = vpop.f32.mrf.mxu1  ;;  %v5040_v25 = vpop.f32.mrf.mxu0 }
 0x258   : > { %v6691_v4 = vadd.f32 %v5102_v63, %v3586_v22  ;;  %v5041_v5 = vadd.f32 %v5040_v25, %v5039_v9 }
 0x259   : > { %v5104_v27 = vpop.f32.mrf.mxu1  ;;  %v5042_v17 = vpop.f32.mrf.mxu0 }
 0x25a   : > { %v5105_v7 = vadd.f32 %v5104_v27, %v5103_v2  ;;  %v3589_v31 = vadd.f32 %v5041_v5, %v6646_v50 }
 0x25b   : > { %v5106_v11 = vpop.f32.mrf.mxu1  ;;  %v5043_v36 = vpop.f32.mrf.mxu0 }
 0x25c   : > { %v6694_v13 = vadd.f32 %v5105_v7, %v3589_v31  ;;  %v5044_v14 = vadd.f32 %v5043_v36, %v5042_v17 }
 0x25d   : > { %v5107_v38 = vpop.f32.mrf.mxu1  ;;  %v5045_v32 = vpop.f32.mrf.mxu0 }
 0x25e   : > { %v5108_v18 = vadd.f32 %v5107_v38, %v5106_v11  ;;  %v3594_v42 = vadd.f32 %v5044_v14, %v6649_v61 }
 0x25f   : > { %v5109_v21 = vpop.f32.mrf.mxu1  ;;  %v5046_v45 = vpop.f32.mrf.mxu0 }
 0x260   : > { %v6697_v23 = vadd.f32 %v5108_v18, %v3594_v42  ;;  %v5047_v29 = vadd.f32 %v5046_v45, %v5045_v32 }
 0x261   : > { %v5110_v47 = vpop.f32.mrf.mxu1  ;;  %v5048_v41 = vpop.f32.mrf.mxu0 }
 0x262   : > { %v5111_v26 = vadd.f32 %v5110_v47, %v5109_v21  ;;  %v3597_v50 = vadd.f32 %v5047_v29, %v6652_v6 }
 0x263   : > { %v5112_v30 = vpop.f32.mrf.mxu1  ;;  %v5049_v53 = vpop.f32.mrf.mxu0 }
 0x264   : > { %v6700_v33 = vadd.f32 %v5111_v26, %v3597_v50  ;;  %v5050_v37 = vadd.f32 %v5049_v53, %v5048_v41 }
 0x265   : > { %v5113_v57 = vpop.f32.mrf.mxu1  ;;  %v6702_v35 = vpop.f32.mrf.mxu0 }
 0x266   : > { %v3602_v61 = vadd.f32 %v5050_v37, %v6655_v15  ;;  %v5114_v56 = vadd.f32 %v5113_v57, %v5112_v30 }
 0x267   : > { %v6705_v40 = vpop.f32.mrf.mxu1  ;;  %v6707_v62 = vpop.f32.mrf.mxu0 }
 0x268   : > { %v6709_v43 = vadd.f32 %v5114_v56, %v3602_v61 }
 0x269   : > { %v6711_v51 = vpop.f32.mrf.mxu1  ;;  %v5134_v6 = vpop.f32.mrf.mxu0 }
 0x26b   : > { %v5198_v3 = vpop.f32.mrf.mxu1  ;;  %v5135_v46 = vpop.f32.mrf.mxu0 }
 0x26c   : > { %v5136_v1 = vadd.f32 %v5135_v46, %v5134_v6 }
 0x26d   : > { %v5199_v49 = vpop.f32.mrf.mxu1  ;;  %v5137_v8 = vpop.f32.mrf.mxu0 }
 0x26e   : > { %v3740_v52 = vadd.f32 %v5136_v1, %v6661_v34  ;;  %v5200_v12 = vadd.f32 %v5199_v49, %v5198_v3 }
 0x26f   : > { %v5201_v59 = vpop.f32.mrf.mxu1  ;;  %v5138_v15 = vpop.f32.mrf.mxu0 }
 0x270   : > { %v5139_v55 = vadd.f32 %v5138_v15, %v5137_v8  ;;  %v6714_v60 = vadd.f32 %v5200_v12, %v3740_v52 }
 0x271   : > { %v5202_v16 = vpop.f32.mrf.mxu1  ;;  %v5140_v19 = vpop.f32.mrf.mxu0 }
 0x272   : > { %v3743_v63 = vadd.f32 %v5139_v55, %v6664_v44  ;;  %v5203_v9 = vadd.f32 %v5202_v16, %v5201_v59  ;;  %v3921_v34 = vmul.f32 %v6714_v60, %v6714_v60 }
 0x273   : > { %v5204_v22 = vpop.f32.mrf.mxu1  ;;  %v5141_v2 = vpop.f32.mrf.mxu0 }
 0x274   : > { %v6717_v25 = vadd.f32 %v5203_v9, %v3743_v63  ;;  %v5142_v5 = vadd.f32 %v5141_v2, %v5140_v19 }
 0x275   : > { %v5205_v27 = vpop.f32.mrf.mxu1  ;;  %v5143_v7 = vpop.f32.mrf.mxu0 }
 0x276   : > { %v3899_v17 = vadd.f32 %v6717_v25, %v6714_v60  ;;  %v3922_v31 = vmul.f32 %v6717_v25, %v6717_v25  ;;  %v3748_v11 = vadd.f32 %v5142_v5, %v6667_v54  ;;  %v5206_v44 = vadd.f32 %v5205_v27, %v5204_v22 }
 0x277   : > { %v5207_v36 = vpop.f32.mrf.mxu1  ;;  %v5144_v14 = vpop.f32.mrf.mxu0 }
 0x278   : > { %v3937_v38 = vadd.f32 %v3922_v31, %v3921_v34  ;;  %v6726_v18 = vadd.f32 %v5206_v44, %v3748_v11  ;;  %v5145_v32 = vadd.f32 %v5144_v14, %v5143_v7 }
 0x279   : > { %v5208_v42 = vpop.f32.mrf.mxu1  ;;  %v5146_v21 = vpop.f32.mrf.mxu0 }
 0x27a   : > { %v3900_v45 = vadd.f32 %v3899_v17, %v6726_v18  ;;  %v3923_v29 = vmul.f32 %v6726_v18, %v6726_v18  ;;  %v3751_v47 = vadd.f32 %v5145_v32, %v6670_v0  ;;  %v5209_v26 = vadd.f32 %v5208_v42, %v5207_v36 }
 0x27b   : > { %v5210_v41 = vpop.f32.mrf.mxu1  ;;  %v5147_v50 = vpop.f32.mrf.mxu0 }
 0x27c   : > { %v3938_v54 = vadd.f32 %v3937_v38, %v3923_v29  ;;  %v6732_v30 = vadd.f32 %v5209_v26, %v3751_v47  ;;  %v5148_v53 = vadd.f32 %v5147_v50, %v5146_v21 }
 0x27d   : > { %v5211_v37 = vpop.f32.mrf.mxu1  ;;  %v5149_v57 = vpop.f32.mrf.mxu0 }
 0x27e   : > { %v3901_v61 = vadd.f32 %v3900_v45, %v6732_v30  ;;  %v3924_v56 = vmul.f32 %v6732_v30, %v6732_v30  ;;  %v3756_v6 = vadd.f32 %v5148_v53, %v6673_v10  ;;  %v5212_v3 = vadd.f32 %v5211_v37, %v5210_v41 }
 0x27f   : > { %v5213_v46 = vpop.f32.mrf.mxu1  ;;  %v5150_v1 = vpop.f32.mrf.mxu0 }
 0x280   : > { %v3939_v0 = vadd.f32 %v3938_v54, %v3924_v56  ;;  %v6738_v49 = vadd.f32 %v5212_v3, %v3756_v6  ;;  %v5151_v8 = vadd.f32 %v5150_v1, %v5149_v57 }
 0x281   : > { %v5214_v52 = vpop.f32.mrf.mxu1  ;;  %v5152_v59 = vpop.f32.mrf.mxu0 }
 0x282   : > { %v3902_v12 = vadd.f32 %v3901_v61, %v6738_v49  ;;  %v3925_v15 = vmul.f32 %v6738_v49, %v6738_v49  ;;  %v3759_v55 = vadd.f32 %v5151_v8, %v6676_v20  ;;  %v5215_v16 = vadd.f32 %v5214_v52, %v5213_v46 }
 0x283   : > { %v5216_v19 = vpop.f32.mrf.mxu1  ;;  %v5153_v63 = vpop.f32.mrf.mxu0 }
 0x284   : > { %v3940_v10 = vadd.f32 %v3939_v0, %v3925_v15  ;;  %v6744_v9 = vadd.f32 %v5215_v16, %v3759_v55  ;;  %v5154_v22 = vadd.f32 %v5153_v63, %v5152_v59 }
 0x285   : > { %v5217_v2 = vpop.f32.mrf.mxu1  ;;  %v5155_v5 = vpop.f32.mrf.mxu0 }
 0x286   : > { %v3903_v27 = vadd.f32 %v3902_v12, %v6744_v9  ;;  %v3926_v34 = vmul.f32 %v6744_v9, %v6744_v9  ;;  %v3764_v7 = vadd.f32 %v5154_v22, %v6679_v28  ;;  %v5218_v17 = vadd.f32 %v5217_v2, %v5216_v19 }
 0x287   : > { %v5219_v31 = vpop.f32.mrf.mxu1  ;;  %v5156_v11 = vpop.f32.mrf.mxu0 }
 0x288   : > { %v3941_v20 = vadd.f32 %v3940_v10, %v3926_v34  ;;  %v6750_v44 = vadd.f32 %v5218_v17, %v3764_v7  ;;  %v5157_v36 = vadd.f32 %v5156_v11, %v5155_v5 }
 0x289   : > { %v5220_v14 = vpop.f32.mrf.mxu1  ;;  %v5158_v38 = vpop.f32.mrf.mxu0 }
 0x28a   : > { %v3904_v32 = vadd.f32 %v3903_v27, %v6750_v44  ;;  %v3927_v42 = vmul.f32 %v6750_v44, %v6750_v44  ;;  %v3767_v21 = vadd.f32 %v5157_v36, %v6682_v39  ;;  %v5221_v45 = vadd.f32 %v5220_v14, %v5219_v31 }
 0x28b   : > { %v5222_v29 = vpop.f32.mrf.mxu1  ;;  %v5159_v47 = vpop.f32.mrf.mxu0 }
 0x28c   : > { %v3942_v28 = vadd.f32 %v3941_v20, %v3927_v42  ;;  %v6756_v26 = vadd.f32 %v5221_v45, %v3767_v21  ;;  %v5160_v41 = vadd.f32 %v5159_v47, %v5158_v38 }
 0x28d   : > { %v5223_v50 = vpop.f32.mrf.mxu1  ;;  %v5161_v54 = vpop.f32.mrf.mxu0 }
 0x28e   : > { %v3905_v53 = vadd.f32 %v3904_v32, %v6756_v26  ;;  %v3928_v37 = vmul.f32 %v6756_v26, %v6756_v26  ;;  %v3772_v57 = vadd.f32 %v5160_v41, %v6685_v48  ;;  %v5224_v61 = vadd.f32 %v5223_v50, %v5222_v29 }
 0x28f   : > { %v5225_v56 = vpop.f32.mrf.mxu1  ;;  %v5162_v6 = vpop.f32.mrf.mxu0 }
 0x290   : > { %v3943_v39 = vadd.f32 %v3942_v28, %v3928_v37  ;;  %v6762_v3 = vadd.f32 %v5224_v61, %v3772_v57  ;;  %v5163_v46 = vadd.f32 %v5162_v6, %v5161_v54 }
 0x291   : > { %v5226_v1 = vpop.f32.mrf.mxu1  ;;  %v5164_v0 = vpop.f32.mrf.mxu0 }
 0x292   : > { %v3906_v8 = vadd.f32 %v3905_v53, %v6762_v3  ;;  %v3929_v52 = vmul.f32 %v6762_v3, %v6762_v3  ;;  %v3775_v59 = vadd.f32 %v5163_v46, %v6688_v58  ;;  %v5227_v12 = vadd.f32 %v5226_v1, %v5225_v56 }
 0x293   : > { %v5228_v15 = vpop.f32.mrf.mxu1  ;;  %v5165_v55 = vpop.f32.mrf.mxu0 }
 0x294   : > { %v3944_v48 = vadd.f32 %v3943_v39, %v3929_v52  ;;  %v6768_v16 = vadd.f32 %v5227_v12, %v3775_v59  ;;  %v5166_v19 = vadd.f32 %v5165_v55, %v5164_v0 }
 0x295   : > { %v5229_v63 = vpop.f32.mrf.mxu1  ;;  %v5167_v10 = vpop.f32.mrf.mxu0 }
 0x296   : > { %v3907_v22 = vadd.f32 %v3906_v8, %v6768_v16  ;;  %v3930_v2 = vmul.f32 %v6768_v16, %v6768_v16  ;;  %v3780_v5 = vadd.f32 %v5166_v19, %v6691_v4  ;;  %v5230_v27 = vadd.f32 %v5229_v63, %v5228_v15 }
 0x297   : > { %v5231_v34 = vpop.f32.mrf.mxu1  ;;  %v5168_v7 = vpop.f32.mrf.mxu0 }
 0x298   : > { %v3945_v58 = vadd.f32 %v3944_v48, %v3930_v2  ;;  %v6774_v17 = vadd.f32 %v5230_v27, %v3780_v5  ;;  %v5169_v31 = vadd.f32 %v5168_v7, %v5167_v10  ;;  %v5117_v48 = vadd.f32 %v6711_v51, %v6705_v40 }
 0x299   : > { %v5232_v11 = vpop.f32.mrf.mxu1  ;;  %v5170_v20 = vpop.f32.mrf.mxu0 }
 0x29a   : > { %v3908_v36 = vadd.f32 %v3907_v22, %v6774_v17  ;;  %v3931_v14 = vmul.f32 %v6774_v17, %v6774_v17  ;;  %v3783_v38 = vadd.f32 %v5169_v31, %v6694_v13  ;;  %v5233_v32 = vadd.f32 %v5232_v11, %v5231_v34 }
 0x29b   : > { %v5234_v42 = vpop.f32.mrf.mxu1  ;;  %v5171_v21 = vpop.f32.mrf.mxu0  ;;  %v5053_v13 = vadd.f32 %v6707_v62, %v6702_v35 }
 0x29c   : > { %v3946_v4 = vadd.f32 %v3945_v58, %v3931_v14  ;;  %v6780_v45 = vadd.f32 %v5233_v32, %v3783_v38  ;;  %v5172_v29 = vadd.f32 %v5171_v21, %v5170_v20 }
 0x29d   : > { %v5235_v47 = vpop.f32.mrf.mxu1  ;;  %v5173_v28 = vpop.f32.mrf.mxu0  ;;  %v3605_v12 = vadd.f32 %v5053_v13, %v6658_v24 }
 0x29e   : > { %v3909_v41 = vadd.f32 %v3908_v36, %v6780_v45  ;;  %v3932_v50 = vmul.f32 %v6780_v45, %v6780_v45  ;;  %v3788_v54 = vadd.f32 %v5172_v29, %v6697_v23  ;;  %v5236_v53 = vadd.f32 %v5235_v47, %v5234_v42 }
 0x29f   : > { %v5237_v37 = vpop.f32.mrf.mxu1  ;;  %v5174_v57 = vpop.f32.mrf.mxu0  ;;  %v3702_v24 = vadd.f32 %v5117_v48, %v3605_v12 }
 0x2a0   : > { %v3947_v61 = vadd.f32 %v3946_v4, %v3932_v50  ;;  %v6788_v56 = vadd.f32 %v5236_v53, %v3788_v54  ;;  %v5175_v6 = vadd.f32 %v5174_v57, %v5173_v28 }
 0x2a1   : > { %v5238_v39 = vpop.f32.mrf.mxu1  ;;  %v5176_v46 = vpop.f32.mrf.mxu0 }
 0x2a2   : > { %v3910_v1 = vadd.f32 %v3909_v41, %v6788_v56  ;;  %v3933_v0 = vmul.f32 %v6788_v56, %v6788_v56  ;;  %v3791_v8 = vadd.f32 %v5175_v6, %v6700_v33  ;;  %v5239_v23 = vadd.f32 %v5238_v39, %v5237_v37 }
 0x2a3   : > { %v5240_v52 = vpop.f32.mrf.mxu1  ;;  %v5177_v59 = vpop.f32.mrf.mxu0 }
 0x2a4   : > { %v3948_v15 = vadd.f32 %v3947_v61, %v3933_v0  ;;  %v6795_v35 = vadd.f32 %v5239_v23, %v3791_v8  ;;  %v5178_v62 = vadd.f32 %v5177_v59, %v5176_v46 }
 0x2a5   : > { %v5241_v55 = vpop.f32.mrf.mxu1  ;;  %v5179_v19 = vpop.f32.mrf.mxu0 }
 0x2a6   : > { %v3911_v63 = vadd.f32 %v3910_v1, %v6795_v35  ;;  %v3934_v10 = vmul.f32 %v6795_v35, %v6795_v35  ;;  %v3796_v33 = vadd.f32 %v5178_v62, %v6709_v43  ;;  %v5242_v22 = vadd.f32 %v5241_v55, %v5240_v52 }
 0x2a7   : > { %v5243_v2 = vpop.f32.mrf.mxu1  ;;  %v5180_v5 = vpop.f32.mrf.mxu0 }
 0x2a8   : > { %v3949_v27 = vadd.f32 %v3948_v15, %v3934_v10  ;;  %v6803_v34 = vadd.f32 %v5242_v22, %v3796_v33  ;;  %v5181_v7 = vadd.f32 %v5180_v5, %v5179_v19  ;;  %v4649_v19 = vld [vmem:[%s1325_s6] ss:$0 sm:$0xff] }
 0x2a9   : > { %v5244_v58 = vpop.f32.mrf.mxu1 }
 0x2aa   : > { %v3912_v31 = vadd.f32 %v3911_v63, %v6803_v34  ;;  %v3935_v40 = vmul.f32 %v6803_v34, %v6803_v34  ;;  %v3799_v51 = vadd.f32 %v5181_v7, %v3702_v24  ;;  %v5245_v11 = vadd.f32 %v5244_v58, %v5243_v2 }
 0x2ac   : > { %v3950_v20 = vadd.f32 %v3949_v27, %v3935_v40  ;;  %v3896_v36 = vadd.f32 %v5245_v11, %v3799_v51 }
 0x2ae   : > { %v3913_v14 = vadd.f32 %v3912_v31, %v3896_v36  ;;  %v3936_v43 = vmul.f32 %v3896_v36, %v3896_v36 }
 0x2b0   : > { %v3914_v38 = vrot.slane %v3913_v14, 4  ;;  %v3951_v32 = vadd.f32 %v3950_v20, %v3936_v43 }
 0x2b2   : > { %v3915_v42 = vadd.f32 %v3914_v38, %v3913_v14  ;;  %v3952_v21 = vrot.slane %v3951_v32, 4 }
 0x2b4   : > { %v3916_v4 = vrot.slane %v3915_v42, 2  ;;  %v3953_v29 = vadd.f32 %v3952_v21, %v3951_v32 }
 0x2b6   : > { %v3917_v47 = vadd.f32 %v3916_v4, %v3915_v42  ;;  %v3954_v28 = vrot.slane %v3953_v29, 2 }
 0x2b8   : > { %v3918_v41 = vrot.slane %v3917_v47, 1  ;;  %v3955_v50 = vadd.f32 %v3954_v28, %v3953_v29 }
 0x2ba   : > { %v3919_v54 = vadd.f32 %v3918_v41, %v3917_v47  ;;  %v3956_v53 = vrot.slane %v3955_v50, 1 }
 0x2bc   : > { %v3920_v37 = vmul.f32 0.0078125, %v3919_v54  ;;  %v3957_v57 = vadd.f32 %v3956_v53, %v3955_v50 }
 0x2be   : > { %v3958_v13 = vmul.f32 0.0078125, %v3957_v57  ;;  %v3959_v61 = vmul.f32 %v3920_v37, %v3920_v37  ;;  %v3964_v6 = vsub.f32 %v6714_v60, %v3920_v37  ;;  %v3965_v39 = vsub.f32 %v6717_v25, %v3920_v37 }
 0x2bf   : > { %v3966_v46 = vsub.f32 %v6726_v18, %v3920_v37  ;;  %v3967_v1 = vsub.f32 %v6732_v30, %v3920_v37  ;;  %v3968_v0 = vsub.f32 %v6738_v49, %v3920_v37  ;;  %v3969_v8 = vsub.f32 %v6744_v9, %v3920_v37 }
 0x2c0   : > { %v3960_v23 = vsub.f32 %v3958_v13, %v3959_v61  ;;  %v3970_v52 = vsub.f32 %v6750_v44, %v3920_v37  ;;  %v3971_v59 = vsub.f32 %v6756_v26, %v3920_v37  ;;  %v3972_v12 = vsub.f32 %v6762_v3, %v3920_v37 }
 0x2c1   : > { %v3973_v60 = vsub.f32 %v6768_v16, %v3920_v37  ;;  %v3974_v25 = vsub.f32 %v6774_v17, %v3920_v37  ;;  %v3975_v18 = vsub.f32 %v6780_v45, %v3920_v37  ;;  %v3976_v30 = vsub.f32 %v6788_v56, %v3920_v37 }
 0x2c2   : > { %v3961_v49 = vmax.f32 %v3960_v23, 0.0  ;;  %v3977_v15 = vsub.f32 %v6795_v35, %v3920_v37  ;;  %v3978_v9 = vsub.f32 %v6803_v34, %v3920_v37  ;;  %v3979_v62 = vsub.f32 %v3896_v36, %v3920_v37  ;;  %v4650_v36 = vld [vmem:[%s1328_s10] ss:$0 sm:$0xff] }
 0x2c4   : > { %v3962_v55 = vadd.f32 1e-05, %v3961_v49 }
 0x2c6   : > { %5414 = vrsqrt.f32 %v3962_v55 }
 0x2d3   : > { %v5415_v44 = vpop.eup %5414 }
 0x2d4   : > { %v3980_v26 = vmul.f32 %v5415_v44, %v3964_v6  ;;  %v3981_v3 = vmul.f32 %v5415_v44, %v3965_v39  ;;  %v3982_v16 = vmul.f32 %v5415_v44, %v3966_v46  ;;  %v3983_v17 = vmul.f32 %v5415_v44, %v3967_v1 }
 0x2d5   : > { %v3984_v45 = vmul.f32 %v5415_v44, %v3968_v0  ;;  %v3985_v56 = vmul.f32 %v5415_v44, %v3969_v8  ;;  %v3986_v35 = vmul.f32 %v5415_v44, %v3970_v52  ;;  %v3987_v48 = vmul.f32 %v5415_v44, %v3971_v59 }
 0x2d6   : > { %v3988_v63 = vmul.f32 %v5415_v44, %v3972_v12  ;;  %v3989_v10 = vmul.f32 %v5415_v44, %v3973_v60  ;;  %v3990_v33 = vmul.f32 %v5415_v44, %v3974_v25  ;;  %v3991_v22 = vmul.f32 %v5415_v44, %v3975_v18 }
 0x2d7   : > { %v3992_v2 = vmul.f32 %v5415_v44, %v3976_v30  ;;  %v3993_v5 = vmul.f32 %v5415_v44, %v3977_v15  ;;  %v3994_v24 = vmul.f32 %v5415_v44, %v3978_v9  ;;  %v3995_v27 = vmul.f32 %v5415_v44, %v3979_v62 }
 0x2d8   : > { %v4003_v34 = vmul.f32 %v4649_v19, %v3980_v26  ;;  %v4004_v7 = vmul.f32 %v4649_v19, %v3981_v3  ;;  %v4005_v58 = vmul.f32 %v4649_v19, %v3982_v16  ;;  %v4006_v31 = vmul.f32 %v4649_v19, %v3983_v17 }
 0x2d9   : > { %v4007_v40 = vmul.f32 %v4649_v19, %v3984_v45  ;;  %v4008_v51 = vmul.f32 %v4649_v19, %v3985_v56  ;;  %v4009_v11 = vmul.f32 %v4649_v19, %v3986_v35  ;;  %v4010_v20 = vmul.f32 %v4649_v19, %v3987_v48 }
 0x2da   : > { %v4011_v14 = vmul.f32 %v4649_v19, %v3988_v63  ;;  %v4012_v43 = vmul.f32 %v4649_v19, %v3989_v10  ;;  %v4013_v38 = vmul.f32 %v4649_v19, %v3990_v33  ;;  %v4014_v32 = vmul.f32 %v4649_v19, %v3991_v22 }
 0x2db   : > { %v4015_v42 = vmul.f32 %v4649_v19, %v3992_v2  ;;  %v4016_v21 = vmul.f32 %v4649_v19, %v3993_v5  ;;  %v4017_v4 = vmul.f32 %v4649_v19, %v3994_v24  ;;  %v4018_v29 = vmul.f32 %v4649_v19, %v3995_v27 }
 0x2dc   : > { %v4026_v47 = vadd.f32 %v4650_v36, %v4003_v34  ;;  %v4027_v28 = vadd.f32 %v4650_v36, %v4004_v7  ;;  %v4028_v41 = vadd.f32 %v4650_v36, %v4005_v58  ;;  %v4029_v50 = vadd.f32 %v4650_v36, %v4006_v31 }
 0x2dd   : > { %v4030_v54 = vadd.f32 %v4650_v36, %v4007_v40  ;;  %v4031_v53 = vadd.f32 %v4650_v36, %v4008_v51  ;;  %v4032_v37 = vadd.f32 %v4650_v36, %v4009_v11  ;;  %v4033_v57 = vadd.f32 %v4650_v36, %v4010_v20 }
 0x2de   : > { %v4034_v13 = vadd.f32 %v4650_v36, %v4011_v14  ;;  %v4035_v61 = vadd.f32 %v4650_v36, %v4012_v43  ;;  %v4036_v6 = vadd.f32 %v4650_v36, %v4013_v38  ;;  %v4037_v39 = vadd.f32 %v4650_v36, %v4014_v32 }
 0x2df   : > { %v4038_v46 = vadd.f32 %v4650_v36, %v4015_v42  ;;  %v4039_v1 = vadd.f32 %v4650_v36, %v4016_v21  ;;  %v4040_v0 = vadd.f32 %v4650_v36, %v4017_v4  ;;  %v4041_v8 = vadd.f32 %v4650_v36, %v4018_v29 }
 0x2e0   : > { %vm4042_vm0 = vcmp.ge.f32.partialorder %v4026_v47, 0.0  ;;  %vm4043_vm1 = vcmp.ge.f32.partialorder %v4027_v28, 0.0  ;;  %vm4044_vm2 = vcmp.ge.f32.partialorder %v4028_v41, 0.0  ;;  %vm4045_vm3 = vcmp.ge.f32.partialorder %v4029_v50, 0.0 }
 0x2e1   : > { %vm4046_vm4 = vcmp.ge.f32.partialorder %v4030_v54, 0.0  ;;  %vm4047_vm5 = vcmp.ge.f32.partialorder %v4031_v53, 0.0  ;;  %vm4048_vm6 = vcmp.ge.f32.partialorder %v4032_v37, 0.0  ;;  %vm4049_vm7 = vcmp.ge.f32.partialorder %v4033_v57, 0.0 }
 0x2e2   : > { %vm4050_vm8 = vcmp.ge.f32.partialorder %v4034_v13, 0.0  ;;  %vm4051_vm9 = vcmp.ge.f32.partialorder %v4035_v61, 0.0  ;;  %vm4052_vm10 = vcmp.ge.f32.partialorder %v4036_v6, 0.0  ;;  %vm4053_vm11 = vcmp.ge.f32.partialorder %v4037_v39, 0.0 }
 0x2e3   : > { %vm4054_vm12 = vcmp.ge.f32.partialorder %v4038_v46, 0.0  ;;  %vm4055_vm13 = vcmp.ge.f32.partialorder %v4039_v1, 0.0  ;;  %vm4056_vm14 = vcmp.ge.f32.partialorder %v4040_v0, 0.0  ;;  %vm4057_vm15 = vcmp.ge.f32.partialorder %v4041_v8, 0.0 }
 0x2e4   : > { %v4058_v23 = vmul.f32 0.2, %v4026_v47  ;;  %v4059_v52 = vmul.f32 0.2, %v4027_v28  ;;  %v4060_v59 = vmul.f32 0.2, %v4028_v41 }
 0x2e5   : > { %v4061_v12 = vmul.f32 0.2, %v4029_v50  ;;  %v4062_v60 = vmul.f32 0.2, %v4030_v54  ;;  %v4063_v25 = vmul.f32 0.2, %v4031_v53 }
 0x2e6   : > { %v4064_v18 = vmul.f32 0.2, %v4032_v37  ;;  %v4065_v30 = vmul.f32 0.2, %v4033_v57  ;;  %v4066_v49 = vmul.f32 0.2, %v4034_v13  ;;  %v4074_v15 = vsel %vm4042_vm0, %v4026_v47, %v4058_v23 }
 0x2e7   : > { %v4067_v9 = vmul.f32 0.2, %v4035_v61  ;;  %v4068_v62 = vmul.f32 0.2, %v4036_v6  ;;  %v4069_v55 = vmul.f32 0.2, %v4037_v39  ;;  %v4075_v44 = vsel %vm4043_vm1, %v4027_v28, %v4059_v52 }
 0x2e8   : > { %v4070_v26 = vmul.f32 0.2, %v4038_v46  ;;  %v4071_v3 = vmul.f32 0.2, %v4039_v1  ;;  %v4072_v16 = vmul.f32 0.2, %v4040_v0  ;;  %v4076_v17 = vsel %vm4044_vm2, %v4028_v41, %v4060_v59 }
 0x2e9   : > { %v4073_v45 = vmul.f32 0.2, %v4041_v8  ;;  %v4077_v56 = vsel %vm4045_vm3, %v4029_v50, %v4061_v12  ;;  %v4078_v35 = vsel %vm4046_vm4, %v4030_v54, %v4062_v60  ;;  %v4079_v48 = vsel %vm4047_vm5, %v4031_v53, %v4063_v25 }
 0x2ea   : > { %v4080_v19 = vsel %vm4048_vm6, %v4032_v37, %v4064_v18  ;;  %v4081_v63 = vsel %vm4049_vm7, %v4033_v57, %v4065_v30  ;;  %v4082_v10 = vsel %vm4050_vm8, %v4034_v13, %v4066_v49  ;;  %v4083_v33 = vsel %vm4051_vm9, %v4035_v61, %v4067_v9 }
 0x2eb   : > { %v4084_v22 = vsel %vm4052_vm10, %v4036_v6, %v4068_v62  ;;  %v4085_v2 = vsel %vm4053_vm11, %v4037_v39, %v4069_v55  ;;  %v4086_v5 = vsel %vm4054_vm12, %v4038_v46, %v4070_v26  ;;  %v4087_v24 = vsel %vm4055_vm13, %v4039_v1, %v4071_v3 }
 0x2ec   : > { %v4088_v27 = vsel %vm4056_vm14, %v4040_v0, %v4072_v16  ;;  %v4089_v34 = vsel %vm4057_vm15, %v4041_v8, %v4073_v45  ;;  %v4690_v7 = vpack.c.bf16 %v4075_v44, %v4074_v15  ;;  %v4695_v58 = vpack.c.bf16 %v4077_v56, %v4076_v17 }
 0x2ed   : > { %v4700_v31 = vpack.c.bf16 %v4079_v48, %v4078_v35  ;;  %v4705_v40 = vpack.c.bf16 %v4081_v63, %v4080_v19  ;;  %v4710_v51 = vpack.c.bf16 %v4083_v33, %v4082_v10  ;;  %v4715_v11 = vpack.c.bf16 %v4085_v2, %v4084_v22  ;;  %4176 = sbr.rel (!%p5516_p6) target bundleno = 768 (0x300), region = 81 }
 0x2ee   : > { %4691 = vst [vmem:[%s6856_s15] sm:$0xff] %v4690_v7   ;;  %4727 = vst [vmem:[%s6856_s15 + $0x8] sm:$0xff] %v4695_v58   ;;  %v4720_v20 = vpack.c.bf16 %v4087_v24, %v4086_v5  ;;  %v4725_v36 = vpack.c.bf16 %v4089_v34, %v4088_v27 }
 0x2ef   : > { %4728 = vst [vmem:[%s6856_s15 + $0x10] sm:$0xff] %v4700_v31   ;;  %4729 = vst [vmem:[%s6856_s15 + $0x18] sm:$0xff] %v4705_v40  }
 0x2f0   : > { %4730 = vst [vmem:[%s6856_s15 + $0x20] sm:$0xff] %v4710_v51   ;;  %4731 = vst [vmem:[%s6856_s15 + $0x28] sm:$0xff] %v4715_v11  }
 0x2f1   : > { %4732 = vst [vmem:[%s6856_s15 + $0x30] sm:$0xff] %v4720_v20   ;;  %4733 = vst [vmem:[%s6856_s15 + $0x38] sm:$0xff] %v4725_v36  }
 0x2f5   : > { %v4198_v14 = vld [vmem:[%s6856_s15] sm:$0xf]  ;;  %v4200_v43 = vld [vmem:[%s6856_s15 + $0x4] sm:$0xf]  ;;  %v4202_v38 = vld [vmem:[%s6856_s15 + $0x8] sm:$0xf] }
 0x2f6   : > { %v4204_v32 = vld [vmem:[%s6856_s15 + $0xc] sm:$0xf]  ;;  %v4206_v42 = vld [vmem:[%s6856_s15 + $0x10] sm:$0xf]  ;;  %4199 = vst [vmem:[%s4181_s13] sm:$0xf] %v4198_v14 }
 0x2f7   : > { %4201 = vst [vmem:[%s4181_s13 + $0x8] sm:$0xf] %v4200_v43  ;;  %4203 = vst [vmem:[%s4181_s13 + $0x10] sm:$0xf] %v4202_v38  ;;  %v4208_v21 = vld [vmem:[%s6856_s15 + $0x14] sm:$0xf] }
 0x2f8   : > { %4205 = vst [vmem:[%s4181_s13 + $0x18] sm:$0xf] %v4204_v32  ;;  %4207 = vst [vmem:[%s4181_s13 + $0x20] sm:$0xf] %v4206_v42  ;;  %v4210_v4 = vld [vmem:[%s6856_s15 + $0x18] sm:$0xf] }
 0x2f9   : > { %v4212_v29 = vld [vmem:[%s6856_s15 + $0x1c] sm:$0xf]  ;;  %4209 = vst [vmem:[%s4181_s13 + $0x28] sm:$0xf] %v4208_v21  ;;  %4211 = vst [vmem:[%s4181_s13 + $0x30] sm:$0xf] %v4210_v4 }
 0x2fa   : > { %4213 = vst [vmem:[%s4181_s13 + $0x38] sm:$0xf] %v4212_v29  ;;  %v4214_v47 = vld [vmem:[%s6856_s15 + $0x20] sm:$0xf]  ;;  %v4216_v28 = vld [vmem:[%s6856_s15 + $0x24] sm:$0xf] }
 0x2fb   : > { %v4218_v41 = vld [vmem:[%s6856_s15 + $0x28] sm:$0xf]  ;;  %4215 = vst [vmem:[%s4181_s13 + $0x40] sm:$0xf] %v4214_v47  ;;  %4217 = vst [vmem:[%s4181_s13 + $0x48] sm:$0xf] %v4216_v28 }
 0x2fc   : > { %4219 = vst [vmem:[%s4181_s13 + $0x50] sm:$0xf] %v4218_v41  ;;  %v4220_v50 = vld [vmem:[%s6856_s15 + $0x2c] sm:$0xf]  ;;  %v4222_v54 = vld [vmem:[%s6856_s15 + $0x30] sm:$0xf] }
 0x2fd   : > { %v4224_v53 = vld [vmem:[%s6856_s15 + $0x34] sm:$0xf]  ;;  %4221 = vst [vmem:[%s4181_s13 + $0x58] sm:$0xf] %v4220_v50  ;;  %4223 = vst [vmem:[%s4181_s13 + $0x60] sm:$0xf] %v4222_v54 }
 0x2fe   : > { %4225 = vst [vmem:[%s4181_s13 + $0x68] sm:$0xf] %v4224_v53  ;;  %v4226_v37 = vld [vmem:[%s6856_s15 + $0x38] sm:$0xf]  ;;  %v4228_v57 = vld [vmem:[%s6856_s15 + $0x3c] sm:$0xf] }
 0x2ff   : > { %4227 = vst [vmem:[%s4181_s13 + $0x70] sm:$0xf] %v4226_v37  ;;  %4229 = vst [vmem:[%s4181_s13 + $0x78] sm:$0xf] %v4228_v57 }
 0x300 PF: > { %s14_s19 = sadd.s32 1, %s5454_s19   ;;  %s6909_s15 = smov %s5442_s16 }
 0x301   : > { %p11_p12 = scmp.ge.s32.totalorder %s14_s19, 4   ;;  %s6910_s16 = smov %s5521_s25 }
 0x302   : > { %s6911_s17 = smov %s5450_s18  ;;  %s6912_s18 = smov %s6914_s20 }
 0x303   :  { %13 = sbr.rel (!%p11_p12) target bundleno = 3 (0x3), region = 162 }

// kernel: discriminator_forward.9
= control target key start
LH: loop header
LB: loop body
LE: loop exit
PB: predicated region body
PF: predicated region fallthrough
CT: control target
= control target key end

     0   :  { %v223_v3 = vlaneseq  ;;  %vm817_vm0 = vcmask 7168   ;;  %s1873_s0 = inlined_call_operand.vmem [shape: bf16[16,8192], index: 0, kind: input, shape index: {}]   ;;  %s1874_s1 = inlined_call_operand.vmem [shape: f32[1,8192], index: 1, kind: input, shape index: {}]   ;;  %s1875_s2 = inlined_call_operand.<no memory space> [shape: f32[1], index: 2, kind: input, shape index: {}]   ;;  %s1876_s3 = inlined_call_operand.vmem [shape: f32[16,1], index: 3, kind: output, shape index: {}]  }
   0x1   :  { %v857_v0 = vld [vmem:[%s1873_s0] sm:$0xff]  ;;  %v862_v1 = vld [vmem:[%s1873_s0 + $0x8] sm:$0xff]  ;;  %v867_v2 = vld [vmem:[%s1873_s0 + $0x10] sm:$0xff] }
   0x2   :  { %1958 = vst [vmem:[#allocation3_spill] sm:$0xff] %v867_v2  ;;  %v872_v4 = vld [vmem:[%s1873_s0 + $0x18] sm:$0xff]  ;;  %v877_v5 = vld [vmem:[%s1873_s0 + $0x20] sm:$0xff]  ;;  %v882_v6 = vld [vmem:[%s1873_s0 + $0x28] sm:$0xff]  ;;  %v224_v21 = vshrl.u32 %v223_v3, 7 }
   0x3   :  { %1959 = vst [vmem:[#allocation4_spill] sm:$0xff] %v872_v4  ;;  %1960 = vst [vmem:[#allocation5_spill] sm:$0xff] %v877_v5  ;;  %v887_v7 = vld [vmem:[%s1873_s0 + $0x88] sm:$0xff]  ;;  %v894_v10 = vld [vmem:[%s1873_s0 + $0x90] sm:$0xff] }
   0x4   :  { %1961 = vst [vmem:[#allocation6_spill] sm:$0xff] %v882_v6  ;;  %v899_v11 = vld [vmem:[%s1873_s0 + $0x98] sm:$0xff]  ;;  %v908_v16 = vld [vmem:[%s1873_s0 + $0xa0] sm:$0xff]  ;;  %v913_v17 = vld [vmem:[%s1873_s0 + $0xa8] sm:$0xff]  ;;  %v933_v35 = vsub.s32 0, %v224_v21  ;;  %v935_v36 = vsub.s32 1, %v224_v21 }
   0x5   :  { %v212_v34 = vld [vmem:[%s1874_s1 + $0x28] sm:$0xff]  ;;  %v937_v37 = vsub.s32 2, %v224_v21  ;;  %v939_v38 = vsub.s32 3, %v224_v21  ;;  %v213_v39 = vld [vmem:[%s1874_s1 + $0x30] sm:$0xff]  ;;  %v944_v40 = vsub.s32 4, %v224_v21  ;;  %v946_v41 = vsub.s32 5, %v224_v21 }
   0x6   :  { %1962 = vst [vmem:[#allocation7_spill] sm:$0xff] %v933_v35  ;;  %1963 = vst [vmem:[#allocation8_spill] sm:$0xff] %v935_v36  ;;  %v948_v42 = vsub.s32 6, %v224_v21  ;;  %v950_v43 = vsub.s32 7, %v224_v21  ;;  %v953_v44 = vrot.slane %v212_v34, %v933_v35  ;;  %v956_v45 = vrot.slane %v212_v34, %v935_v36  ;;  %v214_v48 = vld [vmem:[%s1874_s1 + $0x38] sm:$0xff]  ;;  %v994_v57 = vld [vmem:[%s1873_s0 + $0xb0] sm:$0xff] }
   0x7   :  { %1964 = vst [vmem:[#allocation9_spill] sm:$0xff] %v937_v37  ;;  %1965 = vst [vmem:[#allocation10_spill] sm:$0xff] %v939_v38  ;;  %v959_v46 = vrot.slane %v212_v34, %v937_v37  ;;  %v962_v47 = vrot.slane %v212_v34, %v939_v38  ;;  %v968_v49 = vrot.slane %v212_v34, %v944_v40  ;;  %v999_v58 = vld [vmem:[%s1873_s0 + $0xb8] sm:$0xff]  ;;  %v1016_v63 = vld [vmem:[%s1873_s0 + $0xc0] sm:$0xff]  ;;  %v123_v32 = vunpack.c.l.bf16 %v994_v57 }
   0x8   :  { %1966 = vst [vmem:[#allocation11_spill] sm:$0xff] %v944_v40  ;;  %1967 = vst [vmem:[#allocation12_spill] sm:$0xff] %v946_v41  ;;  %v971_v50 = vrot.slane %v212_v34, %v946_v41  ;;  %v974_v51 = vrot.slane %v212_v34, %v948_v42  ;;  %v977_v52 = vrot.slane %v212_v34, %v950_v43  ;;  %v1021_v3 = vld [vmem:[%s1873_s0 + $0xc8] sm:$0xff]  ;;  %v1038_v22 = vld [vmem:[%s1873_s0 + $0xd0] sm:$0xff]  ;;  %v124_v31 = vunpack.c.h.bf16 %v994_v57 }
   0x9   :  { %1968 = vst [vmem:[#allocation13_spill] sm:$0xff] %v948_v42  ;;  %1969 = vst [vmem:[#allocation14_spill] sm:$0xff] %v950_v43  ;;  %v980_v53 = vrot.slane %v213_v39, %v933_v35  ;;  %v983_v54 = vrot.slane %v213_v39, %v935_v36  ;;  %v986_v55 = vrot.slane %v213_v39, %v937_v37  ;;  %v1043_v20 = vld [vmem:[%s1873_s0 + $0xd8] sm:$0xff]  ;;  %v1060_v13 = vld [vmem:[%s1873_s0 + $0xe0] sm:$0xff]  ;;  %v125_v30 = vunpack.c.l.bf16 %v999_v58 }
   0xa   :  { %1970 = vst [vmem:[#allocation15_spill] sm:$0xff] %v968_v49  ;;  %1971 = vst [vmem:[#allocation16_spill] sm:$0xff] %v971_v50  ;;  %v989_v56 = vrot.slane %v213_v39, %v939_v38  ;;  %v1002_v59 = vrot.slane %v213_v39, %v944_v40  ;;  %v1005_v60 = vrot.slane %v213_v39, %v946_v41  ;;  %v1065_v33 = vld [vmem:[%s1873_s0 + $0xe8] sm:$0xff]  ;;  %v126_v29 = vunpack.c.h.bf16 %v999_v58  ;;  %v45_v9 = vld [vmem:[%s1873_s0 + $0xf0] sm:$0xff] }
   0xb   :  { %1972 = vst [vmem:[#allocation17_spill] sm:$0xff] %v974_v51  ;;  %1973 = vst [vmem:[#allocation18_spill] sm:$0xff] %v977_v52  ;;  %v1008_v61 = vrot.slane %v213_v39, %v948_v42  ;;  %v1011_v62 = vrot.slane %v213_v39, %v950_v43  ;;  %v1024_v21 = vrot.slane %v214_v48, %v933_v35  ;;  %v127_v28 = vunpack.c.l.bf16 %v1016_v63 }
   0xc   :  { %1974 = vst [vmem:[#allocation19_spill] sm:$0xff] %v980_v53  ;;  %1975 = vst [vmem:[#allocation20_spill] sm:$0xff] %v983_v54  ;;  %v1027_v34 = vrot.slane %v214_v48, %v935_v36  ;;  %v1030_v23 = vrot.slane %v214_v48, %v937_v37  ;;  %v1033_v39 = vrot.slane %v214_v48, %v939_v38  ;;  %v128_v27 = vunpack.c.h.bf16 %v1016_v63  ;;  %v46_v63 = vld [vmem:[%s1873_s0 + $0xf8] sm:$0xff] }
   0xd   :  { %1976 = vst [vmem:[#allocation21_spill] sm:$0xff] %v986_v55  ;;  %1977 = vst [vmem:[#allocation22_spill] sm:$0xff] %v989_v56  ;;  %v1046_v19 = vrot.slane %v214_v48, %v944_v40  ;;  %v1049_v18 = vrot.slane %v214_v48, %v946_v41  ;;  %v1052_v15 = vrot.slane %v214_v48, %v948_v42  ;;  %v129_v26 = vunpack.c.l.bf16 %v1021_v3 }
   0xe   :  { %1978 = vst [vmem:[#allocation23_spill] sm:$0xff] %v1002_v59  ;;  %1979 = vst [vmem:[#allocation24_spill] sm:$0xff] %v1005_v60  ;;  %v1055_v14 = vrot.slane %v214_v48, %v950_v43  ;;  %v1074_v48 = vld [vmem:[%s1874_s1] sm:$0xff]  ;;  %v130_v25 = vunpack.c.h.bf16 %v1021_v3  ;;  %v131_v24 = vunpack.c.l.bf16 %v1038_v22  ;;  %v132_v57 = vunpack.c.h.bf16 %v1038_v22 }
   0xf   :  { %1980 = vst [vmem:[#allocation25_spill] sm:$0xff] %v1008_v61  ;;  %1981 = vst [vmem:[#allocation26_spill] sm:$0xff] %v1011_v62  ;;  %v133_v12 = vunpack.c.l.bf16 %v1043_v20  ;;  %v134_v58 = vunpack.c.h.bf16 %v1043_v20  ;;  %v135_v8 = vunpack.c.l.bf16 %v1060_v13  ;;  %v136_v3 = vunpack.c.h.bf16 %v1060_v13  ;;  %v1096_v22 = vld [vmem:[%s1874_s1 + $0x20] sm:$0xff] }
  0x10   :  { %1982 = vst [vmem:[#allocation27_spill] sm:$0xff] %v1024_v21  ;;  %1983 = vst [vmem:[#allocation28_spill] sm:$0xff] %v1027_v34  ;;  %v137_v5 = vunpack.c.l.bf16 %v1065_v33  ;;  %v1100_v20 = vrot.slane %v1074_v48, %v933_v35  ;;  %v1104_v4 = vrot.slane %v1074_v48, %v935_v36  ;;  %v1108_v2 = vrot.slane %v1074_v48, %v937_v37 }
  0x11   :  { %1984 = vst [vmem:[#allocation29_spill] sm:$0xff] %v1030_v23  ;;  %1985 = vst [vmem:[#allocation30_spill] sm:$0xff] %v1033_v39  ;;  %v1112_v13 = vrot.slane %v1096_v22, %v937_v37  ;;  %v1116_v6 = vrot.slane %v1096_v22, %v939_v38  ;;  %v1120_v35 = vrot.slane %v1096_v22, %v944_v40  ;;  %v141_v39 = vunpack.c.l.bf16 %v46_v63 }
  0x12   :  { %1986 = vst [vmem:[#allocation31_spill] sm:$0xff] %v1046_v19  ;;  %1987 = vst [vmem:[#allocation32_spill] sm:$0xff] %v1049_v18  ;;  %v1124_v36 = vrot.slane %v1096_v22, %v946_v41  ;;  %v1132_v37 = vrot.slane %v1096_v22, %v950_v43  ;;  %v139_v18 = vunpack.c.l.bf16 %v45_v9  ;;  %v140_v19 = vunpack.c.h.bf16 %v45_v9 }
  0x13   :  { %1988 = vst [vmem:[#allocation33_spill] sm:$0xff] %v1052_v15  ;;  %1989 = vst [vmem:[#allocation34_spill] sm:$0xff] %v1055_v14  ;;  %v1128_v14 = vrot.slane %v1096_v22, %v948_v42  ;;  %v138_v15 = vunpack.c.h.bf16 %v1065_v33  ;;  %v142_v23 = vunpack.c.h.bf16 %v46_v63  ;;  %v1137_v34 = vrot.slane %v1074_v48, %v939_v38 }
  0x14   :  { %1990 = vst [vmem:[#allocation35_spill] sm:$0xff] %v1096_v22  ;;  %1991 = vst [vmem:[#allocation36_spill] sm:$0xff] %v1104_v4  ;;  %v1141_v41 = vrot.slane %v1074_v48, %v944_v40  ;;  %v1993_v42 = vunpack.c.l.bf16 %v857_v0  ;;  %v1994_v22 = vunpack.c.h.bf16 %v857_v0  ;;  %v1995_v9 = vunpack.c.l.bf16 %v862_v1 }
  0x15   :  { %v1996_v43 = vunpack.c.l.bf16 %v887_v7  ;;  %v1998_v40 = vunpack.c.h.bf16 %v887_v7  ;;  %v2006_v7 = vunpack.c.h.bf16 %v899_v11 }
  0x16   :  { %1992 = vst [vmem:[#allocation37_spill] sm:$0xff] %v1141_v41  ;;  %v543_v21 = vmul.f32 %v1100_v20, %v1993_v42  ;;  %v544_v33 = vmul.f32 %v1104_v4, %v1994_v22  ;;  %v545_v63 = vmul.f32 %v1108_v2, %v1995_v9  ;;  %v2000_v42 = vunpack.c.l.bf16 %v894_v10 }
  0x17   :  { %v1155_v38 = vmul.f32 %v1112_v13, %v1996_v43  ;;  %v1160_v41 = vmul.f32 %v1116_v6, %v1998_v40  ;;  %v2002_v22 = vunpack.c.h.bf16 %v894_v10  ;;  %v2004_v9 = vunpack.c.l.bf16 %v899_v11 }
  0x18   :  { %v1165_v0 = vmul.f32 %v1120_v35, %v2000_v42  ;;  %v1180_v40 = vmul.f32 %v1132_v37, %v2006_v7  ;;  %v2010_v10 = vunpack.c.h.bf16 %v908_v16  ;;  %v2014_v11 = vunpack.c.h.bf16 %v913_v17 }
  0x19   :  { %1997 = vst [vmem:[#allocation38_spill] sm:$0xff] %v1155_v38  ;;  %1999 = vst [vmem:[#allocation39_spill] sm:$0xff] %v1160_v41  ;;  %v1170_v4 = vmul.f32 %v1124_v36, %v2002_v22  ;;  %v1175_v43 = vmul.f32 %v1128_v14, %v2004_v9  ;;  %v2008_v41 = vunpack.c.l.bf16 %v908_v16  ;;  %v1209_v16 = vmul.f32 %v974_v51, %v125_v30 }
  0x1a   :  { %2001 = vst [vmem:[#allocation40_spill] sm:$0xff] %v1165_v0  ;;  %2007 = vst [vmem:[#allocation43_spill] sm:$0xff] %v1180_v40  ;;  %v1190_v22 = vmul.f32 %v956_v45, %v2010_v10  ;;  %v1200_v7 = vmul.f32 %v962_v47, %v2014_v11  ;;  %v1203_v40 = vmul.f32 %v968_v49, %v123_v32 }
  0x1b   :  { %2003 = vst [vmem:[#allocation41_spill] sm:$0xff] %v1170_v4  ;;  %2005 = vst [vmem:[#allocation42_spill] sm:$0xff] %v1175_v43  ;;  %v1185_v42 = vmul.f32 %v953_v44, %v2008_v41  ;;  %v2012_v4 = vunpack.c.l.bf16 %v913_v17  ;;  %v1206_v41 = vmul.f32 %v971_v50, %v124_v31  ;;  %v1212_v10 = vmul.f32 %v977_v52, %v126_v29  ;;  %v2096_v50 = vld [vmem:[#allocation36_spill] sm:$0xff] }
  0x1c   :  { %2011 = vst [vmem:[#allocation45_spill] sm:$0xff] %v1190_v22  ;;  %2015 = vst [vmem:[#allocation47_spill] sm:$0xff] %v1200_v7  ;;  %v1218_v17 = vmul.f32 %v983_v54, %v128_v27  ;;  %v1221_v11 = vmul.f32 %v986_v55, %v129_v26  ;;  %v1224_v32 = vmul.f32 %v989_v56, %v130_v25  ;;  %v1241_v26 = vld [vmem:[%s1873_s0 + $0x30] sm:$0xff]  ;;  %v1246_v25 = vld [vmem:[%s1873_s0 + $0x38] sm:$0xff] }
  0x1d   :  { %2009 = vst [vmem:[#allocation44_spill] sm:$0xff] %v1185_v42  ;;  %v1195_v9 = vmul.f32 %v959_v46, %v2012_v4  ;;  %2016 = vst [vmem:[#allocation48_spill] sm:$0xff] %v1203_v40  ;;  %v1215_v4 = vmul.f32 %v980_v53, %v127_v28  ;;  %v1227_v31 = vmul.f32 %v1002_v59, %v131_v24  ;;  %v2028_v24 = vld [vmem:[#allocation27_spill] sm:$0xff]  ;;  %v2050_v40 = vld [vmem:[#allocation13_spill] sm:$0xff] }
  0x1e   :  { %2017 = vst [vmem:[#allocation49_spill] sm:$0xff] %v1206_v41  ;;  %2018 = vst [vmem:[#allocation50_spill] sm:$0xff] %v1209_v16  ;;  %v1230_v30 = vmul.f32 %v1005_v60, %v132_v57  ;;  %v1233_v29 = vmul.f32 %v1008_v61, %v133_v12  ;;  %v1236_v28 = vmul.f32 %v1011_v62, %v134_v58  ;;  %v2030_v57 = vld [vmem:[#allocation28_spill] sm:$0xff]  ;;  %v2032_v12 = vld [vmem:[#allocation29_spill] sm:$0xff] }
  0x1f   :  { %2013 = vst [vmem:[#allocation46_spill] sm:$0xff] %v1195_v9  ;;  %2019 = vst [vmem:[#allocation51_spill] sm:$0xff] %v1212_v10  ;;  %v1249_v27 = vmul.f32 %v2028_v24, %v135_v8  ;;  %v2034_v58 = vld [vmem:[#allocation30_spill] sm:$0xff]  ;;  %v94_v10 = vunpack.c.h.bf16 %v1246_v25  ;;  %v1320_v9 = vld [vmem:[%s1873_s0 + $0x108] sm:$0xff] }
  0x20   :  { %2020 = vst [vmem:[#allocation52_spill] sm:$0xff] %v1215_v4  ;;  %2021 = vst [vmem:[#allocation53_spill] sm:$0xff] %v1218_v17  ;;  %v2038_v17 = vld [vmem:[#allocation32_spill] sm:$0xff]  ;;  %v93_v4 = vunpack.c.l.bf16 %v1246_v25  ;;  %v1302_v16 = vld [vmem:[%s1873_s0 + $0x58] sm:$0xff] }
  0x21   :  { %2022 = vst [vmem:[#allocation54_spill] sm:$0xff] %v1221_v11  ;;  %2023 = vst [vmem:[#allocation55_spill] sm:$0xff] %v1224_v32  ;;  %v2036_v32 = vld [vmem:[#allocation31_spill] sm:$0xff]  ;;  %v1269_v8 = vmul.f32 %v2038_v17, %v140_v19  ;;  %v2046_v19 = vld [vmem:[#allocation12_spill] sm:$0xff] }
  0x22   :  { %2024 = vst [vmem:[#allocation56_spill] sm:$0xff] %v1227_v31  ;;  %2025 = vst [vmem:[#allocation57_spill] sm:$0xff] %v1230_v30  ;;  %v1252_v30 = vmul.f32 %v2030_v57, %v136_v3  ;;  %v1263_v31 = vld [vmem:[%s1873_s0 + $0x40] sm:$0xff]  ;;  %v1266_v11 = vmul.f32 %v2036_v32, %v139_v18  ;;  %v2045_v18 = vld [vmem:[#allocation6_spill] sm:$0xff] }
  0x23   :  { %2026 = vst [vmem:[#allocation58_spill] sm:$0xff] %v1233_v29  ;;  %2027 = vst [vmem:[#allocation59_spill] sm:$0xff] %v1236_v28  ;;  %v1255_v29 = vmul.f32 %v2032_v12, %v137_v5  ;;  %v1258_v28 = vmul.f32 %v2034_v58, %v138_v15  ;;  %v1280_v15 = vld [vmem:[%s1873_s0 + $0x48] sm:$0xff]  ;;  %v95_v41 = vunpack.c.l.bf16 %v1263_v31  ;;  %v1315_v25 = vld [vmem:[%s1873_s0 + $0x100] sm:$0xff]  ;;  %v96_v22 = vunpack.c.h.bf16 %v1263_v31 }
  0x24   :  { %2029 = vst [vmem:[#allocation60_spill] sm:$0xff] %v1249_v27  ;;  %2031 = vst [vmem:[#allocation61_spill] sm:$0xff] %v1252_v30  ;;  %v2040_v27 = vld [vmem:[#allocation33_spill] sm:$0xff]  ;;  %v2042_v30 = vld [vmem:[#allocation34_spill] sm:$0xff]  ;;  %v97_v42 = vunpack.c.l.bf16 %v1280_v15  ;;  %v98_v43 = vunpack.c.h.bf16 %v1280_v15  ;;  %v2094_v51 = vunpack.c.l.bf16 %v1315_v25 }
  0x25   :  { %2033 = vst [vmem:[#allocation62_spill] sm:$0xff] %v1255_v29  ;;  %2035 = vst [vmem:[#allocation63_spill] sm:$0xff] %v1258_v28  ;;  %v1272_v3 = vmul.f32 %v2040_v27, %v141_v39  ;;  %v1275_v5 = vmul.f32 %v2042_v30, %v142_v23  ;;  %v1285_v28 = vld [vmem:[%s1873_s0 + $0x50] sm:$0xff]  ;;  %v2048_v39 = vunpack.c.h.bf16 %v862_v1  ;;  %v92_v29 = vunpack.c.h.bf16 %v1241_v26  ;;  %v2064_v17 = vld [vmem:[#allocation8_spill] sm:$0xff] }
  0x26   :  { %2037 = vst [vmem:[#allocation64_spill] sm:$0xff] %v1266_v11  ;;  %2039 = vst [vmem:[#allocation65_spill] sm:$0xff] %v1269_v8  ;;  %v90_v11 = vunpack.c.h.bf16 %v2045_v18  ;;  %v1290_v8 = vrot.slane %v1074_v48, %v2046_v19  ;;  %v1307_v1 = vrot.slane %v1074_v48, %v2050_v40  ;;  %v99_v0 = vunpack.c.l.bf16 %v1285_v28  ;;  %v1340_v15 = vld [vmem:[%s1873_s0 + $0x110] sm:$0xff]  ;;  %v2068_v57 = vld [vmem:[#allocation10_spill] sm:$0xff] }
  0x27   :  { %2041 = vst [vmem:[#allocation66_spill] sm:$0xff] %v1272_v3  ;;  %2043 = vst [vmem:[#allocation67_spill] sm:$0xff] %v1275_v5  ;;  %v546_v23 = vmul.f32 %v1137_v34, %v2048_v39  ;;  %v671_v5 = vadd.f32 %v544_v33, %v543_v21  ;;  %v91_v3 = vunpack.c.l.bf16 %v1241_v26  ;;  %v2052_v21 = vld [vmem:[#allocation3_spill] sm:$0xff]  ;;  %v2054_v39 = vld [vmem:[#allocation37_spill] sm:$0xff] }
  0x28   :  { %2044 = vst [vmem:[#allocation68_spill] sm:$0xff] %v1285_v28  ;;  %2047 = vst [vmem:[#allocation6_spill] sm:$0xff] %v1290_v8  ;;  %v2053_v33 = vunpack.c.l.bf16 %v2052_v21  ;;  %v2070_v62 = vld [vmem:[#allocation11_spill] sm:$0xff] }
  0x29   :  { %2049 = vst [vmem:[#allocation69_spill] sm:$0xff] %v1302_v16  ;;  %2051 = vst [vmem:[#allocation70_spill] sm:$0xff] %v1307_v1  ;;  %v672_v26 = vadd.f32 %v671_v5, %v545_v63  ;;  %v208_v63 = vld [vmem:[%s1874_s1 + $0x8] sm:$0xff]  ;;  %v2066_v5 = vld [vmem:[#allocation9_spill] sm:$0xff] }
  0x2a   :  { %v547_v7 = vmul.f32 %v2054_v39, %v2053_v33  ;;  %v2055_v33 = vld [vmem:[#allocation14_spill] sm:$0xff]  ;;  %v2057_v39 = vunpack.c.h.bf16 %v2052_v21  ;;  %2058 = vst [vmem:[#allocation71_spill] sm:$0xff] %v1340_v15  ;;  %v2060_v21 = vld [vmem:[#allocation7_spill] sm:$0xff]  ;;  %v1359_v16 = vrot.slane %v208_v63, %v2064_v17  ;;  %v1362_v28 = vrot.slane %v208_v63, %v2066_v5 }
  0x2b   :  { %v1332_v38 = vrot.slane %v1074_v48, %v2055_v33  ;;  %v673_v30 = vadd.f32 %v672_v26, %v546_v23  ;;  %v1349_v48 = vld [vmem:[%s1874_s1 + $0x10] sm:$0xff]  ;;  %v1352_v23 = vrot.slane %v208_v63, %v2060_v21  ;;  %v1367_v24 = vrot.slane %v208_v63, %v2068_v57  ;;  %v2085_v60 = vld [vmem:[#allocation35_spill] sm:$0xff] }
  0x2c   :  { %v548_v31 = vmul.f32 %v1290_v8, %v2057_v39  ;;  %2059 = vst [vmem:[#allocation72_spill] sm:$0xff] %v1349_v48  ;;  %v2062_v39 = vld [vmem:[#allocation4_spill] sm:$0xff]  ;;  %2067 = vst [vmem:[#allocation74_spill] sm:$0xff] %v1362_v28  ;;  %v1370_v61 = vrot.slane %v208_v63, %v2070_v62  ;;  %v1376_v27 = vrot.slane %v208_v63, %v2046_v19 }
  0x2d   :  { %2056 = vst [vmem:[#allocation3_spill] sm:$0xff] %v1332_v38  ;;  %2061 = vst [vmem:[#allocation73_spill] sm:$0xff] %v1352_v23  ;;  %v2063_v26 = vunpack.c.l.bf16 %v2062_v39  ;;  %v674_v32 = vadd.f32 %v673_v30, %v547_v7  ;;  %v2072_v7 = vunpack.c.h.bf16 %v2062_v39  ;;  %v1382_v58 = vrot.slane %v208_v63, %v2055_v33 }
  0x2e   :  { %2065 = vst [vmem:[#allocation4_spill] sm:$0xff] %v1359_v16  ;;  %2069 = vst [vmem:[#allocation75_spill] sm:$0xff] %v1367_v24  ;;  %v1386_v12 = vrot.slane %v1349_v48, %v2060_v21  ;;  %v1390_v15 = vrot.slane %v1349_v48, %v2064_v17  ;;  %v1405_v21 = vrot.slane %v1349_v48, %v2070_v62 }
  0x2f   :  { %v549_v8 = vmul.f32 %v1307_v1, %v2063_v26  ;;  %2071 = vst [vmem:[#allocation76_spill] sm:$0xff] %v1370_v61  ;;  %v550_v30 = vmul.f32 %v1332_v38, %v2072_v7  ;;  %v675_v26 = vadd.f32 %v674_v32, %v548_v31  ;;  %2073 = vst [vmem:[#allocation77_spill] sm:$0xff] %v1376_v27  ;;  %v2079_v31 = vld [vmem:[#allocation5_spill] sm:$0xff] }
  0x30   :  { %v1379_v1 = vrot.slane %v208_v63, %v2050_v40  ;;  %2075 = vst [vmem:[#allocation79_spill] sm:$0xff] %v1382_v58  ;;  %2076 = vst [vmem:[#allocation80_spill] sm:$0xff] %v1386_v12  ;;  %v1394_v32 = vrot.slane %v1349_v48, %v2066_v5  ;;  %v2080_v39 = vunpack.c.l.bf16 %v2079_v31  ;;  %v1401_v63 = vrot.slane %v1349_v48, %v2068_v57 }
  0x31   :  { %2077 = vst [vmem:[#allocation81_spill] sm:$0xff] %v1390_v15  ;;  %v676_v38 = vadd.f32 %v675_v26, %v549_v8  ;;  %2082 = vst [vmem:[#allocation83_spill] sm:$0xff] %v1405_v21  ;;  %v1409_v33 = vrot.slane %v1349_v48, %v2046_v19  ;;  %v1413_v5 = vrot.slane %v1349_v48, %v2050_v40  ;;  %v2086_v8 = vunpack.c.h.bf16 %v2079_v31  ;;  %v1434_v31 = vld [vmem:[%s1873_s0 + $0x188] sm:$0xff] }
  0x32   :  { %2074 = vst [vmem:[#allocation78_spill] sm:$0xff] %v1379_v1  ;;  %2078 = vst [vmem:[#allocation82_spill] sm:$0xff] %v1394_v32  ;;  %v551_v7 = vmul.f32 %v1352_v23, %v2080_v39  ;;  %v1417_v39 = vrot.slane %v2085_v60, %v2064_v17  ;;  %v2087_v23 = vunpack.c.l.bf16 %v2045_v18  ;;  %v554_v19 = vmul.f32 %v1367_v24, %v90_v11  ;;  %v1439_v18 = vld [vmem:[%s1873_s0 + $0x190] sm:$0xff] }
  0x33   :  { %2081 = vst [vmem:[#allocation5_spill] sm:$0xff] %v1401_v63  ;;  %2083 = vst [vmem:[#allocation84_spill] sm:$0xff] %v1409_v33  ;;  %v552_v26 = vmul.f32 %v1359_v16, %v2086_v8  ;;  %v677_v57 = vadd.f32 %v676_v38, %v550_v30  ;;  %v555_v33 = vmul.f32 %v1370_v61, %v91_v3  ;;  %v1453_v3 = vld [vmem:[%s1873_s0 + $0x180] sm:$0xff]  ;;  %v1477_v30 = vld [vmem:[%s1873_s0 + $0x1a8] sm:$0xff] }
  0x34   :  { %2084 = vst [vmem:[#allocation85_spill] sm:$0xff] %v1413_v5  ;;  %v553_v62 = vmul.f32 %v1362_v28, %v2087_v23  ;;  %v556_v40 = vmul.f32 %v1376_v27, %v92_v29  ;;  %v1429_v5 = vmul.f32 %v1379_v1, %v93_v4  ;;  %v1442_v38 = vmul.f32 %v1382_v58, %v94_v10  ;;  %v1458_v23 = vld [vmem:[%s1873_s0 + $0x198] sm:$0xff]  ;;  %v1463_v10 = vld [vmem:[%s1873_s0 + $0x1a0] sm:$0xff]  ;;  %v73_v58 = vld [vmem:[%s1873_s0 + $0x1d0] sm:$0xff] }
  0x35   :  { %v1445_v11 = vmul.f32 %v1386_v12, %v95_v41  ;;  %v1448_v29 = vmul.f32 %v1390_v15, %v96_v22  ;;  %v678_v4 = vadd.f32 %v677_v57, %v551_v7  ;;  %2090 = vst [vmem:[#allocation88_spill] sm:$0xff] %v1453_v3  ;;  %v1466_v41 = vmul.f32 %v1394_v32, %v97_v42  ;;  %v1483_v15 = vld [vmem:[%s1873_s0 + $0x1b0] sm:$0xff]  ;;  %v1513_v1 = vld [vmem:[%s1873_s0 + $0x1d8] sm:$0xff] }
  0x36   :  { %v1469_v22 = vmul.f32 %v1401_v63, %v98_v43  ;;  %v1472_v57 = vmul.f32 %v1405_v21, %v99_v0  ;;  %v176_v7 = vunpack.c.h.bf16 %v1453_v3  ;;  %v1488_v43 = vld [vmem:[%s1873_s0 + $0x1b8] sm:$0xff]  ;;  %v177_v0 = vunpack.c.l.bf16 %v1434_v31 }
  0x37   :  { %2088 = vst [vmem:[#allocation86_spill] sm:$0xff] %v1445_v11  ;;  %2089 = vst [vmem:[#allocation87_spill] sm:$0xff] %v1448_v29  ;;  %v679_v8 = vadd.f32 %v678_v4, %v552_v26  ;;  %v178_v42 = vunpack.c.h.bf16 %v1434_v31  ;;  %v179_v21 = vunpack.c.l.bf16 %v1439_v18  ;;  %v1496_v26 = vld [vmem:[%s1873_s0 + $0x1c0] sm:$0xff]  ;;  %v1501_v4 = vld [vmem:[%s1873_s0 + $0x1c8] sm:$0xff]  ;;  %v180_v3 = vunpack.c.h.bf16 %v1439_v18 }
  0x38   :  { %2091 = vst [vmem:[#allocation89_spill] sm:$0xff] %v1466_v41  ;;  %2092 = vst [vmem:[#allocation90_spill] sm:$0xff] %v1469_v22  ;;  %v181_v63 = vunpack.c.l.bf16 %v1458_v23  ;;  %v182_v32 = vunpack.c.h.bf16 %v1458_v23  ;;  %v183_v31 = vunpack.c.l.bf16 %v1463_v10  ;;  %v184_v27 = vunpack.c.h.bf16 %v1463_v10  ;;  %v75_v23 = vld [vmem:[%s1873_s0 + $0x1e0] sm:$0xff]  ;;  %v76_v10 = vld [vmem:[%s1873_s0 + $0x1e8] sm:$0xff] }
  0x39   :  { %2093 = vst [vmem:[#allocation91_spill] sm:$0xff] %v1472_v57  ;;  %v680_v12 = vadd.f32 %v679_v8, %v553_v62  ;;  %v185_v18 = vunpack.c.l.bf16 %v1477_v30  ;;  %v186_v60 = vunpack.c.h.bf16 %v1477_v30  ;;  %v187_v62 = vunpack.c.l.bf16 %v1483_v15  ;;  %v77_v30 = vld [vmem:[%s1873_s0 + $0x1f0] sm:$0xff] }
  0x3a   :  { %v188_v8 = vunpack.c.h.bf16 %v1483_v15  ;;  %v189_v61 = vunpack.c.l.bf16 %v1488_v43  ;;  %v190_v24 = vunpack.c.h.bf16 %v1488_v43  ;;  %v191_v16 = vunpack.c.l.bf16 %v1496_v26  ;;  %v78_v15 = vld [vmem:[%s1873_s0 + $0x1f8] sm:$0xff] }
  0x3b   :  { %v681_v28 = vadd.f32 %v680_v12, %v554_v19  ;;  %v192_v17 = vunpack.c.h.bf16 %v1496_v26  ;;  %v193_v57 = vunpack.c.l.bf16 %v1501_v4  ;;  %v194_v12 = vunpack.c.h.bf16 %v1501_v4 }
  0x3c   :  { %v195_v19 = vunpack.c.l.bf16 %v73_v58  ;;  %v196_v43 = vunpack.c.h.bf16 %v73_v58  ;;  %v197_v22 = vunpack.c.l.bf16 %v1513_v1  ;;  %v198_v41 = vunpack.c.h.bf16 %v1513_v1 }
  0x3d   :  { %v682_v48 = vadd.f32 %v681_v28, %v555_v33  ;;  %v199_v29 = vunpack.c.l.bf16 %v75_v23  ;;  %v200_v59 = vunpack.c.h.bf16 %v75_v23  ;;  %v201_v56 = vunpack.c.l.bf16 %v76_v10 }
  0x3e   :  { %v202_v55 = vunpack.c.h.bf16 %v76_v10  ;;  %v203_v26 = vunpack.c.l.bf16 %v77_v30  ;;  %v204_v54 = vunpack.c.h.bf16 %v77_v30  ;;  %v205_v11 = vunpack.c.l.bf16 %v78_v15 }
  0x3f   :  { %v683_v53 = vadd.f32 %v682_v48, %v556_v40  ;;  %v206_v52 = vunpack.c.h.bf16 %v78_v15  ;;  %v607_v4 = vmul.f32 %v1100_v20, %v2094_v51  ;;  %v2095_v58 = vunpack.c.h.bf16 %v1315_v25  ;;  %v2100_v25 = vld [vmem:[#allocation16_spill] sm:$0xff]  ;;  %v2116_v15 = vld [vmem:[#allocation27_spill] sm:$0xff] }
  0x40   :  { %v2097_v28 = vunpack.c.l.bf16 %v1320_v9  ;;  %v2098_v33 = vunpack.c.h.bf16 %v1320_v9  ;;  %v1553_v40 = vmul.f32 %v1417_v39, %v176_v7  ;;  %v1557_v10 = vmul.f32 %v1112_v13, %v177_v0  ;;  %v2099_v9 = vld [vmem:[#allocation15_spill] sm:$0xff]  ;;  %v2107_v7 = vld [vmem:[#allocation22_spill] sm:$0xff] }
  0x41   :  { %v608_v49 = vmul.f32 %v2096_v50, %v2095_v58  ;;  %v684_v48 = vadd.f32 %v683_v53, %v1429_v5  ;;  %v1560_v51 = vmul.f32 %v1116_v6, %v178_v42  ;;  %v1563_v50 = vmul.f32 %v1120_v35, %v179_v21  ;;  %v2101_v5 = vld [vmem:[#allocation17_spill] sm:$0xff]  ;;  %v2102_v21 = vld [vmem:[#allocation18_spill] sm:$0xff]  ;;  %v2108_v42 = vld [vmem:[#allocation23_spill] sm:$0xff] }
  0x42   :  { %v609_v1 = vmul.f32 %v1108_v2, %v2097_v28  ;;  %v610_v23 = vmul.f32 %v1137_v34, %v2098_v33  ;;  %v1566_v2 = vmul.f32 %v1124_v36, %v180_v3  ;;  %v1569_v20 = vmul.f32 %v1128_v14, %v181_v63  ;;  %v2104_v63 = vld [vmem:[#allocation19_spill] sm:$0xff] }
  0x43   :  { %v1572_v34 = vmul.f32 %v1132_v37, %v182_v32  ;;  %v1575_v53 = vmul.f32 %v953_v44, %v183_v31  ;;  %v685_v13 = vadd.f32 %v684_v48, %v1442_v38  ;;  %v1579_v6 = vmul.f32 %v956_v45, %v184_v27  ;;  %v2103_v45 = vld [vmem:[#allocation86_spill] sm:$0xff]  ;;  %v2105_v38 = vld [vmem:[#allocation20_spill] sm:$0xff]  ;;  %v2124_v48 = vld [vmem:[#allocation31_spill] sm:$0xff] }
  0x44   :  { %v1582_v35 = vmul.f32 %v959_v46, %v185_v18  ;;  %v1585_v36 = vmul.f32 %v962_v47, %v186_v60  ;;  %v1588_v14 = vmul.f32 %v2099_v9, %v187_v62  ;;  %v1591_v37 = vmul.f32 %v2100_v25, %v188_v8  ;;  %v2106_v60 = vld [vmem:[#allocation21_spill] sm:$0xff]  ;;  %v2109_v31 = vld [vmem:[#allocation24_spill] sm:$0xff] }
  0x45   :  { %v1594_v44 = vmul.f32 %v2101_v5, %v189_v61  ;;  %v1597_v32 = vmul.f32 %v2102_v21, %v190_v24  ;;  %v686_v27 = vadd.f32 %v685_v13, %v2103_v45  ;;  %v1601_v46 = vmul.f32 %v2104_v63, %v191_v16  ;;  %v2111_v18 = vld [vmem:[#allocation25_spill] sm:$0xff]  ;;  %v2113_v16 = vld [vmem:[#allocation87_spill] sm:$0xff]  ;;  %v2126_v9 = vld [vmem:[#allocation32_spill] sm:$0xff] }
  0x46   :  { %v1604_v47 = vmul.f32 %v2105_v38, %v192_v17  ;;  %v1607_v3 = vmul.f32 %v2106_v60, %v193_v57  ;;  %v1610_v0 = vmul.f32 %v2107_v7, %v194_v12  ;;  %v1613_v61 = vmul.f32 %v2108_v42, %v195_v19  ;;  %v50_v17 = vld [vmem:[%s1873_s0 + $0x118] sm:$0xff]  ;;  %v2118_v19 = vld [vmem:[#allocation28_spill] sm:$0xff]  ;;  %v2129_v5 = vld [vmem:[#allocation33_spill] sm:$0xff] }
  0x47   :  { %v1616_v24 = vmul.f32 %v2109_v31, %v196_v43  ;;  %v1619_v62 = vmul.f32 %v2111_v18, %v197_v22  ;;  %v687_v8 = vadd.f32 %v686_v27, %v2113_v16  ;;  %v2114_v57 = vld [vmem:[#allocation26_spill] sm:$0xff]  ;;  %v1629_v12 = vmul.f32 %v2116_v15, %v199_v29  ;;  %v2120_v43 = vld [vmem:[#allocation29_spill] sm:$0xff]  ;;  %v27_v29 = vld [vmem:[%s1873_s0 + $0x60] sm:$0xff] }
  0x48   :  { %v1626_v30 = vmul.f32 %v2114_v57, %v198_v41  ;;  %v1632_v58 = vmul.f32 %v2118_v19, %v200_v59  ;;  %v1635_v28 = vmul.f32 %v2120_v43, %v201_v56  ;;  %v2122_v22 = vld [vmem:[#allocation30_spill] sm:$0xff]  ;;  %v1641_v13 = vmul.f32 %v2124_v48, %v203_v26  ;;  %v2128_v56 = vld [vmem:[#allocation89_spill] sm:$0xff]  ;;  %v2135_v38 = vld [vmem:[#allocation72_spill] sm:$0xff] }
  0x49   :  { %2110 = vst [vmem:[#allocation36_spill] sm:$0xff] %v1616_v24  ;;  %2112 = vst [vmem:[#allocation15_spill] sm:$0xff] %v1619_v62  ;;  %v1638_v33 = vmul.f32 %v2122_v22, %v202_v55  ;;  %v1644_v25 = vmul.f32 %v2126_v9, %v204_v54  ;;  %v1652_v59 = vld [vmem:[%s1874_s1 + $0x18] sm:$0xff]  ;;  %v688_v41 = vadd.f32 %v687_v8, %v2128_v56  ;;  %v2133_v54 = vld [vmem:[#allocation69_spill] sm:$0xff]  ;;  %v149_v7 = vunpack.c.l.bf16 %v50_v17 }
  0x4a   :  { %2115 = vst [vmem:[#allocation16_spill] sm:$0xff] %v1626_v30  ;;  %2117 = vst [vmem:[#allocation17_spill] sm:$0xff] %v1629_v12  ;;  %v1656_v55 = vmul.f32 %v2129_v5, %v205_v11  ;;  %v2131_v21 = vld [vmem:[#allocation34_spill] sm:$0xff]  ;;  %v736_v45 = vadd.f32 %v608_v49, %v607_v4  ;;  %v102_v27 = vunpack.c.h.bf16 %v2133_v54  ;;  %v2136_v42 = vld [vmem:[#allocation68_spill] sm:$0xff]  ;;  %v103_v22 = vunpack.c.l.bf16 %v27_v29 }
  0x4b   :  { %2119 = vst [vmem:[#allocation18_spill] sm:$0xff] %v1632_v58  ;;  %2121 = vst [vmem:[#allocation86_spill] sm:$0xff] %v1635_v28  ;;  %v1659_v26 = vmul.f32 %v2131_v21, %v206_v52  ;;  %v2134_v63 = vld [vmem:[#allocation14_spill] sm:$0xff]  ;;  %v2137_v31 = vunpack.c.h.bf16 %v2136_v42  ;;  %v2138_v18 = vld [vmem:[#allocation84_spill] sm:$0xff]  ;;  %v2144_v48 = vunpack.c.l.bf16 %v2133_v54 }
  0x4c   :  { %2123 = vst [vmem:[#allocation19_spill] sm:$0xff] %v1638_v33  ;;  %2125 = vst [vmem:[#allocation20_spill] sm:$0xff] %v1641_v13  ;;  %v1664_v60 = vrot.slane %v2135_v38, %v2134_v63  ;;  %v2139_v57 = vld [vmem:[#allocation90_spill] sm:$0xff]  ;;  %v2140_v15 = vld [vmem:[#allocation71_spill] sm:$0xff]  ;;  %v737_v52 = vadd.f32 %v736_v45, %v609_v1  ;;  %v150_v1 = vunpack.c.h.bf16 %v50_v17 }
  0x4d   :  { %2127 = vst [vmem:[#allocation21_spill] sm:$0xff] %v1644_v25  ;;  %2130 = vst [vmem:[#allocation22_spill] sm:$0xff] %v1656_v55  ;;  %v564_v16 = vmul.f32 %v2138_v18, %v2137_v31  ;;  %v689_v8 = vadd.f32 %v688_v41, %v2139_v57  ;;  %v2141_v11 = vunpack.c.l.bf16 %v2140_v15  ;;  %v2142_v19 = vld [vmem:[#allocation37_spill] sm:$0xff]  ;;  %v2143_v49 = vld [vmem:[#allocation7_spill] sm:$0xff]  ;;  %v2147_v45 = vunpack.c.h.bf16 %v2140_v15 }
  0x4e   :  { %2132 = vst [vmem:[#allocation23_spill] sm:$0xff] %v1659_v26  ;;  %v1675_v4 = vrot.slane %v1652_v59, %v2143_v49  ;;  %v2145_v9 = vld [vmem:[#allocation85_spill] sm:$0xff]  ;;  %v51_v5 = vld [vmem:[%s1873_s0 + $0x120] sm:$0xff]  ;;  %v28_v41 = vld [vmem:[%s1873_s0 + $0x68] sm:$0xff]  ;;  %v738_v57 = vadd.f32 %v737_v52, %v610_v23 }
  0x4f   :  { %v611_v43 = vmul.f32 %v2142_v19, %v2141_v11  ;;  %v565_v56 = vmul.f32 %v2145_v9, %v2144_v48  ;;  %v2146_v21 = vld [vmem:[#allocation91_spill] sm:$0xff]  ;;  %v2148_v42 = vld [vmem:[#allocation6_spill] sm:$0xff]  ;;  %v104_v11 = vunpack.c.h.bf16 %v27_v29  ;;  %v2149_v54 = vld [vmem:[#allocation8_spill] sm:$0xff]  ;;  %v566_v48 = vmul.f32 %v1664_v60, %v102_v27 }
  0x50   :  { %v690_v38 = vadd.f32 %v689_v8, %v2146_v21  ;;  %v612_v31 = vmul.f32 %v2148_v42, %v2147_v45  ;;  %v1692_v19 = vrot.slane %v1652_v59, %v2149_v54  ;;  %v151_v55 = vunpack.c.l.bf16 %v51_v5  ;;  %v2150_v25 = vld [vmem:[#allocation70_spill] sm:$0xff]  ;;  %v2151_v8 = vld [vmem:[#allocation9_spill] sm:$0xff]  ;;  %v52_v23 = vld [vmem:[%s1873_s0 + $0x128] sm:$0xff] }
  0x51   :  { %v613_v13 = vmul.f32 %v2150_v25, %v149_v7  ;;  %v739_v33 = vadd.f32 %v738_v57, %v611_v43  ;;  %v105_v28 = vunpack.c.l.bf16 %v28_v41  ;;  %v1698_v17 = vrot.slane %v1652_v59, %v2151_v8  ;;  %v29_v29 = vld [vmem:[%s1873_s0 + $0x70] sm:$0xff]  ;;  %v2152_v52 = vld [vmem:[#allocation3_spill] sm:$0xff]  ;;  %v2153_v21 = vld [vmem:[#allocation10_spill] sm:$0xff] }
  0x52   :  { %v691_v26 = vadd.f32 %v690_v38, %v564_v16  ;;  %v567_v15 = vmul.f32 %v1675_v4, %v103_v22  ;;  %v152_v16 = vunpack.c.h.bf16 %v51_v5  ;;  %v614_v25 = vmul.f32 %v2152_v52, %v150_v1  ;;  %v2154_v57 = vld [vmem:[#allocation73_spill] sm:$0xff]  ;;  %v2155_v12 = vld [vmem:[#allocation11_spill] sm:$0xff]  ;;  %v30_v5 = vld [vmem:[%s1873_s0 + $0x78] sm:$0xff] }
  0x53   :  { %v740_v7 = vadd.f32 %v739_v33, %v612_v31  ;;  %v106_v43 = vunpack.c.h.bf16 %v28_v41  ;;  %v1710_v38 = vrot.slane %v1652_v59, %v2153_v21  ;;  %v568_v22 = vmul.f32 %v1692_v19, %v104_v11  ;;  %v53_v33 = vld [vmem:[%s1873_s0 + $0x130] sm:$0xff]  ;;  %v2156_v31 = vld [vmem:[#allocation4_spill] sm:$0xff]  ;;  %v2162_v24 = vld [vmem:[#allocation35_spill] sm:$0xff] }
  0x54   :  { %v692_v27 = vadd.f32 %v691_v26, %v565_v56  ;;  %v153_v42 = vunpack.c.l.bf16 %v52_v23  ;;  %v615_v54 = vmul.f32 %v2154_v57, %v151_v55  ;;  %v107_v58 = vunpack.c.l.bf16 %v29_v29  ;;  %v2159_v62 = vld [vmem:[#allocation13_spill] sm:$0xff] }
  0x55   :  { %v741_v8 = vadd.f32 %v740_v7, %v613_v13  ;;  %v1716_v26 = vrot.slane %v1652_v59, %v2155_v12  ;;  %v569_v56 = vmul.f32 %v1698_v17, %v105_v28  ;;  %v154_v1 = vunpack.c.h.bf16 %v52_v23  ;;  %v2158_v7 = vld [vmem:[#allocation74_spill] sm:$0xff] }
  0x56   :  { %v693_v45 = vadd.f32 %v692_v27, %v566_v48  ;;  %v616_v55 = vmul.f32 %v2156_v31, %v152_v16  ;;  %v108_v11 = vunpack.c.h.bf16 %v29_v29  ;;  %v2157_v48 = vld [vmem:[#allocation12_spill] sm:$0xff]  ;;  %v570_v28 = vmul.f32 %v1710_v38, %v106_v43  ;;  %v54_v29 = vld [vmem:[%s1873_s0 + $0x138] sm:$0xff]  ;;  %v31_v16 = vld [vmem:[%s1873_s0 + $0x80] sm:$0xff] }
  0x57   :  { %v742_v13 = vadd.f32 %v741_v8, %v614_v25  ;;  %v1728_v12 = vrot.slane %v1652_v59, %v2157_v48  ;;  %v155_v52 = vunpack.c.l.bf16 %v53_v33  ;;  %v617_v21 = vmul.f32 %v2158_v7, %v153_v42  ;;  %v2161_v31 = vld [vmem:[#allocation76_spill] sm:$0xff] }
  0x58   :  { %v694_v41 = vadd.f32 %v693_v45, %v567_v15  ;;  %v109_v30 = vunpack.c.l.bf16 %v30_v5  ;;  %v1734_v15 = vrot.slane %v1652_v59, %v2159_v62  ;;  %v571_v23 = vmul.f32 %v1716_v26, %v107_v58 }
  0x59   :  { %v743_v57 = vadd.f32 %v742_v13, %v615_v54  ;;  %v156_v43 = vunpack.c.h.bf16 %v53_v33  ;;  %v110_v54 = vunpack.c.h.bf16 %v30_v5  ;;  %v1746_v62 = vrot.slane %v1652_v59, %v2134_v63  ;;  %v55_v5 = vld [vmem:[%s1873_s0 + $0x140] sm:$0xff] }
  0x5a   :  { %v695_v27 = vadd.f32 %v694_v41, %v568_v22  ;;  %v2160_v22 = vld [vmem:[#allocation75_spill] sm:$0xff]  ;;  %v572_v58 = vmul.f32 %v1728_v12, %v108_v11  ;;  %v157_v41 = vunpack.c.l.bf16 %v54_v29  ;;  %v619_v13 = vmul.f32 %v2161_v31, %v155_v52 }
  0x5b   :  { %v618_v45 = vmul.f32 %v2160_v22, %v154_v1  ;;  %v744_v42 = vadd.f32 %v743_v57, %v616_v55  ;;  %v111_v7 = vunpack.c.l.bf16 %v31_v16  ;;  %v573_v33 = vmul.f32 %v1734_v15, %v109_v30  ;;  %v2163_v1 = vld [vmem:[#allocation77_spill] sm:$0xff]  ;;  %v2164_v57 = vld [vmem:[#allocation78_spill] sm:$0xff]  ;;  %v56_v30 = vld [vmem:[%s1873_s0 + $0x148] sm:$0xff] }
  0x5c   :  { %v696_v25 = vadd.f32 %v695_v27, %v569_v56  ;;  %v1752_v56 = vrot.slane %v2162_v24, %v2143_v49  ;;  %v158_v63 = vunpack.c.h.bf16 %v54_v29  ;;  %v620_v55 = vmul.f32 %v2163_v1, %v156_v43  ;;  %v2165_v29 = vld [vmem:[#allocation79_spill] sm:$0xff] }
  0x5d   :  { %v745_v48 = vadd.f32 %v744_v42, %v617_v21  ;;  %v574_v27 = vmul.f32 %v1746_v62, %v110_v54  ;;  %v159_v21 = vunpack.c.l.bf16 %v55_v5  ;;  %v161_v54 = vunpack.c.l.bf16 %v56_v30 }
  0x5e   :  { %v697_v8 = vadd.f32 %v696_v25, %v570_v28  ;;  %v112_v28 = vunpack.c.h.bf16 %v31_v16  ;;  %v621_v25 = vmul.f32 %v2164_v57, %v157_v41  ;;  %v575_v49 = vmul.f32 %v1752_v56, %v111_v7  ;;  %v57_v41 = vld [vmem:[%s1873_s0 + $0x150] sm:$0xff] }
  0x5f   :  { %v746_v11 = vadd.f32 %v745_v48, %v618_v45  ;;  %v622_v42 = vmul.f32 %v2165_v29, %v158_v63  ;;  %v162_v48 = vunpack.c.h.bf16 %v56_v30  ;;  %v2167_v7 = vld [vmem:[#allocation81_spill] sm:$0xff]  ;;  %v163_v1 = vunpack.c.l.bf16 %v57_v41  ;;  %v2168_v63 = vld [vmem:[#allocation82_spill] sm:$0xff] }
  0x60   :  { %v698_v59 = vadd.f32 %v697_v8, %v571_v23  ;;  %v160_v23 = vunpack.c.h.bf16 %v55_v5  ;;  %v576_v16 = vmul.f32 %v1417_v39, %v112_v28  ;;  %v58_v39 = vld [vmem:[%s1873_s0 + $0x158] sm:$0xff] }
  0x61   :  { %v747_v24 = vadd.f32 %v746_v11, %v619_v13  ;;  %v2169_v28 = vld [vmem:[#allocation38_spill] sm:$0xff]  ;;  %v165_v30 = vunpack.c.l.bf16 %v58_v39 }
  0x62   :  { %v699_v52 = vadd.f32 %v698_v59, %v572_v58  ;;  %v2166_v58 = vld [vmem:[#allocation80_spill] sm:$0xff]  ;;  %v624_v59 = vmul.f32 %v2167_v7, %v160_v23 }
  0x63   :  { %v748_v43 = vadd.f32 %v747_v24, %v620_v55  ;;  %v623_v8 = vmul.f32 %v2166_v58, %v159_v21  ;;  %v625_v55 = vmul.f32 %v2168_v63, %v161_v54  ;;  %v2170_v21 = vld [vmem:[#allocation5_spill] sm:$0xff]  ;;  %v2171_v24 = vld [vmem:[#allocation39_spill] sm:$0xff]  ;;  %v60_v7 = vld [vmem:[%s1873_s0 + $0x168] sm:$0xff] }
  0x64   :  { %v700_v22 = vadd.f32 %v699_v52, %v573_v33  ;;  %v164_v52 = vunpack.c.h.bf16 %v57_v41  ;;  %v626_v57 = vmul.f32 %v2170_v21, %v162_v48  ;;  %v170_v21 = vunpack.c.h.bf16 %v60_v7 }
  0x65   :  { %v749_v31 = vadd.f32 %v748_v43, %v621_v25  ;;  %v2173_v43 = vld [vmem:[#allocation40_spill] sm:$0xff] }
  0x66   :  { %v701_v45 = vadd.f32 %v700_v22, %v574_v27  ;;  %v2172_v22 = vld [vmem:[#allocation83_spill] sm:$0xff]  ;;  %v628_v54 = vmul.f32 %v2138_v18, %v164_v52  ;;  %v169_v18 = vunpack.c.l.bf16 %v60_v7  ;;  %v2182_v7 = vld [vmem:[#allocation49_spill] sm:$0xff] }
  0x67   :  { %v750_v33 = vadd.f32 %v749_v31, %v622_v42  ;;  %v627_v23 = vmul.f32 %v2172_v22, %v163_v1  ;;  %v59_v42 = vld [vmem:[%s1873_s0 + $0x160] sm:$0xff] }
  0x68   :  { %v702_v13 = vadd.f32 %v701_v45, %v575_v49  ;;  %v166_v45 = vunpack.c.h.bf16 %v58_v39  ;;  %v167_v41 = vunpack.c.l.bf16 %v59_v42 }
  0x69   :  { %v751_v11 = vadd.f32 %v750_v33, %v623_v8  ;;  %v2174_v8 = vld [vmem:[#allocation41_spill] sm:$0xff] }
  0x6a   :  { %v703_v5 = vadd.f32 %v702_v13, %v576_v16  ;;  %v629_v13 = vmul.f32 %v2145_v9, %v165_v30  ;;  %v630_v1 = vmul.f32 %v1664_v60, %v166_v45  ;;  %v631_v39 = vmul.f32 %v1675_v4, %v167_v41  ;;  %v61_v9 = vld [vmem:[%s1873_s0 + $0x170] sm:$0xff]  ;;  %v62_v4 = vld [vmem:[%s1873_s0 + $0x178] sm:$0xff]  ;;  %v2180_v45 = vld [vmem:[#allocation47_spill] sm:$0xff] }
  0x6b   :  { %v752_v25 = vadd.f32 %v751_v11, %v624_v59  ;;  %v2175_v59 = vld [vmem:[#allocation42_spill] sm:$0xff]  ;;  %v171_v60 = vunpack.c.l.bf16 %v61_v9  ;;  %v633_v30 = vmul.f32 %v1698_v17, %v169_v18  ;;  %v174_v17 = vunpack.c.h.bf16 %v62_v4 }
  0x6c   :  { %v704_v27 = vadd.f32 %v703_v5, %v2169_v28  ;;  %v168_v5 = vunpack.c.h.bf16 %v59_v42  ;;  %v172_v42 = vunpack.c.h.bf16 %v61_v9 }
  0x6d   :  { %v753_v29 = vadd.f32 %v752_v25, %v625_v55  ;;  %v2176_v55 = vld [vmem:[#allocation43_spill] sm:$0xff] }
  0x6e   :  { %v705_v49 = vadd.f32 %v704_v27, %v2171_v24  ;;  %v2177_v27 = vld [vmem:[#allocation44_spill] sm:$0xff]  ;;  %v2178_v24 = vld [vmem:[#allocation45_spill] sm:$0xff] }
  0x6f   :  { %v754_v58 = vadd.f32 %v753_v29, %v626_v57  ;;  %v632_v57 = vmul.f32 %v1692_v19, %v168_v5  ;;  %v173_v19 = vunpack.c.l.bf16 %v62_v4 }
  0x70   :  { %v706_v16 = vadd.f32 %v705_v49, %v2173_v43  ;;  %v634_v43 = vmul.f32 %v1710_v38, %v170_v21  ;;  %v2187_v21 = vld [vmem:[#allocation53_spill] sm:$0xff] }
  0x71   :  { %v755_v48 = vadd.f32 %v754_v58, %v627_v23  ;;  %v2179_v23 = vld [vmem:[#allocation46_spill] sm:$0xff]  ;;  %v635_v58 = vmul.f32 %v1716_v26, %v171_v60  ;;  %v2185_v26 = vld [vmem:[#allocation51_spill] sm:$0xff] }
  0x72   :  { %v707_v31 = vadd.f32 %v706_v16, %v2174_v8  ;;  %v2189_v60 = vld [vmem:[#allocation55_spill] sm:$0xff] }
  0x73   :  { %v756_v63 = vadd.f32 %v755_v48, %v628_v54 }
  0x74   :  { %v708_v33 = vadd.f32 %v707_v31, %v2175_v59  ;;  %v2181_v31 = vld [vmem:[#allocation48_spill] sm:$0xff] }
  0x75   :  { %v757_v28 = vadd.f32 %v756_v63, %v629_v13  ;;  %v636_v13 = vmul.f32 %v1728_v12, %v172_v42  ;;  %v2184_v63 = vld [vmem:[#allocation50_spill] sm:$0xff] }
  0x76   :  { %v709_v11 = vadd.f32 %v708_v33, %v2176_v55  ;;  %v2183_v33 = vld [vmem:[#allocation88_spill] sm:$0xff] }
  0x77   :  { %v758_v25 = vadd.f32 %v757_v28, %v630_v1  ;;  %v175_v5 = vunpack.c.l.bf16 %v2183_v33  ;;  %v637_v1 = vmul.f32 %v1734_v15, %v173_v19 }
  0x78   :  { %v710_v52 = vadd.f32 %v709_v11, %v2177_v27  ;;  %v638_v11 = vmul.f32 %v1746_v62, %v174_v17  ;;  %v2186_v27 = vld [vmem:[#allocation52_spill] sm:$0xff]  ;;  %v2196_v17 = vld [vmem:[#allocation62_spill] sm:$0xff] }
  0x79   :  { %v759_v22 = vadd.f32 %v758_v25, %v631_v39  ;;  %v639_v28 = vmul.f32 %v1752_v56, %v175_v5  ;;  %v2191_v56 = vld [vmem:[#allocation57_spill] sm:$0xff] }
  0x7a   :  { %v711_v49 = vadd.f32 %v710_v52, %v2178_v24  ;;  %v2188_v24 = vld [vmem:[#allocation54_spill] sm:$0xff]  ;;  %v2199_v5 = vld [vmem:[#allocation65_spill] sm:$0xff] }
  0x7b   :  { %v760_v16 = vadd.f32 %v759_v22, %v632_v57  ;;  %v2190_v22 = vld [vmem:[#allocation56_spill] sm:$0xff] }
  0x7c   :  { %v712_v29 = vadd.f32 %v711_v49, %v2179_v23 }
  0x7d   :  { %v761_v8 = vadd.f32 %v760_v16, %v633_v30 }
  0x7e   :  { %v713_v54 = vadd.f32 %v712_v29, %v2180_v45 }
  0x7f   :  { %v762_v48 = vadd.f32 %v761_v8, %v634_v43  ;;  %v2192_v43 = vld [vmem:[#allocation58_spill] sm:$0xff] }
  0x80   :  { %v714_v41 = vadd.f32 %v713_v54, %v2181_v31  ;;  %v2193_v54 = vld [vmem:[#allocation59_spill] sm:$0xff]  ;;  %v2195_v31 = vld [vmem:[#allocation61_spill] sm:$0xff] }
  0x81   :  { %v763_v38 = vadd.f32 %v762_v48, %v635_v58  ;;  %v2194_v58 = vld [vmem:[#allocation60_spill] sm:$0xff]  ;;  %v2197_v48 = vld [vmem:[#allocation63_spill] sm:$0xff] }
  0x82   :  { %v715_v59 = vadd.f32 %v714_v41, %v2182_v7 }
  0x83   :  { %v764_v18 = vadd.f32 %v763_v38, %v636_v13  ;;  %v2200_v38 = vld [vmem:[#allocation66_spill] sm:$0xff] }
  0x84   :  { %v716_v55 = vadd.f32 %v715_v59, %v2184_v63  ;;  %v2198_v59 = vld [vmem:[#allocation64_spill] sm:$0xff] }
  0x85   :  { %v765_v9 = vadd.f32 %v764_v18, %v637_v1 }
  0x86   :  { %v717_v39 = vadd.f32 %v716_v55, %v2185_v26  ;;  %v2201_v55 = vld [vmem:[#allocation67_spill] sm:$0xff] }
  0x87   :  { %v766_v52 = vadd.f32 %v765_v9, %v638_v11 }
  0x88   :  { %v718_v12 = vadd.f32 %v717_v39, %v2186_v27 }
  0x89   :  { %v767_v25 = vadd.f32 %v766_v52, %v639_v28  ;;  %v2202_v28 = vld [vmem:[#allocation36_spill] sm:$0xff] }
  0x8a   :  { %v719_v57 = vadd.f32 %v718_v12, %v2187_v21  ;;  %v2204_v12 = vld [vmem:[#allocation16_spill] sm:$0xff] }
  0x8b   :  { %v768_v15 = vadd.f32 %v767_v25, %v1553_v40  ;;  %v2207_v25 = vld [vmem:[#allocation86_spill] sm:$0xff] }
  0x8c   :  { %v720_v49 = vadd.f32 %v719_v57, %v2188_v24  ;;  %v2206_v57 = vld [vmem:[#allocation18_spill] sm:$0xff]  ;;  %v2208_v24 = vld [vmem:[#allocation19_spill] sm:$0xff] }
  0x8d   :  { %v769_v62 = vadd.f32 %v768_v15, %v1557_v10  ;;  %v2210_v15 = vld [vmem:[#allocation21_spill] sm:$0xff] }
  0x8e   :  { %v721_v30 = vadd.f32 %v720_v49, %v2189_v60  ;;  %v2209_v49 = vld [vmem:[#allocation20_spill] sm:$0xff]  ;;  %v2211_v60 = vld [vmem:[#allocation22_spill] sm:$0xff] }
  0x8f   :  { %v770_v23 = vadd.f32 %v769_v62, %v1560_v51 }
  0x90   :  { %v722_v4 = vadd.f32 %v721_v30, %v2190_v22  ;;  %v2212_v30 = vld [vmem:[#allocation23_spill] sm:$0xff]  ;;  %v802_v22 = vstv %s1875_s2 }
  0x91   :  { %v771_v42 = vadd.f32 %v770_v23, %v1563_v50 }
  0x92   :  { %v723_v29 = vadd.f32 %v722_v4, %v2191_v56 }
  0x93   :  { %v772_v45 = vadd.f32 %v771_v42, %v1566_v2 }
  0x94   :  { %v724_v16 = vadd.f32 %v723_v29, %v2192_v43 }
  0x95   :  { %v773_v40 = vadd.f32 %v772_v45, %v1569_v20 }
  0x96   :  { %v725_v19 = vadd.f32 %v724_v16, %v2193_v54 }
  0x97   :  { %v774_v10 = vadd.f32 %v773_v40, %v1572_v34 }
  0x98   :  { %v726_v8 = vadd.f32 %v725_v19, %v2194_v58 }
  0x99   :  { %v775_v51 = vadd.f32 %v774_v10, %v1575_v53 }
  0x9a   :  { %v727_v41 = vadd.f32 %v726_v8, %v2195_v31 }
  0x9b   :  { %v776_v50 = vadd.f32 %v775_v51, %v1579_v6 }
  0x9c   :  { %v728_v13 = vadd.f32 %v727_v41, %v2196_v17 }
  0x9d   :  { %v777_v2 = vadd.f32 %v776_v50, %v1582_v35 }
  0x9e   :  { %v729_v7 = vadd.f32 %v728_v13, %v2197_v48 }
  0x9f   :  { %v778_v20 = vadd.f32 %v777_v2, %v1585_v36 }
  0xa0   :  { %v730_v33 = vadd.f32 %v729_v7, %v2198_v59 }
  0xa1   :  { %v779_v34 = vadd.f32 %v778_v20, %v1588_v14 }
  0xa2   :  { %v731_v1 = vadd.f32 %v730_v33, %v2199_v5 }
  0xa3   :  { %v780_v53 = vadd.f32 %v779_v34, %v1591_v37  ;;  %v2203_v37 = vld [vmem:[#allocation15_spill] sm:$0xff] }
  0xa4   :  { %v732_v63 = vadd.f32 %v731_v1, %v2200_v38 }
  0xa5   :  { %v781_v6 = vadd.f32 %v780_v53, %v1594_v44  ;;  %v2205_v44 = vld [vmem:[#allocation17_spill] sm:$0xff] }
  0xa6   :  { %v733_v11 = vadd.f32 %v732_v63, %v2201_v55 }
  0xa7   :  { %v782_v18 = vadd.f32 %v781_v6, %v1597_v32 }
  0xa8   :  { %734 = vadd.xlane.f32.xlu0 %v733_v11 }
  0xa9   :  { %v783_v35 = vadd.f32 %v782_v18, %v1601_v46 }
  0xab   :  { %v784_v26 = vadd.f32 %v783_v35, %v1604_v47 }
  0xad   :  { %v785_v36 = vadd.f32 %v784_v26, %v1607_v3 }
  0xaf   :  { %v786_v39 = vadd.f32 %v785_v36, %v1610_v0 }
  0xb1   :  { %v787_v14 = vadd.f32 %v786_v39, %v1613_v61 }
  0xb3   :  { %v788_v9 = vadd.f32 %v787_v14, %v2202_v28 }
  0xb5   :  { %v789_v27 = vadd.f32 %v788_v9, %v2203_v37 }
  0xb7   :  { %v790_v52 = vadd.f32 %v789_v27, %v2204_v12 }
  0xb9   :  { %v791_v21 = vadd.f32 %v790_v52, %v2205_v44 }
  0xbb   :  { %v792_v32 = vadd.f32 %v791_v21, %v2206_v57 }
  0xbd   :  { %v793_v46 = vadd.f32 %v792_v32, %v2207_v25 }
  0xbf   :  { %v794_v47 = vadd.f32 %v793_v46, %v2208_v24 }
  0xc1   :  { %v795_v3 = vadd.f32 %v794_v47, %v2209_v49 }
  0xc3   :  { %v796_v0 = vadd.f32 %v795_v3, %v2210_v15 }
  0xc5   :  { %v797_v61 = vadd.f32 %v796_v0, %v2211_v60 }
  0xc7   :  { %v798_v62 = vadd.f32 %v797_v61, %v2212_v30 }
  0xc9   :  { %799 = vadd.xlane.f32.xlu0 %v798_v62 }
 0x131   :  { %v735_v4 = vpop.xlane.xlu0 %734 }
 0x132   :  { %v803_v23 = vadd.f32 %v802_v22, %v735_v4 }
 0x134   :  { %v824_v56 = vmul.f32 -1.442695, %v803_v23 }
 0x136   :  { %826 = vpow2.f32 %v824_v56 }
 0x143   :  { %v827_v29 = vpop.eup %826 }
 0x144   :  { %v811_v42 = vadd.f32 1.0, %v827_v29 }
 0x146   :  { %828 = vrcp.f32 %v811_v42 }
 0x152   :  { %v800_v16 = vpop.xlane.xlu0 %799 }
 0x153   :  { %v829_v43 = vpop.eup %828  ;;  %v804_v45 = vadd.f32 %v802_v22, %v800_v16 }
 0x154   :  { %818 = vst.msk [vmem:[%s1876_s3] sm:$0xff] %vm817_vm0, %v829_v43 }
 0x155   :  { %v825_v54 = vmul.f32 -1.442695, %v804_v45 }
 0x157   :  { %830 = vpow2.f32 %v825_v54 }
 0x164   :  { %v831_v19 = vpop.eup %830 }
 0x165   :  { %v812_v40 = vadd.f32 1.0, %v831_v19 }
 0x167   :  { %832 = vrcp.f32 %v812_v40 }
 0x174   :  { %v833_v58 = vpop.eup %832 }
 0x175   :  { %819 = vst.msk [vmem:[%s1876_s3 + $0x8] sm:$0xff] %vm817_vm0, %v833_v58 }

// kernel: discriminator_forward.8
= control target key start
LH: loop header
LB: loop body
LE: loop exit
PB: predicated region body
PF: predicated region fallthrough
CT: control target
= control target key end

     0   :  { %s9079_s15 = smov 0   ;;  %s9081_s16 = smov 0   ;;  %s10765_s0 = inlined_call_operand.vmem [shape: bf16[32,4096], index: 0, kind: input, shape index: {}]   ;;  %s10766_s1 = inlined_call_operand.vmem [shape: bf16[4096,512], index: 1, kind: input, shape index: {}]   ;;  %s10767_s2 = inlined_call_operand.vmem [shape: f32[1,512], index: 2, kind: input, shape index: {}]   ;;  %s10768_s3 = inlined_call_operand.vmem [shape: f32[1,512], index: 3, kind: input, shape index: {}]   ;;  %s10769_s4 = inlined_call_operand.vmem [shape: bf16[32,512], index: 4, kind: output, shape index: {}]  }
   0x1   :  { %s9083_s17 = smov 0   ;;  %s9085_s18 = smov 0  }
   0x2   :  { %s9087_s19 = smov 0  }
   0x3 LB: > { %s33_s20 = sadd.s32 1, %s9048_s18  ;;  %s7913_s21 = sadd.s32 4294967295, %s9052_s19   ;;  %s9052_s19 = sphi %s9087_s19, %s14_s19   ;;  %s9048_s18 = sphi %s9085_s18, %s10796_s18   ;;  %s9044_s17 = sphi %s9083_s17, %s10795_s17   ;;  %s9040_s16 = sphi %s9081_s16, %s10794_s16   ;;  %s9036_s15 = sphi %s9079_s15, %s10793_s15  }
   0x4   : > { %p35_p0 = scmp.ge.s32.totalorder %s33_s20, 4  ;;  %p73_p1 = scmp.ne.s32.totalorder %s9040_s16, %s9036_s15 }
   0x5   : > { %p74_p2 = scmp.eq.s32.totalorder %s9052_s19, 0  ;;  %p157_p4 = scmp.eq.s32.totalorder %s7913_s21, 3 }
   0x6   : > { %s10798_s20 = smov (%p35_p0, %s33_s20), 0  ;;  %s66_s23 = sadd.s32 1, %s9040_s16 }
   0x7   : > { %p75_p3 = por %p74_p2, %p73_p1  ;;  %s63_s22 = ssub.s32 %s9048_s18, %s10798_s20 }
   0x8   : > { %p64_p5 = scmp.eq.s32.totalorder %s63_s22, 0  ;;  %p9114_p6 = por %p157_p4, %p73_p1 }
   0x9   : > { %p7917_p7 = scmp.ge.s32.totalorder %s9052_s19, 4 }
   0xa   : > { %s9119_s25 = scalar_select %p64_p5, %s9040_s16, %s66_s23  }
   0xb   : > { %189 = sbr.rel (%p7917_p7) target bundleno = 361 (0x169), region = 20 }
  0x10   : > { %192 = sbr.rel (!%p75_p3) target bundleno = 361 (0x169), region = 24  ;;  %s194_s26 = sand.u32 (%p75_p3), 1, %s9040_s16  }
  0x11   : > { %s7919_s27 = sshll.u32 (%p75_p3), %s9048_s18, 2  ;;  %s7918_s28 = sshll.u32 (%p75_p3), %s194_s26, 11 }
  0x12   : > { %s9127_s5 = scalar_lea.vmem (%p75_p3), %s10766_s1, %s7919_s27  ;;  %s9131_s6 = scalar_lea.vmem (%p75_p3), [#allocation2], %s7918_s28 }
  0x13   : > { %v215_v0 = vld [vmem:[%s9127_s5] sm:$0xf] (%p75_p3)  ;;  %v217_v1 = vld [vmem:[%s9127_s5 + $0x10] sm:$0xf] (%p75_p3) }
  0x14   : > { %216 = vst [vmem:[%s9131_s6] sm:$0xf] (%p75_p3), %v215_v0  ;;  %218 = vst [vmem:[%s9131_s6 + $0x4] sm:$0xf] (%p75_p3), %v217_v1  ;;  %v219_v2 = vld [vmem:[%s9127_s5 + $0x20] sm:$0xf] (%p75_p3) }
  0x15   : > { %v221_v3 = vld [vmem:[%s9127_s5 + $0x30] sm:$0xf]  ;;  %v223_v4 = vld [vmem:[%s9127_s5 + $0x40] sm:$0xf]  ;;  %220 = vst [vmem:[%s9131_s6 + $0x8] sm:$0xf] %v219_v2 }
  0x16   : > { %222 = vst [vmem:[%s9131_s6 + $0xc] sm:$0xf] %v221_v3  ;;  %224 = vst [vmem:[%s9131_s6 + $0x10] sm:$0xf] %v223_v4  ;;  %v225_v5 = vld [vmem:[%s9127_s5 + $0x50] sm:$0xf] }
  0x17   : > { %v227_v6 = vld [vmem:[%s9127_s5 + $0x60] sm:$0xf]  ;;  %v229_v7 = vld [vmem:[%s9127_s5 + $0x70] sm:$0xf]  ;;  %226 = vst [vmem:[%s9131_s6 + $0x14] sm:$0xf] %v225_v5 }
  0x18   : > { %228 = vst [vmem:[%s9131_s6 + $0x18] sm:$0xf] %v227_v6  ;;  %230 = vst [vmem:[%s9131_s6 + $0x1c] sm:$0xf] %v229_v7  ;;  %v231_v8 = vld [vmem:[%s9127_s5 + $0x80] sm:$0xf] }
  0x19   : > { %v233_v9 = vld [vmem:[%s9127_s5 + $0x90] sm:$0xf]  ;;  %v235_v10 = vld [vmem:[%s9127_s5 + $0xa0] sm:$0xf]  ;;  %232 = vst [vmem:[%s9131_s6 + $0x20] sm:$0xf] %v231_v8 }
  0x1a   : > { %234 = vst [vmem:[%s9131_s6 + $0x24] sm:$0xf] %v233_v9  ;;  %236 = vst [vmem:[%s9131_s6 + $0x28] sm:$0xf] %v235_v10  ;;  %v237_v11 = vld [vmem:[%s9127_s5 + $0xb0] sm:$0xf] }
  0x1b   : > { %v239_v12 = vld [vmem:[%s9127_s5 + $0xc0] sm:$0xf]  ;;  %v241_v13 = vld [vmem:[%s9127_s5 + $0xd0] sm:$0xf]  ;;  %238 = vst [vmem:[%s9131_s6 + $0x2c] sm:$0xf] %v237_v11 }
  0x1c   : > { %240 = vst [vmem:[%s9131_s6 + $0x30] sm:$0xf] %v239_v12  ;;  %242 = vst [vmem:[%s9131_s6 + $0x34] sm:$0xf] %v241_v13  ;;  %v243_v14 = vld [vmem:[%s9127_s5 + $0xe0] sm:$0xf] }
  0x1d   : > { %v245_v15 = vld [vmem:[%s9127_s5 + $0xf0] sm:$0xf]  ;;  %v247_v16 = vld [vmem:[%s9127_s5 + $0x100] sm:$0xf]  ;;  %244 = vst [vmem:[%s9131_s6 + $0x38] sm:$0xf] %v243_v14 }
  0x1e   : > { %246 = vst [vmem:[%s9131_s6 + $0x3c] sm:$0xf] %v245_v15  ;;  %248 = vst [vmem:[%s9131_s6 + $0x40] sm:$0xf] %v247_v16  ;;  %v249_v17 = vld [vmem:[%s9127_s5 + $0x110] sm:$0xf] }
  0x1f   : > { %v251_v18 = vld [vmem:[%s9127_s5 + $0x120] sm:$0xf]  ;;  %v253_v19 = vld [vmem:[%s9127_s5 + $0x130] sm:$0xf]  ;;  %250 = vst [vmem:[%s9131_s6 + $0x44] sm:$0xf] %v249_v17 }
  0x20   : > { %252 = vst [vmem:[%s9131_s6 + $0x48] sm:$0xf] %v251_v18  ;;  %254 = vst [vmem:[%s9131_s6 + $0x4c] sm:$0xf] %v253_v19  ;;  %v255_v20 = vld [vmem:[%s9127_s5 + $0x140] sm:$0xf] }
  0x21   : > { %v257_v21 = vld [vmem:[%s9127_s5 + $0x150] sm:$0xf]  ;;  %v259_v22 = vld [vmem:[%s9127_s5 + $0x160] sm:$0xf]  ;;  %256 = vst [vmem:[%s9131_s6 + $0x50] sm:$0xf] %v255_v20 }
  0x22   : > { %258 = vst [vmem:[%s9131_s6 + $0x54] sm:$0xf] %v257_v21  ;;  %260 = vst [vmem:[%s9131_s6 + $0x58] sm:$0xf] %v259_v22  ;;  %v261_v23 = vld [vmem:[%s9127_s5 + $0x170] sm:$0xf] }
  0x23   : > { %v263_v24 = vld [vmem:[%s9127_s5 + $0x180] sm:$0xf]  ;;  %v265_v25 = vld [vmem:[%s9127_s5 + $0x190] sm:$0xf]  ;;  %262 = vst [vmem:[%s9131_s6 + $0x5c] sm:$0xf] %v261_v23 }
  0x24   : > { %264 = vst [vmem:[%s9131_s6 + $0x60] sm:$0xf] %v263_v24  ;;  %266 = vst [vmem:[%s9131_s6 + $0x64] sm:$0xf] %v265_v25  ;;  %v267_v26 = vld [vmem:[%s9127_s5 + $0x1a0] sm:$0xf] }
  0x25   : > { %v269_v27 = vld [vmem:[%s9127_s5 + $0x1b0] sm:$0xf]  ;;  %v271_v28 = vld [vmem:[%s9127_s5 + $0x1c0] sm:$0xf]  ;;  %268 = vst [vmem:[%s9131_s6 + $0x68] sm:$0xf] %v267_v26 }
  0x26   : > { %270 = vst [vmem:[%s9131_s6 + $0x6c] sm:$0xf] %v269_v27  ;;  %272 = vst [vmem:[%s9131_s6 + $0x70] sm:$0xf] %v271_v28  ;;  %v273_v29 = vld [vmem:[%s9127_s5 + $0x1d0] sm:$0xf] }
  0x27   : > { %v275_v30 = vld [vmem:[%s9127_s5 + $0x1e0] sm:$0xf]  ;;  %v277_v31 = vld [vmem:[%s9127_s5 + $0x1f0] sm:$0xf]  ;;  %274 = vst [vmem:[%s9131_s6 + $0x74] sm:$0xf] %v273_v29 }
  0x28   : > { %276 = vst [vmem:[%s9131_s6 + $0x78] sm:$0xf] %v275_v30  ;;  %278 = vst [vmem:[%s9131_s6 + $0x7c] sm:$0xf] %v277_v31  ;;  %v279_v32 = vld [vmem:[%s9127_s5 + $0x200] sm:$0xf] }
  0x29   : > { %v281_v33 = vld [vmem:[%s9127_s5 + $0x210] sm:$0xf]  ;;  %v283_v34 = vld [vmem:[%s9127_s5 + $0x220] sm:$0xf]  ;;  %280 = vst [vmem:[%s9131_s6 + $0x80] sm:$0xf] %v279_v32 }
  0x2a   : > { %282 = vst [vmem:[%s9131_s6 + $0x84] sm:$0xf] %v281_v33  ;;  %284 = vst [vmem:[%s9131_s6 + $0x88] sm:$0xf] %v283_v34  ;;  %v285_v35 = vld [vmem:[%s9127_s5 + $0x230] sm:$0xf] }
  0x2b   : > { %v287_v36 = vld [vmem:[%s9127_s5 + $0x240] sm:$0xf]  ;;  %v289_v37 = vld [vmem:[%s9127_s5 + $0x250] sm:$0xf]  ;;  %286 = vst [vmem:[%s9131_s6 + $0x8c] sm:$0xf] %v285_v35 }
  0x2c   : > { %288 = vst [vmem:[%s9131_s6 + $0x90] sm:$0xf] %v287_v36  ;;  %290 = vst [vmem:[%s9131_s6 + $0x94] sm:$0xf] %v289_v37  ;;  %v291_v38 = vld [vmem:[%s9127_s5 + $0x260] sm:$0xf] }
  0x2d   : > { %v293_v39 = vld [vmem:[%s9127_s5 + $0x270] sm:$0xf]  ;;  %v295_v40 = vld [vmem:[%s9127_s5 + $0x280] sm:$0xf]  ;;  %292 = vst [vmem:[%s9131_s6 + $0x98] sm:$0xf] %v291_v38 }
  0x2e   : > { %294 = vst [vmem:[%s9131_s6 + $0x9c] sm:$0xf] %v293_v39  ;;  %296 = vst [vmem:[%s9131_s6 + $0xa0] sm:$0xf] %v295_v40  ;;  %v297_v41 = vld [vmem:[%s9127_s5 + $0x290] sm:$0xf] }
  0x2f   : > { %v299_v42 = vld [vmem:[%s9127_s5 + $0x2a0] sm:$0xf]  ;;  %v301_v43 = vld [vmem:[%s9127_s5 + $0x2b0] sm:$0xf]  ;;  %298 = vst [vmem:[%s9131_s6 + $0xa4] sm:$0xf] %v297_v41 }
  0x30   : > { %300 = vst [vmem:[%s9131_s6 + $0xa8] sm:$0xf] %v299_v42  ;;  %302 = vst [vmem:[%s9131_s6 + $0xac] sm:$0xf] %v301_v43  ;;  %v303_v44 = vld [vmem:[%s9127_s5 + $0x2c0] sm:$0xf] }
  0x31   : > { %v305_v45 = vld [vmem:[%s9127_s5 + $0x2d0] sm:$0xf]  ;;  %v307_v46 = vld [vmem:[%s9127_s5 + $0x2e0] sm:$0xf]  ;;  %304 = vst [vmem:[%s9131_s6 + $0xb0] sm:$0xf] %v303_v44 }
  0x32   : > { %306 = vst [vmem:[%s9131_s6 + $0xb4] sm:$0xf] %v305_v45  ;;  %308 = vst [vmem:[%s9131_s6 + $0xb8] sm:$0xf] %v307_v46  ;;  %v309_v47 = vld [vmem:[%s9127_s5 + $0x2f0] sm:$0xf] }
  0x33   : > { %v311_v48 = vld [vmem:[%s9127_s5 + $0x300] sm:$0xf]  ;;  %v313_v49 = vld [vmem:[%s9127_s5 + $0x310] sm:$0xf]  ;;  %310 = vst [vmem:[%s9131_s6 + $0xbc] sm:$0xf] %v309_v47 }
  0x34   : > { %312 = vst [vmem:[%s9131_s6 + $0xc0] sm:$0xf] %v311_v48  ;;  %314 = vst [vmem:[%s9131_s6 + $0xc4] sm:$0xf] %v313_v49  ;;  %v315_v50 = vld [vmem:[%s9127_s5 + $0x320] sm:$0xf] }
  0x35   : > { %v317_v51 = vld [vmem:[%s9127_s5 + $0x330] sm:$0xf]  ;;  %v319_v52 = vld [vmem:[%s9127_s5 + $0x340] sm:$0xf]  ;;  %316 = vst [vmem:[%s9131_s6 + $0xc8] sm:$0xf] %v315_v50 }
  0x36   : > { %318 = vst [vmem:[%s9131_s6 + $0xcc] sm:$0xf] %v317_v51  ;;  %320 = vst [vmem:[%s9131_s6 + $0xd0] sm:$0xf] %v319_v52  ;;  %v321_v53 = vld [vmem:[%s9127_s5 + $0x350] sm:$0xf] }
  0x37   : > { %v323_v54 = vld [vmem:[%s9127_s5 + $0x360] sm:$0xf]  ;;  %v325_v55 = vld [vmem:[%s9127_s5 + $0x370] sm:$0xf]  ;;  %322 = vst [vmem:[%s9131_s6 + $0xd4] sm:$0xf] %v321_v53 }
  0x38   : > { %324 = vst [vmem:[%s9131_s6 + $0xd8] sm:$0xf] %v323_v54  ;;  %326 = vst [vmem:[%s9131_s6 + $0xdc] sm:$0xf] %v325_v55  ;;  %v327_v56 = vld [vmem:[%s9127_s5 + $0x380] sm:$0xf] }
  0x39   : > { %v329_v57 = vld [vmem:[%s9127_s5 + $0x390] sm:$0xf]  ;;  %v331_v58 = vld [vmem:[%s9127_s5 + $0x3a0] sm:$0xf]  ;;  %328 = vst [vmem:[%s9131_s6 + $0xe0] sm:$0xf] %v327_v56 }
  0x3a   : > { %330 = vst [vmem:[%s9131_s6 + $0xe4] sm:$0xf] %v329_v57  ;;  %332 = vst [vmem:[%s9131_s6 + $0xe8] sm:$0xf] %v331_v58  ;;  %v333_v59 = vld [vmem:[%s9127_s5 + $0x3b0] sm:$0xf] }
  0x3b   : > { %v335_v60 = vld [vmem:[%s9127_s5 + $0x3c0] sm:$0xf]  ;;  %v337_v61 = vld [vmem:[%s9127_s5 + $0x3d0] sm:$0xf]  ;;  %334 = vst [vmem:[%s9131_s6 + $0xec] sm:$0xf] %v333_v59 }
  0x3c   : > { %336 = vst [vmem:[%s9131_s6 + $0xf0] sm:$0xf] %v335_v60  ;;  %338 = vst [vmem:[%s9131_s6 + $0xf4] sm:$0xf] %v337_v61  ;;  %v339_v62 = vld [vmem:[%s9127_s5 + $0x3e0] sm:$0xf] }
  0x3d   : > { %v341_v63 = vld [vmem:[%s9127_s5 + $0x3f0] sm:$0xf]  ;;  %v343_v0 = vld [vmem:[%s9127_s5 + $0x400] sm:$0xf]  ;;  %340 = vst [vmem:[%s9131_s6 + $0xf8] sm:$0xf] %v339_v62 }
  0x3e   : > { %342 = vst [vmem:[%s9131_s6 + $0xfc] sm:$0xf] %v341_v63  ;;  %344 = vst [vmem:[%s9131_s6 + $0x100] sm:$0xf] %v343_v0  ;;  %v345_v1 = vld [vmem:[%s9127_s5 + $0x410] sm:$0xf] }
  0x3f   : > { %v347_v2 = vld [vmem:[%s9127_s5 + $0x420] sm:$0xf]  ;;  %v349_v3 = vld [vmem:[%s9127_s5 + $0x430] sm:$0xf]  ;;  %346 = vst [vmem:[%s9131_s6 + $0x104] sm:$0xf] %v345_v1 }
  0x40   : > { %348 = vst [vmem:[%s9131_s6 + $0x108] sm:$0xf] %v347_v2  ;;  %350 = vst [vmem:[%s9131_s6 + $0x10c] sm:$0xf] %v349_v3  ;;  %v351_v4 = vld [vmem:[%s9127_s5 + $0x440] sm:$0xf] }
  0x41   : > { %v353_v5 = vld [vmem:[%s9127_s5 + $0x450] sm:$0xf]  ;;  %v355_v6 = vld [vmem:[%s9127_s5 + $0x460] sm:$0xf]  ;;  %352 = vst [vmem:[%s9131_s6 + $0x110] sm:$0xf] %v351_v4 }
  0x42   : > { %354 = vst [vmem:[%s9131_s6 + $0x114] sm:$0xf] %v353_v5  ;;  %356 = vst [vmem:[%s9131_s6 + $0x118] sm:$0xf] %v355_v6  ;;  %v357_v7 = vld [vmem:[%s9127_s5 + $0x470] sm:$0xf] }
  0x43   : > { %v359_v8 = vld [vmem:[%s9127_s5 + $0x480] sm:$0xf]  ;;  %v361_v9 = vld [vmem:[%s9127_s5 + $0x490] sm:$0xf]  ;;  %358 = vst [vmem:[%s9131_s6 + $0x11c] sm:$0xf] %v357_v7 }
  0x44   : > { %360 = vst [vmem:[%s9131_s6 + $0x120] sm:$0xf] %v359_v8  ;;  %362 = vst [vmem:[%s9131_s6 + $0x124] sm:$0xf] %v361_v9  ;;  %v363_v10 = vld [vmem:[%s9127_s5 + $0x4a0] sm:$0xf] }
  0x45   : > { %v365_v11 = vld [vmem:[%s9127_s5 + $0x4b0] sm:$0xf]  ;;  %v367_v12 = vld [vmem:[%s9127_s5 + $0x4c0] sm:$0xf]  ;;  %364 = vst [vmem:[%s9131_s6 + $0x128] sm:$0xf] %v363_v10 }
  0x46   : > { %366 = vst [vmem:[%s9131_s6 + $0x12c] sm:$0xf] %v365_v11  ;;  %368 = vst [vmem:[%s9131_s6 + $0x130] sm:$0xf] %v367_v12  ;;  %v369_v13 = vld [vmem:[%s9127_s5 + $0x4d0] sm:$0xf] }
  0x47   : > { %v371_v14 = vld [vmem:[%s9127_s5 + $0x4e0] sm:$0xf]  ;;  %v373_v15 = vld [vmem:[%s9127_s5 + $0x4f0] sm:$0xf]  ;;  %370 = vst [vmem:[%s9131_s6 + $0x134] sm:$0xf] %v369_v13 }
  0x48   : > { %372 = vst [vmem:[%s9131_s6 + $0x138] sm:$0xf] %v371_v14  ;;  %374 = vst [vmem:[%s9131_s6 + $0x13c] sm:$0xf] %v373_v15  ;;  %v375_v16 = vld [vmem:[%s9127_s5 + $0x500] sm:$0xf] }
  0x49   : > { %v377_v17 = vld [vmem:[%s9127_s5 + $0x510] sm:$0xf]  ;;  %v379_v18 = vld [vmem:[%s9127_s5 + $0x520] sm:$0xf]  ;;  %376 = vst [vmem:[%s9131_s6 + $0x140] sm:$0xf] %v375_v16 }
  0x4a   : > { %378 = vst [vmem:[%s9131_s6 + $0x144] sm:$0xf] %v377_v17  ;;  %380 = vst [vmem:[%s9131_s6 + $0x148] sm:$0xf] %v379_v18  ;;  %v381_v19 = vld [vmem:[%s9127_s5 + $0x530] sm:$0xf] }
  0x4b   : > { %v383_v20 = vld [vmem:[%s9127_s5 + $0x540] sm:$0xf]  ;;  %v385_v21 = vld [vmem:[%s9127_s5 + $0x550] sm:$0xf]  ;;  %382 = vst [vmem:[%s9131_s6 + $0x14c] sm:$0xf] %v381_v19 }
  0x4c   : > { %384 = vst [vmem:[%s9131_s6 + $0x150] sm:$0xf] %v383_v20  ;;  %386 = vst [vmem:[%s9131_s6 + $0x154] sm:$0xf] %v385_v21  ;;  %v387_v22 = vld [vmem:[%s9127_s5 + $0x560] sm:$0xf] }
  0x4d   : > { %v389_v23 = vld [vmem:[%s9127_s5 + $0x570] sm:$0xf]  ;;  %v391_v24 = vld [vmem:[%s9127_s5 + $0x580] sm:$0xf]  ;;  %388 = vst [vmem:[%s9131_s6 + $0x158] sm:$0xf] %v387_v22 }
  0x4e   : > { %390 = vst [vmem:[%s9131_s6 + $0x15c] sm:$0xf] %v389_v23  ;;  %392 = vst [vmem:[%s9131_s6 + $0x160] sm:$0xf] %v391_v24  ;;  %v393_v25 = vld [vmem:[%s9127_s5 + $0x590] sm:$0xf] }
  0x4f   : > { %v395_v26 = vld [vmem:[%s9127_s5 + $0x5a0] sm:$0xf]  ;;  %v397_v27 = vld [vmem:[%s9127_s5 + $0x5b0] sm:$0xf]  ;;  %394 = vst [vmem:[%s9131_s6 + $0x164] sm:$0xf] %v393_v25 }
  0x50   : > { %396 = vst [vmem:[%s9131_s6 + $0x168] sm:$0xf] %v395_v26  ;;  %398 = vst [vmem:[%s9131_s6 + $0x16c] sm:$0xf] %v397_v27  ;;  %v399_v28 = vld [vmem:[%s9127_s5 + $0x5c0] sm:$0xf] }
  0x51   : > { %v401_v29 = vld [vmem:[%s9127_s5 + $0x5d0] sm:$0xf]  ;;  %v403_v30 = vld [vmem:[%s9127_s5 + $0x5e0] sm:$0xf]  ;;  %400 = vst [vmem:[%s9131_s6 + $0x170] sm:$0xf] %v399_v28 }
  0x52   : > { %402 = vst [vmem:[%s9131_s6 + $0x174] sm:$0xf] %v401_v29  ;;  %404 = vst [vmem:[%s9131_s6 + $0x178] sm:$0xf] %v403_v30  ;;  %v405_v31 = vld [vmem:[%s9127_s5 + $0x5f0] sm:$0xf] }
  0x53   : > { %v407_v32 = vld [vmem:[%s9127_s5 + $0x600] sm:$0xf]  ;;  %v409_v33 = vld [vmem:[%s9127_s5 + $0x610] sm:$0xf]  ;;  %406 = vst [vmem:[%s9131_s6 + $0x17c] sm:$0xf] %v405_v31 }
  0x54   : > { %408 = vst [vmem:[%s9131_s6 + $0x180] sm:$0xf] %v407_v32  ;;  %410 = vst [vmem:[%s9131_s6 + $0x184] sm:$0xf] %v409_v33  ;;  %v411_v34 = vld [vmem:[%s9127_s5 + $0x620] sm:$0xf] }
  0x55   : > { %v413_v35 = vld [vmem:[%s9127_s5 + $0x630] sm:$0xf]  ;;  %v415_v36 = vld [vmem:[%s9127_s5 + $0x640] sm:$0xf]  ;;  %412 = vst [vmem:[%s9131_s6 + $0x188] sm:$0xf] %v411_v34 }
  0x56   : > { %414 = vst [vmem:[%s9131_s6 + $0x18c] sm:$0xf] %v413_v35  ;;  %416 = vst [vmem:[%s9131_s6 + $0x190] sm:$0xf] %v415_v36  ;;  %v417_v37 = vld [vmem:[%s9127_s5 + $0x650] sm:$0xf] }
  0x57   : > { %v419_v38 = vld [vmem:[%s9127_s5 + $0x660] sm:$0xf]  ;;  %v421_v39 = vld [vmem:[%s9127_s5 + $0x670] sm:$0xf]  ;;  %418 = vst [vmem:[%s9131_s6 + $0x194] sm:$0xf] %v417_v37 }
  0x58   : > { %420 = vst [vmem:[%s9131_s6 + $0x198] sm:$0xf] %v419_v38  ;;  %422 = vst [vmem:[%s9131_s6 + $0x19c] sm:$0xf] %v421_v39  ;;  %v423_v40 = vld [vmem:[%s9127_s5 + $0x680] sm:$0xf] }
  0x59   : > { %v425_v41 = vld [vmem:[%s9127_s5 + $0x690] sm:$0xf]  ;;  %v427_v42 = vld [vmem:[%s9127_s5 + $0x6a0] sm:$0xf]  ;;  %424 = vst [vmem:[%s9131_s6 + $0x1a0] sm:$0xf] %v423_v40 }
  0x5a   : > { %426 = vst [vmem:[%s9131_s6 + $0x1a4] sm:$0xf] %v425_v41  ;;  %428 = vst [vmem:[%s9131_s6 + $0x1a8] sm:$0xf] %v427_v42  ;;  %v429_v43 = vld [vmem:[%s9127_s5 + $0x6b0] sm:$0xf] }
  0x5b   : > { %v431_v44 = vld [vmem:[%s9127_s5 + $0x6c0] sm:$0xf]  ;;  %v433_v45 = vld [vmem:[%s9127_s5 + $0x6d0] sm:$0xf]  ;;  %430 = vst [vmem:[%s9131_s6 + $0x1ac] sm:$0xf] %v429_v43 }
  0x5c   : > { %432 = vst [vmem:[%s9131_s6 + $0x1b0] sm:$0xf] %v431_v44  ;;  %434 = vst [vmem:[%s9131_s6 + $0x1b4] sm:$0xf] %v433_v45  ;;  %v435_v46 = vld [vmem:[%s9127_s5 + $0x6e0] sm:$0xf] }
  0x5d   : > { %v437_v47 = vld [vmem:[%s9127_s5 + $0x6f0] sm:$0xf]  ;;  %v439_v48 = vld [vmem:[%s9127_s5 + $0x700] sm:$0xf]  ;;  %436 = vst [vmem:[%s9131_s6 + $0x1b8] sm:$0xf] %v435_v46 }
  0x5e   : > { %438 = vst [vmem:[%s9131_s6 + $0x1bc] sm:$0xf] %v437_v47  ;;  %440 = vst [vmem:[%s9131_s6 + $0x1c0] sm:$0xf] %v439_v48  ;;  %v441_v49 = vld [vmem:[%s9127_s5 + $0x710] sm:$0xf] }
  0x5f   : > { %v443_v50 = vld [vmem:[%s9127_s5 + $0x720] sm:$0xf]  ;;  %v445_v51 = vld [vmem:[%s9127_s5 + $0x730] sm:$0xf]  ;;  %442 = vst [vmem:[%s9131_s6 + $0x1c4] sm:$0xf] %v441_v49 }
  0x60   : > { %444 = vst [vmem:[%s9131_s6 + $0x1c8] sm:$0xf] %v443_v50  ;;  %446 = vst [vmem:[%s9131_s6 + $0x1cc] sm:$0xf] %v445_v51  ;;  %v447_v52 = vld [vmem:[%s9127_s5 + $0x740] sm:$0xf] }
  0x61   : > { %v449_v53 = vld [vmem:[%s9127_s5 + $0x750] sm:$0xf]  ;;  %v451_v54 = vld [vmem:[%s9127_s5 + $0x760] sm:$0xf]  ;;  %448 = vst [vmem:[%s9131_s6 + $0x1d0] sm:$0xf] %v447_v52 }
  0x62   : > { %450 = vst [vmem:[%s9131_s6 + $0x1d4] sm:$0xf] %v449_v53  ;;  %452 = vst [vmem:[%s9131_s6 + $0x1d8] sm:$0xf] %v451_v54  ;;  %v453_v55 = vld [vmem:[%s9127_s5 + $0x770] sm:$0xf] }
  0x63   : > { %v455_v56 = vld [vmem:[%s9127_s5 + $0x780] sm:$0xf]  ;;  %v457_v57 = vld [vmem:[%s9127_s5 + $0x790] sm:$0xf]  ;;  %454 = vst [vmem:[%s9131_s6 + $0x1dc] sm:$0xf] %v453_v55 }
  0x64   : > { %456 = vst [vmem:[%s9131_s6 + $0x1e0] sm:$0xf] %v455_v56  ;;  %458 = vst [vmem:[%s9131_s6 + $0x1e4] sm:$0xf] %v457_v57  ;;  %v459_v58 = vld [vmem:[%s9127_s5 + $0x7a0] sm:$0xf] }
  0x65   : > { %v461_v59 = vld [vmem:[%s9127_s5 + $0x7b0] sm:$0xf]  ;;  %v463_v60 = vld [vmem:[%s9127_s5 + $0x7c0] sm:$0xf]  ;;  %460 = vst [vmem:[%s9131_s6 + $0x1e8] sm:$0xf] %v459_v58 }
  0x66   : > { %462 = vst [vmem:[%s9131_s6 + $0x1ec] sm:$0xf] %v461_v59  ;;  %464 = vst [vmem:[%s9131_s6 + $0x1f0] sm:$0xf] %v463_v60  ;;  %v465_v61 = vld [vmem:[%s9127_s5 + $0x7d0] sm:$0xf] }
  0x67   : > { %v467_v62 = vld [vmem:[%s9127_s5 + $0x7e0] sm:$0xf]  ;;  %v469_v63 = vld [vmem:[%s9127_s5 + $0x7f0] sm:$0xf]  ;;  %466 = vst [vmem:[%s9131_s6 + $0x1f4] sm:$0xf] %v465_v61 }
  0x68   : > { %468 = vst [vmem:[%s9131_s6 + $0x1f8] sm:$0xf] %v467_v62  ;;  %470 = vst [vmem:[%s9131_s6 + $0x1fc] sm:$0xf] %v469_v63  ;;  %v471_v0 = vld [vmem:[%s9127_s5 + $0x800] sm:$0xf] }
  0x69   : > { %v473_v1 = vld [vmem:[%s9127_s5 + $0x810] sm:$0xf]  ;;  %v475_v2 = vld [vmem:[%s9127_s5 + $0x820] sm:$0xf]  ;;  %472 = vst [vmem:[%s9131_s6 + $0x200] sm:$0xf] %v471_v0 }
  0x6a   : > { %474 = vst [vmem:[%s9131_s6 + $0x204] sm:$0xf] %v473_v1  ;;  %476 = vst [vmem:[%s9131_s6 + $0x208] sm:$0xf] %v475_v2  ;;  %v477_v3 = vld [vmem:[%s9127_s5 + $0x830] sm:$0xf] }
  0x6b   : > { %v479_v4 = vld [vmem:[%s9127_s5 + $0x840] sm:$0xf]  ;;  %v481_v5 = vld [vmem:[%s9127_s5 + $0x850] sm:$0xf]  ;;  %478 = vst [vmem:[%s9131_s6 + $0x20c] sm:$0xf] %v477_v3 }
  0x6c   : > { %480 = vst [vmem:[%s9131_s6 + $0x210] sm:$0xf] %v479_v4  ;;  %482 = vst [vmem:[%s9131_s6 + $0x214] sm:$0xf] %v481_v5  ;;  %v483_v6 = vld [vmem:[%s9127_s5 + $0x860] sm:$0xf] }
  0x6d   : > { %v485_v7 = vld [vmem:[%s9127_s5 + $0x870] sm:$0xf]  ;;  %v487_v8 = vld [vmem:[%s9127_s5 + $0x880] sm:$0xf]  ;;  %484 = vst [vmem:[%s9131_s6 + $0x218] sm:$0xf] %v483_v6 }
  0x6e   : > { %486 = vst [vmem:[%s9131_s6 + $0x21c] sm:$0xf] %v485_v7  ;;  %488 = vst [vmem:[%s9131_s6 + $0x220] sm:$0xf] %v487_v8  ;;  %v489_v9 = vld [vmem:[%s9127_s5 + $0x890] sm:$0xf] }
  0x6f   : > { %v491_v10 = vld [vmem:[%s9127_s5 + $0x8a0] sm:$0xf]  ;;  %v493_v11 = vld [vmem:[%s9127_s5 + $0x8b0] sm:$0xf]  ;;  %490 = vst [vmem:[%s9131_s6 + $0x224] sm:$0xf] %v489_v9 }
  0x70   : > { %492 = vst [vmem:[%s9131_s6 + $0x228] sm:$0xf] %v491_v10  ;;  %494 = vst [vmem:[%s9131_s6 + $0x22c] sm:$0xf] %v493_v11  ;;  %v495_v12 = vld [vmem:[%s9127_s5 + $0x8c0] sm:$0xf] }
  0x71   : > { %v497_v13 = vld [vmem:[%s9127_s5 + $0x8d0] sm:$0xf]  ;;  %v499_v14 = vld [vmem:[%s9127_s5 + $0x8e0] sm:$0xf]  ;;  %496 = vst [vmem:[%s9131_s6 + $0x230] sm:$0xf] %v495_v12 }
  0x72   : > { %498 = vst [vmem:[%s9131_s6 + $0x234] sm:$0xf] %v497_v13  ;;  %500 = vst [vmem:[%s9131_s6 + $0x238] sm:$0xf] %v499_v14  ;;  %v501_v15 = vld [vmem:[%s9127_s5 + $0x8f0] sm:$0xf] }
  0x73   : > { %v503_v16 = vld [vmem:[%s9127_s5 + $0x900] sm:$0xf]  ;;  %v505_v17 = vld [vmem:[%s9127_s5 + $0x910] sm:$0xf]  ;;  %502 = vst [vmem:[%s9131_s6 + $0x23c] sm:$0xf] %v501_v15 }
  0x74   : > { %504 = vst [vmem:[%s9131_s6 + $0x240] sm:$0xf] %v503_v16  ;;  %506 = vst [vmem:[%s9131_s6 + $0x244] sm:$0xf] %v505_v17  ;;  %v507_v18 = vld [vmem:[%s9127_s5 + $0x920] sm:$0xf] }
  0x75   : > { %v509_v19 = vld [vmem:[%s9127_s5 + $0x930] sm:$0xf]  ;;  %v511_v20 = vld [vmem:[%s9127_s5 + $0x940] sm:$0xf]  ;;  %508 = vst [vmem:[%s9131_s6 + $0x248] sm:$0xf] %v507_v18 }
  0x76   : > { %510 = vst [vmem:[%s9131_s6 + $0x24c] sm:$0xf] %v509_v19  ;;  %512 = vst [vmem:[%s9131_s6 + $0x250] sm:$0xf] %v511_v20  ;;  %v513_v21 = vld [vmem:[%s9127_s5 + $0x950] sm:$0xf] }
  0x77   : > { %v515_v22 = vld [vmem:[%s9127_s5 + $0x960] sm:$0xf]  ;;  %v517_v23 = vld [vmem:[%s9127_s5 + $0x970] sm:$0xf]  ;;  %514 = vst [vmem:[%s9131_s6 + $0x254] sm:$0xf] %v513_v21 }
  0x78   : > { %516 = vst [vmem:[%s9131_s6 + $0x258] sm:$0xf] %v515_v22  ;;  %518 = vst [vmem:[%s9131_s6 + $0x25c] sm:$0xf] %v517_v23  ;;  %v519_v24 = vld [vmem:[%s9127_s5 + $0x980] sm:$0xf] }
  0x79   : > { %v521_v25 = vld [vmem:[%s9127_s5 + $0x990] sm:$0xf]  ;;  %v523_v26 = vld [vmem:[%s9127_s5 + $0x9a0] sm:$0xf]  ;;  %520 = vst [vmem:[%s9131_s6 + $0x260] sm:$0xf] %v519_v24 }
  0x7a   : > { %522 = vst [vmem:[%s9131_s6 + $0x264] sm:$0xf] %v521_v25  ;;  %524 = vst [vmem:[%s9131_s6 + $0x268] sm:$0xf] %v523_v26  ;;  %v525_v27 = vld [vmem:[%s9127_s5 + $0x9b0] sm:$0xf] }
  0x7b   : > { %v527_v28 = vld [vmem:[%s9127_s5 + $0x9c0] sm:$0xf]  ;;  %v529_v29 = vld [vmem:[%s9127_s5 + $0x9d0] sm:$0xf]  ;;  %526 = vst [vmem:[%s9131_s6 + $0x26c] sm:$0xf] %v525_v27 }
  0x7c   : > { %528 = vst [vmem:[%s9131_s6 + $0x270] sm:$0xf] %v527_v28  ;;  %530 = vst [vmem:[%s9131_s6 + $0x274] sm:$0xf] %v529_v29  ;;  %v531_v30 = vld [vmem:[%s9127_s5 + $0x9e0] sm:$0xf] }
  0x7d   : > { %v533_v31 = vld [vmem:[%s9127_s5 + $0x9f0] sm:$0xf]  ;;  %v535_v32 = vld [vmem:[%s9127_s5 + $0xa00] sm:$0xf]  ;;  %532 = vst [vmem:[%s9131_s6 + $0x278] sm:$0xf] %v531_v30 }
  0x7e   : > { %534 = vst [vmem:[%s9131_s6 + $0x27c] sm:$0xf] %v533_v31  ;;  %536 = vst [vmem:[%s9131_s6 + $0x280] sm:$0xf] %v535_v32  ;;  %v537_v33 = vld [vmem:[%s9127_s5 + $0xa10] sm:$0xf] }
  0x7f   : > { %v539_v34 = vld [vmem:[%s9127_s5 + $0xa20] sm:$0xf]  ;;  %v541_v35 = vld [vmem:[%s9127_s5 + $0xa30] sm:$0xf]  ;;  %538 = vst [vmem:[%s9131_s6 + $0x284] sm:$0xf] %v537_v33 }
  0x80   : > { %540 = vst [vmem:[%s9131_s6 + $0x288] sm:$0xf] %v539_v34  ;;  %542 = vst [vmem:[%s9131_s6 + $0x28c] sm:$0xf] %v541_v35  ;;  %v543_v36 = vld [vmem:[%s9127_s5 + $0xa40] sm:$0xf] }
  0x81   : > { %v545_v37 = vld [vmem:[%s9127_s5 + $0xa50] sm:$0xf]  ;;  %v547_v38 = vld [vmem:[%s9127_s5 + $0xa60] sm:$0xf]  ;;  %544 = vst [vmem:[%s9131_s6 + $0x290] sm:$0xf] %v543_v36 }
  0x82   : > { %546 = vst [vmem:[%s9131_s6 + $0x294] sm:$0xf] %v545_v37  ;;  %548 = vst [vmem:[%s9131_s6 + $0x298] sm:$0xf] %v547_v38  ;;  %v549_v39 = vld [vmem:[%s9127_s5 + $0xa70] sm:$0xf] }
  0x83   : > { %v551_v40 = vld [vmem:[%s9127_s5 + $0xa80] sm:$0xf]  ;;  %v553_v41 = vld [vmem:[%s9127_s5 + $0xa90] sm:$0xf]  ;;  %550 = vst [vmem:[%s9131_s6 + $0x29c] sm:$0xf] %v549_v39 }
  0x84   : > { %552 = vst [vmem:[%s9131_s6 + $0x2a0] sm:$0xf] %v551_v40  ;;  %554 = vst [vmem:[%s9131_s6 + $0x2a4] sm:$0xf] %v553_v41  ;;  %v555_v42 = vld [vmem:[%s9127_s5 + $0xaa0] sm:$0xf] }
  0x85   : > { %v557_v43 = vld [vmem:[%s9127_s5 + $0xab0] sm:$0xf]  ;;  %v559_v44 = vld [vmem:[%s9127_s5 + $0xac0] sm:$0xf]  ;;  %556 = vst [vmem:[%s9131_s6 + $0x2a8] sm:$0xf] %v555_v42 }
  0x86   : > { %558 = vst [vmem:[%s9131_s6 + $0x2ac] sm:$0xf] %v557_v43  ;;  %560 = vst [vmem:[%s9131_s6 + $0x2b0] sm:$0xf] %v559_v44  ;;  %v561_v45 = vld [vmem:[%s9127_s5 + $0xad0] sm:$0xf] }
  0x87   : > { %v563_v46 = vld [vmem:[%s9127_s5 + $0xae0] sm:$0xf]  ;;  %v565_v47 = vld [vmem:[%s9127_s5 + $0xaf0] sm:$0xf]  ;;  %562 = vst [vmem:[%s9131_s6 + $0x2b4] sm:$0xf] %v561_v45 }
  0x88   : > { %564 = vst [vmem:[%s9131_s6 + $0x2b8] sm:$0xf] %v563_v46  ;;  %566 = vst [vmem:[%s9131_s6 + $0x2bc] sm:$0xf] %v565_v47  ;;  %v567_v48 = vld [vmem:[%s9127_s5 + $0xb00] sm:$0xf] }
  0x89   : > { %v569_v49 = vld [vmem:[%s9127_s5 + $0xb10] sm:$0xf]  ;;  %v571_v50 = vld [vmem:[%s9127_s5 + $0xb20] sm:$0xf]  ;;  %568 = vst [vmem:[%s9131_s6 + $0x2c0] sm:$0xf] %v567_v48 }
  0x8a   : > { %570 = vst [vmem:[%s9131_s6 + $0x2c4] sm:$0xf] %v569_v49  ;;  %572 = vst [vmem:[%s9131_s6 + $0x2c8] sm:$0xf] %v571_v50  ;;  %v573_v51 = vld [vmem:[%s9127_s5 + $0xb30] sm:$0xf] }
  0x8b   : > { %v575_v52 = vld [vmem:[%s9127_s5 + $0xb40] sm:$0xf]  ;;  %v577_v53 = vld [vmem:[%s9127_s5 + $0xb50] sm:$0xf]  ;;  %574 = vst [vmem:[%s9131_s6 + $0x2cc] sm:$0xf] %v573_v51 }
  0x8c   : > { %576 = vst [vmem:[%s9131_s6 + $0x2d0] sm:$0xf] %v575_v52  ;;  %578 = vst [vmem:[%s9131_s6 + $0x2d4] sm:$0xf] %v577_v53  ;;  %v579_v54 = vld [vmem:[%s9127_s5 + $0xb60] sm:$0xf] }
  0x8d   : > { %v581_v55 = vld [vmem:[%s9127_s5 + $0xb70] sm:$0xf]  ;;  %v583_v56 = vld [vmem:[%s9127_s5 + $0xb80] sm:$0xf]  ;;  %580 = vst [vmem:[%s9131_s6 + $0x2d8] sm:$0xf] %v579_v54 }
  0x8e   : > { %582 = vst [vmem:[%s9131_s6 + $0x2dc] sm:$0xf] %v581_v55  ;;  %584 = vst [vmem:[%s9131_s6 + $0x2e0] sm:$0xf] %v583_v56  ;;  %v585_v57 = vld [vmem:[%s9127_s5 + $0xb90] sm:$0xf] }
  0x8f   : > { %v587_v58 = vld [vmem:[%s9127_s5 + $0xba0] sm:$0xf]  ;;  %v589_v59 = vld [vmem:[%s9127_s5 + $0xbb0] sm:$0xf]  ;;  %586 = vst [vmem:[%s9131_s6 + $0x2e4] sm:$0xf] %v585_v57 }
  0x90   : > { %588 = vst [vmem:[%s9131_s6 + $0x2e8] sm:$0xf] %v587_v58  ;;  %590 = vst [vmem:[%s9131_s6 + $0x2ec] sm:$0xf] %v589_v59  ;;  %v591_v60 = vld [vmem:[%s9127_s5 + $0xbc0] sm:$0xf] }
  0x91   : > { %v593_v61 = vld [vmem:[%s9127_s5 + $0xbd0] sm:$0xf]  ;;  %v595_v62 = vld [vmem:[%s9127_s5 + $0xbe0] sm:$0xf]  ;;  %592 = vst [vmem:[%s9131_s6 + $0x2f0] sm:$0xf] %v591_v60 }
  0x92   : > { %594 = vst [vmem:[%s9131_s6 + $0x2f4] sm:$0xf] %v593_v61  ;;  %596 = vst [vmem:[%s9131_s6 + $0x2f8] sm:$0xf] %v595_v62  ;;  %v597_v63 = vld [vmem:[%s9127_s5 + $0xbf0] sm:$0xf] }
  0x93   : > { %v599_v0 = vld [vmem:[%s9127_s5 + $0xc00] sm:$0xf]  ;;  %v601_v1 = vld [vmem:[%s9127_s5 + $0xc10] sm:$0xf]  ;;  %598 = vst [vmem:[%s9131_s6 + $0x2fc] sm:$0xf] %v597_v63 }
  0x94   : > { %600 = vst [vmem:[%s9131_s6 + $0x300] sm:$0xf] %v599_v0  ;;  %602 = vst [vmem:[%s9131_s6 + $0x304] sm:$0xf] %v601_v1  ;;  %v603_v2 = vld [vmem:[%s9127_s5 + $0xc20] sm:$0xf] }
  0x95   : > { %v605_v3 = vld [vmem:[%s9127_s5 + $0xc30] sm:$0xf]  ;;  %v607_v4 = vld [vmem:[%s9127_s5 + $0xc40] sm:$0xf]  ;;  %604 = vst [vmem:[%s9131_s6 + $0x308] sm:$0xf] %v603_v2 }
  0x96   : > { %606 = vst [vmem:[%s9131_s6 + $0x30c] sm:$0xf] %v605_v3  ;;  %608 = vst [vmem:[%s9131_s6 + $0x310] sm:$0xf] %v607_v4  ;;  %v609_v5 = vld [vmem:[%s9127_s5 + $0xc50] sm:$0xf] }
  0x97   : > { %v611_v6 = vld [vmem:[%s9127_s5 + $0xc60] sm:$0xf]  ;;  %v613_v7 = vld [vmem:[%s9127_s5 + $0xc70] sm:$0xf]  ;;  %610 = vst [vmem:[%s9131_s6 + $0x314] sm:$0xf] %v609_v5 }
  0x98   : > { %612 = vst [vmem:[%s9131_s6 + $0x318] sm:$0xf] %v611_v6  ;;  %614 = vst [vmem:[%s9131_s6 + $0x31c] sm:$0xf] %v613_v7  ;;  %v615_v8 = vld [vmem:[%s9127_s5 + $0xc80] sm:$0xf] }
  0x99   : > { %v617_v9 = vld [vmem:[%s9127_s5 + $0xc90] sm:$0xf]  ;;  %v619_v10 = vld [vmem:[%s9127_s5 + $0xca0] sm:$0xf]  ;;  %616 = vst [vmem:[%s9131_s6 + $0x320] sm:$0xf] %v615_v8 }
  0x9a   : > { %618 = vst [vmem:[%s9131_s6 + $0x324] sm:$0xf] %v617_v9  ;;  %620 = vst [vmem:[%s9131_s6 + $0x328] sm:$0xf] %v619_v10  ;;  %v621_v11 = vld [vmem:[%s9127_s5 + $0xcb0] sm:$0xf] }
  0x9b   : > { %v623_v12 = vld [vmem:[%s9127_s5 + $0xcc0] sm:$0xf]  ;;  %v625_v13 = vld [vmem:[%s9127_s5 + $0xcd0] sm:$0xf]  ;;  %622 = vst [vmem:[%s9131_s6 + $0x32c] sm:$0xf] %v621_v11 }
  0x9c   : > { %624 = vst [vmem:[%s9131_s6 + $0x330] sm:$0xf] %v623_v12  ;;  %626 = vst [vmem:[%s9131_s6 + $0x334] sm:$0xf] %v625_v13  ;;  %v627_v14 = vld [vmem:[%s9127_s5 + $0xce0] sm:$0xf] }
  0x9d   : > { %v629_v15 = vld [vmem:[%s9127_s5 + $0xcf0] sm:$0xf]  ;;  %v631_v16 = vld [vmem:[%s9127_s5 + $0xd00] sm:$0xf]  ;;  %628 = vst [vmem:[%s9131_s6 + $0x338] sm:$0xf] %v627_v14 }
  0x9e   : > { %630 = vst [vmem:[%s9131_s6 + $0x33c] sm:$0xf] %v629_v15  ;;  %632 = vst [vmem:[%s9131_s6 + $0x340] sm:$0xf] %v631_v16  ;;  %v633_v17 = vld [vmem:[%s9127_s5 + $0xd10] sm:$0xf] }
  0x9f   : > { %v635_v18 = vld [vmem:[%s9127_s5 + $0xd20] sm:$0xf]  ;;  %v637_v19 = vld [vmem:[%s9127_s5 + $0xd30] sm:$0xf]  ;;  %634 = vst [vmem:[%s9131_s6 + $0x344] sm:$0xf] %v633_v17 }
  0xa0   : > { %636 = vst [vmem:[%s9131_s6 + $0x348] sm:$0xf] %v635_v18  ;;  %638 = vst [vmem:[%s9131_s6 + $0x34c] sm:$0xf] %v637_v19  ;;  %v639_v20 = vld [vmem:[%s9127_s5 + $0xd40] sm:$0xf] }
  0xa1   : > { %v641_v21 = vld [vmem:[%s9127_s5 + $0xd50] sm:$0xf]  ;;  %v643_v22 = vld [vmem:[%s9127_s5 + $0xd60] sm:$0xf]  ;;  %640 = vst [vmem:[%s9131_s6 + $0x350] sm:$0xf] %v639_v20 }
  0xa2   : > { %642 = vst [vmem:[%s9131_s6 + $0x354] sm:$0xf] %v641_v21  ;;  %644 = vst [vmem:[%s9131_s6 + $0x358] sm:$0xf] %v643_v22  ;;  %v645_v23 = vld [vmem:[%s9127_s5 + $0xd70] sm:$0xf] }
  0xa3   : > { %v647_v24 = vld [vmem:[%s9127_s5 + $0xd80] sm:$0xf]  ;;  %v649_v25 = vld [vmem:[%s9127_s5 + $0xd90] sm:$0xf]  ;;  %646 = vst [vmem:[%s9131_s6 + $0x35c] sm:$0xf] %v645_v23 }
  0xa4   : > { %648 = vst [vmem:[%s9131_s6 + $0x360] sm:$0xf] %v647_v24  ;;  %650 = vst [vmem:[%s9131_s6 + $0x364] sm:$0xf] %v649_v25  ;;  %v651_v26 = vld [vmem:[%s9127_s5 + $0xda0] sm:$0xf] }
  0xa5   : > { %v653_v27 = vld [vmem:[%s9127_s5 + $0xdb0] sm:$0xf]  ;;  %v655_v28 = vld [vmem:[%s9127_s5 + $0xdc0] sm:$0xf]  ;;  %652 = vst [vmem:[%s9131_s6 + $0x368] sm:$0xf] %v651_v26 }
  0xa6   : > { %654 = vst [vmem:[%s9131_s6 + $0x36c] sm:$0xf] %v653_v27  ;;  %656 = vst [vmem:[%s9131_s6 + $0x370] sm:$0xf] %v655_v28  ;;  %v657_v29 = vld [vmem:[%s9127_s5 + $0xdd0] sm:$0xf] }
  0xa7   : > { %v659_v30 = vld [vmem:[%s9127_s5 + $0xde0] sm:$0xf]  ;;  %v661_v31 = vld [vmem:[%s9127_s5 + $0xdf0] sm:$0xf]  ;;  %658 = vst [vmem:[%s9131_s6 + $0x374] sm:$0xf] %v657_v29 }
  0xa8   : > { %660 = vst [vmem:[%s9131_s6 + $0x378] sm:$0xf] %v659_v30  ;;  %662 = vst [vmem:[%s9131_s6 + $0x37c] sm:$0xf] %v661_v31  ;;  %v663_v32 = vld [vmem:[%s9127_s5 + $0xe00] sm:$0xf] }
  0xa9   : > { %v665_v33 = vld [vmem:[%s9127_s5 + $0xe10] sm:$0xf]  ;;  %v667_v34 = vld [vmem:[%s9127_s5 + $0xe20] sm:$0xf]  ;;  %664 = vst [vmem:[%s9131_s6 + $0x380] sm:$0xf] %v663_v32 }
  0xaa   : > { %666 = vst [vmem:[%s9131_s6 + $0x384] sm:$0xf] %v665_v33  ;;  %668 = vst [vmem:[%s9131_s6 + $0x388] sm:$0xf] %v667_v34  ;;  %v669_v35 = vld [vmem:[%s9127_s5 + $0xe30] sm:$0xf] }
  0xab   : > { %v671_v36 = vld [vmem:[%s9127_s5 + $0xe40] sm:$0xf]  ;;  %v673_v37 = vld [vmem:[%s9127_s5 + $0xe50] sm:$0xf]  ;;  %670 = vst [vmem:[%s9131_s6 + $0x38c] sm:$0xf] %v669_v35 }
  0xac   : > { %672 = vst [vmem:[%s9131_s6 + $0x390] sm:$0xf] %v671_v36  ;;  %674 = vst [vmem:[%s9131_s6 + $0x394] sm:$0xf] %v673_v37  ;;  %v675_v38 = vld [vmem:[%s9127_s5 + $0xe60] sm:$0xf] }
  0xad   : > { %v677_v39 = vld [vmem:[%s9127_s5 + $0xe70] sm:$0xf]  ;;  %v679_v40 = vld [vmem:[%s9127_s5 + $0xe80] sm:$0xf]  ;;  %676 = vst [vmem:[%s9131_s6 + $0x398] sm:$0xf] %v675_v38 }
  0xae   : > { %678 = vst [vmem:[%s9131_s6 + $0x39c] sm:$0xf] %v677_v39  ;;  %680 = vst [vmem:[%s9131_s6 + $0x3a0] sm:$0xf] %v679_v40  ;;  %v681_v41 = vld [vmem:[%s9127_s5 + $0xe90] sm:$0xf] }
  0xaf   : > { %v683_v42 = vld [vmem:[%s9127_s5 + $0xea0] sm:$0xf]  ;;  %v685_v43 = vld [vmem:[%s9127_s5 + $0xeb0] sm:$0xf]  ;;  %682 = vst [vmem:[%s9131_s6 + $0x3a4] sm:$0xf] %v681_v41 }
  0xb0   : > { %684 = vst [vmem:[%s9131_s6 + $0x3a8] sm:$0xf] %v683_v42  ;;  %686 = vst [vmem:[%s9131_s6 + $0x3ac] sm:$0xf] %v685_v43  ;;  %v687_v44 = vld [vmem:[%s9127_s5 + $0xec0] sm:$0xf] }
  0xb1   : > { %v689_v45 = vld [vmem:[%s9127_s5 + $0xed0] sm:$0xf]  ;;  %v691_v46 = vld [vmem:[%s9127_s5 + $0xee0] sm:$0xf]  ;;  %688 = vst [vmem:[%s9131_s6 + $0x3b0] sm:$0xf] %v687_v44 }
  0xb2   : > { %690 = vst [vmem:[%s9131_s6 + $0x3b4] sm:$0xf] %v689_v45  ;;  %692 = vst [vmem:[%s9131_s6 + $0x3b8] sm:$0xf] %v691_v46  ;;  %v693_v47 = vld [vmem:[%s9127_s5 + $0xef0] sm:$0xf] }
  0xb3   : > { %v695_v48 = vld [vmem:[%s9127_s5 + $0xf00] sm:$0xf]  ;;  %v697_v49 = vld [vmem:[%s9127_s5 + $0xf10] sm:$0xf]  ;;  %694 = vst [vmem:[%s9131_s6 + $0x3bc] sm:$0xf] %v693_v47 }
  0xb4   : > { %696 = vst [vmem:[%s9131_s6 + $0x3c0] sm:$0xf] %v695_v48  ;;  %698 = vst [vmem:[%s9131_s6 + $0x3c4] sm:$0xf] %v697_v49  ;;  %v699_v50 = vld [vmem:[%s9127_s5 + $0xf20] sm:$0xf] }
  0xb5   : > { %v701_v51 = vld [vmem:[%s9127_s5 + $0xf30] sm:$0xf]  ;;  %v703_v52 = vld [vmem:[%s9127_s5 + $0xf40] sm:$0xf]  ;;  %700 = vst [vmem:[%s9131_s6 + $0x3c8] sm:$0xf] %v699_v50 }
  0xb6   : > { %702 = vst [vmem:[%s9131_s6 + $0x3cc] sm:$0xf] %v701_v51  ;;  %704 = vst [vmem:[%s9131_s6 + $0x3d0] sm:$0xf] %v703_v52  ;;  %v705_v53 = vld [vmem:[%s9127_s5 + $0xf50] sm:$0xf] }
  0xb7   : > { %v707_v54 = vld [vmem:[%s9127_s5 + $0xf60] sm:$0xf]  ;;  %v709_v55 = vld [vmem:[%s9127_s5 + $0xf70] sm:$0xf]  ;;  %706 = vst [vmem:[%s9131_s6 + $0x3d4] sm:$0xf] %v705_v53 }
  0xb8   : > { %708 = vst [vmem:[%s9131_s6 + $0x3d8] sm:$0xf] %v707_v54  ;;  %710 = vst [vmem:[%s9131_s6 + $0x3dc] sm:$0xf] %v709_v55  ;;  %v711_v56 = vld [vmem:[%s9127_s5 + $0xf80] sm:$0xf] }
  0xb9   : > { %v713_v57 = vld [vmem:[%s9127_s5 + $0xf90] sm:$0xf]  ;;  %v715_v58 = vld [vmem:[%s9127_s5 + $0xfa0] sm:$0xf]  ;;  %712 = vst [vmem:[%s9131_s6 + $0x3e0] sm:$0xf] %v711_v56 }
  0xba   : > { %714 = vst [vmem:[%s9131_s6 + $0x3e4] sm:$0xf] %v713_v57  ;;  %716 = vst [vmem:[%s9131_s6 + $0x3e8] sm:$0xf] %v715_v58  ;;  %v717_v59 = vld [vmem:[%s9127_s5 + $0xfb0] sm:$0xf] }
  0xbb   : > { %v719_v60 = vld [vmem:[%s9127_s5 + $0xfc0] sm:$0xf]  ;;  %v721_v61 = vld [vmem:[%s9127_s5 + $0xfd0] sm:$0xf]  ;;  %718 = vst [vmem:[%s9131_s6 + $0x3ec] sm:$0xf] %v717_v59 }
  0xbc   : > { %720 = vst [vmem:[%s9131_s6 + $0x3f0] sm:$0xf] %v719_v60  ;;  %722 = vst [vmem:[%s9131_s6 + $0x3f4] sm:$0xf] %v721_v61  ;;  %v723_v62 = vld [vmem:[%s9127_s5 + $0xfe0] sm:$0xf] }
  0xbd   : > { %v725_v63 = vld [vmem:[%s9127_s5 + $0xff0] sm:$0xf]  ;;  %v727_v0 = vld [vmem:[%s9127_s5 + $0x1000] sm:$0xf]  ;;  %724 = vst [vmem:[%s9131_s6 + $0x3f8] sm:$0xf] %v723_v62 }
  0xbe   : > { %726 = vst [vmem:[%s9131_s6 + $0x3fc] sm:$0xf] %v725_v63  ;;  %728 = vst [vmem:[%s9131_s6 + $0x400] sm:$0xf] %v727_v0  ;;  %v729_v1 = vld [vmem:[%s9127_s5 + $0x1010] sm:$0xf] }
  0xbf   : > { %v731_v2 = vld [vmem:[%s9127_s5 + $0x1020] sm:$0xf]  ;;  %v733_v3 = vld [vmem:[%s9127_s5 + $0x1030] sm:$0xf]  ;;  %730 = vst [vmem:[%s9131_s6 + $0x404] sm:$0xf] %v729_v1 }
  0xc0   : > { %732 = vst [vmem:[%s9131_s6 + $0x408] sm:$0xf] %v731_v2  ;;  %734 = vst [vmem:[%s9131_s6 + $0x40c] sm:$0xf] %v733_v3  ;;  %v735_v4 = vld [vmem:[%s9127_s5 + $0x1040] sm:$0xf] }
  0xc1   : > { %v737_v5 = vld [vmem:[%s9127_s5 + $0x1050] sm:$0xf]  ;;  %v739_v6 = vld [vmem:[%s9127_s5 + $0x1060] sm:$0xf]  ;;  %736 = vst [vmem:[%s9131_s6 + $0x410] sm:$0xf] %v735_v4 }
  0xc2   : > { %738 = vst [vmem:[%s9131_s6 + $0x414] sm:$0xf] %v737_v5  ;;  %740 = vst [vmem:[%s9131_s6 + $0x418] sm:$0xf] %v739_v6  ;;  %v741_v7 = vld [vmem:[%s9127_s5 + $0x1070] sm:$0xf] }
  0xc3   : > { %v743_v8 = vld [vmem:[%s9127_s5 + $0x1080] sm:$0xf]  ;;  %v745_v9 = vld [vmem:[%s9127_s5 + $0x1090] sm:$0xf]  ;;  %742 = vst [vmem:[%s9131_s6 + $0x41c] sm:$0xf] %v741_v7 }
  0xc4   : > { %744 = vst [vmem:[%s9131_s6 + $0x420] sm:$0xf] %v743_v8  ;;  %746 = vst [vmem:[%s9131_s6 + $0x424] sm:$0xf] %v745_v9  ;;  %v747_v10 = vld [vmem:[%s9127_s5 + $0x10a0] sm:$0xf] }
  0xc5   : > { %v749_v11 = vld [vmem:[%s9127_s5 + $0x10b0] sm:$0xf]  ;;  %v751_v12 = vld [vmem:[%s9127_s5 + $0x10c0] sm:$0xf]  ;;  %748 = vst [vmem:[%s9131_s6 + $0x428] sm:$0xf] %v747_v10 }
  0xc6   : > { %750 = vst [vmem:[%s9131_s6 + $0x42c] sm:$0xf] %v749_v11  ;;  %752 = vst [vmem:[%s9131_s6 + $0x430] sm:$0xf] %v751_v12  ;;  %v753_v13 = vld [vmem:[%s9127_s5 + $0x10d0] sm:$0xf] }
  0xc7   : > { %v755_v14 = vld [vmem:[%s9127_s5 + $0x10e0] sm:$0xf]  ;;  %v757_v15 = vld [vmem:[%s9127_s5 + $0x10f0] sm:$0xf]  ;;  %754 = vst [vmem:[%s9131_s6 + $0x434] sm:$0xf] %v753_v13 }
  0xc8   : > { %756 = vst [vmem:[%s9131_s6 + $0x438] sm:$0xf] %v755_v14  ;;  %758 = vst [vmem:[%s9131_s6 + $0x43c] sm:$0xf] %v757_v15  ;;  %v759_v16 = vld [vmem:[%s9127_s5 + $0x1100] sm:$0xf] }
  0xc9   : > { %v761_v17 = vld [vmem:[%s9127_s5 + $0x1110] sm:$0xf]  ;;  %v763_v18 = vld [vmem:[%s9127_s5 + $0x1120] sm:$0xf]  ;;  %760 = vst [vmem:[%s9131_s6 + $0x440] sm:$0xf] %v759_v16 }
  0xca   : > { %762 = vst [vmem:[%s9131_s6 + $0x444] sm:$0xf] %v761_v17  ;;  %764 = vst [vmem:[%s9131_s6 + $0x448] sm:$0xf] %v763_v18  ;;  %v765_v19 = vld [vmem:[%s9127_s5 + $0x1130] sm:$0xf] }
  0xcb   : > { %v767_v20 = vld [vmem:[%s9127_s5 + $0x1140] sm:$0xf]  ;;  %v769_v21 = vld [vmem:[%s9127_s5 + $0x1150] sm:$0xf]  ;;  %766 = vst [vmem:[%s9131_s6 + $0x44c] sm:$0xf] %v765_v19 }
  0xcc   : > { %768 = vst [vmem:[%s9131_s6 + $0x450] sm:$0xf] %v767_v20  ;;  %770 = vst [vmem:[%s9131_s6 + $0x454] sm:$0xf] %v769_v21  ;;  %v771_v22 = vld [vmem:[%s9127_s5 + $0x1160] sm:$0xf] }
  0xcd   : > { %v773_v23 = vld [vmem:[%s9127_s5 + $0x1170] sm:$0xf]  ;;  %v775_v24 = vld [vmem:[%s9127_s5 + $0x1180] sm:$0xf]  ;;  %772 = vst [vmem:[%s9131_s6 + $0x458] sm:$0xf] %v771_v22 }
  0xce   : > { %774 = vst [vmem:[%s9131_s6 + $0x45c] sm:$0xf] %v773_v23  ;;  %776 = vst [vmem:[%s9131_s6 + $0x460] sm:$0xf] %v775_v24  ;;  %v777_v25 = vld [vmem:[%s9127_s5 + $0x1190] sm:$0xf] }
  0xcf   : > { %v779_v26 = vld [vmem:[%s9127_s5 + $0x11a0] sm:$0xf]  ;;  %v781_v27 = vld [vmem:[%s9127_s5 + $0x11b0] sm:$0xf]  ;;  %778 = vst [vmem:[%s9131_s6 + $0x464] sm:$0xf] %v777_v25 }
  0xd0   : > { %780 = vst [vmem:[%s9131_s6 + $0x468] sm:$0xf] %v779_v26  ;;  %782 = vst [vmem:[%s9131_s6 + $0x46c] sm:$0xf] %v781_v27  ;;  %v783_v28 = vld [vmem:[%s9127_s5 + $0x11c0] sm:$0xf] }
  0xd1   : > { %v785_v29 = vld [vmem:[%s9127_s5 + $0x11d0] sm:$0xf]  ;;  %v787_v30 = vld [vmem:[%s9127_s5 + $0x11e0] sm:$0xf]  ;;  %784 = vst [vmem:[%s9131_s6 + $0x470] sm:$0xf] %v783_v28 }
  0xd2   : > { %786 = vst [vmem:[%s9131_s6 + $0x474] sm:$0xf] %v785_v29  ;;  %788 = vst [vmem:[%s9131_s6 + $0x478] sm:$0xf] %v787_v30  ;;  %v789_v31 = vld [vmem:[%s9127_s5 + $0x11f0] sm:$0xf] }
  0xd3   : > { %v791_v32 = vld [vmem:[%s9127_s5 + $0x1200] sm:$0xf]  ;;  %v793_v33 = vld [vmem:[%s9127_s5 + $0x1210] sm:$0xf]  ;;  %790 = vst [vmem:[%s9131_s6 + $0x47c] sm:$0xf] %v789_v31 }
  0xd4   : > { %792 = vst [vmem:[%s9131_s6 + $0x480] sm:$0xf] %v791_v32  ;;  %794 = vst [vmem:[%s9131_s6 + $0x484] sm:$0xf] %v793_v33  ;;  %v795_v34 = vld [vmem:[%s9127_s5 + $0x1220] sm:$0xf] }
  0xd5   : > { %v797_v35 = vld [vmem:[%s9127_s5 + $0x1230] sm:$0xf]  ;;  %v799_v36 = vld [vmem:[%s9127_s5 + $0x1240] sm:$0xf]  ;;  %796 = vst [vmem:[%s9131_s6 + $0x488] sm:$0xf] %v795_v34 }
  0xd6   : > { %798 = vst [vmem:[%s9131_s6 + $0x48c] sm:$0xf] %v797_v35  ;;  %800 = vst [vmem:[%s9131_s6 + $0x490] sm:$0xf] %v799_v36  ;;  %v801_v37 = vld [vmem:[%s9127_s5 + $0x1250] sm:$0xf] }
  0xd7   : > { %v803_v38 = vld [vmem:[%s9127_s5 + $0x1260] sm:$0xf]  ;;  %v805_v39 = vld [vmem:[%s9127_s5 + $0x1270] sm:$0xf]  ;;  %802 = vst [vmem:[%s9131_s6 + $0x494] sm:$0xf] %v801_v37 }
  0xd8   : > { %804 = vst [vmem:[%s9131_s6 + $0x498] sm:$0xf] %v803_v38  ;;  %806 = vst [vmem:[%s9131_s6 + $0x49c] sm:$0xf] %v805_v39  ;;  %v807_v40 = vld [vmem:[%s9127_s5 + $0x1280] sm:$0xf] }
  0xd9   : > { %v809_v41 = vld [vmem:[%s9127_s5 + $0x1290] sm:$0xf]  ;;  %v811_v42 = vld [vmem:[%s9127_s5 + $0x12a0] sm:$0xf]  ;;  %808 = vst [vmem:[%s9131_s6 + $0x4a0] sm:$0xf] %v807_v40 }
  0xda   : > { %810 = vst [vmem:[%s9131_s6 + $0x4a4] sm:$0xf] %v809_v41  ;;  %812 = vst [vmem:[%s9131_s6 + $0x4a8] sm:$0xf] %v811_v42  ;;  %v813_v43 = vld [vmem:[%s9127_s5 + $0x12b0] sm:$0xf] }
  0xdb   : > { %v815_v44 = vld [vmem:[%s9127_s5 + $0x12c0] sm:$0xf]  ;;  %v817_v45 = vld [vmem:[%s9127_s5 + $0x12d0] sm:$0xf]  ;;  %814 = vst [vmem:[%s9131_s6 + $0x4ac] sm:$0xf] %v813_v43 }
  0xdc   : > { %816 = vst [vmem:[%s9131_s6 + $0x4b0] sm:$0xf] %v815_v44  ;;  %818 = vst [vmem:[%s9131_s6 + $0x4b4] sm:$0xf] %v817_v45  ;;  %v819_v46 = vld [vmem:[%s9127_s5 + $0x12e0] sm:$0xf] }
  0xdd   : > { %v821_v47 = vld [vmem:[%s9127_s5 + $0x12f0] sm:$0xf]  ;;  %v823_v48 = vld [vmem:[%s9127_s5 + $0x1300] sm:$0xf]  ;;  %820 = vst [vmem:[%s9131_s6 + $0x4b8] sm:$0xf] %v819_v46 }
  0xde   : > { %822 = vst [vmem:[%s9131_s6 + $0x4bc] sm:$0xf] %v821_v47  ;;  %824 = vst [vmem:[%s9131_s6 + $0x4c0] sm:$0xf] %v823_v48  ;;  %v825_v49 = vld [vmem:[%s9127_s5 + $0x1310] sm:$0xf] }
  0xdf   : > { %v827_v50 = vld [vmem:[%s9127_s5 + $0x1320] sm:$0xf]  ;;  %v829_v51 = vld [vmem:[%s9127_s5 + $0x1330] sm:$0xf]  ;;  %826 = vst [vmem:[%s9131_s6 + $0x4c4] sm:$0xf] %v825_v49 }
  0xe0   : > { %828 = vst [vmem:[%s9131_s6 + $0x4c8] sm:$0xf] %v827_v50  ;;  %830 = vst [vmem:[%s9131_s6 + $0x4cc] sm:$0xf] %v829_v51  ;;  %v831_v52 = vld [vmem:[%s9127_s5 + $0x1340] sm:$0xf] }
  0xe1   : > { %v833_v53 = vld [vmem:[%s9127_s5 + $0x1350] sm:$0xf]  ;;  %v835_v54 = vld [vmem:[%s9127_s5 + $0x1360] sm:$0xf]  ;;  %832 = vst [vmem:[%s9131_s6 + $0x4d0] sm:$0xf] %v831_v52 }
  0xe2   : > { %834 = vst [vmem:[%s9131_s6 + $0x4d4] sm:$0xf] %v833_v53  ;;  %836 = vst [vmem:[%s9131_s6 + $0x4d8] sm:$0xf] %v835_v54  ;;  %v837_v55 = vld [vmem:[%s9127_s5 + $0x1370] sm:$0xf] }
  0xe3   : > { %v839_v56 = vld [vmem:[%s9127_s5 + $0x1380] sm:$0xf]  ;;  %v841_v57 = vld [vmem:[%s9127_s5 + $0x1390] sm:$0xf]  ;;  %838 = vst [vmem:[%s9131_s6 + $0x4dc] sm:$0xf] %v837_v55 }
  0xe4   : > { %840 = vst [vmem:[%s9131_s6 + $0x4e0] sm:$0xf] %v839_v56  ;;  %842 = vst [vmem:[%s9131_s6 + $0x4e4] sm:$0xf] %v841_v57  ;;  %v843_v58 = vld [vmem:[%s9127_s5 + $0x13a0] sm:$0xf] }
  0xe5   : > { %v845_v59 = vld [vmem:[%s9127_s5 + $0x13b0] sm:$0xf]  ;;  %v847_v60 = vld [vmem:[%s9127_s5 + $0x13c0] sm:$0xf]  ;;  %844 = vst [vmem:[%s9131_s6 + $0x4e8] sm:$0xf] %v843_v58 }
  0xe6   : > { %846 = vst [vmem:[%s9131_s6 + $0x4ec] sm:$0xf] %v845_v59  ;;  %848 = vst [vmem:[%s9131_s6 + $0x4f0] sm:$0xf] %v847_v60  ;;  %v849_v61 = vld [vmem:[%s9127_s5 + $0x13d0] sm:$0xf] }
  0xe7   : > { %v851_v62 = vld [vmem:[%s9127_s5 + $0x13e0] sm:$0xf]  ;;  %v853_v63 = vld [vmem:[%s9127_s5 + $0x13f0] sm:$0xf]  ;;  %850 = vst [vmem:[%s9131_s6 + $0x4f4] sm:$0xf] %v849_v61 }
  0xe8   : > { %852 = vst [vmem:[%s9131_s6 + $0x4f8] sm:$0xf] %v851_v62  ;;  %854 = vst [vmem:[%s9131_s6 + $0x4fc] sm:$0xf] %v853_v63  ;;  %v855_v0 = vld [vmem:[%s9127_s5 + $0x1400] sm:$0xf] }
  0xe9   : > { %v857_v1 = vld [vmem:[%s9127_s5 + $0x1410] sm:$0xf]  ;;  %v859_v2 = vld [vmem:[%s9127_s5 + $0x1420] sm:$0xf]  ;;  %856 = vst [vmem:[%s9131_s6 + $0x500] sm:$0xf] %v855_v0 }
  0xea   : > { %858 = vst [vmem:[%s9131_s6 + $0x504] sm:$0xf] %v857_v1  ;;  %860 = vst [vmem:[%s9131_s6 + $0x508] sm:$0xf] %v859_v2  ;;  %v861_v3 = vld [vmem:[%s9127_s5 + $0x1430] sm:$0xf] }
  0xeb   : > { %v863_v4 = vld [vmem:[%s9127_s5 + $0x1440] sm:$0xf]  ;;  %v865_v5 = vld [vmem:[%s9127_s5 + $0x1450] sm:$0xf]  ;;  %862 = vst [vmem:[%s9131_s6 + $0x50c] sm:$0xf] %v861_v3 }
  0xec   : > { %864 = vst [vmem:[%s9131_s6 + $0x510] sm:$0xf] %v863_v4  ;;  %866 = vst [vmem:[%s9131_s6 + $0x514] sm:$0xf] %v865_v5  ;;  %v867_v6 = vld [vmem:[%s9127_s5 + $0x1460] sm:$0xf] }
  0xed   : > { %v869_v7 = vld [vmem:[%s9127_s5 + $0x1470] sm:$0xf]  ;;  %v871_v8 = vld [vmem:[%s9127_s5 + $0x1480] sm:$0xf]  ;;  %868 = vst [vmem:[%s9131_s6 + $0x518] sm:$0xf] %v867_v6 }
  0xee   : > { %870 = vst [vmem:[%s9131_s6 + $0x51c] sm:$0xf] %v869_v7  ;;  %872 = vst [vmem:[%s9131_s6 + $0x520] sm:$0xf] %v871_v8  ;;  %v873_v9 = vld [vmem:[%s9127_s5 + $0x1490] sm:$0xf] }
  0xef   : > { %v875_v10 = vld [vmem:[%s9127_s5 + $0x14a0] sm:$0xf]  ;;  %v877_v11 = vld [vmem:[%s9127_s5 + $0x14b0] sm:$0xf]  ;;  %874 = vst [vmem:[%s9131_s6 + $0x524] sm:$0xf] %v873_v9 }
  0xf0   : > { %876 = vst [vmem:[%s9131_s6 + $0x528] sm:$0xf] %v875_v10  ;;  %878 = vst [vmem:[%s9131_s6 + $0x52c] sm:$0xf] %v877_v11  ;;  %v879_v12 = vld [vmem:[%s9127_s5 + $0x14c0] sm:$0xf] }
  0xf1   : > { %v881_v13 = vld [vmem:[%s9127_s5 + $0x14d0] sm:$0xf]  ;;  %v883_v14 = vld [vmem:[%s9127_s5 + $0x14e0] sm:$0xf]  ;;  %880 = vst [vmem:[%s9131_s6 + $0x530] sm:$0xf] %v879_v12 }
  0xf2   : > { %882 = vst [vmem:[%s9131_s6 + $0x534] sm:$0xf] %v881_v13  ;;  %884 = vst [vmem:[%s9131_s6 + $0x538] sm:$0xf] %v883_v14  ;;  %v885_v15 = vld [vmem:[%s9127_s5 + $0x14f0] sm:$0xf] }
  0xf3   : > { %v887_v16 = vld [vmem:[%s9127_s5 + $0x1500] sm:$0xf]  ;;  %v889_v17 = vld [vmem:[%s9127_s5 + $0x1510] sm:$0xf]  ;;  %886 = vst [vmem:[%s9131_s6 + $0x53c] sm:$0xf] %v885_v15 }
  0xf4   : > { %888 = vst [vmem:[%s9131_s6 + $0x540] sm:$0xf] %v887_v16  ;;  %890 = vst [vmem:[%s9131_s6 + $0x544] sm:$0xf] %v889_v17  ;;  %v891_v18 = vld [vmem:[%s9127_s5 + $0x1520] sm:$0xf] }
  0xf5   : > { %v893_v19 = vld [vmem:[%s9127_s5 + $0x1530] sm:$0xf]  ;;  %v895_v20 = vld [vmem:[%s9127_s5 + $0x1540] sm:$0xf]  ;;  %892 = vst [vmem:[%s9131_s6 + $0x548] sm:$0xf] %v891_v18 }
  0xf6   : > { %894 = vst [vmem:[%s9131_s6 + $0x54c] sm:$0xf] %v893_v19  ;;  %896 = vst [vmem:[%s9131_s6 + $0x550] sm:$0xf] %v895_v20  ;;  %v897_v21 = vld [vmem:[%s9127_s5 + $0x1550] sm:$0xf] }
  0xf7   : > { %v899_v22 = vld [vmem:[%s9127_s5 + $0x1560] sm:$0xf]  ;;  %v901_v23 = vld [vmem:[%s9127_s5 + $0x1570] sm:$0xf]  ;;  %898 = vst [vmem:[%s9131_s6 + $0x554] sm:$0xf] %v897_v21 }
  0xf8   : > { %900 = vst [vmem:[%s9131_s6 + $0x558] sm:$0xf] %v899_v22  ;;  %902 = vst [vmem:[%s9131_s6 + $0x55c] sm:$0xf] %v901_v23  ;;  %v903_v24 = vld [vmem:[%s9127_s5 + $0x1580] sm:$0xf] }
  0xf9   : > { %v905_v25 = vld [vmem:[%s9127_s5 + $0x1590] sm:$0xf]  ;;  %v907_v26 = vld [vmem:[%s9127_s5 + $0x15a0] sm:$0xf]  ;;  %904 = vst [vmem:[%s9131_s6 + $0x560] sm:$0xf] %v903_v24 }
  0xfa   : > { %906 = vst [vmem:[%s9131_s6 + $0x564] sm:$0xf] %v905_v25  ;;  %908 = vst [vmem:[%s9131_s6 + $0x568] sm:$0xf] %v907_v26  ;;  %v909_v27 = vld [vmem:[%s9127_s5 + $0x15b0] sm:$0xf] }
  0xfb   : > { %v911_v28 = vld [vmem:[%s9127_s5 + $0x15c0] sm:$0xf]  ;;  %v913_v29 = vld [vmem:[%s9127_s5 + $0x15d0] sm:$0xf]  ;;  %910 = vst [vmem:[%s9131_s6 + $0x56c] sm:$0xf] %v909_v27 }
  0xfc   : > { %912 = vst [vmem:[%s9131_s6 + $0x570] sm:$0xf] %v911_v28  ;;  %914 = vst [vmem:[%s9131_s6 + $0x574] sm:$0xf] %v913_v29  ;;  %v915_v30 = vld [vmem:[%s9127_s5 + $0x15e0] sm:$0xf] }
  0xfd   : > { %v917_v31 = vld [vmem:[%s9127_s5 + $0x15f0] sm:$0xf]  ;;  %v919_v32 = vld [vmem:[%s9127_s5 + $0x1600] sm:$0xf]  ;;  %916 = vst [vmem:[%s9131_s6 + $0x578] sm:$0xf] %v915_v30 }
  0xfe   : > { %918 = vst [vmem:[%s9131_s6 + $0x57c] sm:$0xf] %v917_v31  ;;  %920 = vst [vmem:[%s9131_s6 + $0x580] sm:$0xf] %v919_v32  ;;  %v921_v33 = vld [vmem:[%s9127_s5 + $0x1610] sm:$0xf] }
  0xff   : > { %v923_v34 = vld [vmem:[%s9127_s5 + $0x1620] sm:$0xf]  ;;  %v925_v35 = vld [vmem:[%s9127_s5 + $0x1630] sm:$0xf]  ;;  %922 = vst [vmem:[%s9131_s6 + $0x584] sm:$0xf] %v921_v33 }
 0x100   : > { %924 = vst [vmem:[%s9131_s6 + $0x588] sm:$0xf] %v923_v34  ;;  %926 = vst [vmem:[%s9131_s6 + $0x58c] sm:$0xf] %v925_v35  ;;  %v927_v36 = vld [vmem:[%s9127_s5 + $0x1640] sm:$0xf] }
 0x101   : > { %v929_v37 = vld [vmem:[%s9127_s5 + $0x1650] sm:$0xf]  ;;  %v931_v38 = vld [vmem:[%s9127_s5 + $0x1660] sm:$0xf]  ;;  %928 = vst [vmem:[%s9131_s6 + $0x590] sm:$0xf] %v927_v36 }
 0x102   : > { %930 = vst [vmem:[%s9131_s6 + $0x594] sm:$0xf] %v929_v37  ;;  %932 = vst [vmem:[%s9131_s6 + $0x598] sm:$0xf] %v931_v38  ;;  %v933_v39 = vld [vmem:[%s9127_s5 + $0x1670] sm:$0xf] }
 0x103   : > { %v935_v40 = vld [vmem:[%s9127_s5 + $0x1680] sm:$0xf]  ;;  %v937_v41 = vld [vmem:[%s9127_s5 + $0x1690] sm:$0xf]  ;;  %934 = vst [vmem:[%s9131_s6 + $0x59c] sm:$0xf] %v933_v39 }
 0x104   : > { %936 = vst [vmem:[%s9131_s6 + $0x5a0] sm:$0xf] %v935_v40  ;;  %938 = vst [vmem:[%s9131_s6 + $0x5a4] sm:$0xf] %v937_v41  ;;  %v939_v42 = vld [vmem:[%s9127_s5 + $0x16a0] sm:$0xf] }
 0x105   : > { %v941_v43 = vld [vmem:[%s9127_s5 + $0x16b0] sm:$0xf]  ;;  %v943_v44 = vld [vmem:[%s9127_s5 + $0x16c0] sm:$0xf]  ;;  %940 = vst [vmem:[%s9131_s6 + $0x5a8] sm:$0xf] %v939_v42 }
 0x106   : > { %942 = vst [vmem:[%s9131_s6 + $0x5ac] sm:$0xf] %v941_v43  ;;  %944 = vst [vmem:[%s9131_s6 + $0x5b0] sm:$0xf] %v943_v44  ;;  %v945_v45 = vld [vmem:[%s9127_s5 + $0x16d0] sm:$0xf] }
 0x107   : > { %v947_v46 = vld [vmem:[%s9127_s5 + $0x16e0] sm:$0xf]  ;;  %v949_v47 = vld [vmem:[%s9127_s5 + $0x16f0] sm:$0xf]  ;;  %946 = vst [vmem:[%s9131_s6 + $0x5b4] sm:$0xf] %v945_v45 }
 0x108   : > { %948 = vst [vmem:[%s9131_s6 + $0x5b8] sm:$0xf] %v947_v46  ;;  %950 = vst [vmem:[%s9131_s6 + $0x5bc] sm:$0xf] %v949_v47  ;;  %v951_v48 = vld [vmem:[%s9127_s5 + $0x1700] sm:$0xf] }
 0x109   : > { %v953_v49 = vld [vmem:[%s9127_s5 + $0x1710] sm:$0xf]  ;;  %v955_v50 = vld [vmem:[%s9127_s5 + $0x1720] sm:$0xf]  ;;  %952 = vst [vmem:[%s9131_s6 + $0x5c0] sm:$0xf] %v951_v48 }
 0x10a   : > { %954 = vst [vmem:[%s9131_s6 + $0x5c4] sm:$0xf] %v953_v49  ;;  %956 = vst [vmem:[%s9131_s6 + $0x5c8] sm:$0xf] %v955_v50  ;;  %v957_v51 = vld [vmem:[%s9127_s5 + $0x1730] sm:$0xf] }
 0x10b   : > { %v959_v52 = vld [vmem:[%s9127_s5 + $0x1740] sm:$0xf]  ;;  %v961_v53 = vld [vmem:[%s9127_s5 + $0x1750] sm:$0xf]  ;;  %958 = vst [vmem:[%s9131_s6 + $0x5cc] sm:$0xf] %v957_v51 }
 0x10c   : > { %960 = vst [vmem:[%s9131_s6 + $0x5d0] sm:$0xf] %v959_v52  ;;  %962 = vst [vmem:[%s9131_s6 + $0x5d4] sm:$0xf] %v961_v53  ;;  %v963_v54 = vld [vmem:[%s9127_s5 + $0x1760] sm:$0xf] }
 0x10d   : > { %v965_v55 = vld [vmem:[%s9127_s5 + $0x1770] sm:$0xf]  ;;  %v967_v56 = vld [vmem:[%s9127_s5 + $0x1780] sm:$0xf]  ;;  %964 = vst [vmem:[%s9131_s6 + $0x5d8] sm:$0xf] %v963_v54 }
 0x10e   : > { %966 = vst [vmem:[%s9131_s6 + $0x5dc] sm:$0xf] %v965_v55  ;;  %968 = vst [vmem:[%s9131_s6 + $0x5e0] sm:$0xf] %v967_v56  ;;  %v969_v57 = vld [vmem:[%s9127_s5 + $0x1790] sm:$0xf] }
 0x10f   : > { %v971_v58 = vld [vmem:[%s9127_s5 + $0x17a0] sm:$0xf]  ;;  %v973_v59 = vld [vmem:[%s9127_s5 + $0x17b0] sm:$0xf]  ;;  %970 = vst [vmem:[%s9131_s6 + $0x5e4] sm:$0xf] %v969_v57 }
 0x110   : > { %972 = vst [vmem:[%s9131_s6 + $0x5e8] sm:$0xf] %v971_v58  ;;  %974 = vst [vmem:[%s9131_s6 + $0x5ec] sm:$0xf] %v973_v59  ;;  %v975_v60 = vld [vmem:[%s9127_s5 + $0x17c0] sm:$0xf] }
 0x111   : > { %v977_v61 = vld [vmem:[%s9127_s5 + $0x17d0] sm:$0xf]  ;;  %v979_v62 = vld [vmem:[%s9127_s5 + $0x17e0] sm:$0xf]  ;;  %976 = vst [vmem:[%s9131_s6 + $0x5f0] sm:$0xf] %v975_v60 }
 0x112   : > { %978 = vst [vmem:[%s9131_s6 + $0x5f4] sm:$0xf] %v977_v61  ;;  %980 = vst [vmem:[%s9131_s6 + $0x5f8] sm:$0xf] %v979_v62  ;;  %v981_v63 = vld [vmem:[%s9127_s5 + $0x17f0] sm:$0xf] }
 0x113   : > { %v983_v0 = vld [vmem:[%s9127_s5 + $0x1800] sm:$0xf]  ;;  %v985_v1 = vld [vmem:[%s9127_s5 + $0x1810] sm:$0xf]  ;;  %982 = vst [vmem:[%s9131_s6 + $0x5fc] sm:$0xf] %v981_v63 }
 0x114   : > { %984 = vst [vmem:[%s9131_s6 + $0x600] sm:$0xf] %v983_v0  ;;  %986 = vst [vmem:[%s9131_s6 + $0x604] sm:$0xf] %v985_v1  ;;  %v987_v2 = vld [vmem:[%s9127_s5 + $0x1820] sm:$0xf] }
 0x115   : > { %v989_v3 = vld [vmem:[%s9127_s5 + $0x1830] sm:$0xf]  ;;  %v991_v4 = vld [vmem:[%s9127_s5 + $0x1840] sm:$0xf]  ;;  %988 = vst [vmem:[%s9131_s6 + $0x608] sm:$0xf] %v987_v2 }
 0x116   : > { %990 = vst [vmem:[%s9131_s6 + $0x60c] sm:$0xf] %v989_v3  ;;  %992 = vst [vmem:[%s9131_s6 + $0x610] sm:$0xf] %v991_v4  ;;  %v993_v5 = vld [vmem:[%s9127_s5 + $0x1850] sm:$0xf] }
 0x117   : > { %v995_v6 = vld [vmem:[%s9127_s5 + $0x1860] sm:$0xf]  ;;  %v997_v7 = vld [vmem:[%s9127_s5 + $0x1870] sm:$0xf]  ;;  %994 = vst [vmem:[%s9131_s6 + $0x614] sm:$0xf] %v993_v5 }
 0x118   : > { %996 = vst [vmem:[%s9131_s6 + $0x618] sm:$0xf] %v995_v6  ;;  %998 = vst [vmem:[%s9131_s6 + $0x61c] sm:$0xf] %v997_v7  ;;  %v999_v8 = vld [vmem:[%s9127_s5 + $0x1880] sm:$0xf] }
 0x119   : > { %v1001_v9 = vld [vmem:[%s9127_s5 + $0x1890] sm:$0xf]  ;;  %v1003_v10 = vld [vmem:[%s9127_s5 + $0x18a0] sm:$0xf]  ;;  %1000 = vst [vmem:[%s9131_s6 + $0x620] sm:$0xf] %v999_v8 }
 0x11a   : > { %1002 = vst [vmem:[%s9131_s6 + $0x624] sm:$0xf] %v1001_v9  ;;  %1004 = vst [vmem:[%s9131_s6 + $0x628] sm:$0xf] %v1003_v10  ;;  %v1005_v11 = vld [vmem:[%s9127_s5 + $0x18b0] sm:$0xf] }
 0x11b   : > { %v1007_v12 = vld [vmem:[%s9127_s5 + $0x18c0] sm:$0xf]  ;;  %v1009_v13 = vld [vmem:[%s9127_s5 + $0x18d0] sm:$0xf]  ;;  %1006 = vst [vmem:[%s9131_s6 + $0x62c] sm:$0xf] %v1005_v11 }
 0x11c   : > { %1008 = vst [vmem:[%s9131_s6 + $0x630] sm:$0xf] %v1007_v12  ;;  %1010 = vst [vmem:[%s9131_s6 + $0x634] sm:$0xf] %v1009_v13  ;;  %v1011_v14 = vld [vmem:[%s9127_s5 + $0x18e0] sm:$0xf] }
 0x11d   : > { %v1013_v15 = vld [vmem:[%s9127_s5 + $0x18f0] sm:$0xf]  ;;  %v1015_v16 = vld [vmem:[%s9127_s5 + $0x1900] sm:$0xf]  ;;  %1012 = vst [vmem:[%s9131_s6 + $0x638] sm:$0xf] %v1011_v14 }
 0x11e   : > { %1014 = vst [vmem:[%s9131_s6 + $0x63c] sm:$0xf] %v1013_v15  ;;  %1016 = vst [vmem:[%s9131_s6 + $0x640] sm:$0xf] %v1015_v16  ;;  %v1017_v17 = vld [vmem:[%s9127_s5 + $0x1910] sm:$0xf] }
 0x11f   : > { %v1019_v18 = vld [vmem:[%s9127_s5 + $0x1920] sm:$0xf]  ;;  %v1021_v19 = vld [vmem:[%s9127_s5 + $0x1930] sm:$0xf]  ;;  %1018 = vst [vmem:[%s9131_s6 + $0x644] sm:$0xf] %v1017_v17 }
 0x120   : > { %1020 = vst [vmem:[%s9131_s6 + $0x648] sm:$0xf] %v1019_v18  ;;  %1022 = vst [vmem:[%s9131_s6 + $0x64c] sm:$0xf] %v1021_v19  ;;  %v1023_v20 = vld [vmem:[%s9127_s5 + $0x1940] sm:$0xf] }
 0x121   : > { %v1025_v21 = vld [vmem:[%s9127_s5 + $0x1950] sm:$0xf]  ;;  %v1027_v22 = vld [vmem:[%s9127_s5 + $0x1960] sm:$0xf]  ;;  %1024 = vst [vmem:[%s9131_s6 + $0x650] sm:$0xf] %v1023_v20 }
 0x122   : > { %1026 = vst [vmem:[%s9131_s6 + $0x654] sm:$0xf] %v1025_v21  ;;  %1028 = vst [vmem:[%s9131_s6 + $0x658] sm:$0xf] %v1027_v22  ;;  %v1029_v23 = vld [vmem:[%s9127_s5 + $0x1970] sm:$0xf] }
 0x123   : > { %v1031_v24 = vld [vmem:[%s9127_s5 + $0x1980] sm:$0xf]  ;;  %v1033_v25 = vld [vmem:[%s9127_s5 + $0x1990] sm:$0xf]  ;;  %1030 = vst [vmem:[%s9131_s6 + $0x65c] sm:$0xf] %v1029_v23 }
 0x124   : > { %1032 = vst [vmem:[%s9131_s6 + $0x660] sm:$0xf] %v1031_v24  ;;  %1034 = vst [vmem:[%s9131_s6 + $0x664] sm:$0xf] %v1033_v25  ;;  %v1035_v26 = vld [vmem:[%s9127_s5 + $0x19a0] sm:$0xf] }
 0x125   : > { %v1037_v27 = vld [vmem:[%s9127_s5 + $0x19b0] sm:$0xf]  ;;  %v1039_v28 = vld [vmem:[%s9127_s5 + $0x19c0] sm:$0xf]  ;;  %1036 = vst [vmem:[%s9131_s6 + $0x668] sm:$0xf] %v1035_v26 }
 0x126   : > { %1038 = vst [vmem:[%s9131_s6 + $0x66c] sm:$0xf] %v1037_v27  ;;  %1040 = vst [vmem:[%s9131_s6 + $0x670] sm:$0xf] %v1039_v28  ;;  %v1041_v29 = vld [vmem:[%s9127_s5 + $0x19d0] sm:$0xf] }
 0x127   : > { %v1043_v30 = vld [vmem:[%s9127_s5 + $0x19e0] sm:$0xf]  ;;  %v1045_v31 = vld [vmem:[%s9127_s5 + $0x19f0] sm:$0xf]  ;;  %1042 = vst [vmem:[%s9131_s6 + $0x674] sm:$0xf] %v1041_v29 }
 0x128   : > { %1044 = vst [vmem:[%s9131_s6 + $0x678] sm:$0xf] %v1043_v30  ;;  %1046 = vst [vmem:[%s9131_s6 + $0x67c] sm:$0xf] %v1045_v31  ;;  %v1047_v32 = vld [vmem:[%s9127_s5 + $0x1a00] sm:$0xf] }
 0x129   : > { %v1049_v33 = vld [vmem:[%s9127_s5 + $0x1a10] sm:$0xf]  ;;  %v1051_v34 = vld [vmem:[%s9127_s5 + $0x1a20] sm:$0xf]  ;;  %1048 = vst [vmem:[%s9131_s6 + $0x680] sm:$0xf] %v1047_v32 }
 0x12a   : > { %1050 = vst [vmem:[%s9131_s6 + $0x684] sm:$0xf] %v1049_v33  ;;  %1052 = vst [vmem:[%s9131_s6 + $0x688] sm:$0xf] %v1051_v34  ;;  %v1053_v35 = vld [vmem:[%s9127_s5 + $0x1a30] sm:$0xf] }
 0x12b   : > { %v1055_v36 = vld [vmem:[%s9127_s5 + $0x1a40] sm:$0xf]  ;;  %v1057_v37 = vld [vmem:[%s9127_s5 + $0x1a50] sm:$0xf]  ;;  %1054 = vst [vmem:[%s9131_s6 + $0x68c] sm:$0xf] %v1053_v35 }
 0x12c   : > { %1056 = vst [vmem:[%s9131_s6 + $0x690] sm:$0xf] %v1055_v36  ;;  %1058 = vst [vmem:[%s9131_s6 + $0x694] sm:$0xf] %v1057_v37  ;;  %v1059_v38 = vld [vmem:[%s9127_s5 + $0x1a60] sm:$0xf] }
 0x12d   : > { %v1061_v39 = vld [vmem:[%s9127_s5 + $0x1a70] sm:$0xf]  ;;  %v1063_v40 = vld [vmem:[%s9127_s5 + $0x1a80] sm:$0xf]  ;;  %1060 = vst [vmem:[%s9131_s6 + $0x698] sm:$0xf] %v1059_v38 }
 0x12e   : > { %1062 = vst [vmem:[%s9131_s6 + $0x69c] sm:$0xf] %v1061_v39  ;;  %1064 = vst [vmem:[%s9131_s6 + $0x6a0] sm:$0xf] %v1063_v40  ;;  %v1065_v41 = vld [vmem:[%s9127_s5 + $0x1a90] sm:$0xf] }
 0x12f   : > { %v1067_v42 = vld [vmem:[%s9127_s5 + $0x1aa0] sm:$0xf]  ;;  %v1069_v43 = vld [vmem:[%s9127_s5 + $0x1ab0] sm:$0xf]  ;;  %1066 = vst [vmem:[%s9131_s6 + $0x6a4] sm:$0xf] %v1065_v41 }
 0x130   : > { %1068 = vst [vmem:[%s9131_s6 + $0x6a8] sm:$0xf] %v1067_v42  ;;  %1070 = vst [vmem:[%s9131_s6 + $0x6ac] sm:$0xf] %v1069_v43  ;;  %v1071_v44 = vld [vmem:[%s9127_s5 + $0x1ac0] sm:$0xf] }
 0x131   : > { %v1073_v45 = vld [vmem:[%s9127_s5 + $0x1ad0] sm:$0xf]  ;;  %v1075_v46 = vld [vmem:[%s9127_s5 + $0x1ae0] sm:$0xf]  ;;  %1072 = vst [vmem:[%s9131_s6 + $0x6b0] sm:$0xf] %v1071_v44 }
 0x132   : > { %1074 = vst [vmem:[%s9131_s6 + $0x6b4] sm:$0xf] %v1073_v45  ;;  %1076 = vst [vmem:[%s9131_s6 + $0x6b8] sm:$0xf] %v1075_v46  ;;  %v1077_v47 = vld [vmem:[%s9127_s5 + $0x1af0] sm:$0xf] }
 0x133   : > { %v1079_v48 = vld [vmem:[%s9127_s5 + $0x1b00] sm:$0xf]  ;;  %v1081_v49 = vld [vmem:[%s9127_s5 + $0x1b10] sm:$0xf]  ;;  %1078 = vst [vmem:[%s9131_s6 + $0x6bc] sm:$0xf] %v1077_v47 }
 0x134   : > { %1080 = vst [vmem:[%s9131_s6 + $0x6c0] sm:$0xf] %v1079_v48  ;;  %1082 = vst [vmem:[%s9131_s6 + $0x6c4] sm:$0xf] %v1081_v49  ;;  %v1083_v50 = vld [vmem:[%s9127_s5 + $0x1b20] sm:$0xf] }
 0x135   : > { %v1085_v51 = vld [vmem:[%s9127_s5 + $0x1b30] sm:$0xf]  ;;  %v1087_v52 = vld [vmem:[%s9127_s5 + $0x1b40] sm:$0xf]  ;;  %1084 = vst [vmem:[%s9131_s6 + $0x6c8] sm:$0xf] %v1083_v50 }
 0x136   : > { %1086 = vst [vmem:[%s9131_s6 + $0x6cc] sm:$0xf] %v1085_v51  ;;  %1088 = vst [vmem:[%s9131_s6 + $0x6d0] sm:$0xf] %v1087_v52  ;;  %v1089_v53 = vld [vmem:[%s9127_s5 + $0x1b50] sm:$0xf] }
 0x137   : > { %v1091_v54 = vld [vmem:[%s9127_s5 + $0x1b60] sm:$0xf]  ;;  %v1093_v55 = vld [vmem:[%s9127_s5 + $0x1b70] sm:$0xf]  ;;  %1090 = vst [vmem:[%s9131_s6 + $0x6d4] sm:$0xf] %v1089_v53 }
 0x138   : > { %1092 = vst [vmem:[%s9131_s6 + $0x6d8] sm:$0xf] %v1091_v54  ;;  %1094 = vst [vmem:[%s9131_s6 + $0x6dc] sm:$0xf] %v1093_v55  ;;  %v1095_v56 = vld [vmem:[%s9127_s5 + $0x1b80] sm:$0xf] }
 0x139   : > { %v1097_v57 = vld [vmem:[%s9127_s5 + $0x1b90] sm:$0xf]  ;;  %v1099_v58 = vld [vmem:[%s9127_s5 + $0x1ba0] sm:$0xf]  ;;  %1096 = vst [vmem:[%s9131_s6 + $0x6e0] sm:$0xf] %v1095_v56 }
 0x13a   : > { %1098 = vst [vmem:[%s9131_s6 + $0x6e4] sm:$0xf] %v1097_v57  ;;  %1100 = vst [vmem:[%s9131_s6 + $0x6e8] sm:$0xf] %v1099_v58  ;;  %v1101_v59 = vld [vmem:[%s9127_s5 + $0x1bb0] sm:$0xf] }
 0x13b   : > { %v1103_v60 = vld [vmem:[%s9127_s5 + $0x1bc0] sm:$0xf]  ;;  %v1105_v61 = vld [vmem:[%s9127_s5 + $0x1bd0] sm:$0xf]  ;;  %1102 = vst [vmem:[%s9131_s6 + $0x6ec] sm:$0xf] %v1101_v59 }
 0x13c   : > { %1104 = vst [vmem:[%s9131_s6 + $0x6f0] sm:$0xf] %v1103_v60  ;;  %1106 = vst [vmem:[%s9131_s6 + $0x6f4] sm:$0xf] %v1105_v61  ;;  %v1107_v62 = vld [vmem:[%s9127_s5 + $0x1be0] sm:$0xf] }
 0x13d   : > { %v1109_v63 = vld [vmem:[%s9127_s5 + $0x1bf0] sm:$0xf]  ;;  %v1111_v0 = vld [vmem:[%s9127_s5 + $0x1c00] sm:$0xf]  ;;  %1108 = vst [vmem:[%s9131_s6 + $0x6f8] sm:$0xf] %v1107_v62 }
 0x13e   : > { %1110 = vst [vmem:[%s9131_s6 + $0x6fc] sm:$0xf] %v1109_v63  ;;  %1112 = vst [vmem:[%s9131_s6 + $0x700] sm:$0xf] %v1111_v0  ;;  %v1113_v1 = vld [vmem:[%s9127_s5 + $0x1c10] sm:$0xf] }
 0x13f   : > { %v1115_v2 = vld [vmem:[%s9127_s5 + $0x1c20] sm:$0xf]  ;;  %v1117_v3 = vld [vmem:[%s9127_s5 + $0x1c30] sm:$0xf]  ;;  %1114 = vst [vmem:[%s9131_s6 + $0x704] sm:$0xf] %v1113_v1 }
 0x140   : > { %1116 = vst [vmem:[%s9131_s6 + $0x708] sm:$0xf] %v1115_v2  ;;  %1118 = vst [vmem:[%s9131_s6 + $0x70c] sm:$0xf] %v1117_v3  ;;  %v1119_v4 = vld [vmem:[%s9127_s5 + $0x1c40] sm:$0xf] }
 0x141   : > { %v1121_v5 = vld [vmem:[%s9127_s5 + $0x1c50] sm:$0xf]  ;;  %v1123_v6 = vld [vmem:[%s9127_s5 + $0x1c60] sm:$0xf]  ;;  %1120 = vst [vmem:[%s9131_s6 + $0x710] sm:$0xf] %v1119_v4 }
 0x142   : > { %1122 = vst [vmem:[%s9131_s6 + $0x714] sm:$0xf] %v1121_v5  ;;  %1124 = vst [vmem:[%s9131_s6 + $0x718] sm:$0xf] %v1123_v6  ;;  %v1125_v7 = vld [vmem:[%s9127_s5 + $0x1c70] sm:$0xf] }
 0x143   : > { %v1127_v8 = vld [vmem:[%s9127_s5 + $0x1c80] sm:$0xf]  ;;  %v1129_v9 = vld [vmem:[%s9127_s5 + $0x1c90] sm:$0xf]  ;;  %1126 = vst [vmem:[%s9131_s6 + $0x71c] sm:$0xf] %v1125_v7 }
 0x144   : > { %1128 = vst [vmem:[%s9131_s6 + $0x720] sm:$0xf] %v1127_v8  ;;  %1130 = vst [vmem:[%s9131_s6 + $0x724] sm:$0xf] %v1129_v9  ;;  %v1131_v10 = vld [vmem:[%s9127_s5 + $0x1ca0] sm:$0xf] }
 0x145   : > { %v1133_v11 = vld [vmem:[%s9127_s5 + $0x1cb0] sm:$0xf]  ;;  %v1135_v12 = vld [vmem:[%s9127_s5 + $0x1cc0] sm:$0xf]  ;;  %1132 = vst [vmem:[%s9131_s6 + $0x728] sm:$0xf] %v1131_v10 }
 0x146   : > { %1134 = vst [vmem:[%s9131_s6 + $0x72c] sm:$0xf] %v1133_v11  ;;  %1136 = vst [vmem:[%s9131_s6 + $0x730] sm:$0xf] %v1135_v12  ;;  %v1137_v13 = vld [vmem:[%s9127_s5 + $0x1cd0] sm:$0xf] }
 0x147   : > { %v1139_v14 = vld [vmem:[%s9127_s5 + $0x1ce0] sm:$0xf]  ;;  %v1141_v15 = vld [vmem:[%s9127_s5 + $0x1cf0] sm:$0xf]  ;;  %1138 = vst [vmem:[%s9131_s6 + $0x734] sm:$0xf] %v1137_v13 }
 0x148   : > { %1140 = vst [vmem:[%s9131_s6 + $0x738] sm:$0xf] %v1139_v14  ;;  %1142 = vst [vmem:[%s9131_s6 + $0x73c] sm:$0xf] %v1141_v15  ;;  %v1143_v16 = vld [vmem:[%s9127_s5 + $0x1d00] sm:$0xf] }
 0x149   : > { %v1145_v17 = vld [vmem:[%s9127_s5 + $0x1d10] sm:$0xf]  ;;  %v1147_v18 = vld [vmem:[%s9127_s5 + $0x1d20] sm:$0xf]  ;;  %1144 = vst [vmem:[%s9131_s6 + $0x740] sm:$0xf] %v1143_v16 }
 0x14a   : > { %1146 = vst [vmem:[%s9131_s6 + $0x744] sm:$0xf] %v1145_v17  ;;  %1148 = vst [vmem:[%s9131_s6 + $0x748] sm:$0xf] %v1147_v18  ;;  %v1149_v19 = vld [vmem:[%s9127_s5 + $0x1d30] sm:$0xf] }
 0x14b   : > { %v1151_v20 = vld [vmem:[%s9127_s5 + $0x1d40] sm:$0xf]  ;;  %v1153_v21 = vld [vmem:[%s9127_s5 + $0x1d50] sm:$0xf]  ;;  %1150 = vst [vmem:[%s9131_s6 + $0x74c] sm:$0xf] %v1149_v19 }
 0x14c   : > { %1152 = vst [vmem:[%s9131_s6 + $0x750] sm:$0xf] %v1151_v20  ;;  %1154 = vst [vmem:[%s9131_s6 + $0x754] sm:$0xf] %v1153_v21  ;;  %v1155_v22 = vld [vmem:[%s9127_s5 + $0x1d60] sm:$0xf] }
 0x14d   : > { %v1157_v23 = vld [vmem:[%s9127_s5 + $0x1d70] sm:$0xf]  ;;  %v1159_v24 = vld [vmem:[%s9127_s5 + $0x1d80] sm:$0xf]  ;;  %1156 = vst [vmem:[%s9131_s6 + $0x758] sm:$0xf] %v1155_v22 }
 0x14e   : > { %1158 = vst [vmem:[%s9131_s6 + $0x75c] sm:$0xf] %v1157_v23  ;;  %1160 = vst [vmem:[%s9131_s6 + $0x760] sm:$0xf] %v1159_v24  ;;  %v1161_v25 = vld [vmem:[%s9127_s5 + $0x1d90] sm:$0xf] }
 0x14f   : > { %v1163_v26 = vld [vmem:[%s9127_s5 + $0x1da0] sm:$0xf]  ;;  %v1165_v27 = vld [vmem:[%s9127_s5 + $0x1db0] sm:$0xf]  ;;  %1162 = vst [vmem:[%s9131_s6 + $0x764] sm:$0xf] %v1161_v25 }
 0x150   : > { %1164 = vst [vmem:[%s9131_s6 + $0x768] sm:$0xf] %v1163_v26  ;;  %1166 = vst [vmem:[%s9131_s6 + $0x76c] sm:$0xf] %v1165_v27  ;;  %v1167_v28 = vld [vmem:[%s9127_s5 + $0x1dc0] sm:$0xf] }
 0x151   : > { %v1169_v29 = vld [vmem:[%s9127_s5 + $0x1dd0] sm:$0xf]  ;;  %v1171_v30 = vld [vmem:[%s9127_s5 + $0x1de0] sm:$0xf]  ;;  %1168 = vst [vmem:[%s9131_s6 + $0x770] sm:$0xf] %v1167_v28 }
 0x152   : > { %1170 = vst [vmem:[%s9131_s6 + $0x774] sm:$0xf] %v1169_v29  ;;  %1172 = vst [vmem:[%s9131_s6 + $0x778] sm:$0xf] %v1171_v30  ;;  %v1173_v31 = vld [vmem:[%s9127_s5 + $0x1df0] sm:$0xf] }
 0x153   : > { %v1175_v32 = vld [vmem:[%s9127_s5 + $0x1e00] sm:$0xf]  ;;  %v1177_v33 = vld [vmem:[%s9127_s5 + $0x1e10] sm:$0xf]  ;;  %1174 = vst [vmem:[%s9131_s6 + $0x77c] sm:$0xf] %v1173_v31 }
 0x154   : > { %1176 = vst [vmem:[%s9131_s6 + $0x780] sm:$0xf] %v1175_v32  ;;  %1178 = vst [vmem:[%s9131_s6 + $0x784] sm:$0xf] %v1177_v33  ;;  %v1179_v34 = vld [vmem:[%s9127_s5 + $0x1e20] sm:$0xf] }
 0x155   : > { %v1181_v35 = vld [vmem:[%s9127_s5 + $0x1e30] sm:$0xf]  ;;  %v1183_v36 = vld [vmem:[%s9127_s5 + $0x1e40] sm:$0xf]  ;;  %1180 = vst [vmem:[%s9131_s6 + $0x788] sm:$0xf] %v1179_v34 }
 0x156   : > { %1182 = vst [vmem:[%s9131_s6 + $0x78c] sm:$0xf] %v1181_v35  ;;  %1184 = vst [vmem:[%s9131_s6 + $0x790] sm:$0xf] %v1183_v36  ;;  %v1185_v37 = vld [vmem:[%s9127_s5 + $0x1e50] sm:$0xf] }
 0x157   : > { %v1187_v38 = vld [vmem:[%s9127_s5 + $0x1e60] sm:$0xf]  ;;  %v1189_v39 = vld [vmem:[%s9127_s5 + $0x1e70] sm:$0xf]  ;;  %1186 = vst [vmem:[%s9131_s6 + $0x794] sm:$0xf] %v1185_v37 }
 0x158   : > { %1188 = vst [vmem:[%s9131_s6 + $0x798] sm:$0xf] %v1187_v38  ;;  %1190 = vst [vmem:[%s9131_s6 + $0x79c] sm:$0xf] %v1189_v39  ;;  %v1191_v40 = vld [vmem:[%s9127_s5 + $0x1e80] sm:$0xf] }
 0x159   : > { %v1193_v41 = vld [vmem:[%s9127_s5 + $0x1e90] sm:$0xf]  ;;  %v1195_v42 = vld [vmem:[%s9127_s5 + $0x1ea0] sm:$0xf]  ;;  %1192 = vst [vmem:[%s9131_s6 + $0x7a0] sm:$0xf] %v1191_v40 }
 0x15a   : > { %1194 = vst [vmem:[%s9131_s6 + $0x7a4] sm:$0xf] %v1193_v41  ;;  %1196 = vst [vmem:[%s9131_s6 + $0x7a8] sm:$0xf] %v1195_v42  ;;  %v1197_v43 = vld [vmem:[%s9127_s5 + $0x1eb0] sm:$0xf] }
 0x15b   : > { %v1199_v44 = vld [vmem:[%s9127_s5 + $0x1ec0] sm:$0xf]  ;;  %v1201_v45 = vld [vmem:[%s9127_s5 + $0x1ed0] sm:$0xf]  ;;  %1198 = vst [vmem:[%s9131_s6 + $0x7ac] sm:$0xf] %v1197_v43 }
 0x15c   : > { %1200 = vst [vmem:[%s9131_s6 + $0x7b0] sm:$0xf] %v1199_v44  ;;  %1202 = vst [vmem:[%s9131_s6 + $0x7b4] sm:$0xf] %v1201_v45  ;;  %v1203_v46 = vld [vmem:[%s9127_s5 + $0x1ee0] sm:$0xf] }
 0x15d   : > { %v1205_v47 = vld [vmem:[%s9127_s5 + $0x1ef0] sm:$0xf]  ;;  %v1207_v48 = vld [vmem:[%s9127_s5 + $0x1f00] sm:$0xf]  ;;  %1204 = vst [vmem:[%s9131_s6 + $0x7b8] sm:$0xf] %v1203_v46 }
 0x15e   : > { %1206 = vst [vmem:[%s9131_s6 + $0x7bc] sm:$0xf] %v1205_v47  ;;  %1208 = vst [vmem:[%s9131_s6 + $0x7c0] sm:$0xf] %v1207_v48  ;;  %v1209_v49 = vld [vmem:[%s9127_s5 + $0x1f10] sm:$0xf] }
 0x15f   : > { %v1211_v50 = vld [vmem:[%s9127_s5 + $0x1f20] sm:$0xf]  ;;  %v1213_v51 = vld [vmem:[%s9127_s5 + $0x1f30] sm:$0xf]  ;;  %1210 = vst [vmem:[%s9131_s6 + $0x7c4] sm:$0xf] %v1209_v49 }
 0x160   : > { %1212 = vst [vmem:[%s9131_s6 + $0x7c8] sm:$0xf] %v1211_v50  ;;  %1214 = vst [vmem:[%s9131_s6 + $0x7cc] sm:$0xf] %v1213_v51  ;;  %v1215_v52 = vld [vmem:[%s9127_s5 + $0x1f40] sm:$0xf] }
 0x161   : > { %v1217_v53 = vld [vmem:[%s9127_s5 + $0x1f50] sm:$0xf]  ;;  %v1219_v54 = vld [vmem:[%s9127_s5 + $0x1f60] sm:$0xf]  ;;  %1216 = vst [vmem:[%s9131_s6 + $0x7d0] sm:$0xf] %v1215_v52 }
 0x162   : > { %1218 = vst [vmem:[%s9131_s6 + $0x7d4] sm:$0xf] %v1217_v53  ;;  %1220 = vst [vmem:[%s9131_s6 + $0x7d8] sm:$0xf] %v1219_v54  ;;  %v1221_v55 = vld [vmem:[%s9127_s5 + $0x1f70] sm:$0xf] }
 0x163   : > { %v1223_v56 = vld [vmem:[%s9127_s5 + $0x1f80] sm:$0xf]  ;;  %v1225_v57 = vld [vmem:[%s9127_s5 + $0x1f90] sm:$0xf]  ;;  %1222 = vst [vmem:[%s9131_s6 + $0x7dc] sm:$0xf] %v1221_v55 }
 0x164   : > { %1224 = vst [vmem:[%s9131_s6 + $0x7e0] sm:$0xf] %v1223_v56  ;;  %1226 = vst [vmem:[%s9131_s6 + $0x7e4] sm:$0xf] %v1225_v57  ;;  %v1227_v58 = vld [vmem:[%s9127_s5 + $0x1fa0] sm:$0xf] }
 0x165   : > { %v1229_v59 = vld [vmem:[%s9127_s5 + $0x1fb0] sm:$0xf]  ;;  %v1231_v60 = vld [vmem:[%s9127_s5 + $0x1fc0] sm:$0xf]  ;;  %1228 = vst [vmem:[%s9131_s6 + $0x7e8] sm:$0xf] %v1227_v58 }
 0x166   : > { %1230 = vst [vmem:[%s9131_s6 + $0x7ec] sm:$0xf] %v1229_v59  ;;  %1232 = vst [vmem:[%s9131_s6 + $0x7f0] sm:$0xf] %v1231_v60  ;;  %v1233_v61 = vld [vmem:[%s9127_s5 + $0x1fd0] sm:$0xf] }
 0x167   : > { %v1235_v62 = vld [vmem:[%s9127_s5 + $0x1fe0] sm:$0xf]  ;;  %v1237_v63 = vld [vmem:[%s9127_s5 + $0x1ff0] sm:$0xf]  ;;  %1234 = vst [vmem:[%s9131_s6 + $0x7f4] sm:$0xf] %v1233_v61 }
 0x168   : > { %1236 = vst [vmem:[%s9131_s6 + $0x7f8] sm:$0xf] %v1235_v62  ;;  %1238 = vst [vmem:[%s9131_s6 + $0x7fc] sm:$0xf] %v1237_v63 }
 0x169 PF: > { %p7920_p8 = scmp.ge.s32.totalorder %s9052_s19, 1  ;;  %p4375_p9 = scmp.lt.s32.totalorder %s9052_s19, 5 }
 0x16b   : > { %p4376_p10 = pnand %p7920_p8, %p4375_p9 }
 0x16d   : > { %4379 = sbr.rel (%p4376_p10) target bundleno = 916 (0x394), region = 84 }
 0x172   : > { %s4382_s7 = sand.u32 1, %s9036_s15   ;;  %v10161_v0 = vld [vmem:[%s10765_s0] sm:$0xff]  ;;  %v10171_v2 = vld [vmem:[%s10765_s0 + $0x8] sm:$0xff]  ;;  %p4425_p11 = scmp.lt.s32.totalorder %s9044_s17, 3 }
 0x173   : > { %v10166_v1 = vld [vmem:[%s10765_s0 + $0x80] sm:$0xff]  ;;  %s7921_s14 = sshll.u32 %s4382_s7, 11  ;;  %v10180_v4 = vld [vmem:[%s10765_s0 + $0x88] sm:$0xff]  ;;  %s7922_s21 = sshll.u32 %s4382_s7, 4 }
 0x174   : > { %v7924_v3 = vcombine.high %v10161_v0, %v10166_v1  ;;  %v7926_v5 = vcombine.high %v10171_v2, %v10180_v4  ;;  %s10184_s23 = scalar_lea.vmem [#allocation2], %s7921_s14  ;;  %v4465_v35 = vld [vmem:[%s10765_s0 + $0x100] sm:$0xff]  ;;  %v4466_v38 = vld [vmem:[%s10765_s0 + $0x108] sm:$0xff]  ;;  %v7923_v42 = vcombine.low %v10161_v0, %v10166_v1  ;;  %v7925_v43 = vcombine.low %v10171_v2, %v10180_v4  ;;  %s4417_s22 = scalar_lea.vmem [#allocation3], %s7922_s21 }
 0x175   : > { %v8756_v6 = vld [vmem:[%s10184_s23 + $0x78] sm:$0xff]   ;;  %v8760_v10 = vld [vmem:[%s10184_s23 + $0x70] sm:$0xff]   ;;  %v8764_v14 = vld [vmem:[%s10184_s23 + $0x68] sm:$0xff]   ;;  %s4426_s8 = scalar_select %p4425_p11, %s9044_s17, 3 }
 0x176   : > { %6897 = vmatprep.mubr.bf16.mxu0 %v7924_v3  ;;  %v8757_v7 = vld [vmem:[%s10184_s23 + $0xf8] sm:$0xff]   ;;  %6946 = vmatprep.mubr.bf16.mxu1 %v7926_v5  ;;  %v8761_v11 = vld [vmem:[%s10184_s23 + $0xf0] sm:$0xff]   ;;  %v8765_v15 = vld [vmem:[%s10184_s23 + $0xe8] sm:$0xff]   ;;  %s8250_s15 = sshll.u32 (%p9114_p6), %s9044_s17, 2 }
 0x177   : > { %8268 = vmatprep.subr.bf16.mxu0 %v8756_v6  ;;  %v8758_v8 = vld [vmem:[%s10184_s23 + $0x38] sm:$0xff]   ;;  %8296 = vmatprep.subr.bf16.mxu1 %v8757_v7  ;;  %v8762_v12 = vld [vmem:[%s10184_s23 + $0x30] sm:$0xff]   ;;  %v8766_v16 = vld [vmem:[%s10184_s23 + $0x28] sm:$0xff]   ;;  %s4427_s11 = scalar_lea.vmem %s10767_s2, %s4426_s8  ;;  %s4430_s14 = scalar_lea.vmem %s10768_s3, %s4426_s8 }
 0x178   : > { %v8759_v9 = vld [vmem:[%s10184_s23 + $0xb8] sm:$0xff]   ;;  %8269 = vmatpush3.bf16.msra.mxu0 %v8758_v8  ;;  %v8763_v13 = vld [vmem:[%s10184_s23 + $0xb0] sm:$0xff]   ;;  %v8767_v17 = vld [vmem:[%s10184_s23 + $0xa8] sm:$0xff]   ;;  %s7751_s26 = scalar_lea.vmem (%p9114_p6), %s10769_s4, %s8250_s15 }
 0x179   : > { %8297 = vmatpush3.bf16.msra.mxu1 %v8759_v9  ;;  %8270 = vmatprep.subr.bf16.mxu0 %v8760_v10  ;;  %v8768_v18 = vld [vmem:[%s10184_s23 + $0x60] sm:$0xff]   ;;  %v8772_v22 = vld [vmem:[%s10184_s23 + $0x58] sm:$0xff]   ;;  %v8776_v26 = vld [vmem:[%s10184_s23 + $0x50] sm:$0xff]  }
 0x17a   : > { %8298 = vmatprep.subr.bf16.mxu1 %v8761_v11  ;;  %v8769_v19 = vld [vmem:[%s10184_s23 + $0xe0] sm:$0xff]   ;;  %v8773_v23 = vld [vmem:[%s10184_s23 + $0xd8] sm:$0xff]   ;;  %v8777_v27 = vld [vmem:[%s10184_s23 + $0xd0] sm:$0xff]  }
 0x17b   : > { %v8770_v20 = vld [vmem:[%s10184_s23 + $0x20] sm:$0xff]   ;;  %v8774_v24 = vld [vmem:[%s10184_s23 + $0x18] sm:$0xff]   ;;  %v8778_v28 = vld [vmem:[%s10184_s23 + $0x10] sm:$0xff]  }
 0x17c   : > { %8271 = vmatpush3.bf16.msra.mxu0 %v8762_v12  ;;  %v8771_v21 = vld [vmem:[%s10184_s23 + $0xa0] sm:$0xff]   ;;  %v8775_v25 = vld [vmem:[%s10184_s23 + $0x98] sm:$0xff]   ;;  %v8779_v29 = vld [vmem:[%s10184_s23 + $0x90] sm:$0xff]  }
 0x17d   : > { %8299 = vmatpush3.bf16.msra.mxu1 %v8763_v13  ;;  %8272 = vmatprep.subr.bf16.mxu0 %v8764_v14  ;;  %v8780_v30 = vld [vmem:[%s10184_s23 + $0x48] sm:$0xff]   ;;  %v8784_v34 = vld [vmem:[%s10184_s23 + $0x40] sm:$0xff]   ;;  %v8788_v44 = vld [vmem:[%s10184_s23 + $0x178] sm:$0xff]  }
 0x17e   : > { %8300 = vmatprep.subr.bf16.mxu1 %v8765_v15  ;;  %v8781_v31 = vld [vmem:[%s10184_s23 + $0xc8] sm:$0xff]   ;;  %v4481_v36 = vld [vmem:[%s10765_s0 + $0x180] sm:$0xff]  ;;  %v8789_v45 = vld [vmem:[%s10184_s23 + $0x1f8] sm:$0xff]  }
 0x17f   : > { %v8782_v32 = vld [vmem:[%s10184_s23 + $0x8] sm:$0xff]   ;;  %v8785_v37 = vld [vmem:[%s10184_s23 + $0xc0] sm:$0xff]   ;;  %v7956_v46 = vcombine.high %v4465_v35, %v4481_v36  ;;  %v8790_v47 = vld [vmem:[%s10184_s23 + $0x138] sm:$0xff]   ;;  %v7955_v54 = vcombine.low %v4465_v35, %v4481_v36 }
 0x180   : > { %8273 = vmatpush3.bf16.msra.mxu0 %v8766_v16  ;;  %v8783_v33 = vld [vmem:[%s10184_s23 + $0x88] sm:$0xff]   ;;  %v8786_v40 = vld [vmem:[%s10184_s23] sm:$0xff]   ;;  %v8791_v49 = vld [vmem:[%s10184_s23 + $0x1b8] sm:$0xff]  }
 0x181   : > { %8301 = vmatpush3.bf16.msra.mxu1 %v8767_v17  ;;  %8274 = vmatprep.subr.bf16.mxu0 %v8768_v18  ;;  %v4482_v39 = vld [vmem:[%s10765_s0 + $0x188] sm:$0xff]  ;;  %v8787_v41 = vld [vmem:[%s10184_s23 + $0x80] sm:$0xff]   ;;  %v8792_v50 = vld [vmem:[%s10184_s23 + $0x170] sm:$0xff]  }
 0x182   : > { %8302 = vmatprep.subr.bf16.mxu1 %v8769_v19  ;;  %v7958_v48 = vcombine.high %v4466_v38, %v4482_v39  ;;  %v8793_v51 = vld [vmem:[%s10184_s23 + $0x1f0] sm:$0xff]   ;;  %v8796_v55 = vld [vmem:[%s10184_s23 + $0x168] sm:$0xff]   ;;  %v7957_v56 = vcombine.low %v4466_v38, %v4482_v39  ;;  %v8800_v60 = vld [vmem:[%s10184_s23 + $0x160] sm:$0xff]  }
 0x183   : > { %v8794_v52 = vld [vmem:[%s10184_s23 + $0x130] sm:$0xff]   ;;  %v8797_v57 = vld [vmem:[%s10184_s23 + $0x1e8] sm:$0xff]   ;;  %v8801_v61 = vld [vmem:[%s10184_s23 + $0x1e0] sm:$0xff]  }
 0x184   : > { %8275 = vmatpush3.bf16.msra.mxu0 %v8770_v20  ;;  %v8795_v53 = vld [vmem:[%s10184_s23 + $0x1b0] sm:$0xff]   ;;  %v8798_v58 = vld [vmem:[%s10184_s23 + $0x128] sm:$0xff]   ;;  %v8802_v62 = vld [vmem:[%s10184_s23 + $0x120] sm:$0xff]  }
 0x185   : > { %8303 = vmatpush3.bf16.msra.mxu1 %v8771_v21  ;;  %8276 = vmatprep.subr.bf16.mxu0 %v8772_v22  ;;  %v8799_v59 = vld [vmem:[%s10184_s23 + $0x1a8] sm:$0xff]   ;;  %v8803_v63 = vld [vmem:[%s10184_s23 + $0x1a0] sm:$0xff]   ;;  %v8804_v0 = vld [vmem:[%s10184_s23 + $0x158] sm:$0xff]  }
 0x186   : > { %8304 = vmatprep.subr.bf16.mxu1 %v8773_v23  ;;  %v8805_v1 = vld [vmem:[%s10184_s23 + $0x1d8] sm:$0xff]   ;;  %v8808_v4 = vld [vmem:[%s10184_s23 + $0x150] sm:$0xff]   ;;  %v8812_v8 = vld [vmem:[%s10184_s23 + $0x148] sm:$0xff]  }
 0x187   : > { %v8806_v2 = vld [vmem:[%s10184_s23 + $0x118] sm:$0xff]   ;;  %v8809_v5 = vld [vmem:[%s10184_s23 + $0x1d0] sm:$0xff]   ;;  %v8813_v9 = vld [vmem:[%s10184_s23 + $0x1c8] sm:$0xff]  }
 0x188   : > { %8277 = vmatpush3.bf16.msra.mxu0 %v8774_v24  ;;  %v8807_v3 = vld [vmem:[%s10184_s23 + $0x198] sm:$0xff]   ;;  %v8810_v6 = vld [vmem:[%s10184_s23 + $0x110] sm:$0xff]   ;;  %v8814_v10 = vld [vmem:[%s10184_s23 + $0x108] sm:$0xff]  }
 0x189   : > { %8305 = vmatpush3.bf16.msra.mxu1 %v8775_v25  ;;  %8278 = vmatprep.subr.bf16.mxu0 %v8776_v26  ;;  %v8811_v7 = vld [vmem:[%s10184_s23 + $0x190] sm:$0xff]   ;;  %v8815_v11 = vld [vmem:[%s10184_s23 + $0x188] sm:$0xff]   ;;  %v8816_v12 = vld [vmem:[%s10184_s23 + $0x140] sm:$0xff]  }
 0x18a   : > { %8306 = vmatprep.subr.bf16.mxu1 %v8777_v27  ;;  %v4435_v13 = vld [vmem:[%s10765_s0 + $0x10] sm:$0xff]  ;;  %v8817_v14 = vld [vmem:[%s10184_s23 + $0x1c0] sm:$0xff]   ;;  %v4436_v18 = vld [vmem:[%s10765_s0 + $0x18] sm:$0xff] }
 0x18b   : > { %v8818_v15 = vld [vmem:[%s10184_s23 + $0x100] sm:$0xff]   ;;  %v4451_v17 = vld [vmem:[%s10765_s0 + $0x90] sm:$0xff]  ;;  %v4452_v19 = vld [vmem:[%s10765_s0 + $0x98] sm:$0xff] }
 0x18c   : > { %8279 = vmatpush3.bf16.msra.mxu0 %v8778_v28  ;;  %v8819_v16 = vld [vmem:[%s10184_s23 + $0x180] sm:$0xff]   ;;  %v7927_v20 = vcombine.low %v4435_v13, %v4451_v17  ;;  %v7928_v21 = vcombine.high %v4435_v13, %v4451_v17  ;;  %v7929_v22 = vcombine.low %v4436_v18, %v4452_v19  ;;  %v7930_v23 = vcombine.high %v4436_v18, %v4452_v19  ;;  %v8820_v24 = vld [vmem:[%s10184_s23 + $0x278] sm:$0xff]   ;;  %v8824_v28 = vld [vmem:[%s10184_s23 + $0x270] sm:$0xff]  }
 0x18d   : > { %8307 = vmatpush3.bf16.msra.mxu1 %v8779_v29  ;;  %8280 = vmatprep.subr.bf16.mxu0 %v8780_v30  ;;  %v8821_v25 = vld [vmem:[%s10184_s23 + $0x2f8] sm:$0xff]   ;;  %v8825_v29 = vld [vmem:[%s10184_s23 + $0x2f0] sm:$0xff]   ;;  %v8828_v36 = vld [vmem:[%s10184_s23 + $0x268] sm:$0xff]  }
 0x18e   : > { %8308 = vmatprep.subr.bf16.mxu1 %v8781_v31  ;;  %v8822_v26 = vld [vmem:[%s10184_s23 + $0x238] sm:$0xff]   ;;  %v8826_v30 = vld [vmem:[%s10184_s23 + $0x230] sm:$0xff]   ;;  %v4485_v17 = vld [vmem:[%s10765_s0 + $0x1a0] sm:$0xff] }
 0x18f   : > { %v8823_v27 = vld [vmem:[%s10184_s23 + $0x2b8] sm:$0xff]   ;;  %v8827_v31 = vld [vmem:[%s10184_s23 + $0x2b0] sm:$0xff]  }
 0x190   : > { %8281 = vmatpush3.bf16.msra.mxu0 %v8782_v32  ;;  %v4467_v32 = vld [vmem:[%s10765_s0 + $0x110] sm:$0xff]  ;;  %v4468_v38 = vld [vmem:[%s10765_s0 + $0x118] sm:$0xff] }
 0x191   : > { %8309 = vmatpush3.bf16.msra.mxu1 %v8783_v33  ;;  %8282 = vmatprep.subr.bf16.mxu0 %v8784_v34  ;;  %v4483_v33 = vld [vmem:[%s10765_s0 + $0x190] sm:$0xff]  ;;  %v4484_v39 = vld [vmem:[%s10765_s0 + $0x198] sm:$0xff] }
 0x192   : > { %8310 = vmatprep.subr.bf16.mxu1 %v8785_v37  ;;  %v7960_v34 = vcombine.high %v4467_v32, %v4483_v33  ;;  %v7959_v35 = vcombine.low %v4467_v32, %v4483_v33  ;;  %v8829_v37 = vld [vmem:[%s10184_s23 + $0x2e8] sm:$0xff]   ;;  %v8857_v13 = vld [vmem:[%s10184_s23 + $0x3f0] sm:$0xff]   ;;  %v8868_v32 = vld [vmem:[%s10184_s23 + $0x358] sm:$0xff]  }
 0x193   : > { %v8869_v33 = vld [vmem:[%s10184_s23 + $0x3d8] sm:$0xff]  }
 0x194   : > { %8283 = vmatpush3.bf16.msra.mxu0 %v8786_v40  ;;  %v7962_v40 = vcombine.high %v4468_v38, %v4484_v39 }
 0x195   : > { %8311 = vmatpush3.bf16.msra.mxu1 %v8787_v41  ;;  %8324 = vmatprep.subr.bf16.mxu0 %v8788_v44  ;;  %v8830_v41 = vld [vmem:[%s10184_s23 + $0x228] sm:$0xff]   ;;  %v8832_v44 = vld [vmem:[%s10184_s23 + $0x260] sm:$0xff]  }
 0x196   : > { %8352 = vmatprep.subr.bf16.mxu1 %v8789_v45  ;;  %v8833_v45 = vld [vmem:[%s10184_s23 + $0x2e0] sm:$0xff]  }
 0x197   : > { %6898 = vmatmul.mubr.bf16.vlgmr.msra.gmra.mxu0 %v7923_v42  ;;  %v7961_v42 = vcombine.low %v4468_v38, %v4484_v39  ;;  %v8874_v38 = vld [vmem:[%s10184_s23 + $0x310] sm:$0xff]  }
 0x198   : > { %6947 = vmatmul.mubr.bf16.vlgmr.msra.gmra.mxu1 %v7925_v43  ;;  %8325 = vmatpush3.bf16.msra.mxu0 %v8790_v47  ;;  %v8831_v43 = vld [vmem:[%s10184_s23 + $0x2a8] sm:$0xff]   ;;  %v8835_v47 = vld [vmem:[%s10184_s23 + $0x2a0] sm:$0xff]   ;;  %v8875_v39 = vld [vmem:[%s10184_s23 + $0x390] sm:$0xff]  }
 0x199   : > { %8353 = vmatpush3.bf16.msra.mxu1 %v8791_v49  ;;  %6905 = vmatprep.mubr.bf16.mxu0 %v7956_v46  ;;  %v8834_v46 = vld [vmem:[%s10184_s23 + $0x220] sm:$0xff]   ;;  %v8837_v49 = vld [vmem:[%s10184_s23 + $0x2d8] sm:$0xff]  }
 0x19a   : > { %8326 = vmatprep.subr.bf16.mxu0 %v8792_v50  ;;  %6954 = vmatprep.mubr.bf16.mxu1 %v7958_v48  ;;  %v8836_v48 = vld [vmem:[%s10184_s23 + $0x258] sm:$0xff]  }
 0x19b   : > { %8354 = vmatprep.subr.bf16.mxu1 %v8793_v51  ;;  %v8838_v50 = vld [vmem:[%s10184_s23 + $0x218] sm:$0xff]  }
 0x19c   : > { %8327 = vmatpush3.bf16.msra.mxu0 %v8794_v52  ;;  %v8839_v51 = vld [vmem:[%s10184_s23 + $0x298] sm:$0xff]   ;;  %v8840_v52 = vld [vmem:[%s10184_s23 + $0x250] sm:$0xff]  }
 0x19d   : > { %8355 = vmatpush3.bf16.msra.mxu1 %v8795_v53  ;;  %8328 = vmatprep.subr.bf16.mxu0 %v8796_v55  ;;  %v8841_v53 = vld [vmem:[%s10184_s23 + $0x2d0] sm:$0xff]  }
 0x19e   : > { %8356 = vmatprep.subr.bf16.mxu1 %v8797_v57  ;;  %v8843_v55 = vld [vmem:[%s10184_s23 + $0x290] sm:$0xff]   ;;  %v8845_v57 = vld [vmem:[%s10184_s23 + $0x2c8] sm:$0xff]  }
 0x19f   : > { %6906 = vmatmul.mubr.bf16.gmra.mxu0 %v7955_v54  ;;  %v8842_v54 = vld [vmem:[%s10184_s23 + $0x210] sm:$0xff]  }
 0x1a0   : > { %8329 = vmatpush3.bf16.msra.mxu0 %v8798_v58  ;;  %6955 = vmatmul.mubr.bf16.gmra.mxu1 %v7957_v56  ;;  %v8844_v56 = vld [vmem:[%s10184_s23 + $0x248] sm:$0xff]  }
 0x1a1   : > { %8357 = vmatpush3.bf16.msra.mxu1 %v8799_v59  ;;  %8330 = vmatprep.subr.bf16.mxu0 %v8800_v60  ;;  %v8846_v58 = vld [vmem:[%s10184_s23 + $0x208] sm:$0xff]   ;;  %v8848_v60 = vld [vmem:[%s10184_s23 + $0x240] sm:$0xff]  }
 0x1a2   : > { %8358 = vmatprep.subr.bf16.mxu1 %v8801_v61  ;;  %6995 = vmatprep.mubr.bf16.mxu0 %v7928_v21  ;;  %v8847_v59 = vld [vmem:[%s10184_s23 + $0x288] sm:$0xff]   ;;  %v8849_v61 = vld [vmem:[%s10184_s23 + $0x2c0] sm:$0xff]  }
 0x1a3   : > { %7044 = vmatprep.mubr.bf16.mxu1 %v7930_v23  ;;  %v8861_v21 = vld [vmem:[%s10184_s23 + $0x3e8] sm:$0xff]  }
 0x1a4   : > { %8331 = vmatpush3.bf16.msra.mxu0 %v8802_v62  ;;  %v8850_v62 = vld [vmem:[%s10184_s23 + $0x200] sm:$0xff]   ;;  %v4486_v23 = vld [vmem:[%s10765_s0 + $0x1a8] sm:$0xff] }
 0x1a5   : > { %8359 = vmatpush3.bf16.msra.mxu1 %v8803_v63  ;;  %8332 = vmatprep.subr.bf16.mxu0 %v8804_v0  ;;  %v8851_v63 = vld [vmem:[%s10184_s23 + $0x280] sm:$0xff]  }
 0x1a6   : > { %8360 = vmatprep.subr.bf16.mxu1 %v8805_v1  ;;  %v4437_v0 = vld [vmem:[%s10765_s0 + $0x20] sm:$0xff] }
 0x1a7   : > { %v4453_v1 = vld [vmem:[%s10765_s0 + $0xa0] sm:$0xff] }
 0x1a8   : > { %8333 = vmatpush3.bf16.msra.mxu0 %v8806_v2  ;;  %v7931_v2 = vcombine.low %v4437_v0, %v4453_v1 }
 0x1a9   : > { %8361 = vmatpush3.bf16.msra.mxu1 %v8807_v3  ;;  %8334 = vmatprep.subr.bf16.mxu0 %v8808_v4  ;;  %v7932_v3 = vcombine.high %v4437_v0, %v4453_v1  ;;  %v4438_v4 = vld [vmem:[%s10765_s0 + $0x28] sm:$0xff]  ;;  %v4471_v0 = vld [vmem:[%s10765_s0 + $0x130] sm:$0xff] }
 0x1aa   : > { %8362 = vmatprep.subr.bf16.mxu1 %v8809_v5  ;;  %v4454_v5 = vld [vmem:[%s10765_s0 + $0xa8] sm:$0xff]  ;;  %v4487_v1 = vld [vmem:[%s10765_s0 + $0x1b0] sm:$0xff] }
 0x1ac   : > { %8335 = vmatpush3.bf16.msra.mxu0 %v8810_v6  ;;  %v7933_v6 = vcombine.low %v4438_v4, %v4454_v5 }
 0x1ad   : > { %8363 = vmatpush3.bf16.msra.mxu1 %v8811_v7  ;;  %8336 = vmatprep.subr.bf16.mxu0 %v8812_v8  ;;  %v7934_v7 = vcombine.high %v4438_v4, %v4454_v5  ;;  %v8852_v8 = vld [vmem:[%s10184_s23 + $0x378] sm:$0xff]   ;;  %v8892_v4 = vld [vmem:[%s10184_s23 + $0x468] sm:$0xff]  }
 0x1ae   : > { %8364 = vmatprep.subr.bf16.mxu1 %v8813_v9  ;;  %v8853_v9 = vld [vmem:[%s10184_s23 + $0x3f8] sm:$0xff]   ;;  %v8893_v5 = vld [vmem:[%s10184_s23 + $0x4e8] sm:$0xff]  }
 0x1b0   : > { %8337 = vmatpush3.bf16.msra.mxu0 %v8814_v10  ;;  %v8854_v10 = vld [vmem:[%s10184_s23 + $0x338] sm:$0xff]  }
 0x1b1   : > { %8365 = vmatpush3.bf16.msra.mxu1 %v8815_v11  ;;  %8338 = vmatprep.subr.bf16.mxu0 %v8816_v12  ;;  %v8855_v11 = vld [vmem:[%s10184_s23 + $0x3b8] sm:$0xff]   ;;  %v8856_v12 = vld [vmem:[%s10184_s23 + $0x370] sm:$0xff]  }
 0x1b2   : > { %8366 = vmatprep.subr.bf16.mxu1 %v8817_v14  ;;  %v8858_v14 = vld [vmem:[%s10184_s23 + $0x330] sm:$0xff]  }
 0x1b4   : > { %8339 = vmatpush3.bf16.msra.mxu0 %v8818_v15  ;;  %v8859_v15 = vld [vmem:[%s10184_s23 + $0x3b0] sm:$0xff]  }
 0x1b5   : > { %8367 = vmatpush3.bf16.msra.mxu1 %v8819_v16  ;;  %8380 = vmatprep.subr.bf16.mxu0 %v8820_v24  ;;  %v4469_v16 = vld [vmem:[%s10765_s0 + $0x120] sm:$0xff] }
 0x1b6   : > { %8408 = vmatprep.subr.bf16.mxu1 %v8821_v25  ;;  %v7964_v18 = vcombine.high %v4469_v16, %v4485_v17  ;;  %v7963_v19 = vcombine.low %v4469_v16, %v4485_v17  ;;  %v8862_v25 = vld [vmem:[%s10184_s23 + $0x328] sm:$0xff]   ;;  %v8900_v16 = vld [vmem:[%s10184_s23 + $0x458] sm:$0xff]  }
 0x1b7   : > { %6996 = vmatmul.mubr.bf16.vlgmr.msra.gmra.mxu0 %v7927_v20  ;;  %v8860_v20 = vld [vmem:[%s10184_s23 + $0x368] sm:$0xff]   ;;  %v8901_v17 = vld [vmem:[%s10184_s23 + $0x4d8] sm:$0xff]  }
 0x1b8   : > { %7045 = vmatmul.mubr.bf16.vlgmr.msra.gmra.mxu1 %v7929_v22  ;;  %8381 = vmatpush3.bf16.msra.mxu0 %v8822_v26  ;;  %v4470_v22 = vld [vmem:[%s10765_s0 + $0x128] sm:$0xff] }
 0x1b9   : > { %8409 = vmatpush3.bf16.msra.mxu1 %v8823_v27  ;;  %8382 = vmatprep.subr.bf16.mxu0 %v8824_v28  ;;  %v7966_v24 = vcombine.high %v4470_v22, %v4486_v23  ;;  %v7965_v26 = vcombine.low %v4470_v22, %v4486_v23  ;;  %v8863_v27 = vld [vmem:[%s10184_s23 + $0x3a8] sm:$0xff]   ;;  %v8864_v28 = vld [vmem:[%s10184_s23 + $0x360] sm:$0xff]   ;;  %v8906_v22 = vld [vmem:[%s10184_s23 + $0x410] sm:$0xff]  }
 0x1ba   : > { %8410 = vmatprep.subr.bf16.mxu1 %v8825_v29  ;;  %7003 = vmatprep.mubr.bf16.mxu0 %v7960_v34  ;;  %v8865_v29 = vld [vmem:[%s10184_s23 + $0x3e0] sm:$0xff]   ;;  %v8870_v34 = vld [vmem:[%s10184_s23 + $0x318] sm:$0xff]   ;;  %v8907_v23 = vld [vmem:[%s10184_s23 + $0x490] sm:$0xff]  }
 0x1bb   : > { %7052 = vmatprep.mubr.bf16.mxu1 %v7962_v40  ;;  %v8876_v40 = vld [vmem:[%s10184_s23 + $0x348] sm:$0xff]  }
 0x1bc   : > { %8383 = vmatpush3.bf16.msra.mxu0 %v8826_v30  ;;  %v8866_v30 = vld [vmem:[%s10184_s23 + $0x320] sm:$0xff]  }
 0x1bd   : > { %8411 = vmatpush3.bf16.msra.mxu1 %v8827_v31  ;;  %8384 = vmatprep.subr.bf16.mxu0 %v8828_v36  ;;  %v8867_v31 = vld [vmem:[%s10184_s23 + $0x3a0] sm:$0xff]   ;;  %v8872_v36 = vld [vmem:[%s10184_s23 + $0x350] sm:$0xff]  }
 0x1be   : > { %8412 = vmatprep.subr.bf16.mxu1 %v8829_v37  ;;  %v8873_v37 = vld [vmem:[%s10184_s23 + $0x3d0] sm:$0xff]  }
 0x1bf   : > { %7004 = vmatmul.mubr.bf16.gmra.mxu0 %v7959_v35  ;;  %v8871_v35 = vld [vmem:[%s10184_s23 + $0x398] sm:$0xff]  }
 0x1c0   : > { %8385 = vmatpush3.bf16.msra.mxu0 %v8830_v41  ;;  %7053 = vmatmul.mubr.bf16.gmra.mxu1 %v7961_v42  ;;  %v8877_v41 = vld [vmem:[%s10184_s23 + $0x3c8] sm:$0xff]  }
 0x1c1   : > { %8413 = vmatpush3.bf16.msra.mxu1 %v8831_v43  ;;  %8386 = vmatprep.subr.bf16.mxu0 %v8832_v44  ;;  %v8878_v42 = vld [vmem:[%s10184_s23 + $0x308] sm:$0xff]   ;;  %v8880_v44 = vld [vmem:[%s10184_s23 + $0x340] sm:$0xff]  }
 0x1c2   : > { %8414 = vmatprep.subr.bf16.mxu1 %v8833_v45  ;;  %7093 = vmatprep.mubr.bf16.mxu0 %v7932_v3  ;;  %v8879_v43 = vld [vmem:[%s10184_s23 + $0x388] sm:$0xff]   ;;  %v8881_v45 = vld [vmem:[%s10184_s23 + $0x3c0] sm:$0xff]   ;;  %v7967_v3 = vcombine.low %v4471_v0, %v4487_v1 }
 0x1c3   : > { %7142 = vmatprep.mubr.bf16.mxu1 %v7934_v7  ;;  %v4488_v7 = vld [vmem:[%s10765_s0 + $0x1b8] sm:$0xff] }
 0x1c4   : > { %8387 = vmatpush3.bf16.msra.mxu0 %v8834_v46  ;;  %v8882_v46 = vld [vmem:[%s10184_s23 + $0x300] sm:$0xff]  }
 0x1c5   : > { %8415 = vmatpush3.bf16.msra.mxu1 %v8835_v47  ;;  %8388 = vmatprep.subr.bf16.mxu0 %v8836_v48  ;;  %v8883_v47 = vld [vmem:[%s10184_s23 + $0x380] sm:$0xff]   ;;  %v4439_v48 = vld [vmem:[%s10765_s0 + $0x30] sm:$0xff] }
 0x1c6   : > { %8416 = vmatprep.subr.bf16.mxu1 %v8837_v49  ;;  %v4455_v49 = vld [vmem:[%s10765_s0 + $0xb0] sm:$0xff] }
 0x1c8   : > { %8389 = vmatpush3.bf16.msra.mxu0 %v8838_v50  ;;  %v4440_v50 = vld [vmem:[%s10765_s0 + $0x38] sm:$0xff] }
 0x1c9   : > { %8417 = vmatpush3.bf16.msra.mxu1 %v8839_v51  ;;  %8390 = vmatprep.subr.bf16.mxu0 %v8840_v52  ;;  %v7935_v51 = vcombine.low %v4439_v48, %v4455_v49  ;;  %v7936_v52 = vcombine.high %v4439_v48, %v4455_v49  ;;  %v4473_v48 = vld [vmem:[%s10765_s0 + $0x140] sm:$0xff] }
 0x1ca   : > { %8418 = vmatprep.subr.bf16.mxu1 %v8841_v53  ;;  %v4456_v53 = vld [vmem:[%s10765_s0 + $0xb8] sm:$0xff]  ;;  %v4489_v49 = vld [vmem:[%s10765_s0 + $0x1c0] sm:$0xff] }
 0x1cc   : > { %8391 = vmatpush3.bf16.msra.mxu0 %v8842_v54  ;;  %v7937_v54 = vcombine.low %v4440_v50, %v4456_v53 }
 0x1cd   : > { %8419 = vmatpush3.bf16.msra.mxu1 %v8843_v55  ;;  %8392 = vmatprep.subr.bf16.mxu0 %v8844_v56  ;;  %v7938_v55 = vcombine.high %v4440_v50, %v4456_v53  ;;  %v8884_v56 = vld [vmem:[%s10184_s23 + $0x478] sm:$0xff]   ;;  %v7972_v50 = vcombine.high %v4473_v48, %v4489_v49  ;;  %v8925_v53 = vld [vmem:[%s10184_s23 + $0x5e8] sm:$0xff]  }
 0x1ce   : > { %8420 = vmatprep.subr.bf16.mxu1 %v8845_v57  ;;  %v8885_v57 = vld [vmem:[%s10184_s23 + $0x4f8] sm:$0xff]  }
 0x1d0   : > { %8393 = vmatpush3.bf16.msra.mxu0 %v8846_v58  ;;  %v8886_v58 = vld [vmem:[%s10184_s23 + $0x438] sm:$0xff]  }
 0x1d1   : > { %8421 = vmatpush3.bf16.msra.mxu1 %v8847_v59  ;;  %8394 = vmatprep.subr.bf16.mxu0 %v8848_v60  ;;  %v8887_v59 = vld [vmem:[%s10184_s23 + $0x4b8] sm:$0xff]   ;;  %v8888_v60 = vld [vmem:[%s10184_s23 + $0x470] sm:$0xff]  }
 0x1d2   : > { %8422 = vmatprep.subr.bf16.mxu1 %v8849_v61  ;;  %v8889_v61 = vld [vmem:[%s10184_s23 + $0x4f0] sm:$0xff]  }
 0x1d4   : > { %8395 = vmatpush3.bf16.msra.mxu0 %v8850_v62  ;;  %v8890_v62 = vld [vmem:[%s10184_s23 + $0x430] sm:$0xff]  }
 0x1d5   : > { %8423 = vmatpush3.bf16.msra.mxu1 %v8851_v63  ;;  %8436 = vmatprep.subr.bf16.mxu0 %v8852_v8  ;;  %v8891_v63 = vld [vmem:[%s10184_s23 + $0x4b0] sm:$0xff]  }
 0x1d6   : > { %8464 = vmatprep.subr.bf16.mxu1 %v8853_v9  ;;  %v8894_v9 = vld [vmem:[%s10184_s23 + $0x428] sm:$0xff]  }
 0x1d7   : > { %7094 = vmatmul.mubr.bf16.vlgmr.msra.gmra.mxu0 %v7931_v2  ;;  %v7968_v2 = vcombine.high %v4471_v0, %v4487_v1  ;;  %v8932_v0 = vld [vmem:[%s10184_s23 + $0x558] sm:$0xff]  }
 0x1d8   : > { %7143 = vmatmul.mubr.bf16.vlgmr.msra.gmra.mxu1 %v7933_v6  ;;  %8437 = vmatpush3.bf16.msra.mxu0 %v8854_v10  ;;  %v4472_v6 = vld [vmem:[%s10765_s0 + $0x138] sm:$0xff] }
 0x1d9   : > { %8465 = vmatpush3.bf16.msra.mxu1 %v8855_v11  ;;  %8438 = vmatprep.subr.bf16.mxu0 %v8856_v12  ;;  %v7970_v8 = vcombine.high %v4472_v6, %v4488_v7  ;;  %v7969_v10 = vcombine.low %v4472_v6, %v4488_v7  ;;  %v8895_v11 = vld [vmem:[%s10184_s23 + $0x4a8] sm:$0xff]   ;;  %v8896_v12 = vld [vmem:[%s10184_s23 + $0x460] sm:$0xff]   ;;  %v8933_v1 = vld [vmem:[%s10184_s23 + $0x5d8] sm:$0xff]  }
 0x1da   : > { %8466 = vmatprep.subr.bf16.mxu1 %v8857_v13  ;;  %7101 = vmatprep.mubr.bf16.mxu0 %v7964_v18  ;;  %v8897_v13 = vld [vmem:[%s10184_s23 + $0x4e0] sm:$0xff]   ;;  %v8902_v18 = vld [vmem:[%s10184_s23 + $0x418] sm:$0xff]   ;;  %v8938_v6 = vld [vmem:[%s10184_s23 + $0x510] sm:$0xff]  }
 0x1db   : > { %7150 = vmatprep.mubr.bf16.mxu1 %v7966_v24  ;;  %v8908_v24 = vld [vmem:[%s10184_s23 + $0x448] sm:$0xff]   ;;  %v8939_v7 = vld [vmem:[%s10184_s23 + $0x590] sm:$0xff]  }
 0x1dc   : > { %8439 = vmatpush3.bf16.msra.mxu0 %v8858_v14  ;;  %v8898_v14 = vld [vmem:[%s10184_s23 + $0x420] sm:$0xff]  }
 0x1dd   : > { %8467 = vmatpush3.bf16.msra.mxu1 %v8859_v15  ;;  %8440 = vmatprep.subr.bf16.mxu0 %v8860_v20  ;;  %v8899_v15 = vld [vmem:[%s10184_s23 + $0x4a0] sm:$0xff]   ;;  %v8904_v20 = vld [vmem:[%s10184_s23 + $0x450] sm:$0xff]  }
 0x1de   : > { %8468 = vmatprep.subr.bf16.mxu1 %v8861_v21  ;;  %v8905_v21 = vld [vmem:[%s10184_s23 + $0x4d0] sm:$0xff]  }
 0x1df   : > { %7102 = vmatmul.mubr.bf16.gmra.mxu0 %v7963_v19  ;;  %v8903_v19 = vld [vmem:[%s10184_s23 + $0x498] sm:$0xff]  }
 0x1e0   : > { %8441 = vmatpush3.bf16.msra.mxu0 %v8862_v25  ;;  %7151 = vmatmul.mubr.bf16.gmra.mxu1 %v7965_v26  ;;  %v8909_v25 = vld [vmem:[%s10184_s23 + $0x4c8] sm:$0xff]  }
 0x1e1   : > { %8469 = vmatpush3.bf16.msra.mxu1 %v8863_v27  ;;  %8442 = vmatprep.subr.bf16.mxu0 %v8864_v28  ;;  %v8910_v26 = vld [vmem:[%s10184_s23 + $0x408] sm:$0xff]   ;;  %v8912_v28 = vld [vmem:[%s10184_s23 + $0x440] sm:$0xff]  }
 0x1e2   : > { %8470 = vmatprep.subr.bf16.mxu1 %v8865_v29  ;;  %7191 = vmatprep.mubr.bf16.mxu0 %v7936_v52  ;;  %v8911_v27 = vld [vmem:[%s10184_s23 + $0x488] sm:$0xff]   ;;  %v8913_v29 = vld [vmem:[%s10184_s23 + $0x4c0] sm:$0xff]  }
 0x1e3   : > { %7240 = vmatprep.mubr.bf16.mxu1 %v7938_v55  ;;  %v8924_v52 = vld [vmem:[%s10184_s23 + $0x568] sm:$0xff]  }
 0x1e4   : > { %8443 = vmatpush3.bf16.msra.mxu0 %v8866_v30  ;;  %v8914_v30 = vld [vmem:[%s10184_s23 + $0x400] sm:$0xff]   ;;  %v4490_v55 = vld [vmem:[%s10765_s0 + $0x1c8] sm:$0xff] }
 0x1e5   : > { %8471 = vmatpush3.bf16.msra.mxu1 %v8867_v31  ;;  %8444 = vmatprep.subr.bf16.mxu0 %v8868_v32  ;;  %v8915_v31 = vld [vmem:[%s10184_s23 + $0x480] sm:$0xff]  }
 0x1e6   : > { %8472 = vmatprep.subr.bf16.mxu1 %v8869_v33  ;;  %v4441_v32 = vld [vmem:[%s10765_s0 + $0x40] sm:$0xff] }
 0x1e7   : > { %v4457_v33 = vld [vmem:[%s10765_s0 + $0xc0] sm:$0xff] }
 0x1e8   : > { %8445 = vmatpush3.bf16.msra.mxu0 %v8870_v34  ;;  %v4442_v34 = vld [vmem:[%s10765_s0 + $0x48] sm:$0xff] }
 0x1e9   : > { %8473 = vmatpush3.bf16.msra.mxu1 %v8871_v35  ;;  %8446 = vmatprep.subr.bf16.mxu0 %v8872_v36  ;;  %v4458_v35 = vld [vmem:[%s10765_s0 + $0xc8] sm:$0xff]  ;;  %v7939_v36 = vcombine.low %v4441_v32, %v4457_v33 }
 0x1ea   : > { %8474 = vmatprep.subr.bf16.mxu1 %v8873_v37  ;;  %v7940_v37 = vcombine.high %v4441_v32, %v4457_v33  ;;  %v4475_v32 = vld [vmem:[%s10765_s0 + $0x150] sm:$0xff] }
 0x1eb   : > { %v4491_v33 = vld [vmem:[%s10765_s0 + $0x1d0] sm:$0xff] }
 0x1ec   : > { %8447 = vmatpush3.bf16.msra.mxu0 %v8874_v38  ;;  %v7941_v38 = vcombine.low %v4442_v34, %v4458_v35 }
 0x1ed   : > { %8475 = vmatpush3.bf16.msra.mxu1 %v8875_v39  ;;  %8448 = vmatprep.subr.bf16.mxu0 %v8876_v40  ;;  %v7942_v39 = vcombine.high %v4442_v34, %v4458_v35  ;;  %v8916_v40 = vld [vmem:[%s10184_s23 + $0x578] sm:$0xff]   ;;  %v7976_v34 = vcombine.high %v4475_v32, %v4491_v33  ;;  %v7975_v35 = vcombine.low %v4475_v32, %v4491_v33 }
 0x1ee   : > { %8476 = vmatprep.subr.bf16.mxu1 %v8877_v41  ;;  %v8917_v41 = vld [vmem:[%s10184_s23 + $0x5f8] sm:$0xff]  }
 0x1ef   : > { %v8982_v32 = vld [vmem:[%s10184_s23 + $0x738] sm:$0xff]  }
 0x1f0   : > { %8449 = vmatpush3.bf16.msra.mxu0 %v8878_v42  ;;  %v8918_v42 = vld [vmem:[%s10184_s23 + $0x538] sm:$0xff]  }
 0x1f1   : > { %8477 = vmatpush3.bf16.msra.mxu1 %v8879_v43  ;;  %8450 = vmatprep.subr.bf16.mxu0 %v8880_v44  ;;  %v8919_v43 = vld [vmem:[%s10184_s23 + $0x5b8] sm:$0xff]   ;;  %v8920_v44 = vld [vmem:[%s10184_s23 + $0x570] sm:$0xff]  }
 0x1f2   : > { %8478 = vmatprep.subr.bf16.mxu1 %v8881_v45  ;;  %v8921_v45 = vld [vmem:[%s10184_s23 + $0x5f0] sm:$0xff]  }
 0x1f4   : > { %8451 = vmatpush3.bf16.msra.mxu0 %v8882_v46  ;;  %v8922_v46 = vld [vmem:[%s10184_s23 + $0x530] sm:$0xff]  }
 0x1f5   : > { %8479 = vmatpush3.bf16.msra.mxu1 %v8883_v47  ;;  %8492 = vmatprep.subr.bf16.mxu0 %v8884_v56  ;;  %v8923_v47 = vld [vmem:[%s10184_s23 + $0x5b0] sm:$0xff]  }
 0x1f6   : > { %8520 = vmatprep.subr.bf16.mxu1 %v8885_v57  ;;  %v8926_v57 = vld [vmem:[%s10184_s23 + $0x528] sm:$0xff]  }
 0x1f7   : > { %7192 = vmatmul.mubr.bf16.vlgmr.msra.gmra.mxu0 %v7935_v51  ;;  %v7971_v51 = vcombine.low %v4473_v48, %v4489_v49  ;;  %v8964_v48 = vld [vmem:[%s10184_s23 + $0x658] sm:$0xff]  }
 0x1f8   : > { %7241 = vmatmul.mubr.bf16.vlgmr.msra.gmra.mxu1 %v7937_v54  ;;  %8493 = vmatpush3.bf16.msra.mxu0 %v8886_v58  ;;  %v4474_v54 = vld [vmem:[%s10765_s0 + $0x148] sm:$0xff]  ;;  %v8965_v49 = vld [vmem:[%s10184_s23 + $0x6d8] sm:$0xff]  }
 0x1f9   : > { %8521 = vmatpush3.bf16.msra.mxu1 %v8887_v59  ;;  %8494 = vmatprep.subr.bf16.mxu0 %v8888_v60  ;;  %v7974_v56 = vcombine.high %v4474_v54, %v4490_v55  ;;  %v7973_v58 = vcombine.low %v4474_v54, %v4490_v55  ;;  %v8927_v59 = vld [vmem:[%s10184_s23 + $0x5a8] sm:$0xff]   ;;  %v8928_v60 = vld [vmem:[%s10184_s23 + $0x560] sm:$0xff]   ;;  %v8970_v54 = vld [vmem:[%s10184_s23 + $0x610] sm:$0xff]  }
 0x1fa   : > { %8522 = vmatprep.subr.bf16.mxu1 %v8889_v61  ;;  %7199 = vmatprep.mubr.bf16.mxu0 %v7968_v2  ;;  %v8929_v61 = vld [vmem:[%s10184_s23 + $0x5e0] sm:$0xff]   ;;  %v8934_v2 = vld [vmem:[%s10184_s23 + $0x518] sm:$0xff]  }
 0x1fb   : > { %7248 = vmatprep.mubr.bf16.mxu1 %v7970_v8  ;;  %v8940_v8 = vld [vmem:[%s10184_s23 + $0x548] sm:$0xff]  }
 0x1fc   : > { %8495 = vmatpush3.bf16.msra.mxu0 %v8890_v62  ;;  %v8930_v62 = vld [vmem:[%s10184_s23 + $0x520] sm:$0xff]  }
 0x1fd   : > { %8523 = vmatpush3.bf16.msra.mxu1 %v8891_v63  ;;  %8496 = vmatprep.subr.bf16.mxu0 %v8892_v4  ;;  %v8931_v63 = vld [vmem:[%s10184_s23 + $0x5a0] sm:$0xff]   ;;  %v8936_v4 = vld [vmem:[%s10184_s23 + $0x550] sm:$0xff]  }
 0x1fe   : > { %8524 = vmatprep.subr.bf16.mxu1 %v8893_v5  ;;  %v8937_v5 = vld [vmem:[%s10184_s23 + $0x5d0] sm:$0xff]  }
 0x1ff   : > { %7200 = vmatmul.mubr.bf16.gmra.mxu0 %v7967_v3  ;;  %v8935_v3 = vld [vmem:[%s10184_s23 + $0x598] sm:$0xff]  }
 0x200   : > { %8497 = vmatpush3.bf16.msra.mxu0 %v8894_v9  ;;  %7249 = vmatmul.mubr.bf16.gmra.mxu1 %v7969_v10  ;;  %v8941_v9 = vld [vmem:[%s10184_s23 + $0x5c8] sm:$0xff]  }
 0x201   : > { %8525 = vmatpush3.bf16.msra.mxu1 %v8895_v11  ;;  %8498 = vmatprep.subr.bf16.mxu0 %v8896_v12  ;;  %v8942_v10 = vld [vmem:[%s10184_s23 + $0x508] sm:$0xff]   ;;  %v8944_v12 = vld [vmem:[%s10184_s23 + $0x540] sm:$0xff]  }
 0x202   : > { %8526 = vmatprep.subr.bf16.mxu1 %v8897_v13  ;;  %7289 = vmatprep.mubr.bf16.mxu0 %v7940_v37  ;;  %v8943_v11 = vld [vmem:[%s10184_s23 + $0x588] sm:$0xff]   ;;  %v8945_v13 = vld [vmem:[%s10184_s23 + $0x5c0] sm:$0xff]  }
 0x203   : > { %7338 = vmatprep.mubr.bf16.mxu1 %v7942_v39  ;;  %v8957_v37 = vld [vmem:[%s10184_s23 + $0x6e8] sm:$0xff]   ;;  %v4492_v39 = vld [vmem:[%s10765_s0 + $0x1d8] sm:$0xff] }
 0x204   : > { %8499 = vmatpush3.bf16.msra.mxu0 %v8898_v14  ;;  %v8946_v14 = vld [vmem:[%s10184_s23 + $0x500] sm:$0xff]  }
 0x205   : > { %8527 = vmatpush3.bf16.msra.mxu1 %v8899_v15  ;;  %8500 = vmatprep.subr.bf16.mxu0 %v8900_v16  ;;  %v8947_v15 = vld [vmem:[%s10184_s23 + $0x580] sm:$0xff]   ;;  %v4443_v16 = vld [vmem:[%s10765_s0 + $0x50] sm:$0xff] }
 0x206   : > { %8528 = vmatprep.subr.bf16.mxu1 %v8901_v17  ;;  %v4459_v17 = vld [vmem:[%s10765_s0 + $0xd0] sm:$0xff] }
 0x208   : > { %8501 = vmatpush3.bf16.msra.mxu0 %v8902_v18  ;;  %v7943_v18 = vcombine.low %v4443_v16, %v4459_v17 }
 0x209   : > { %8529 = vmatpush3.bf16.msra.mxu1 %v8903_v19  ;;  %8502 = vmatprep.subr.bf16.mxu0 %v8904_v20  ;;  %v7944_v19 = vcombine.high %v4443_v16, %v4459_v17  ;;  %v4444_v20 = vld [vmem:[%s10765_s0 + $0x58] sm:$0xff]  ;;  %v4461_v16 = vld [vmem:[%s10765_s0 + $0xe0] sm:$0xff]  ;;  %v4446_v17 = vld [vmem:[%s10765_s0 + $0x68] sm:$0xff] }
 0x20a   : > { %8530 = vmatprep.subr.bf16.mxu1 %v8905_v21  ;;  %v4460_v21 = vld [vmem:[%s10765_s0 + $0xd8] sm:$0xff] }
 0x20c   : > { %8503 = vmatpush3.bf16.msra.mxu0 %v8906_v22  ;;  %v7945_v22 = vcombine.low %v4444_v20, %v4460_v21 }
 0x20d   : > { %8531 = vmatpush3.bf16.msra.mxu1 %v8907_v23  ;;  %8504 = vmatprep.subr.bf16.mxu0 %v8908_v24  ;;  %v7946_v23 = vcombine.high %v4444_v20, %v4460_v21  ;;  %v8948_v24 = vld [vmem:[%s10184_s23 + $0x678] sm:$0xff]  }
 0x20e   : > { %8532 = vmatprep.subr.bf16.mxu1 %v8909_v25  ;;  %v8949_v25 = vld [vmem:[%s10184_s23 + $0x6f8] sm:$0xff]  }
 0x210   : > { %8505 = vmatpush3.bf16.msra.mxu0 %v8910_v26  ;;  %v8950_v26 = vld [vmem:[%s10184_s23 + $0x638] sm:$0xff]  }
 0x211   : > { %8533 = vmatpush3.bf16.msra.mxu1 %v8911_v27  ;;  %8506 = vmatprep.subr.bf16.mxu0 %v8912_v28  ;;  %v8951_v27 = vld [vmem:[%s10184_s23 + $0x6b8] sm:$0xff]   ;;  %v8952_v28 = vld [vmem:[%s10184_s23 + $0x670] sm:$0xff]  }
 0x212   : > { %8534 = vmatprep.subr.bf16.mxu1 %v8913_v29  ;;  %v8953_v29 = vld [vmem:[%s10184_s23 + $0x6f0] sm:$0xff]  }
 0x214   : > { %8507 = vmatpush3.bf16.msra.mxu0 %v8914_v30  ;;  %v8954_v30 = vld [vmem:[%s10184_s23 + $0x630] sm:$0xff]  }
 0x215   : > { %8535 = vmatpush3.bf16.msra.mxu1 %v8915_v31  ;;  %8548 = vmatprep.subr.bf16.mxu0 %v8916_v40  ;;  %v8955_v31 = vld [vmem:[%s10184_s23 + $0x6b0] sm:$0xff]  }
 0x216   : > { %8576 = vmatprep.subr.bf16.mxu1 %v8917_v41  ;;  %v8958_v41 = vld [vmem:[%s10184_s23 + $0x628] sm:$0xff]  }
 0x217   : > { %7290 = vmatmul.mubr.bf16.vlgmr.msra.gmra.mxu0 %v7939_v36  ;;  %v8956_v36 = vld [vmem:[%s10184_s23 + $0x668] sm:$0xff]  }
 0x218   : > { %7339 = vmatmul.mubr.bf16.vlgmr.msra.gmra.mxu1 %v7941_v38  ;;  %8549 = vmatpush3.bf16.msra.mxu0 %v8918_v42  ;;  %v4476_v38 = vld [vmem:[%s10765_s0 + $0x158] sm:$0xff] }
 0x219   : > { %8577 = vmatpush3.bf16.msra.mxu1 %v8919_v43  ;;  %8550 = vmatprep.subr.bf16.mxu0 %v8920_v44  ;;  %v7978_v40 = vcombine.high %v4476_v38, %v4492_v39  ;;  %v7977_v42 = vcombine.low %v4476_v38, %v4492_v39  ;;  %v8959_v43 = vld [vmem:[%s10184_s23 + $0x6a8] sm:$0xff]   ;;  %v8960_v44 = vld [vmem:[%s10184_s23 + $0x660] sm:$0xff]   ;;  %v8984_v38 = vld [vmem:[%s10184_s23 + $0x770] sm:$0xff]  }
 0x21a   : > { %8578 = vmatprep.subr.bf16.mxu1 %v8921_v45  ;;  %7297 = vmatprep.mubr.bf16.mxu0 %v7972_v50  ;;  %v8961_v45 = vld [vmem:[%s10184_s23 + $0x6e0] sm:$0xff]   ;;  %v8966_v50 = vld [vmem:[%s10184_s23 + $0x618] sm:$0xff]  }
 0x21b   : > { %7346 = vmatprep.mubr.bf16.mxu1 %v7974_v56  ;;  %v8971_v56 = vld [vmem:[%s10184_s23 + $0x690] sm:$0xff]  }
 0x21c   : > { %8551 = vmatpush3.bf16.msra.mxu0 %v8922_v46  ;;  %v8962_v46 = vld [vmem:[%s10184_s23 + $0x620] sm:$0xff]  }
 0x21d   : > { %8579 = vmatpush3.bf16.msra.mxu1 %v8923_v47  ;;  %8552 = vmatprep.subr.bf16.mxu0 %v8924_v52  ;;  %v8963_v47 = vld [vmem:[%s10184_s23 + $0x6a0] sm:$0xff]   ;;  %v8968_v52 = vld [vmem:[%s10184_s23 + $0x650] sm:$0xff]  }
 0x21e   : > { %8580 = vmatprep.subr.bf16.mxu1 %v8925_v53  ;;  %v8969_v53 = vld [vmem:[%s10184_s23 + $0x6d0] sm:$0xff]  }
 0x21f   : > { %7298 = vmatmul.mubr.bf16.gmra.mxu0 %v7971_v51  ;;  %v8967_v51 = vld [vmem:[%s10184_s23 + $0x698] sm:$0xff]  }
 0x220   : > { %8553 = vmatpush3.bf16.msra.mxu0 %v8926_v57  ;;  %7347 = vmatmul.mubr.bf16.gmra.mxu1 %v7973_v58  ;;  %v8972_v58 = vld [vmem:[%s10184_s23 + $0x648] sm:$0xff]  }
 0x221   : > { %8581 = vmatpush3.bf16.msra.mxu1 %v8927_v59  ;;  %8554 = vmatprep.subr.bf16.mxu0 %v8928_v60  ;;  %v8973_v60 = vld [vmem:[%s10184_s23 + $0x6c8] sm:$0xff]  }
 0x222   : > { %8582 = vmatprep.subr.bf16.mxu1 %v8929_v61  ;;  %7387 = vmatprep.mubr.bf16.mxu0 %v7944_v19 }
 0x223   : > { %7436 = vmatprep.mubr.bf16.mxu1 %v7946_v23 }
 0x224   : > { %8555 = vmatpush3.bf16.msra.mxu0 %v8930_v62 }
 0x225   : > { %8583 = vmatpush3.bf16.msra.mxu1 %v8931_v63  ;;  %8556 = vmatprep.subr.bf16.mxu0 %v8932_v0  ;;  %v8974_v63 = vld [vmem:[%s10184_s23 + $0x608] sm:$0xff]  }
 0x226   : > { %8584 = vmatprep.subr.bf16.mxu1 %v8933_v1 }
 0x228   : > { %8557 = vmatpush3.bf16.msra.mxu0 %v8934_v2  ;;  %v8975_v2 = vld [vmem:[%s10184_s23 + $0x688] sm:$0xff]  }
 0x229   : > { %8585 = vmatpush3.bf16.msra.mxu1 %v8935_v3  ;;  %8558 = vmatprep.subr.bf16.mxu0 %v8936_v4  ;;  %v8976_v4 = vld [vmem:[%s10184_s23 + $0x640] sm:$0xff]  }
 0x22a   : > { %8586 = vmatprep.subr.bf16.mxu1 %v8937_v5 }
 0x22c   : > { %8559 = vmatpush3.bf16.msra.mxu0 %v8938_v6 }
 0x22d   : > { %8587 = vmatpush3.bf16.msra.mxu1 %v8939_v7  ;;  %8560 = vmatprep.subr.bf16.mxu0 %v8940_v8  ;;  %v8977_v7 = vld [vmem:[%s10184_s23 + $0x6c0] sm:$0xff]  }
 0x22e   : > { %8588 = vmatprep.subr.bf16.mxu1 %v8941_v9 }
 0x230   : > { %8561 = vmatpush3.bf16.msra.mxu0 %v8942_v10  ;;  %v8978_v10 = vld [vmem:[%s10184_s23 + $0x600] sm:$0xff]  }
 0x231   : > { %8589 = vmatpush3.bf16.msra.mxu1 %v8943_v11  ;;  %8562 = vmatprep.subr.bf16.mxu0 %v8944_v12 }
 0x232   : > { %8590 = vmatprep.subr.bf16.mxu1 %v8945_v13  ;;  %v8979_v13 = vld [vmem:[%s10184_s23 + $0x680] sm:$0xff]  }
 0x234   : > { %8563 = vmatpush3.bf16.msra.mxu0 %v8946_v14 }
 0x235   : > { %8591 = vmatpush3.bf16.msra.mxu1 %v8947_v15  ;;  %8604 = vmatprep.subr.bf16.mxu0 %v8948_v24  ;;  %v4445_v15 = vld [vmem:[%s10765_s0 + $0x60] sm:$0xff] }
 0x236   : > { %8632 = vmatprep.subr.bf16.mxu1 %v8949_v25  ;;  %v7947_v20 = vcombine.low %v4445_v15, %v4461_v16  ;;  %v7948_v21 = vcombine.high %v4445_v15, %v4461_v16  ;;  %v9006_v16 = vld [vmem:[%s10184_s23 + $0x708] sm:$0xff]  }
 0x237   : > { %7388 = vmatmul.mubr.bf16.vlgmr.msra.gmra.mxu0 %v7943_v18 }
 0x238   : > { %7437 = vmatmul.mubr.bf16.vlgmr.msra.gmra.mxu1 %v7945_v22  ;;  %8605 = vmatpush3.bf16.msra.mxu0 %v8950_v26  ;;  %v4462_v22 = vld [vmem:[%s10765_s0 + $0xe8] sm:$0xff] }
 0x239   : > { %8633 = vmatpush3.bf16.msra.mxu1 %v8951_v27  ;;  %8606 = vmatprep.subr.bf16.mxu0 %v8952_v28  ;;  %v7949_v25 = vcombine.low %v4446_v17, %v4462_v22  ;;  %v7950_v26 = vcombine.high %v4446_v17, %v4462_v22  ;;  %v8980_v27 = vld [vmem:[%s10184_s23 + $0x778] sm:$0xff]  }
 0x23a   : > { %8634 = vmatprep.subr.bf16.mxu1 %v8953_v29  ;;  %7395 = vmatprep.mubr.bf16.mxu0 %v7976_v34 }
 0x23b   : > { %7444 = vmatprep.mubr.bf16.mxu1 %v7978_v40  ;;  %v8985_v40 = vld [vmem:[%s10184_s23 + $0x7f0] sm:$0xff]  }
 0x23c   : > { %8607 = vmatpush3.bf16.msra.mxu0 %v8954_v30  ;;  %v8981_v30 = vld [vmem:[%s10184_s23 + $0x7f8] sm:$0xff]  }
 0x23d   : > { %8635 = vmatpush3.bf16.msra.mxu1 %v8955_v31  ;;  %8608 = vmatprep.subr.bf16.mxu0 %v8956_v36 }
 0x23e   : > { %8636 = vmatprep.subr.bf16.mxu1 %v8957_v37 }
 0x23f   : > { %7396 = vmatmul.mubr.bf16.gmra.mxu0 %v7975_v35  ;;  %v8983_v35 = vld [vmem:[%s10184_s23 + $0x7b8] sm:$0xff]  }
 0x240   : > { %8609 = vmatpush3.bf16.msra.mxu0 %v8958_v41  ;;  %7445 = vmatmul.mubr.bf16.gmra.mxu1 %v7977_v42  ;;  %v8986_v41 = vld [vmem:[%s10184_s23 + $0x730] sm:$0xff]  }
 0x241   : > { %8637 = vmatpush3.bf16.msra.mxu1 %v8959_v43  ;;  %8610 = vmatprep.subr.bf16.mxu0 %v8960_v44  ;;  %v8987_v43 = vld [vmem:[%s10184_s23 + $0x7b0] sm:$0xff]   ;;  %v4477_v44 = vld [vmem:[%s10765_s0 + $0x160] sm:$0xff] }
 0x242   : > { %8638 = vmatprep.subr.bf16.mxu1 %v8961_v45  ;;  %7485 = vmatprep.mubr.bf16.mxu0 %v7948_v21  ;;  %v4493_v45 = vld [vmem:[%s10765_s0 + $0x1e0] sm:$0xff] }
 0x243   : > { %7534 = vmatprep.mubr.bf16.mxu1 %v7950_v26 }
 0x244   : > { %8611 = vmatpush3.bf16.msra.mxu0 %v8962_v46  ;;  %v7980_v46 = vcombine.high %v4477_v44, %v4493_v45 }
 0x245   : > { %8639 = vmatpush3.bf16.msra.mxu1 %v8963_v47  ;;  %8612 = vmatprep.subr.bf16.mxu0 %v8964_v48  ;;  %v7979_v47 = vcombine.low %v4477_v44, %v4493_v45  ;;  %v8988_v48 = vld [vmem:[%s10184_s23 + $0x768] sm:$0xff]  }
 0x246   : > { %8640 = vmatprep.subr.bf16.mxu1 %v8965_v49  ;;  %v8989_v49 = vld [vmem:[%s10184_s23 + $0x7e8] sm:$0xff]  }
 0x248   : > { %8613 = vmatpush3.bf16.msra.mxu0 %v8966_v50  ;;  %v4478_v50 = vld [vmem:[%s10765_s0 + $0x168] sm:$0xff] }
 0x249   : > { %8641 = vmatpush3.bf16.msra.mxu1 %v8967_v51  ;;  %8614 = vmatprep.subr.bf16.mxu0 %v8968_v52  ;;  %v4494_v51 = vld [vmem:[%s10765_s0 + $0x1e8] sm:$0xff] }
 0x24a   : > { %8642 = vmatprep.subr.bf16.mxu1 %v8969_v53  ;;  %v7982_v52 = vcombine.high %v4478_v50, %v4494_v51  ;;  %v8990_v53 = vld [vmem:[%s10184_s23 + $0x728] sm:$0xff]  }
 0x24c   : > { %8615 = vmatpush3.bf16.msra.mxu0 %v8970_v54  ;;  %v7981_v54 = vcombine.low %v4478_v50, %v4494_v51 }
 0x24d   : > { %8643 = vmatpush3.bf16.msra.mxu1 %v8971_v56  ;;  %8616 = vmatprep.subr.bf16.mxu0 %v8972_v58  ;;  %v8992_v56 = vld [vmem:[%s10184_s23 + $0x760] sm:$0xff]  }
 0x24e   : > { %8644 = vmatprep.subr.bf16.mxu1 %v8973_v60  ;;  %v8994_v58 = vld [vmem:[%s10184_s23 + $0x720] sm:$0xff]   ;;  %v8996_v60 = vld [vmem:[%s10184_s23 + $0x758] sm:$0xff]  }
 0x250   : > { %8617 = vmatpush3.bf16.msra.mxu0 %v8974_v63  ;;  %v8999_v63 = vld [vmem:[%s10184_s23 + $0x798] sm:$0xff]  }
 0x251   : > { %8645 = vmatpush3.bf16.msra.mxu1 %v8975_v2  ;;  %8618 = vmatprep.subr.bf16.mxu0 %v8976_v4  ;;  %v9002_v4 = vld [vmem:[%s10184_s23 + $0x710] sm:$0xff]  }
 0x252   : > { %8646 = vmatprep.subr.bf16.mxu1 %v8977_v7 }
 0x254   : > { %8619 = vmatpush3.bf16.msra.mxu0 %v8978_v10 }
 0x255   : > { %8647 = vmatpush3.bf16.msra.mxu1 %v8979_v13  ;;  %8660 = vmatprep.subr.bf16.mxu0 %v8980_v27 }
 0x256   : > { %8688 = vmatprep.subr.bf16.mxu1 %v8981_v30 }
 0x257   : > { %v8284_v55 = vpop.f32.mrf.mxu0  ;;  %7486 = vmatmul.mubr.bf16.vlgmr.msra.gmra.mxu0 %v7947_v20  ;;  %v9007_v20 = vld [vmem:[%s10184_s23 + $0x788] sm:$0xff]  }
 0x258   : > { %v8312_v57 = vpop.f32.mrf.mxu1  ;;  %7535 = vmatmul.mubr.bf16.vlgmr.msra.gmra.mxu1 %v7949_v25  ;;  %8661 = vmatpush3.bf16.msra.mxu0 %v8982_v32  ;;  %v9009_v25 = vld [vmem:[%s10184_s23 + $0x7c0] sm:$0xff]   ;;  %v4463_v32 = vld [vmem:[%s10765_s0 + $0xf0] sm:$0xff] }
 0x259   : > { %v8285_v59 = vpop.f32.mrf.mxu0  ;;  %8689 = vmatpush3.bf16.msra.mxu1 %v8983_v35  ;;  %8662 = vmatprep.subr.bf16.mxu0 %v8984_v38 }
 0x25a   : > { %v8286_v61 = vadd.f32 %v8285_v59, %v8284_v55  ;;  %v8313_v62 = vpop.f32.mrf.mxu1  ;;  %8690 = vmatprep.subr.bf16.mxu1 %v8985_v40  ;;  %7493 = vmatprep.mubr.bf16.mxu0 %v7980_v46  ;;  %v8991_v55 = vld [vmem:[%s10184_s23 + $0x7a8] sm:$0xff]   ;;  %v8995_v59 = vld [vmem:[%s10184_s23 + $0x7a0] sm:$0xff]   ;;  %v4479_v40 = vld [vmem:[%s10765_s0 + $0x170] sm:$0xff] }
 0x25b   : > { %v8314_v0 = vadd.f32 %v8313_v62, %v8312_v57  ;;  %v8287_v1 = vpop.f32.mrf.mxu0  ;;  %7542 = vmatprep.mubr.bf16.mxu1 %v7982_v52  ;;  %v8993_v57 = vld [vmem:[%s10184_s23 + $0x7e0] sm:$0xff]   ;;  %v8998_v62 = vld [vmem:[%s10184_s23 + $0x718] sm:$0xff]  }
 0x25c   : > { %v8315_v3 = vpop.f32.mrf.mxu1  ;;  %8663 = vmatpush3.bf16.msra.mxu0 %v8986_v41  ;;  %v4495_v41 = vld [vmem:[%s10765_s0 + $0x1f0] sm:$0xff] }
 0x25d   : > { %v10543_v5 = vadd.f32 %v8314_v0, %v8286_v61  ;;  %v8288_v6 = vpop.f32.mrf.mxu0  ;;  %8691 = vmatpush3.bf16.msra.mxu1 %v8987_v43  ;;  %8664 = vmatprep.subr.bf16.mxu0 %v8988_v48  ;;  %v8997_v61 = vld [vmem:[%s10184_s23 + $0x7d8] sm:$0xff]   ;;  %v9000_v0 = vld [vmem:[%s10184_s23 + $0x750] sm:$0xff]   ;;  %v7984_v46 = vcombine.high %v4479_v40, %v4495_v41 }
 0x25e   : > { %v8289_v8 = vadd.f32 %v8288_v6, %v8287_v1  ;;  %v8316_v9 = vpop.f32.mrf.mxu1  ;;  %8692 = vmatprep.subr.bf16.mxu1 %v8989_v49  ;;  %v4480_v43 = vld [vmem:[%s10765_s0 + $0x178] sm:$0xff] }
 0x25f   : > { %v8317_v11 = vadd.f32 %v8316_v9, %v8315_v3  ;;  %v8290_v12 = vpop.f32.mrf.mxu0  ;;  %7494 = vmatmul.mubr.bf16.gmra.mxu0 %v7979_v47  ;;  %v9001_v3 = vld [vmem:[%s10184_s23 + $0x7d0] sm:$0xff]   ;;  %v4496_v47 = vld [vmem:[%s10765_s0 + $0x1f8] sm:$0xff] }
 0x260   : > { %v8318_v14 = vpop.f32.mrf.mxu1  ;;  %8665 = vmatpush3.bf16.msra.mxu0 %v8990_v53  ;;  %7543 = vmatmul.mubr.bf16.gmra.mxu1 %v7981_v54  ;;  %v7986_v49 = vcombine.high %v4480_v43, %v4496_v47 }
 0x261   : > { %v10557_v18 = vadd.f32 %v8317_v11, %v8289_v8  ;;  %v8291_v19 = vpop.f32.mrf.mxu0  ;;  %8693 = vmatpush3.bf16.msra.mxu1 %v8991_v55  ;;  %8666 = vmatprep.subr.bf16.mxu0 %v8992_v56  ;;  %v9003_v8 = vld [vmem:[%s10184_s23 + $0x790] sm:$0xff]   ;;  %v9004_v11 = vld [vmem:[%s10184_s23 + $0x748] sm:$0xff]  }
 0x262   : > { %v8292_v23 = vadd.f32 %v8291_v19, %v8290_v12  ;;  %v8319_v24 = vpop.f32.mrf.mxu1  ;;  %8694 = vmatprep.subr.bf16.mxu1 %v8993_v57 }
 0x263   : > { %v8320_v28 = vadd.f32 %v8319_v24, %v8318_v14  ;;  %v8293_v29 = vpop.f32.mrf.mxu0  ;;  %v9005_v14 = vld [vmem:[%s10184_s23 + $0x7c8] sm:$0xff]   ;;  %v9008_v24 = vld [vmem:[%s10184_s23 + $0x740] sm:$0xff]  }
 0x264   : > { %v8321_v31 = vpop.f32.mrf.mxu1  ;;  %8667 = vmatpush3.bf16.msra.mxu0 %v8994_v58  ;;  %v7983_v58 = vcombine.low %v4479_v40, %v4495_v41 }
 0x265   : > { %v10565_v33 = vadd.f32 %v8320_v28, %v8292_v23  ;;  %v8294_v34 = vpop.f32.mrf.mxu0  ;;  %8695 = vmatpush3.bf16.msra.mxu1 %v8995_v59  ;;  %8668 = vmatprep.subr.bf16.mxu0 %v8996_v60  ;;  %v9011_v28 = vld [vmem:[%s10184_s23 + $0x780] sm:$0xff]   ;;  %v7985_v59 = vcombine.low %v4480_v43, %v4496_v47 }
 0x266   : > { %v8295_v36 = vadd.f32 %v8294_v34, %v8293_v29  ;;  %v8322_v37 = vpop.f32.mrf.mxu1  ;;  %8696 = vmatprep.subr.bf16.mxu1 %v8997_v61  ;;  %v4447_v29 = vld [vmem:[%s10765_s0 + $0x70] sm:$0xff]  ;;  %v4464_v34 = vld [vmem:[%s10765_s0 + $0xf8] sm:$0xff] }
 0x267   : > { %v8323_v39 = vadd.f32 %v8322_v37, %v8321_v31  ;;  %v7952_v37 = vcombine.high %v4447_v29, %v4463_v32 }
 0x268   : > { %8669 = vmatpush3.bf16.msra.mxu0 %v8998_v62 }
 0x269   : > { %v10571_v42 = vadd.f32 %v8323_v39, %v8295_v36  ;;  %8697 = vmatpush3.bf16.msra.mxu1 %v8999_v63  ;;  %8670 = vmatprep.subr.bf16.mxu0 %v9000_v0  ;;  %v7951_v36 = vcombine.low %v4447_v29, %v4463_v32 }
 0x26a   : > { %8698 = vmatprep.subr.bf16.mxu1 %v9001_v3  ;;  %7583 = vmatprep.mubr.bf16.mxu0 %v7952_v37 }
 0x26c   : > { %8671 = vmatpush3.bf16.msra.mxu0 %v9002_v4 }
 0x26d   : > { %8699 = vmatpush3.bf16.msra.mxu1 %v9003_v8  ;;  %8672 = vmatprep.subr.bf16.mxu0 %v9004_v11 }
 0x26e   : > { %8700 = vmatprep.subr.bf16.mxu1 %v9005_v14 }
 0x270   : > { %8673 = vmatpush3.bf16.msra.mxu0 %v9006_v16 }
 0x271   : > { %8701 = vmatpush3.bf16.msra.mxu1 %v9007_v20  ;;  %8674 = vmatprep.subr.bf16.mxu0 %v9008_v24 }
 0x272   : > { %8702 = vmatprep.subr.bf16.mxu1 %v9009_v25 }
 0x275   : > { %8703 = vmatpush3.bf16.msra.mxu1 %v9011_v28 }
 0x277   : > { %v8340_v1 = vpop.f32.mrf.mxu0 }
 0x278   : > { %v8368_v2 = vpop.f32.mrf.mxu1 }
 0x279   : > { %v8341_v6 = vpop.f32.mrf.mxu0 }
 0x27a   : > { %v8369_v7 = vpop.f32.mrf.mxu1  ;;  %v8342_v9 = vadd.f32 %v8341_v6, %v8340_v1 }
 0x27b   : > { %v8370_v10 = vadd.f32 %v8369_v7, %v8368_v2  ;;  %v8343_v12 = vpop.f32.mrf.mxu0 }
 0x27c   : > { %v8371_v13 = vpop.f32.mrf.mxu1  ;;  %v6998_v15 = vadd.f32 %v8342_v9, %v10543_v5  ;;  %v9010_v5 = vld [vmem:[%s10184_s23 + $0x700] sm:$0xff]  }
 0x27d   : > { %v8344_v17 = vpop.f32.mrf.mxu0  ;;  %8675 = vmatpush3.bf16.msra.mxu0 %v9010_v5 }
 0x27e   : > { %v8372_v19 = vpop.f32.mrf.mxu1  ;;  %v7047_v21 = vadd.f32 %v8370_v10, %v6998_v15  ;;  %v8345_v22 = vadd.f32 %v8344_v17, %v8343_v12 }
 0x27f   : > { %v8373_v23 = vadd.f32 %v8372_v19, %v8371_v13  ;;  %v8346_v27 = vpop.f32.mrf.mxu0 }
 0x280   : > { %v7001_v26 = vadd.f32 %v8345_v22, %v10557_v18  ;;  %v4448_v18 = vld [vmem:[%s10765_s0 + $0x78] sm:$0xff]  ;;  %v8374_v44 = vpop.f32.mrf.mxu1  ;;  %7584 = vmatmul.mubr.bf16.vlgmr.msra.gmra.mxu0 %v7951_v36 }
 0x281   : > { %v8347_v31 = vpop.f32.mrf.mxu0  ;;  %v7953_v38 = vcombine.low %v4448_v18, %v4464_v34  ;;  %v7954_v39 = vcombine.high %v4448_v18, %v4464_v34  ;;  %7591 = vmatprep.mubr.bf16.mxu0 %v7984_v46 }
 0x282   : > { %v7050_v30 = vadd.f32 %v8373_v23, %v7001_v26  ;;  %v8348_v35 = vadd.f32 %v8347_v31, %v8346_v27  ;;  %v8375_v50 = vpop.f32.mrf.mxu1 }
 0x283   : > { %v8349_v45 = vpop.f32.mrf.mxu0  ;;  %7632 = vmatprep.mubr.bf16.mxu1 %v7954_v39  ;;  %v8376_v52 = vadd.f32 %v8375_v50, %v8374_v44 }
 0x284   : > { %v7006_v48 = vadd.f32 %v8348_v35, %v10565_v33  ;;  %7633 = vmatmul.mubr.bf16.vlgmr.msra.gmra.mxu1 %v7953_v38  ;;  %v8377_v54 = vpop.f32.mrf.mxu1 }
 0x285   : > { %v8350_v51 = vpop.f32.mrf.mxu0  ;;  %7640 = vmatprep.mubr.bf16.mxu1 %v7986_v49 }
 0x286   : > { %v8351_v53 = vadd.f32 %v8350_v51, %v8349_v45  ;;  %v7055_v55 = vadd.f32 %v8376_v52, %v7006_v48  ;;  %v8378_v57 = vpop.f32.mrf.mxu1 }
 0x287   : > { %v8379_v60 = vadd.f32 %v8378_v57, %v8377_v54 }
 0x288   : > { %v7009_v56 = vadd.f32 %v8351_v53, %v10571_v42  ;;  %7592 = vmatmul.mubr.bf16.gmra.mxu0 %v7983_v58 }
 0x28a   : > { %v10638_v33 = vadd.f32 %v8379_v60, %v7009_v56 }
 0x28c   : > { %7641 = vmatmul.mubr.bf16.gmra.mxu1 %v7985_v59 }
 0x297   : > { %v8396_v61 = vpop.f32.mrf.mxu0 }
 0x298   : > { %v8424_v62 = vpop.f32.mrf.mxu1 }
 0x299   : > { %v8397_v63 = vpop.f32.mrf.mxu0 }
 0x29a   : > { %v8398_v0 = vadd.f32 %v8397_v63, %v8396_v61  ;;  %v8425_v1 = vpop.f32.mrf.mxu1 }
 0x29b   : > { %v8426_v2 = vadd.f32 %v8425_v1, %v8424_v62  ;;  %v8399_v3 = vpop.f32.mrf.mxu0 }
 0x29c   : > { %v7096_v4 = vadd.f32 %v8398_v0, %v7047_v21  ;;  %v8427_v6 = vpop.f32.mrf.mxu1 }
 0x29d   : > { %v8400_v7 = vpop.f32.mrf.mxu0 }
 0x29e   : > { %v10640_v8 = vadd.f32 %v8426_v2, %v7096_v4  ;;  %v8401_v42 = vadd.f32 %v8400_v7, %v8399_v3  ;;  %v8428_v9 = vpop.f32.mrf.mxu1 }
 0x29f   : > { %v8429_v10 = vadd.f32 %v8428_v9, %v8427_v6  ;;  %v8402_v12 = vpop.f32.mrf.mxu0 }
 0x2a0   : > { %v7099_v11 = vadd.f32 %v8401_v42, %v7050_v30  ;;  %v8430_v16 = vpop.f32.mrf.mxu1 }
 0x2a1   : > { %v8403_v14 = vpop.f32.mrf.mxu0 }
 0x2a2   : > { %v10642_v13 = vadd.f32 %v8429_v10, %v7099_v11  ;;  %v8404_v15 = vadd.f32 %v8403_v14, %v8402_v12  ;;  %v8431_v19 = vpop.f32.mrf.mxu1 }
 0x2a3   : > { %v8432_v20 = vadd.f32 %v8431_v19, %v8430_v16  ;;  %v8405_v21 = vpop.f32.mrf.mxu0 }
 0x2a4   : > { %v7104_v17 = vadd.f32 %v8404_v15, %v7055_v55  ;;  %v10646_v25 = vpop.f32.mrf.mxu1 }
 0x2a5   : > { %v8406_v23 = vpop.f32.mrf.mxu0 }
 0x2a6   : > { %v10644_v22 = vadd.f32 %v8432_v20, %v7104_v17  ;;  %v10648_v27 = vpop.f32.mrf.mxu1 }
 0x2b7   : > { %v8452_v24 = vpop.f32.mrf.mxu0 }
 0x2b8   : > { %v8480_v5 = vpop.f32.mrf.mxu1 }
 0x2b9   : > { %v8453_v26 = vpop.f32.mrf.mxu0 }
 0x2ba   : > { %v8481_v29 = vpop.f32.mrf.mxu1  ;;  %v8454_v16 = vadd.f32 %v8453_v26, %v8452_v24  ;;  %v8435_v24 = vadd.f32 %v10648_v27, %v10646_v25 }
 0x2bb   : > { %v8455_v28 = vpop.f32.mrf.mxu0 }
 0x2bc   : > { %v10650_v31 = vpop.f32.mrf.mxu1  ;;  %v7194_v20 = vadd.f32 %v8454_v16, %v10640_v8 }
 0x2bd   : > { %v8456_v30 = vpop.f32.mrf.mxu0 }
 0x2be   : > { %v8484_v18 = vpop.f32.mrf.mxu1 }
 0x2bf   : > { %v8458_v32 = vpop.f32.mrf.mxu0  ;;  %v8485_v8 = vadd.f32 %v8484_v18, %v10650_v31 }
 0x2c0   : > { %v10652_v35 = vpop.f32.mrf.mxu1 }
 0x2c1   : > { %v8459_v34 = vpop.f32.mrf.mxu0 }
 0x2c2   : > { %v8487_v37 = vpop.f32.mrf.mxu1 }
 0x2c3   : > { %v10654_v36 = vpop.f32.mrf.mxu0 }
 0x2c4   : > { %v10656_v39 = vpop.f32.mrf.mxu1 }
 0x2c5   : > { %v8462_v38 = vpop.f32.mrf.mxu0 }
 0x2c6   : > { %v10658_v41 = vpop.f32.mrf.mxu1 }
 0x2c7   : > { %v8491_v31 = vadd.f32 %v10658_v41, %v10656_v39 }
 0x2d7   : > { %v8508_v40 = vpop.f32.mrf.mxu0 }
 0x2d8   : > { %v8536_v44 = vpop.f32.mrf.mxu1 }
 0x2d9   : > { %v8509_v43 = vpop.f32.mrf.mxu0 }
 0x2da   : > { %v8537_v46 = vpop.f32.mrf.mxu1 }
 0x2db   : > { %v8511_v45 = vpop.f32.mrf.mxu0 }
 0x2dc   : > { %v10660_v48 = vpop.f32.mrf.mxu1 }
 0x2dd   : > { %v8512_v47 = vpop.f32.mrf.mxu0 }
 0x2de   : > { %v10662_v50 = vpop.f32.mrf.mxu1 }
 0x2df   : > { %v8514_v49 = vpop.f32.mrf.mxu0 }
 0x2e0   : > { %v10664_v52 = vpop.f32.mrf.mxu1 }
 0x2e1   : > { %v8515_v51 = vpop.f32.mrf.mxu0 }
 0x2e2   : > { %v10668_v54 = vpop.f32.mrf.mxu1 }
 0x2e3   : > { %v10666_v53 = vpop.f32.mrf.mxu0 }
 0x2e4   : > { %v10672_v56 = vpop.f32.mrf.mxu1 }
 0x2e5   : > { %v10670_v55 = vpop.f32.mrf.mxu0  ;;  %10771 = vst [vmem:[#allocation4_spill] sm:$0xff] %v10672_v56 }
 0x2e6   : > { %v10674_v58 = vpop.f32.mrf.mxu1 }
 0x2e7   : > { %10772 = vst [vmem:[#allocation5_spill] sm:$0xff] %v10674_v58 }
 0x2f7   : > { %v8564_v57 = vpop.f32.mrf.mxu0 }
 0x2f8   : > { %v8592_v59 = vpop.f32.mrf.mxu1 }
 0x2f9   : > { %v8565_v60 = vpop.f32.mrf.mxu0 }
 0x2fa   : > { %v8593_v61 = vpop.f32.mrf.mxu1 }
 0x2fb   : > { %v8567_v62 = vpop.f32.mrf.mxu0 }
 0x2fc   : > { %v10676_v63 = vpop.f32.mrf.mxu1 }
 0x2fd   : > { %10773 = vst [vmem:[#allocation6_spill] sm:$0xff] %v10676_v63  ;;  %v8568_v0 = vpop.f32.mrf.mxu0  ;;  %v8510_v63 = vadd.f32 %v8509_v43, %v8508_v40 }
 0x2fe   : > { %v10678_v1 = vpop.f32.mrf.mxu1 }
 0x2ff   : > { %10774 = vst [vmem:[#allocation7_spill] sm:$0xff] %v10678_v1  ;;  %v8570_v2 = vpop.f32.mrf.mxu0  ;;  %v8407_v1 = vadd.f32 %v8406_v23, %v8405_v21  ;;  %v8538_v21 = vadd.f32 %v8537_v46, %v8536_v44  ;;  %v8513_v23 = vadd.f32 %v8512_v47, %v8511_v45  ;;  %v8519_v44 = vadd.f32 %v10670_v55, %v10666_v53 }
 0x300   : > { %v10680_v3 = vpop.f32.mrf.mxu1 }
 0x301   : > { %10775 = vst [vmem:[#allocation8_spill] sm:$0xff] %v10680_v3  ;;  %v8571_v4 = vpop.f32.mrf.mxu0  ;;  %v8482_v3 = vadd.f32 %v8481_v29, %v8480_v5  ;;  %v7107_v56 = vadd.f32 %v8407_v1, %v10638_v33  ;;  %v8488_v29 = vadd.f32 %v8487_v37, %v10652_v35  ;;  %v8594_v35 = vadd.f32 %v8593_v61, %v8592_v59  ;;  %v10783_v59 = vld [vmem:[#allocation5_spill] sm:$0xff] }
 0x302   : > { %v10682_v6 = vpop.f32.mrf.mxu1  ;;  %v8569_v37 = vadd.f32 %v8568_v0, %v8567_v62 }
 0x303   : > { %10776 = vst [vmem:[#allocation9_spill] sm:$0xff] %v10682_v6  ;;  %v10684_v7 = vpop.f32.mrf.mxu0  ;;  %v8457_v6 = vadd.f32 %v8456_v30, %v8455_v28  ;;  %v8463_v30 = vadd.f32 %v8462_v38, %v10654_v36  ;;  %v7156_v33 = vadd.f32 %v8435_v24, %v7107_v56  ;;  %v8544_v38 = vadd.f32 %v10668_v54, %v10664_v52 }
 0x304   : > { %10777 = vst [vmem:[#allocation10_spill] sm:$0xff] %v10684_v7  ;;  %v10686_v42 = vpop.f32.mrf.mxu1  ;;  %v8572_v56 = vadd.f32 %v8571_v4, %v8570_v2 }
 0x305   : > { %10778 = vst [vmem:[#allocation11_spill] sm:$0xff] %v10686_v42  ;;  %v10688_v9 = vpop.f32.mrf.mxu0  ;;  %v8460_v42 = vadd.f32 %v8459_v34, %v8458_v32  ;;  %v8566_v32 = vadd.f32 %v8565_v60, %v8564_v57  ;;  %v8516_v34 = vadd.f32 %v8515_v51, %v8514_v49 }
 0x306   : > { %10779 = vst [vmem:[#allocation12_spill] sm:$0xff] %v10688_v9  ;;  %v10690_v10 = vpop.f32.mrf.mxu1  ;;  %v7243_v9 = vadd.f32 %v8482_v3, %v7194_v20  ;;  %v7205_v3 = vadd.f32 %v8463_v30, %v7156_v33  ;;  %v10785_v52 = vld [vmem:[#allocation7_spill] sm:$0xff] }
 0x307   : > { %10780 = vst [vmem:[#allocation13_spill] sm:$0xff] %v10690_v10  ;;  %v7197_v10 = vadd.f32 %v8457_v6, %v10642_v13  ;;  %v7202_v28 = vadd.f32 %v8460_v42, %v10644_v22  ;;  %v8541_v22 = vadd.f32 %v10662_v50, %v10660_v48  ;;  %v10782_v50 = vld [vmem:[#allocation4_spill] sm:$0xff] }
 0x308   : > { %v7292_v5 = vadd.f32 %v8510_v63, %v7243_v9  ;;  %v7254_v51 = vadd.f32 %v8491_v31, %v7205_v3  ;;  %v8547_v60 = vadd.f32 %v10783_v59, %v10782_v50  ;;  %v10784_v63 = vld [vmem:[#allocation6_spill] sm:$0xff]  ;;  %v10786_v42 = vld [vmem:[#allocation8_spill] sm:$0xff] }
 0x309   : > { %v7246_v13 = vadd.f32 %v8485_v8, %v7197_v10  ;;  %v7251_v1 = vadd.f32 %v8488_v29, %v7202_v28  ;;  %v8597_v54 = vadd.f32 %v10785_v52, %v10784_v63 }
 0x30a   : > { %v7341_v27 = vadd.f32 %v8538_v21, %v7292_v5  ;;  %v7303_v48 = vadd.f32 %v8519_v44, %v7254_v51  ;;  %v10787_v9 = vld [vmem:[#allocation9_spill] sm:$0xff] }
 0x30b   : > { %v7295_v43 = vadd.f32 %v8513_v23, %v7246_v13  ;;  %v7300_v36 = vadd.f32 %v8516_v34, %v7251_v1  ;;  %v8600_v10 = vadd.f32 %v10787_v9, %v10786_v42 }
 0x30c   : > { %v7390_v18 = vadd.f32 %v8566_v32, %v7341_v27  ;;  %v7352_v21 = vadd.f32 %v8547_v60, %v7303_v48 }
 0x30d   : > { %v7344_v47 = vadd.f32 %v8541_v22, %v7295_v43  ;;  %v7349_v57 = vadd.f32 %v8544_v38, %v7300_v36  ;;  %v10789_v16 = vld [vmem:[#allocation12_spill] sm:$0xff] }
 0x30e   : > { %v7439_v39 = vadd.f32 %v8594_v35, %v7390_v18  ;;  %v10791_v13 = vld [vmem:[#allocation13_spill] sm:$0xff] }
 0x30f   : > { %v7393_v41 = vadd.f32 %v8569_v37, %v7344_v47  ;;  %v7398_v6 = vadd.f32 %v8572_v56, %v7349_v57 }
 0x311   : > { %v7447_v30 = vadd.f32 %v8600_v10, %v7398_v6 }
 0x317   : > { %v8620_v11 = vpop.f32.mrf.mxu0 }
 0x318   : > { %v8648_v12 = vpop.f32.mrf.mxu1 }
 0x319   : > { %v8621_v14 = vpop.f32.mrf.mxu0 }
 0x31a   : > { %v8649_v15 = vpop.f32.mrf.mxu1  ;;  %v8622_v49 = vadd.f32 %v8621_v14, %v8620_v11  ;;  %v7442_v11 = vadd.f32 %v8597_v54, %v7393_v41  ;;  %v10788_v14 = vld [vmem:[#allocation10_spill] sm:$0xff] }
 0x31b   : > { %v8623_v17 = vpop.f32.mrf.mxu0  ;;  %v8650_v53 = vadd.f32 %v8649_v15, %v8648_v12  ;;  %v8575_v20 = vadd.f32 %v10789_v16, %v10788_v14 }
 0x31c   : > { %v10692_v19 = vpop.f32.mrf.mxu1  ;;  %v7488_v0 = vadd.f32 %v8622_v49, %v7439_v39 }
 0x31d   : > { %10781 = vst [vmem:[#allocation14_spill] sm:$0xff] %v10692_v19  ;;  %v8624_v7 = vpop.f32.mrf.mxu0  ;;  %v7401_v15 = vadd.f32 %v8575_v20, %v7352_v21 }
 0x31e   : > { %v10695_v58 = vpop.f32.mrf.mxu1  ;;  %v8625_v55 = vadd.f32 %v8624_v7, %v8623_v17  ;;  %v7537_v23 = vadd.f32 %v8650_v53, %v7488_v0  ;;  %v10790_v17 = vld [vmem:[#allocation11_spill] sm:$0xff] }
 0x31f   : > { %v8626_v26 = vpop.f32.mrf.mxu0  ;;  %v8603_v32 = vadd.f32 %v10791_v13, %v10790_v17 }
 0x320   : > { %v10701_v19 = vpop.f32.mrf.mxu1  ;;  %v7491_v28 = vadd.f32 %v8625_v55, %v7442_v11 }
 0x321   : > { %v8627_v40 = vpop.f32.mrf.mxu0  ;;  %v7450_v38 = vadd.f32 %v8603_v32, %v7401_v15 }
 0x322   : > { %v8655_v25 = vpop.f32.mrf.mxu1  ;;  %v8628_v24 = vadd.f32 %v8627_v40, %v8626_v26 }
 0x323   : > { %v8629_v45 = vpop.f32.mrf.mxu0  ;;  %v8656_v26 = vadd.f32 %v8655_v25, %v10701_v19 }
 0x324   : > { %v8657_v46 = vpop.f32.mrf.mxu1  ;;  %v10792_v33 = vld [vmem:[#allocation14_spill] sm:$0xff]  ;;  %v7496_v43 = vadd.f32 %v8628_v24, %v7447_v30 }
 0x325   : > { %v8630_v61 = vpop.f32.mrf.mxu0  ;;  %v8653_v34 = vadd.f32 %v10695_v58, %v10792_v33 }
 0x326   : > { %v8658_v62 = vpop.f32.mrf.mxu1  ;;  %v8631_v22 = vadd.f32 %v8630_v61, %v8629_v45  ;;  %v7545_v49 = vadd.f32 %v8656_v26, %v7496_v43 }
 0x327   : > { %v7540_v31 = vadd.f32 %v8653_v34, %v7491_v28  ;;  %v8659_v39 = vadd.f32 %v8658_v62, %v8657_v46 }
 0x328   : > { %v7499_v56 = vadd.f32 %v8631_v22, %v7450_v38 }
 0x32a   : > { %v7548_v52 = vadd.f32 %v8659_v39, %v7499_v56 }
 0x340   : > { %v8676_v2 = vpop.f32.mrf.mxu0 }
 0x342   : > { %v8677_v8 = vpop.f32.mrf.mxu0 }
 0x343   : > { %v8678_v29 = vadd.f32 %v8677_v8, %v8676_v2 }
 0x344   : > { %v8704_v4 = vpop.f32.mrf.mxu1  ;;  %v8679_v12 = vpop.f32.mrf.mxu0 }
 0x345   : > { %v7586_v27 = vadd.f32 %v8678_v29, %v7537_v23 }
 0x346   : > { %v8705_v5 = vpop.f32.mrf.mxu1  ;;  %v8680_v1 = vpop.f32.mrf.mxu0 }
 0x347   : > { %v8706_v40 = vadd.f32 %v8705_v5, %v8704_v4  ;;  %v8681_v18 = vadd.f32 %v8680_v1, %v8679_v12 }
 0x348   : > { %v8707_v7 = vpop.f32.mrf.mxu1  ;;  %v8682_v37 = vpop.f32.mrf.mxu0 }
 0x349   : > { %v10728_v35 = vadd.f32 %v8706_v40, %v7586_v27  ;;  %v7589_v44 = vadd.f32 %v8681_v18, %v7540_v31  ;;  %v8243_v40 = vld [vmem:[%s4427_s11] ss:$0 sm:$0xff] }
 0x34a   : > { %v8708_v3 = vpop.f32.mrf.mxu1  ;;  %v8683_v51 = vpop.f32.mrf.mxu0  ;;  %v8244_v18 = vld [vmem:[%s4430_s14] ss:$0 sm:$0xff] }
 0x34b   : > { %v8709_v47 = vadd.f32 %v8708_v3, %v8707_v7  ;;  %v8684_v19 = vadd.f32 %v8683_v51, %v8682_v37  ;;  %v7659_v25 = vmul.f32 %v10728_v35, %v10728_v35 }
 0x34c   : > { %v8710_v36 = vpop.f32.mrf.mxu1  ;;  %v8685_v57 = vpop.f32.mrf.mxu0 }
 0x34d   : > { %v7638_v41 = vadd.f32 %v8709_v47, %v7589_v44  ;;  %v7594_v59 = vadd.f32 %v8684_v19, %v7545_v49 }
 0x34e   : > { %v8711_v58 = vpop.f32.mrf.mxu1  ;;  %v8686_v61 = vpop.f32.mrf.mxu0 }
 0x34f   : > { %v7649_v48 = vadd.f32 %v7638_v41, %v10728_v35  ;;  %v7660_v50 = vmul.f32 %v7638_v41, %v7638_v41  ;;  %v8712_v60 = vadd.f32 %v8711_v58, %v8710_v36  ;;  %v8687_v53 = vadd.f32 %v8686_v61, %v8685_v57 }
 0x350   : > { %v8713_v45 = vpop.f32.mrf.mxu1 }
 0x351   : > { %v7663_v54 = vadd.f32 %v7660_v50, %v7659_v25  ;;  %v7643_v0 = vadd.f32 %v8712_v60, %v7594_v59  ;;  %v7597_v62 = vadd.f32 %v8687_v53, %v7548_v52 }
 0x352   : > { %v8714_v63 = vpop.f32.mrf.mxu1 }
 0x353   : > { %v7650_v55 = vadd.f32 %v7649_v48, %v7643_v0  ;;  %v7661_v46 = vmul.f32 %v7643_v0, %v7643_v0  ;;  %v8715_v6 = vadd.f32 %v8714_v63, %v8713_v45 }
 0x355   : > { %v7664_v42 = vadd.f32 %v7663_v54, %v7661_v46  ;;  %v7646_v9 = vadd.f32 %v8715_v6, %v7597_v62 }
 0x357   : > { %v7651_v10 = vadd.f32 %v7650_v55, %v7646_v9  ;;  %v7662_v2 = vmul.f32 %v7646_v9, %v7646_v9 }
 0x359   : > { %v7652_v4 = vrot.slane %v7651_v10, 4  ;;  %v7665_v11 = vadd.f32 %v7664_v42, %v7662_v2 }
 0x35b   : > { %v7653_v14 = vadd.f32 %v7652_v4, %v7651_v10  ;;  %v7666_v16 = vrot.slane %v7665_v11, 4 }
 0x35d   : > { %v7654_v20 = vrot.slane %v7653_v14, 2  ;;  %v7667_v24 = vadd.f32 %v7666_v16, %v7665_v11 }
 0x35f   : > { %v7655_v8 = vadd.f32 %v7654_v20, %v7653_v14  ;;  %v7668_v5 = vrot.slane %v7667_v24, 2 }
 0x361   : > { %v7656_v21 = vrot.slane %v7655_v8, 1  ;;  %v7669_v23 = vadd.f32 %v7668_v5, %v7667_v24 }
 0x363   : > { %v7657_v28 = vadd.f32 %v7656_v21, %v7655_v8  ;;  %v7670_v29 = vrot.slane %v7669_v23, 1 }
 0x365   : > { %v7658_v30 = vmul.f32 0.03125, %v7657_v28  ;;  %v7671_v12 = vadd.f32 %v7670_v29, %v7669_v23 }
 0x367   : > { %v7672_v7 = vmul.f32 0.03125, %v7671_v12  ;;  %v7673_v15 = vmul.f32 %v7658_v30, %v7658_v30  ;;  %v7678_v17 = vsub.f32 %v10728_v35, %v7658_v30  ;;  %v7679_v13 = vsub.f32 %v7638_v41, %v7658_v30 }
 0x368   : > { %v7680_v32 = vsub.f32 %v7643_v0, %v7658_v30  ;;  %v7681_v33 = vsub.f32 %v7646_v9, %v7658_v30 }
 0x369   : > { %v7674_v34 = vsub.f32 %v7672_v7, %v7673_v15 }
 0x36b   : > { %v7675_v27 = vmax.f32 %v7674_v34, 0.0 }
 0x36d   : > { %v7676_v43 = vadd.f32 1e-05, %v7675_v27 }
 0x36f   : > { %9012 = vrsqrt.f32 %v7676_v43 }
 0x37c   : > { %v9013_v26 = vpop.eup %9012 }
 0x37d   : > { %v7682_v1 = vmul.f32 %v9013_v26, %v7678_v17  ;;  %v7683_v3 = vmul.f32 %v9013_v26, %v7679_v13  ;;  %v7684_v31 = vmul.f32 %v9013_v26, %v7680_v32  ;;  %v7685_v22 = vmul.f32 %v9013_v26, %v7681_v33 }
 0x37f   : > { %v7693_v35 = vmul.f32 %v8243_v40, %v7682_v1  ;;  %v7694_v37 = vmul.f32 %v8243_v40, %v7683_v3  ;;  %v7695_v36 = vmul.f32 %v8243_v40, %v7684_v31  ;;  %v7696_v38 = vmul.f32 %v8243_v40, %v7685_v22 }
 0x381   : > { %v7704_v44 = vadd.f32 %v8244_v18, %v7693_v35  ;;  %v7705_v47 = vadd.f32 %v8244_v18, %v7694_v37  ;;  %v7706_v49 = vadd.f32 %v8244_v18, %v7695_v36  ;;  %v7707_v51 = vadd.f32 %v8244_v18, %v7696_v38 }
 0x383   : > { %vm7708_vm0 = vcmp.ge.f32.partialorder %v7704_v44, 0.0  ;;  %vm7709_vm1 = vcmp.ge.f32.partialorder %v7705_v47, 0.0  ;;  %vm7710_vm2 = vcmp.ge.f32.partialorder %v7706_v49, 0.0  ;;  %vm7711_vm3 = vcmp.ge.f32.partialorder %v7707_v51, 0.0 }
 0x384   : > { %v7712_v58 = vmul.f32 0.2, %v7704_v44  ;;  %v7713_v56 = vmul.f32 0.2, %v7705_v47  ;;  %v7714_v39 = vmul.f32 0.2, %v7706_v49 }
 0x385   : > { %v7715_v41 = vmul.f32 0.2, %v7707_v51 }
 0x386   : > { %v7716_v19 = vsel %vm7708_vm0, %v7704_v44, %v7712_v58  ;;  %v7717_v25 = vsel %vm7709_vm1, %v7705_v47, %v7713_v56  ;;  %v7718_v57 = vsel %vm7710_vm2, %v7706_v49, %v7714_v39  ;;  %7746 = sbr.rel (!%p9114_p6) target bundleno = 916 (0x394), region = 92 }
 0x387   : > { %v7719_v45 = vsel %vm7711_vm3, %v7707_v51, %v7715_v41  ;;  %v8260_v48 = vpack.c.bf16 %v7717_v25, %v7716_v19 }
 0x388   : > { %v8265_v50 = vpack.c.bf16 %v7719_v45, %v7718_v57 }
 0x389   : > { %8261 = vst [vmem:[%s4417_s22] sm:$0xff] %v8260_v48  }
 0x38a   : > { %8267 = vst [vmem:[%s4417_s22 + $0x8] sm:$0xff] %v8265_v50  }
 0x390   : > { %v7768_v59 = vld [vmem:[%s4417_s22] sm:$0xf]  ;;  %v7770_v60 = vld [vmem:[%s4417_s22 + $0x4] sm:$0xf] }
 0x391   : > { %v7772_v61 = vld [vmem:[%s4417_s22 + $0x8] sm:$0xf]  ;;  %v7774_v63 = vld [vmem:[%s4417_s22 + $0xc] sm:$0xf]  ;;  %7769 = vst [vmem:[%s7751_s26] sm:$0xf] %v7768_v59 }
 0x392   : > { %7771 = vst [vmem:[%s7751_s26 + $0x10] sm:$0xf] %v7770_v60  ;;  %7773 = vst [vmem:[%s7751_s26 + $0x20] sm:$0xf] %v7772_v61 }
 0x393   : > { %7775 = vst [vmem:[%s7751_s26 + $0x30] sm:$0xf] %v7774_v63 }
 0x394 PF: > { %s14_s19 = sadd.s32 1, %s9052_s19   ;;  %s10793_s15 = smov %s9040_s16 }
 0x395   : > { %p11_p12 = scmp.ge.s32.totalorder %s14_s19, 6   ;;  %s10794_s16 = smov %s9119_s25 }
 0x396   : > { %s10795_s17 = smov %s9048_s18  ;;  %s10796_s18 = smov %s10798_s20 }
 0x397   :  { %13 = sbr.rel (!%p11_p12) target bundleno = 3 (0x3), region = 177 }

</bundles_post_ra>
